<compile_context>
chip_gen: v7x
topology: tpu7x:2x2x1
jax: 0.10.0
libtpu: 0.0.40
codegen_flags: <defaults>
</compile_context>

<pallas_src>
import numpy as np
import jax
import jax.numpy as jnp
from jax import lax
from jax.experimental import pallas as pl
from jax.experimental.pallas import tpu as pltpu


def _round_up(x, m):
    return ((x + m - 1) // m) * m


def _default_mlp_dtype():
    """bf16 MLP on chips with bf16 VPU/EUP (v6e/v7x); f32 otherwise (v5e & older)."""
    try:
        kind = jax.devices()[0].device_kind.lower()
    except Exception:
        return jnp.float32
    if ("v6" in kind) or ("v7" in kind) or ("7x" in kind):
        return jnp.bfloat16
    return jnp.float32


def _make_fused_kernel(Nx, Nx_pad, T_BLK, layer_sizes, compute_dtype, replicated):
    """Kernel body: T_BLK RK4 steps of du/dt = flux(u) + MLP(u)*p_mult per grid step."""
    n_layers = len(layer_sizes) - 1
    f32 = jnp.float32
    is_f32_mlp = jnp.dtype(compute_dtype) == jnp.dtype(jnp.float32)

    def kernel(*refs):
        params_ref = refs[0]                       # SMEM (4,): [D/10, s0, s1, p_mult]
        dts_ref = refs[1]                          # SMEM (n_blocks*T_BLK,)
        u0_ref = refs[2]                           # VMEM (1, Nx_pad)
        w_refs = refs[3:3 + n_layers]              # VMEM weights
        out_ref = refs[3 + n_layers]               # VMEM (T_BLK, Nx_pad) output block
        u_carry = refs[4 + n_layers]               # VMEM (1, Nx_pad) scratch (carried)

        pid = pl.program_id(0)

        # Initialize the carried state from u0 on the first block only.
        @pl.when(pid == 0)
        def _():
            u_carry[...] = u0_ref[...]

        # ---- hoisted out of the time loop: scalars -> lane-dense vregs, weights ----
        d10 = params_ref[0]
        s0 = params_ref[1]
        s1 = params_ref[2]
        p_mult = params_ref[3]
        a_self_v = jnp.full((1, Nx_pad), 2.0 * d10 * s0, f32)   # coeff of u[i]
        a_nbr_v = jnp.full((1, Nx_pad), d10 * s1, f32)          # coeff of u[i-1]+u[i+1]
        p_mult_v = jnp.full((1, Nx_pad), p_mult, f32)

        ws = []
        for li in range(n_layers):
            w = w_refs[li][...].astype(compute_dtype)
            if layer_sizes[li] == 1 or layer_sizes[li + 1] == 1:
                # Column weights for the VPU broadcast paths: broadcast once, reuse.
                w = jnp.broadcast_to(w, (w.shape[0], Nx_pad))
            ws.append(w)

        if not replicated:
            lane = lax.broadcasted_iota(jnp.int32, (1, Nx_pad), 1)
            valid = lane < Nx

            def lane_bcast(uc, k):
                # broadcast u[k] to all lanes (cross-lane reduce of a masked copy)
                return jnp.sum(jnp.where(lane == k, uc, 0.0), axis=1, keepdims=True)

        dot_prec = lax.Precision.HIGHEST if is_f32_mlp else None

        def mlp(h_f32):
            # h: (1, Nx_pad); features on sublanes, grid points on lanes.
            h = h_f32.astype(compute_dtype)
            for li in range(n_layers):
                k_in, k_out = layer_sizes[li], layer_sizes[li + 1]
                w = ws[li]
                if k_in == 1:
                    h = w * h                                               # VPU
                elif k_out == 1:
                    # VPU mul + f32 sublane reduce (XLU); avoids a 1-col matmul.
                    h = jnp.sum((w * h).astype(f32), axis=0,
                                keepdims=True).astype(compute_dtype)
                else:
                    h = jnp.dot(w, h, preferred_element_type=jnp.float32,
                                precision=dot_prec).astype(compute_dtype)   # MXU
                h = jnp.tanh(h)   # sigmoid=False -> Tanh after every Linear
            return h.astype(f32)

        def dudt(uc):
            # Periodic stencil via lane rolls (XLU). In the replicated layout the
            # wrap is exact with plain rolls; in the padded layout fix the 2 wrap
            # lanes of the neighbor-sum explicitly.
            nbr = (pltpu.roll(uc, shift=1, axis=1)
                   + pltpu.roll(uc, shift=Nx_pad - 1, axis=1))
            if not replicated:
                nbr = jnp.where(lane == 0,
                                lane_bcast(uc, 1) + lane_bcast(uc, Nx - 1), nbr)
                nbr = jnp.where(lane == Nx - 1,
                                lane_bcast(uc, Nx - 2) + lane_bcast(uc, 0), nbr)
            flux = a_self_v * uc + a_nbr_v * nbr
            return flux + mlp(uc) * p_mult_v

        first_step = pid * T_BLK

        def step(j, uc):
            dt = dts_ref[first_step + j]
            dt_v = jnp.full((1, Nx_pad), dt, f32)
            half_v = jnp.full((1, Nx_pad), 0.5 * dt, f32)
            sixth_v = jnp.full((1, Nx_pad), dt * (1.0 / 6.0), f32)
            k1 = dudt(uc)
            k2 = dudt(uc + half_v * k1)
            k3 = dudt(uc + half_v * k2)
            k4 = dudt(uc + dt_v * k3)
            u_new = uc + sixth_v * (k1 + 2.0 * (k2 + k3) + k4)
            if not replicated:
                u_new = jnp.where(valid, u_new, 0.0)   # keep pad lanes bounded
            out_ref[pl.ds(j, 1), :] = u_new            # lane-dense row store
            return u_new

        # Unroll only within the block (grid axis bounds code size / live ranges).
        u_final = lax.fori_loop(0, T_BLK, step, u_carry[...], unroll=True)
        u_carry[...] = u_final

    return kernel


class FINNAllenCahnPallas:
    """JAX/Pallas port of FINN_AllenCahn (learn_coeff=False, learn_stencil=False,
    bias=False, sigmoid=False).  The whole RK4 integration runs inside a single
    Pallas call with a time-blocked grid."""

    def __init__(self, Nx, D, layer_sizes, dx, key, mlp_dtype=None, t_block=8):
        self.Nx = Nx
        self.dx = dx                  # stored like the reference; flux never uses dx
        self.layer_sizes = layer_sizes
        self.t_block = t_block
        self.mlp_dtype = _default_mlp_dtype() if mlp_dtype is None else mlp_dtype
        # Scalar parameters packed for SMEM: [D/10, stencil[0], stencil[1], p_mult]
        self.params = jnp.array([D / 10.0, -1.0, 1.0, 10.0], dtype=jnp.float32)

        # torch.nn.Linear(bias=False) default init: W ~ U(-1/sqrt(fan_in)), shape (out,in).
        # Kernel keeps (out,in) except H->1 layers, passed transposed as (in,1).
        self.weights = []            # kernel layout
        self.weights_torch = []      # (out, in) layout, for the pure-JAX reference
        for li in range(len(layer_sizes) - 1):
            key, sub = jax.random.split(key)
            fan_in, fan_out = layer_sizes[li], layer_sizes[li + 1]
            bound = 1.0 / np.sqrt(fan_in)
            w = jax.random.uniform(sub, (fan_out, fan_in), jnp.float32,
                                   minval=-bound, maxval=bound)
            self.weights_torch.append(w)
            if fan_out == 1 and fan_in != 1:
                w = w.T
            self.weights.append(w)

    def forward(self, t, u):
        """u: (len(t), Nx), t: (len(t),) -> pred: (len(t), Nx)."""
        Nx = self.Nx
        nt = t.shape[0]
        n_steps = nt - 1
        n_layers = len(self.layer_sizes) - 1
        T_BLK = self.t_block
        n_blocks = max(1, pl.cdiv(max(n_steps, 1), T_BLK))
        n_steps_pad = n_blocks * T_BLK            # extra steps get dt=0 (no-ops)

        Nx_pad = _round_up(Nx, 128)
        replicated = (Nx_pad % Nx == 0)           # exact periodic wrap via replication

        u0 = u[0].astype(jnp.float32)             # (Nx,)
        if replicated:
            u0_pad = jnp.tile(u0, Nx_pad // Nx)[None, :]          # (1, Nx_pad) lane-dense
        else:
            u0_pad = jnp.zeros((1, Nx_pad), jnp.float32).at[0, :Nx].set(u0)

        dts = (t[1:] - t[:-1]).astype(jnp.float32)
        dts_pad = jnp.zeros((n_steps_pad,), jnp.float32).at[:n_steps].set(dts)
        # NOTE: for very long runs, 1-D SMEM pads to next_pow2(4*n_steps) bytes; still
        # small for thousands of steps.

        kernel = _make_fused_kernel(Nx, Nx_pad, T_BLK, self.layer_sizes,
                                    self.mlp_dtype, replicated)

        smem = pl.BlockSpec(memory_space=pltpu.MemorySpace.SMEM)
        u0_spec = pl.BlockSpec((1, Nx_pad), lambda i: (0, 0))
        w_specs = [pl.BlockSpec(w.shape, lambda i: (0, 0)) for w in self.weights]
        out_spec = pl.BlockSpec((T_BLK, Nx_pad), lambda i: (i, 0))

        out = pl.pallas_call(
            kernel,
            out_shape=jax.ShapeDtypeStruct((n_steps_pad, Nx_pad), jnp.float32),
            grid=(n_blocks,),
            in_specs=[smem, smem, u0_spec] + w_specs,
            out_specs=out_spec,
            scratch_shapes=[pltpu.VMEM((1, Nx_pad), jnp.float32)],
            compiler_params=pltpu.CompilerParams(
                dimension_semantics=("arbitrary",)),      # sequential carry in time
        )(self.params, dts_pad, u0_pad, *self.weights)

        steps = out[:n_steps, :Nx]                        # drop dt=0 pad steps, pad lanes
        return jnp.concatenate([u0[None, :], steps], axis=0)

    # ----- pure-JAX reference (same fixed-step RK4) for correctness checking -----
    def reference_forward(self, t, u):
        Nx = self.Nx
        d10, s0, s1, p_mult = [float(x) for x in np.asarray(self.params)]

        def mlp(uvec):
            h = uvec[:, None]                              # (Nx, 1)
            for w in self.weights_torch:                   # W: (out, in)
                h = jnp.tanh(jnp.dot(h, w.T, precision=lax.Precision.HIGHEST))
            return h[:, 0]

        def dudt(uvec):
            nbr = jnp.roll(uvec, 1) + jnp.roll(uvec, -1)
            flux = d10 * (2.0 * s0 * uvec + s1 * nbr)
            return flux + mlp(uvec) * p_mult

        uc = u[0].astype(jnp.float32)
        outs = [uc]
        dts = np.asarray(t[1:] - t[:-1], dtype=np.float32)
        for dt in dts:
            k1 = dudt(uc)
            k2 = dudt(uc + 0.5 * dt * k1)
            k3 = dudt(uc + 0.5 * dt * k2)
            k4 = dudt(uc + dt * k3)
            uc = uc + (dt / 6.0) * (k1 + 2.0 * (k2 + k3) + k4)
            outs.append(uc)
        return jnp.stack(outs, axis=0)


if __name__ == "__main__":
    key = jax.random.PRNGKey(0)
    Nx = 64
    nt = 8
    layer_sizes = [1, 32, 32, 1]
    D = 0.005
    dx = 1.0 / Nx

    k_u, k_w = jax.random.split(key)
    t = jnp.linspace(0.0, 0.07, nt, dtype=jnp.float32)
    # u plays the role of th.tensor[len(t), Nx]; only u[0] is consumed by forward.
    u = jax.random.uniform(k_u, (nt, Nx), jnp.float32, minval=-1.0, maxval=1.0)

    model = FINNAllenCahnPallas(Nx=Nx, D=D, layer_sizes=layer_sizes, dx=dx, key=k_w)
    pred = jax.jit(model.forward)(t, u)
    pred = jax.block_until_ready(pred)

    assert pred.shape == (nt, Nx)
    assert bool(jnp.all(jnp.isfinite(pred)))

    # Loose tolerance: bf16 MLP path on v6e/v7x introduces small per-step error.
    ref = model.reference_forward(t, u)
    max_err = float(jnp.max(jnp.abs(pred - ref)))
    assert max_err < 5e-2, f"kernel/reference mismatch: max_err={max_err}"

    print("KERNEL_OK")
</pallas_src>

<mosaic_0001>
module attributes {stable_mosaic.version = 11 : i64} {
  func.func @kernel(%arg0: i32, %arg1: memref<4xf32, #tpu.memory_space<smem>>, %arg2: memref<8xf32, #tpu.memory_space<smem>>, %arg3: memref<1x128xf32, #tpu.memory_space<vmem>>, %arg4: memref<32x1xf32, #tpu.memory_space<vmem>>, %arg5: memref<32x32xf32, #tpu.memory_space<vmem>>, %arg6: memref<32x1xf32, #tpu.memory_space<vmem>>, %arg7: memref<8x128xf32, #tpu.memory_space<vmem>>, %arg8: memref<1x128xf32, #tpu.memory_space<vmem>>) attributes {dimension_semantics = [#tpu.dimension_semantics<arbitrary>], iteration_bounds = array<i64: 1>, scalar_prefetch = 0 : i64, scratch_operands = 1 : i64, tpu.core_type = #tpu.core_type<tc>, window_params = [{transform_indices = @transform_0, window_bounds = array<i64: 4>}, {transform_indices = @transform_1, window_bounds = array<i64: 8>}, {pipeline_mode = #tpu.pipeline_mode<synchronous>, transform_indices = @transform_2, window_bounds = array<i64: 1, 128>}, {pipeline_mode = #tpu.pipeline_mode<synchronous>, transform_indices = @transform_3, window_bounds = array<i64: 32, 1>}, {pipeline_mode = #tpu.pipeline_mode<synchronous>, transform_indices = @transform_4, window_bounds = array<i64: 32, 32>}, {pipeline_mode = #tpu.pipeline_mode<synchronous>, transform_indices = @transform_5, window_bounds = array<i64: 32, 1>}, {transform_indices = @transform_6, window_bounds = array<i64: 8, 128>}]} {
    %c0_i32 = arith.constant 0 : i32
    %0 = arith.cmpi eq, %arg0, %c0_i32 : i32
    %1 = arith.extui %0 : i1 to i32
    %c0_i32_0 = arith.constant 0 : i32
    %2 = arith.cmpi ne, %1, %c0_i32_0 : i32
    scf.if %2 {
      %c0_172 = arith.constant 0 : index
      %c0_173 = arith.constant 0 : index
      %751 = vector.load %arg3[%c0_172, %c0_173] : memref<1x128xf32, #tpu.memory_space<vmem>>, vector<1x128xf32>
      %c0_174 = arith.constant 0 : index
      %c0_175 = arith.constant 0 : index
      %752 = vector.load %arg8[%c0_174, %c0_175] : memref<1x128xf32, #tpu.memory_space<vmem>>, vector<1x128xf32>
      tpu.vector_store %arg8[%c0_174, %c0_175], %751 {strides = array<i32>} : memref<1x128xf32, #tpu.memory_space<vmem>>, vector<1x128xf32>,
    } else {
    }
    %c0 = arith.constant 0 : index
    %3 = memref.load %arg1[%c0] : memref<4xf32, #tpu.memory_space<smem>>
    %c1 = arith.constant 1 : index
    %4 = memref.load %arg1[%c1] : memref<4xf32, #tpu.memory_space<smem>>
    %c2 = arith.constant 2 : index
    %5 = memref.load %arg1[%c2] : memref<4xf32, #tpu.memory_space<smem>>
    %c3 = arith.constant 3 : index
    %6 = memref.load %arg1[%c3] : memref<4xf32, #tpu.memory_space<smem>>
    %cst = arith.constant 2.000000e+00 : f32
    %7 = arith.mulf %cst, %3 : f32
    %8 = arith.mulf %7, %4 : f32
    %9 = vector.broadcast %8 : f32 to vector<1x128xf32>
    %10 = arith.mulf %3, %5 : f32
    %11 = vector.broadcast %10 : f32 to vector<1x128xf32>
    %12 = vector.broadcast %6 : f32 to vector<1x128xf32>
    %c0_1 = arith.constant 0 : index
    %c0_2 = arith.constant 0 : index
    %13 = vector.load %arg4[%c0_1, %c0_2] : memref<32x1xf32, #tpu.memory_space<vmem>>, vector<32x1xf32>
    %14 = vector.shape_cast %13 : vector<32x1xf32> to vector<32x1xf32>
    %15 = vector.broadcast %14 : vector<32x1xf32> to vector<32x128xf32>
    %c0_3 = arith.constant 0 : index
    %c0_4 = arith.constant 0 : index
    %16 = vector.load %arg5[%c0_3, %c0_4] : memref<32x32xf32, #tpu.memory_space<vmem>>, vector<32x32xf32>
    %c0_5 = arith.constant 0 : index
    %c0_6 = arith.constant 0 : index
    %17 = vector.load %arg6[%c0_5, %c0_6] : memref<32x1xf32, #tpu.memory_space<vmem>>, vector<32x1xf32>
    %18 = vector.shape_cast %17 : vector<32x1xf32> to vector<32x1xf32>
    %19 = vector.broadcast %18 : vector<32x1xf32> to vector<32x128xf32>
    %c8_i32 = arith.constant 8 : i32
    %20 = arith.muli %arg0, %c8_i32 : i32
    %c0_7 = arith.constant 0 : index
    %c0_8 = arith.constant 0 : index
    %21 = vector.load %arg8[%c0_7, %c0_8] : memref<1x128xf32, #tpu.memory_space<vmem>>, vector<1x128xf32>
    %c0_i32_9 = arith.constant 0 : i32
    %22 = arith.addi %20, %c0_i32_9 : i32
    %23 = arith.index_cast %22 : i32 to index
    %24 = memref.load %arg2[%23] : memref<8xf32, #tpu.memory_space<smem>>
    %25 = vector.broadcast %24 : f32 to vector<1x128xf32>
    %cst_10 = arith.constant 5.000000e-01 : f32
    %26 = arith.mulf %cst_10, %24 : f32
    %27 = vector.broadcast %26 : f32 to vector<1x128xf32>
    %cst_11 = arith.constant 0.166666672 : f32
    %28 = arith.mulf %24, %cst_11 : f32
    %29 = vector.broadcast %28 : f32 to vector<1x128xf32>
    %c1_i32 = arith.constant 1 : i32
    %30 = tpu.dynamic_rotate %21 by %c1_i32 dim 1 : vector<1x128xf32>, i32 -> vector<1x128xf32>
    %c127_i32 = arith.constant 127 : i32
    %31 = tpu.dynamic_rotate %21 by %c127_i32 dim 1 : vector<1x128xf32>, i32 -> vector<1x128xf32>
    %32 = arith.addf %30, %31 : vector<1x128xf32>
    %33 = arith.mulf %9, %21 : vector<1x128xf32>
    %34 = arith.mulf %11, %32 : vector<1x128xf32>
    %35 = arith.addf %33, %34 : vector<1x128xf32>
    %36 = vector.broadcast %21 : vector<1x128xf32> to vector<32x128xf32>
    %37 = arith.mulf %15, %36 : vector<32x128xf32>
    %38 = math.tanh %37 : vector<32x128xf32>
    %cst_12 = arith.constant dense<0.000000e+00> : vector<32x128xf32>
    %39 = tpu.matmul %16, %38, %cst_12 {dimension_numbers = #tpu.dot_dimension_numbers<[1], [0], [0], [1], [0, 0, 1, 1], [], []>, precision = #tpu.contract_precision<fp32>} : vector<32x32xf32>, vector<32x128xf32>, vector<32x128xf32> -> vector<32x128xf32>
    %40 = math.tanh %39 : vector<32x128xf32>
    %41 = arith.mulf %19, %40 : vector<32x128xf32>
    %cst_13 = arith.constant dense<0.000000e+00> : vector<128xf32>
    %42 = vector.multi_reduction <add>, %41, %cst_13 [0] : vector<32x128xf32> to vector<128xf32>
    %43 = vector.shape_cast %42 : vector<128xf32> to vector<1x128xf32>
    %44 = math.tanh %43 : vector<1x128xf32>
    %45 = arith.mulf %44, %12 : vector<1x128xf32>
    %46 = arith.addf %35, %45 : vector<1x128xf32>
    %47 = arith.mulf %27, %46 : vector<1x128xf32>
    %48 = arith.addf %21, %47 : vector<1x128xf32>
    %c1_i32_14 = arith.constant 1 : i32
    %49 = tpu.dynamic_rotate %48 by %c1_i32_14 dim 1 : vector<1x128xf32>, i32 -> vector<1x128xf32>
    %c127_i32_15 = arith.constant 127 : i32
    %50 = tpu.dynamic_rotate %48 by %c127_i32_15 dim 1 : vector<1x128xf32>, i32 -> vector<1x128xf32>
    %51 = arith.addf %49, %50 : vector<1x128xf32>
    %52 = arith.mulf %9, %48 : vector<1x128xf32>
    %53 = arith.mulf %11, %51 : vector<1x128xf32>
    %54 = arith.addf %52, %53 : vector<1x128xf32>
    %55 = vector.broadcast %48 : vector<1x128xf32> to vector<32x128xf32>
    %56 = arith.mulf %15, %55 : vector<32x128xf32>
    %57 = math.tanh %56 : vector<32x128xf32>
    %cst_16 = arith.constant dense<0.000000e+00> : vector<32x128xf32>
    %58 = tpu.matmul %16, %57, %cst_16 {dimension_numbers = #tpu.dot_dimension_numbers<[1], [0], [0], [1], [0, 0, 1, 1], [], []>, precision = #tpu.contract_precision<fp32>} : vector<32x32xf32>, vector<32x128xf32>, vector<32x128xf32> -> vector<32x128xf32>
    %59 = math.tanh %58 : vector<32x128xf32>
    %60 = arith.mulf %19, %59 : vector<32x128xf32>
    %cst_17 = arith.constant dense<0.000000e+00> : vector<128xf32>
    %61 = vector.multi_reduction <add>, %60, %cst_17 [0] : vector<32x128xf32> to vector<128xf32>
    %62 = vector.shape_cast %61 : vector<128xf32> to vector<1x128xf32>
    %63 = math.tanh %62 : vector<1x128xf32>
    %64 = arith.mulf %63, %12 : vector<1x128xf32>
    %65 = arith.addf %54, %64 : vector<1x128xf32>
    %66 = arith.mulf %27, %65 : vector<1x128xf32>
    %67 = arith.addf %21, %66 : vector<1x128xf32>
    %c1_i32_18 = arith.constant 1 : i32
    %68 = tpu.dynamic_rotate %67 by %c1_i32_18 dim 1 : vector<1x128xf32>, i32 -> vector<1x128xf32>
    %c127_i32_19 = arith.constant 127 : i32
    %69 = tpu.dynamic_rotate %67 by %c127_i32_19 dim 1 : vector<1x128xf32>, i32 -> vector<1x128xf32>
    %70 = arith.addf %68, %69 : vector<1x128xf32>
    %71 = arith.mulf %9, %67 : vector<1x128xf32>
    %72 = arith.mulf %11, %70 : vector<1x128xf32>
    %73 = arith.addf %71, %72 : vector<1x128xf32>
    %74 = vector.broadcast %67 : vector<1x128xf32> to vector<32x128xf32>
    %75 = arith.mulf %15, %74 : vector<32x128xf32>
    %76 = math.tanh %75 : vector<32x128xf32>
    %cst_20 = arith.constant dense<0.000000e+00> : vector<32x128xf32>
    %77 = tpu.matmul %16, %76, %cst_20 {dimension_numbers = #tpu.dot_dimension_numbers<[1], [0], [0], [1], [0, 0, 1, 1], [], []>, precision = #tpu.contract_precision<fp32>} : vector<32x32xf32>, vector<32x128xf32>, vector<32x128xf32> -> vector<32x128xf32>
    %78 = math.tanh %77 : vector<32x128xf32>
    %79 = arith.mulf %19, %78 : vector<32x128xf32>
    %cst_21 = arith.constant dense<0.000000e+00> : vector<128xf32>
    %80 = vector.multi_reduction <add>, %79, %cst_21 [0] : vector<32x128xf32> to vector<128xf32>
    %81 = vector.shape_cast %80 : vector<128xf32> to vector<1x128xf32>
    %82 = math.tanh %81 : vector<1x128xf32>
    %83 = arith.mulf %82, %12 : vector<1x128xf32>
    %84 = arith.addf %73, %83 : vector<1x128xf32>
    %85 = arith.mulf %25, %84 : vector<1x128xf32>
    %86 = arith.addf %21, %85 : vector<1x128xf32>
    %c1_i32_22 = arith.constant 1 : i32
    %87 = tpu.dynamic_rotate %86 by %c1_i32_22 dim 1 : vector<1x128xf32>, i32 -> vector<1x128xf32>
    %c127_i32_23 = arith.constant 127 : i32
    %88 = tpu.dynamic_rotate %86 by %c127_i32_23 dim 1 : vector<1x128xf32>, i32 -> vector<1x128xf32>
    %89 = arith.addf %87, %88 : vector<1x128xf32>
    %90 = arith.mulf %9, %86 : vector<1x128xf32>
    %91 = arith.mulf %11, %89 : vector<1x128xf32>
    %92 = arith.addf %90, %91 : vector<1x128xf32>
    %93 = vector.broadcast %86 : vector<1x128xf32> to vector<32x128xf32>
    %94 = arith.mulf %15, %93 : vector<32x128xf32>
    %95 = math.tanh %94 : vector<32x128xf32>
    %cst_24 = arith.constant dense<0.000000e+00> : vector<32x128xf32>
    %96 = tpu.matmul %16, %95, %cst_24 {dimension_numbers = #tpu.dot_dimension_numbers<[1], [0], [0], [1], [0, 0, 1, 1], [], []>, precision = #tpu.contract_precision<fp32>} : vector<32x32xf32>, vector<32x128xf32>, vector<32x128xf32> -> vector<32x128xf32>
    %97 = math.tanh %96 : vector<32x128xf32>
    %98 = arith.mulf %19, %97 : vector<32x128xf32>
    %cst_25 = arith.constant dense<0.000000e+00> : vector<128xf32>
    %99 = vector.multi_reduction <add>, %98, %cst_25 [0] : vector<32x128xf32> to vector<128xf32>
    %100 = vector.shape_cast %99 : vector<128xf32> to vector<1x128xf32>
    %101 = math.tanh %100 : vector<1x128xf32>
    %102 = arith.mulf %101, %12 : vector<1x128xf32>
    %103 = arith.addf %92, %102 : vector<1x128xf32>
    %104 = arith.addf %65, %84 : vector<1x128xf32>
    %cst_26 = arith.constant 2.000000e+00 : f32
    %105 = vector.broadcast %cst_26 : f32 to vector<1x128xf32>
    %106 = arith.mulf %105, %104 : vector<1x128xf32>
    %107 = arith.addf %46, %106 : vector<1x128xf32>
    %108 = arith.addf %107, %103 : vector<1x128xf32>
    %109 = arith.mulf %29, %108 : vector<1x128xf32>
    %110 = arith.addf %21, %109 : vector<1x128xf32>
    %111 = arith.index_cast %c0_i32_9 : i32 to index
    %c0_27 = arith.constant 0 : index
    %112 = vector.load %arg7[%111, %c0_27] : memref<8x128xf32, #tpu.memory_space<vmem>>, vector<1x128xf32>
    tpu.vector_store %arg7[%111, %c0_27], %110 {strides = array<i32>} : memref<8x128xf32, #tpu.memory_space<vmem>>, vector<1x128xf32>,
    %c1_i32_28 = arith.constant 1 : i32
    %113 = arith.addi %20, %c1_i32_28 : i32
    %114 = arith.index_cast %113 : i32 to index
    %115 = memref.load %arg2[%114] : memref<8xf32, #tpu.memory_space<smem>>
    %116 = vector.broadcast %115 : f32 to vector<1x128xf32>
    %cst_29 = arith.constant 5.000000e-01 : f32
    %117 = arith.mulf %cst_29, %115 : f32
    %118 = vector.broadcast %117 : f32 to vector<1x128xf32>
    %cst_30 = arith.constant 0.166666672 : f32
    %119 = arith.mulf %115, %cst_30 : f32
    %120 = vector.broadcast %119 : f32 to vector<1x128xf32>
    %c1_i32_31 = arith.constant 1 : i32
    %121 = tpu.dynamic_rotate %110 by %c1_i32_31 dim 1 : vector<1x128xf32>, i32 -> vector<1x128xf32>
    %c127_i32_32 = arith.constant 127 : i32
    %122 = tpu.dynamic_rotate %110 by %c127_i32_32 dim 1 : vector<1x128xf32>, i32 -> vector<1x128xf32>
    %123 = arith.addf %121, %122 : vector<1x128xf32>
    %124 = arith.mulf %9, %110 : vector<1x128xf32>
    %125 = arith.mulf %11, %123 : vector<1x128xf32>
    %126 = arith.addf %124, %125 : vector<1x128xf32>
    %127 = vector.broadcast %110 : vector<1x128xf32> to vector<32x128xf32>
    %128 = arith.mulf %15, %127 : vector<32x128xf32>
    %129 = math.tanh %128 : vector<32x128xf32>
    %cst_33 = arith.constant dense<0.000000e+00> : vector<32x128xf32>
    %130 = tpu.matmul %16, %129, %cst_33 {dimension_numbers = #tpu.dot_dimension_numbers<[1], [0], [0], [1], [0, 0, 1, 1], [], []>, precision = #tpu.contract_precision<fp32>} : vector<32x32xf32>, vector<32x128xf32>, vector<32x128xf32> -> vector<32x128xf32>
    %131 = math.tanh %130 : vector<32x128xf32>
    %132 = arith.mulf %19, %131 : vector<32x128xf32>
    %cst_34 = arith.constant dense<0.000000e+00> : vector<128xf32>
    %133 = vector.multi_reduction <add>, %132, %cst_34 [0] : vector<32x128xf32> to vector<128xf32>
    %134 = vector.shape_cast %133 : vector<128xf32> to vector<1x128xf32>
    %135 = math.tanh %134 : vector<1x128xf32>
    %136 = arith.mulf %135, %12 : vector<1x128xf32>
    %137 = arith.addf %126, %136 : vector<1x128xf32>
    %138 = arith.mulf %118, %137 : vector<1x128xf32>
    %139 = arith.addf %110, %138 : vector<1x128xf32>
    %c1_i32_35 = arith.constant 1 : i32
    %140 = tpu.dynamic_rotate %139 by %c1_i32_35 dim 1 : vector<1x128xf32>, i32 -> vector<1x128xf32>
    %c127_i32_36 = arith.constant 127 : i32
    %141 = tpu.dynamic_rotate %139 by %c127_i32_36 dim 1 : vector<1x128xf32>, i32 -> vector<1x128xf32>
    %142 = arith.addf %140, %141 : vector<1x128xf32>
    %143 = arith.mulf %9, %139 : vector<1x128xf32>
    %144 = arith.mulf %11, %142 : vector<1x128xf32>
    %145 = arith.addf %143, %144 : vector<1x128xf32>
    %146 = vector.broadcast %139 : vector<1x128xf32> to vector<32x128xf32>
    %147 = arith.mulf %15, %146 : vector<32x128xf32>
    %148 = math.tanh %147 : vector<32x128xf32>
    %cst_37 = arith.constant dense<0.000000e+00> : vector<32x128xf32>
    %149 = tpu.matmul %16, %148, %cst_37 {dimension_numbers = #tpu.dot_dimension_numbers<[1], [0], [0], [1], [0, 0, 1, 1], [], []>, precision = #tpu.contract_precision<fp32>} : vector<32x32xf32>, vector<32x128xf32>, vector<32x128xf32> -> vector<32x128xf32>
    %150 = math.tanh %149 : vector<32x128xf32>
    %151 = arith.mulf %19, %150 : vector<32x128xf32>
    %cst_38 = arith.constant dense<0.000000e+00> : vector<128xf32>
    %152 = vector.multi_reduction <add>, %151, %cst_38 [0] : vector<32x128xf32> to vector<128xf32>
    %153 = vector.shape_cast %152 : vector<128xf32> to vector<1x128xf32>
    %154 = math.tanh %153 : vector<1x128xf32>
    %155 = arith.mulf %154, %12 : vector<1x128xf32>
    %156 = arith.addf %145, %155 : vector<1x128xf32>
    %157 = arith.mulf %118, %156 : vector<1x128xf32>
    %158 = arith.addf %110, %157 : vector<1x128xf32>
    %c1_i32_39 = arith.constant 1 : i32
    %159 = tpu.dynamic_rotate %158 by %c1_i32_39 dim 1 : vector<1x128xf32>, i32 -> vector<1x128xf32>
    %c127_i32_40 = arith.constant 127 : i32
    %160 = tpu.dynamic_rotate %158 by %c127_i32_40 dim 1 : vector<1x128xf32>, i32 -> vector<1x128xf32>
    %161 = arith.addf %159, %160 : vector<1x128xf32>
    %162 = arith.mulf %9, %158 : vector<1x128xf32>
    %163 = arith.mulf %11, %161 : vector<1x128xf32>
    %164 = arith.addf %162, %163 : vector<1x128xf32>
    %165 = vector.broadcast %158 : vector<1x128xf32> to vector<32x128xf32>
    %166 = arith.mulf %15, %165 : vector<32x128xf32>
    %167 = math.tanh %166 : vector<32x128xf32>
    %cst_41 = arith.constant dense<0.000000e+00> : vector<32x128xf32>
    %168 = tpu.matmul %16, %167, %cst_41 {dimension_numbers = #tpu.dot_dimension_numbers<[1], [0], [0], [1], [0, 0, 1, 1], [], []>, precision = #tpu.contract_precision<fp32>} : vector<32x32xf32>, vector<32x128xf32>, vector<32x128xf32> -> vector<32x128xf32>
    %169 = math.tanh %168 : vector<32x128xf32>
    %170 = arith.mulf %19, %169 : vector<32x128xf32>
    %cst_42 = arith.constant dense<0.000000e+00> : vector<128xf32>
    %171 = vector.multi_reduction <add>, %170, %cst_42 [0] : vector<32x128xf32> to vector<128xf32>
    %172 = vector.shape_cast %171 : vector<128xf32> to vector<1x128xf32>
    %173 = math.tanh %172 : vector<1x128xf32>
    %174 = arith.mulf %173, %12 : vector<1x128xf32>
    %175 = arith.addf %164, %174 : vector<1x128xf32>
    %176 = arith.mulf %116, %175 : vector<1x128xf32>
    %177 = arith.addf %110, %176 : vector<1x128xf32>
    %c1_i32_43 = arith.constant 1 : i32
    %178 = tpu.dynamic_rotate %177 by %c1_i32_43 dim 1 : vector<1x128xf32>, i32 -> vector<1x128xf32>
    %c127_i32_44 = arith.constant 127 : i32
    %179 = tpu.dynamic_rotate %177 by %c127_i32_44 dim 1 : vector<1x128xf32>, i32 -> vector<1x128xf32>
    %180 = arith.addf %178, %179 : vector<1x128xf32>
    %181 = arith.mulf %9, %177 : vector<1x128xf32>
    %182 = arith.mulf %11, %180 : vector<1x128xf32>
    %183 = arith.addf %181, %182 : vector<1x128xf32>
    %184 = vector.broadcast %177 : vector<1x128xf32> to vector<32x128xf32>
    %185 = arith.mulf %15, %184 : vector<32x128xf32>
    %186 = math.tanh %185 : vector<32x128xf32>
    %cst_45 = arith.constant dense<0.000000e+00> : vector<32x128xf32>
    %187 = tpu.matmul %16, %186, %cst_45 {dimension_numbers = #tpu.dot_dimension_numbers<[1], [0], [0], [1], [0, 0, 1, 1], [], []>, precision = #tpu.contract_precision<fp32>} : vector<32x32xf32>, vector<32x128xf32>, vector<32x128xf32> -> vector<32x128xf32>
    %188 = math.tanh %187 : vector<32x128xf32>
    %189 = arith.mulf %19, %188 : vector<32x128xf32>
    %cst_46 = arith.constant dense<0.000000e+00> : vector<128xf32>
    %190 = vector.multi_reduction <add>, %189, %cst_46 [0] : vector<32x128xf32> to vector<128xf32>
    %191 = vector.shape_cast %190 : vector<128xf32> to vector<1x128xf32>
    %192 = math.tanh %191 : vector<1x128xf32>
    %193 = arith.mulf %192, %12 : vector<1x128xf32>
    %194 = arith.addf %183, %193 : vector<1x128xf32>
    %195 = arith.addf %156, %175 : vector<1x128xf32>
    %cst_47 = arith.constant 2.000000e+00 : f32
    %196 = vector.broadcast %cst_47 : f32 to vector<1x128xf32>
    %197 = arith.mulf %196, %195 : vector<1x128xf32>
    %198 = arith.addf %137, %197 : vector<1x128xf32>
    %199 = arith.addf %198, %194 : vector<1x128xf32>
    %200 = arith.mulf %120, %199 : vector<1x128xf32>
    %201 = arith.addf %110, %200 : vector<1x128xf32>
    %202 = arith.index_cast %c1_i32_28 : i32 to index
    %c0_48 = arith.constant 0 : index
    %203 = vector.load %arg7[%202, %c0_48] : memref<8x128xf32, #tpu.memory_space<vmem>>, vector<1x128xf32>
    tpu.vector_store %arg7[%202, %c0_48], %201 {strides = array<i32>} : memref<8x128xf32, #tpu.memory_space<vmem>>, vector<1x128xf32>,
    %c2_i32 = arith.constant 2 : i32
    %204 = arith.addi %20, %c2_i32 : i32
    %205 = arith.index_cast %204 : i32 to index
    %206 = memref.load %arg2[%205] : memref<8xf32, #tpu.memory_space<smem>>
    %207 = vector.broadcast %206 : f32 to vector<1x128xf32>
    %cst_49 = arith.constant 5.000000e-01 : f32
    %208 = arith.mulf %cst_49, %206 : f32
    %209 = vector.broadcast %208 : f32 to vector<1x128xf32>
    %cst_50 = arith.constant 0.166666672 : f32
    %210 = arith.mulf %206, %cst_50 : f32
    %211 = vector.broadcast %210 : f32 to vector<1x128xf32>
    %c1_i32_51 = arith.constant 1 : i32
    %212 = tpu.dynamic_rotate %201 by %c1_i32_51 dim 1 : vector<1x128xf32>, i32 -> vector<1x128xf32>
    %c127_i32_52 = arith.constant 127 : i32
    %213 = tpu.dynamic_rotate %201 by %c127_i32_52 dim 1 : vector<1x128xf32>, i32 -> vector<1x128xf32>
    %214 = arith.addf %212, %213 : vector<1x128xf32>
    %215 = arith.mulf %9, %201 : vector<1x128xf32>
    %216 = arith.mulf %11, %214 : vector<1x128xf32>
    %217 = arith.addf %215, %216 : vector<1x128xf32>
    %218 = vector.broadcast %201 : vector<1x128xf32> to vector<32x128xf32>
    %219 = arith.mulf %15, %218 : vector<32x128xf32>
    %220 = math.tanh %219 : vector<32x128xf32>
    %cst_53 = arith.constant dense<0.000000e+00> : vector<32x128xf32>
    %221 = tpu.matmul %16, %220, %cst_53 {dimension_numbers = #tpu.dot_dimension_numbers<[1], [0], [0], [1], [0, 0, 1, 1], [], []>, precision = #tpu.contract_precision<fp32>} : vector<32x32xf32>, vector<32x128xf32>, vector<32x128xf32> -> vector<32x128xf32>
    %222 = math.tanh %221 : vector<32x128xf32>
    %223 = arith.mulf %19, %222 : vector<32x128xf32>
    %cst_54 = arith.constant dense<0.000000e+00> : vector<128xf32>
    %224 = vector.multi_reduction <add>, %223, %cst_54 [0] : vector<32x128xf32> to vector<128xf32>
    %225 = vector.shape_cast %224 : vector<128xf32> to vector<1x128xf32>
    %226 = math.tanh %225 : vector<1x128xf32>
    %227 = arith.mulf %226, %12 : vector<1x128xf32>
    %228 = arith.addf %217, %227 : vector<1x128xf32>
    %229 = arith.mulf %209, %228 : vector<1x128xf32>
    %230 = arith.addf %201, %229 : vector<1x128xf32>
    %c1_i32_55 = arith.constant 1 : i32
    %231 = tpu.dynamic_rotate %230 by %c1_i32_55 dim 1 : vector<1x128xf32>, i32 -> vector<1x128xf32>
    %c127_i32_56 = arith.constant 127 : i32
    %232 = tpu.dynamic_rotate %230 by %c127_i32_56 dim 1 : vector<1x128xf32>, i32 -> vector<1x128xf32>
    %233 = arith.addf %231, %232 : vector<1x128xf32>
    %234 = arith.mulf %9, %230 : vector<1x128xf32>
    %235 = arith.mulf %11, %233 : vector<1x128xf32>
    %236 = arith.addf %234, %235 : vector<1x128xf32>
    %237 = vector.broadcast %230 : vector<1x128xf32> to vector<32x128xf32>
    %238 = arith.mulf %15, %237 : vector<32x128xf32>
    %239 = math.tanh %238 : vector<32x128xf32>
    %cst_57 = arith.constant dense<0.000000e+00> : vector<32x128xf32>
    %240 = tpu.matmul %16, %239, %cst_57 {dimension_numbers = #tpu.dot_dimension_numbers<[1], [0], [0], [1], [0, 0, 1, 1], [], []>, precision = #tpu.contract_precision<fp32>} : vector<32x32xf32>, vector<32x128xf32>, vector<32x128xf32> -> vector<32x128xf32>
    %241 = math.tanh %240 : vector<32x128xf32>
    %242 = arith.mulf %19, %241 : vector<32x128xf32>
    %cst_58 = arith.constant dense<0.000000e+00> : vector<128xf32>
    %243 = vector.multi_reduction <add>, %242, %cst_58 [0] : vector<32x128xf32> to vector<128xf32>
    %244 = vector.shape_cast %243 : vector<128xf32> to vector<1x128xf32>
    %245 = math.tanh %244 : vector<1x128xf32>
    %246 = arith.mulf %245, %12 : vector<1x128xf32>
    %247 = arith.addf %236, %246 : vector<1x128xf32>
    %248 = arith.mulf %209, %247 : vector<1x128xf32>
    %249 = arith.addf %201, %248 : vector<1x128xf32>
    %c1_i32_59 = arith.constant 1 : i32
    %250 = tpu.dynamic_rotate %249 by %c1_i32_59 dim 1 : vector<1x128xf32>, i32 -> vector<1x128xf32>
    %c127_i32_60 = arith.constant 127 : i32
    %251 = tpu.dynamic_rotate %249 by %c127_i32_60 dim 1 : vector<1x128xf32>, i32 -> vector<1x128xf32>
    %252 = arith.addf %250, %251 : vector<1x128xf32>
    %253 = arith.mulf %9, %249 : vector<1x128xf32>
    %254 = arith.mulf %11, %252 : vector<1x128xf32>
    %255 = arith.addf %253, %254 : vector<1x128xf32>
    %256 = vector.broadcast %249 : vector<1x128xf32> to vector<32x128xf32>
    %257 = arith.mulf %15, %256 : vector<32x128xf32>
    %258 = math.tanh %257 : vector<32x128xf32>
    %cst_61 = arith.constant dense<0.000000e+00> : vector<32x128xf32>
    %259 = tpu.matmul %16, %258, %cst_61 {dimension_numbers = #tpu.dot_dimension_numbers<[1], [0], [0], [1], [0, 0, 1, 1], [], []>, precision = #tpu.contract_precision<fp32>} : vector<32x32xf32>, vector<32x128xf32>, vector<32x128xf32> -> vector<32x128xf32>
    %260 = math.tanh %259 : vector<32x128xf32>
    %261 = arith.mulf %19, %260 : vector<32x128xf32>
    %cst_62 = arith.constant dense<0.000000e+00> : vector<128xf32>
    %262 = vector.multi_reduction <add>, %261, %cst_62 [0] : vector<32x128xf32> to vector<128xf32>
    %263 = vector.shape_cast %262 : vector<128xf32> to vector<1x128xf32>
    %264 = math.tanh %263 : vector<1x128xf32>
    %265 = arith.mulf %264, %12 : vector<1x128xf32>
    %266 = arith.addf %255, %265 : vector<1x128xf32>
    %267 = arith.mulf %207, %266 : vector<1x128xf32>
    %268 = arith.addf %201, %267 : vector<1x128xf32>
    %c1_i32_63 = arith.constant 1 : i32
    %269 = tpu.dynamic_rotate %268 by %c1_i32_63 dim 1 : vector<1x128xf32>, i32 -> vector<1x128xf32>
    %c127_i32_64 = arith.constant 127 : i32
    %270 = tpu.dynamic_rotate %268 by %c127_i32_64 dim 1 : vector<1x128xf32>, i32 -> vector<1x128xf32>
    %271 = arith.addf %269, %270 : vector<1x128xf32>
    %272 = arith.mulf %9, %268 : vector<1x128xf32>
    %273 = arith.mulf %11, %271 : vector<1x128xf32>
    %274 = arith.addf %272, %273 : vector<1x128xf32>
    %275 = vector.broadcast %268 : vector<1x128xf32> to vector<32x128xf32>
    %276 = arith.mulf %15, %275 : vector<32x128xf32>
    %277 = math.tanh %276 : vector<32x128xf32>
    %cst_65 = arith.constant dense<0.000000e+00> : vector<32x128xf32>
    %278 = tpu.matmul %16, %277, %cst_65 {dimension_numbers = #tpu.dot_dimension_numbers<[1], [0], [0], [1], [0, 0, 1, 1], [], []>, precision = #tpu.contract_precision<fp32>} : vector<32x32xf32>, vector<32x128xf32>, vector<32x128xf32> -> vector<32x128xf32>
    %279 = math.tanh %278 : vector<32x128xf32>
    %280 = arith.mulf %19, %279 : vector<32x128xf32>
    %cst_66 = arith.constant dense<0.000000e+00> : vector<128xf32>
    %281 = vector.multi_reduction <add>, %280, %cst_66 [0] : vector<32x128xf32> to vector<128xf32>
    %282 = vector.shape_cast %281 : vector<128xf32> to vector<1x128xf32>
    %283 = math.tanh %282 : vector<1x128xf32>
    %284 = arith.mulf %283, %12 : vector<1x128xf32>
    %285 = arith.addf %274, %284 : vector<1x128xf32>
    %286 = arith.addf %247, %266 : vector<1x128xf32>
    %cst_67 = arith.constant 2.000000e+00 : f32
    %287 = vector.broadcast %cst_67 : f32 to vector<1x128xf32>
    %288 = arith.mulf %287, %286 : vector<1x128xf32>
    %289 = arith.addf %228, %288 : vector<1x128xf32>
    %290 = arith.addf %289, %285 : vector<1x128xf32>
    %291 = arith.mulf %211, %290 : vector<1x128xf32>
    %292 = arith.addf %201, %291 : vector<1x128xf32>
    %293 = arith.index_cast %c2_i32 : i32 to index
    %c0_68 = arith.constant 0 : index
    %294 = vector.load %arg7[%293, %c0_68] : memref<8x128xf32, #tpu.memory_space<vmem>>, vector<1x128xf32>
    tpu.vector_store %arg7[%293, %c0_68], %292 {strides = array<i32>} : memref<8x128xf32, #tpu.memory_space<vmem>>, vector<1x128xf32>,
    %c3_i32 = arith.constant 3 : i32
    %295 = arith.addi %20, %c3_i32 : i32
    %296 = arith.index_cast %295 : i32 to index
    %297 = memref.load %arg2[%296] : memref<8xf32, #tpu.memory_space<smem>>
    %298 = vector.broadcast %297 : f32 to vector<1x128xf32>
    %cst_69 = arith.constant 5.000000e-01 : f32
    %299 = arith.mulf %cst_69, %297 : f32
    %300 = vector.broadcast %299 : f32 to vector<1x128xf32>
    %cst_70 = arith.constant 0.166666672 : f32
    %301 = arith.mulf %297, %cst_70 : f32
    %302 = vector.broadcast %301 : f32 to vector<1x128xf32>
    %c1_i32_71 = arith.constant 1 : i32
    %303 = tpu.dynamic_rotate %292 by %c1_i32_71 dim 1 : vector<1x128xf32>, i32 -> vector<1x128xf32>
    %c127_i32_72 = arith.constant 127 : i32
    %304 = tpu.dynamic_rotate %292 by %c127_i32_72 dim 1 : vector<1x128xf32>, i32 -> vector<1x128xf32>
    %305 = arith.addf %303, %304 : vector<1x128xf32>
    %306 = arith.mulf %9, %292 : vector<1x128xf32>
    %307 = arith.mulf %11, %305 : vector<1x128xf32>
    %308 = arith.addf %306, %307 : vector<1x128xf32>
    %309 = vector.broadcast %292 : vector<1x128xf32> to vector<32x128xf32>
    %310 = arith.mulf %15, %309 : vector<32x128xf32>
    %311 = math.tanh %310 : vector<32x128xf32>
    %cst_73 = arith.constant dense<0.000000e+00> : vector<32x128xf32>
    %312 = tpu.matmul %16, %311, %cst_73 {dimension_numbers = #tpu.dot_dimension_numbers<[1], [0], [0], [1], [0, 0, 1, 1], [], []>, precision = #tpu.contract_precision<fp32>} : vector<32x32xf32>, vector<32x128xf32>, vector<32x128xf32> -> vector<32x128xf32>
    %313 = math.tanh %312 : vector<32x128xf32>
    %314 = arith.mulf %19, %313 : vector<32x128xf32>
    %cst_74 = arith.constant dense<0.000000e+00> : vector<128xf32>
    %315 = vector.multi_reduction <add>, %314, %cst_74 [0] : vector<32x128xf32> to vector<128xf32>
    %316 = vector.shape_cast %315 : vector<128xf32> to vector<1x128xf32>
    %317 = math.tanh %316 : vector<1x128xf32>
    %318 = arith.mulf %317, %12 : vector<1x128xf32>
    %319 = arith.addf %308, %318 : vector<1x128xf32>
    %320 = arith.mulf %300, %319 : vector<1x128xf32>
    %321 = arith.addf %292, %320 : vector<1x128xf32>
    %c1_i32_75 = arith.constant 1 : i32
    %322 = tpu.dynamic_rotate %321 by %c1_i32_75 dim 1 : vector<1x128xf32>, i32 -> vector<1x128xf32>
    %c127_i32_76 = arith.constant 127 : i32
    %323 = tpu.dynamic_rotate %321 by %c127_i32_76 dim 1 : vector<1x128xf32>, i32 -> vector<1x128xf32>
    %324 = arith.addf %322, %323 : vector<1x128xf32>
    %325 = arith.mulf %9, %321 : vector<1x128xf32>
    %326 = arith.mulf %11, %324 : vector<1x128xf32>
    %327 = arith.addf %325, %326 : vector<1x128xf32>
    %328 = vector.broadcast %321 : vector<1x128xf32> to vector<32x128xf32>
    %329 = arith.mulf %15, %328 : vector<32x128xf32>
    %330 = math.tanh %329 : vector<32x128xf32>
    %cst_77 = arith.constant dense<0.000000e+00> : vector<32x128xf32>
    %331 = tpu.matmul %16, %330, %cst_77 {dimension_numbers = #tpu.dot_dimension_numbers<[1], [0], [0], [1], [0, 0, 1, 1], [], []>, precision = #tpu.contract_precision<fp32>} : vector<32x32xf32>, vector<32x128xf32>, vector<32x128xf32> -> vector<32x128xf32>
    %332 = math.tanh %331 : vector<32x128xf32>
    %333 = arith.mulf %19, %332 : vector<32x128xf32>
    %cst_78 = arith.constant dense<0.000000e+00> : vector<128xf32>
    %334 = vector.multi_reduction <add>, %333, %cst_78 [0] : vector<32x128xf32> to vector<128xf32>
    %335 = vector.shape_cast %334 : vector<128xf32> to vector<1x128xf32>
    %336 = math.tanh %335 : vector<1x128xf32>
    %337 = arith.mulf %336, %12 : vector<1x128xf32>
    %338 = arith.addf %327, %337 : vector<1x128xf32>
    %339 = arith.mulf %300, %338 : vector<1x128xf32>
    %340 = arith.addf %292, %339 : vector<1x128xf32>
    %c1_i32_79 = arith.constant 1 : i32
    %341 = tpu.dynamic_rotate %340 by %c1_i32_79 dim 1 : vector<1x128xf32>, i32 -> vector<1x128xf32>
    %c127_i32_80 = arith.constant 127 : i32
    %342 = tpu.dynamic_rotate %340 by %c127_i32_80 dim 1 : vector<1x128xf32>, i32 -> vector<1x128xf32>
    %343 = arith.addf %341, %342 : vector<1x128xf32>
    %344 = arith.mulf %9, %340 : vector<1x128xf32>
    %345 = arith.mulf %11, %343 : vector<1x128xf32>
    %346 = arith.addf %344, %345 : vector<1x128xf32>
    %347 = vector.broadcast %340 : vector<1x128xf32> to vector<32x128xf32>
    %348 = arith.mulf %15, %347 : vector<32x128xf32>
    %349 = math.tanh %348 : vector<32x128xf32>
    %cst_81 = arith.constant dense<0.000000e+00> : vector<32x128xf32>
    %350 = tpu.matmul %16, %349, %cst_81 {dimension_numbers = #tpu.dot_dimension_numbers<[1], [0], [0], [1], [0, 0, 1, 1], [], []>, precision = #tpu.contract_precision<fp32>} : vector<32x32xf32>, vector<32x128xf32>, vector<32x128xf32> -> vector<32x128xf32>
    %351 = math.tanh %350 : vector<32x128xf32>
    %352 = arith.mulf %19, %351 : vector<32x128xf32>
    %cst_82 = arith.constant dense<0.000000e+00> : vector<128xf32>
    %353 = vector.multi_reduction <add>, %352, %cst_82 [0] : vector<32x128xf32> to vector<128xf32>
    %354 = vector.shape_cast %353 : vector<128xf32> to vector<1x128xf32>
    %355 = math.tanh %354 : vector<1x128xf32>
    %356 = arith.mulf %355, %12 : vector<1x128xf32>
    %357 = arith.addf %346, %356 : vector<1x128xf32>
    %358 = arith.mulf %298, %357 : vector<1x128xf32>
    %359 = arith.addf %292, %358 : vector<1x128xf32>
    %c1_i32_83 = arith.constant 1 : i32
    %360 = tpu.dynamic_rotate %359 by %c1_i32_83 dim 1 : vector<1x128xf32>, i32 -> vector<1x128xf32>
    %c127_i32_84 = arith.constant 127 : i32
    %361 = tpu.dynamic_rotate %359 by %c127_i32_84 dim 1 : vector<1x128xf32>, i32 -> vector<1x128xf32>
    %362 = arith.addf %360, %361 : vector<1x128xf32>
    %363 = arith.mulf %9, %359 : vector<1x128xf32>
    %364 = arith.mulf %11, %362 : vector<1x128xf32>
    %365 = arith.addf %363, %364 : vector<1x128xf32>
    %366 = vector.broadcast %359 : vector<1x128xf32> to vector<32x128xf32>
    %367 = arith.mulf %15, %366 : vector<32x128xf32>
    %368 = math.tanh %367 : vector<32x128xf32>
    %cst_85 = arith.constant dense<0.000000e+00> : vector<32x128xf32>
    %369 = tpu.matmul %16, %368, %cst_85 {dimension_numbers = #tpu.dot_dimension_numbers<[1], [0], [0], [1], [0, 0, 1, 1], [], []>, precision = #tpu.contract_precision<fp32>} : vector<32x32xf32>, vector<32x128xf32>, vector<32x128xf32> -> vector<32x128xf32>
    %370 = math.tanh %369 : vector<32x128xf32>
    %371 = arith.mulf %19, %370 : vector<32x128xf32>
    %cst_86 = arith.constant dense<0.000000e+00> : vector<128xf32>
    %372 = vector.multi_reduction <add>, %371, %cst_86 [0] : vector<32x128xf32> to vector<128xf32>
    %373 = vector.shape_cast %372 : vector<128xf32> to vector<1x128xf32>
    %374 = math.tanh %373 : vector<1x128xf32>
    %375 = arith.mulf %374, %12 : vector<1x128xf32>
    %376 = arith.addf %365, %375 : vector<1x128xf32>
    %377 = arith.addf %338, %357 : vector<1x128xf32>
    %cst_87 = arith.constant 2.000000e+00 : f32
    %378 = vector.broadcast %cst_87 : f32 to vector<1x128xf32>
    %379 = arith.mulf %378, %377 : vector<1x128xf32>
    %380 = arith.addf %319, %379 : vector<1x128xf32>
    %381 = arith.addf %380, %376 : vector<1x128xf32>
    %382 = arith.mulf %302, %381 : vector<1x128xf32>
    %383 = arith.addf %292, %382 : vector<1x128xf32>
    %384 = arith.index_cast %c3_i32 : i32 to index
    %c0_88 = arith.constant 0 : index
    %385 = vector.load %arg7[%384, %c0_88] : memref<8x128xf32, #tpu.memory_space<vmem>>, vector<1x128xf32>
    tpu.vector_store %arg7[%384, %c0_88], %383 {strides = array<i32>} : memref<8x128xf32, #tpu.memory_space<vmem>>, vector<1x128xf32>,
    %c4_i32 = arith.constant 4 : i32
    %386 = arith.addi %20, %c4_i32 : i32
    %387 = arith.index_cast %386 : i32 to index
    %388 = memref.load %arg2[%387] : memref<8xf32, #tpu.memory_space<smem>>
    %389 = vector.broadcast %388 : f32 to vector<1x128xf32>
    %cst_89 = arith.constant 5.000000e-01 : f32
    %390 = arith.mulf %cst_89, %388 : f32
    %391 = vector.broadcast %390 : f32 to vector<1x128xf32>
    %cst_90 = arith.constant 0.166666672 : f32
    %392 = arith.mulf %388, %cst_90 : f32
    %393 = vector.broadcast %392 : f32 to vector<1x128xf32>
    %c1_i32_91 = arith.constant 1 : i32
    %394 = tpu.dynamic_rotate %383 by %c1_i32_91 dim 1 : vector<1x128xf32>, i32 -> vector<1x128xf32>
    %c127_i32_92 = arith.constant 127 : i32
    %395 = tpu.dynamic_rotate %383 by %c127_i32_92 dim 1 : vector<1x128xf32>, i32 -> vector<1x128xf32>
    %396 = arith.addf %394, %395 : vector<1x128xf32>
    %397 = arith.mulf %9, %383 : vector<1x128xf32>
    %398 = arith.mulf %11, %396 : vector<1x128xf32>
    %399 = arith.addf %397, %398 : vector<1x128xf32>
    %400 = vector.broadcast %383 : vector<1x128xf32> to vector<32x128xf32>
    %401 = arith.mulf %15, %400 : vector<32x128xf32>
    %402 = math.tanh %401 : vector<32x128xf32>
    %cst_93 = arith.constant dense<0.000000e+00> : vector<32x128xf32>
    %403 = tpu.matmul %16, %402, %cst_93 {dimension_numbers = #tpu.dot_dimension_numbers<[1], [0], [0], [1], [0, 0, 1, 1], [], []>, precision = #tpu.contract_precision<fp32>} : vector<32x32xf32>, vector<32x128xf32>, vector<32x128xf32> -> vector<32x128xf32>
    %404 = math.tanh %403 : vector<32x128xf32>
    %405 = arith.mulf %19, %404 : vector<32x128xf32>
    %cst_94 = arith.constant dense<0.000000e+00> : vector<128xf32>
    %406 = vector.multi_reduction <add>, %405, %cst_94 [0] : vector<32x128xf32> to vector<128xf32>
    %407 = vector.shape_cast %406 : vector<128xf32> to vector<1x128xf32>
    %408 = math.tanh %407 : vector<1x128xf32>
    %409 = arith.mulf %408, %12 : vector<1x128xf32>
    %410 = arith.addf %399, %409 : vector<1x128xf32>
    %411 = arith.mulf %391, %410 : vector<1x128xf32>
    %412 = arith.addf %383, %411 : vector<1x128xf32>
    %c1_i32_95 = arith.constant 1 : i32
    %413 = tpu.dynamic_rotate %412 by %c1_i32_95 dim 1 : vector<1x128xf32>, i32 -> vector<1x128xf32>
    %c127_i32_96 = arith.constant 127 : i32
    %414 = tpu.dynamic_rotate %412 by %c127_i32_96 dim 1 : vector<1x128xf32>, i32 -> vector<1x128xf32>
    %415 = arith.addf %413, %414 : vector<1x128xf32>
    %416 = arith.mulf %9, %412 : vector<1x128xf32>
    %417 = arith.mulf %11, %415 : vector<1x128xf32>
    %418 = arith.addf %416, %417 : vector<1x128xf32>
    %419 = vector.broadcast %412 : vector<1x128xf32> to vector<32x128xf32>
    %420 = arith.mulf %15, %419 : vector<32x128xf32>
    %421 = math.tanh %420 : vector<32x128xf32>
    %cst_97 = arith.constant dense<0.000000e+00> : vector<32x128xf32>
    %422 = tpu.matmul %16, %421, %cst_97 {dimension_numbers = #tpu.dot_dimension_numbers<[1], [0], [0], [1], [0, 0, 1, 1], [], []>, precision = #tpu.contract_precision<fp32>} : vector<32x32xf32>, vector<32x128xf32>, vector<32x128xf32> -> vector<32x128xf32>
    %423 = math.tanh %422 : vector<32x128xf32>
    %424 = arith.mulf %19, %423 : vector<32x128xf32>
    %cst_98 = arith.constant dense<0.000000e+00> : vector<128xf32>
    %425 = vector.multi_reduction <add>, %424, %cst_98 [0] : vector<32x128xf32> to vector<128xf32>
    %426 = vector.shape_cast %425 : vector<128xf32> to vector<1x128xf32>
    %427 = math.tanh %426 : vector<1x128xf32>
    %428 = arith.mulf %427, %12 : vector<1x128xf32>
    %429 = arith.addf %418, %428 : vector<1x128xf32>
    %430 = arith.mulf %391, %429 : vector<1x128xf32>
    %431 = arith.addf %383, %430 : vector<1x128xf32>
    %c1_i32_99 = arith.constant 1 : i32
    %432 = tpu.dynamic_rotate %431 by %c1_i32_99 dim 1 : vector<1x128xf32>, i32 -> vector<1x128xf32>
    %c127_i32_100 = arith.constant 127 : i32
    %433 = tpu.dynamic_rotate %431 by %c127_i32_100 dim 1 : vector<1x128xf32>, i32 -> vector<1x128xf32>
    %434 = arith.addf %432, %433 : vector<1x128xf32>
    %435 = arith.mulf %9, %431 : vector<1x128xf32>
    %436 = arith.mulf %11, %434 : vector<1x128xf32>
    %437 = arith.addf %435, %436 : vector<1x128xf32>
    %438 = vector.broadcast %431 : vector<1x128xf32> to vector<32x128xf32>
    %439 = arith.mulf %15, %438 : vector<32x128xf32>
    %440 = math.tanh %439 : vector<32x128xf32>
    %cst_101 = arith.constant dense<0.000000e+00> : vector<32x128xf32>
    %441 = tpu.matmul %16, %440, %cst_101 {dimension_numbers = #tpu.dot_dimension_numbers<[1], [0], [0], [1], [0, 0, 1, 1], [], []>, precision = #tpu.contract_precision<fp32>} : vector<32x32xf32>, vector<32x128xf32>, vector<32x128xf32> -> vector<32x128xf32>
    %442 = math.tanh %441 : vector<32x128xf32>
    %443 = arith.mulf %19, %442 : vector<32x128xf32>
    %cst_102 = arith.constant dense<0.000000e+00> : vector<128xf32>
    %444 = vector.multi_reduction <add>, %443, %cst_102 [0] : vector<32x128xf32> to vector<128xf32>
    %445 = vector.shape_cast %444 : vector<128xf32> to vector<1x128xf32>
    %446 = math.tanh %445 : vector<1x128xf32>
    %447 = arith.mulf %446, %12 : vector<1x128xf32>
    %448 = arith.addf %437, %447 : vector<1x128xf32>
    %449 = arith.mulf %389, %448 : vector<1x128xf32>
    %450 = arith.addf %383, %449 : vector<1x128xf32>
    %c1_i32_103 = arith.constant 1 : i32
    %451 = tpu.dynamic_rotate %450 by %c1_i32_103 dim 1 : vector<1x128xf32>, i32 -> vector<1x128xf32>
    %c127_i32_104 = arith.constant 127 : i32
    %452 = tpu.dynamic_rotate %450 by %c127_i32_104 dim 1 : vector<1x128xf32>, i32 -> vector<1x128xf32>
    %453 = arith.addf %451, %452 : vector<1x128xf32>
    %454 = arith.mulf %9, %450 : vector<1x128xf32>
    %455 = arith.mulf %11, %453 : vector<1x128xf32>
    %456 = arith.addf %454, %455 : vector<1x128xf32>
    %457 = vector.broadcast %450 : vector<1x128xf32> to vector<32x128xf32>
    %458 = arith.mulf %15, %457 : vector<32x128xf32>
    %459 = math.tanh %458 : vector<32x128xf32>
    %cst_105 = arith.constant dense<0.000000e+00> : vector<32x128xf32>
    %460 = tpu.matmul %16, %459, %cst_105 {dimension_numbers = #tpu.dot_dimension_numbers<[1], [0], [0], [1], [0, 0, 1, 1], [], []>, precision = #tpu.contract_precision<fp32>} : vector<32x32xf32>, vector<32x128xf32>, vector<32x128xf32> -> vector<32x128xf32>
    %461 = math.tanh %460 : vector<32x128xf32>
    %462 = arith.mulf %19, %461 : vector<32x128xf32>
    %cst_106 = arith.constant dense<0.000000e+00> : vector<128xf32>
    %463 = vector.multi_reduction <add>, %462, %cst_106 [0] : vector<32x128xf32> to vector<128xf32>
    %464 = vector.shape_cast %463 : vector<128xf32> to vector<1x128xf32>
    %465 = math.tanh %464 : vector<1x128xf32>
    %466 = arith.mulf %465, %12 : vector<1x128xf32>
    %467 = arith.addf %456, %466 : vector<1x128xf32>
    %468 = arith.addf %429, %448 : vector<1x128xf32>
    %cst_107 = arith.constant 2.000000e+00 : f32
    %469 = vector.broadcast %cst_107 : f32 to vector<1x128xf32>
    %470 = arith.mulf %469, %468 : vector<1x128xf32>
    %471 = arith.addf %410, %470 : vector<1x128xf32>
    %472 = arith.addf %471, %467 : vector<1x128xf32>
    %473 = arith.mulf %393, %472 : vector<1x128xf32>
    %474 = arith.addf %383, %473 : vector<1x128xf32>
    %475 = arith.index_cast %c4_i32 : i32 to index
    %c0_108 = arith.constant 0 : index
    %476 = vector.load %arg7[%475, %c0_108] : memref<8x128xf32, #tpu.memory_space<vmem>>, vector<1x128xf32>
    tpu.vector_store %arg7[%475, %c0_108], %474 {strides = array<i32>} : memref<8x128xf32, #tpu.memory_space<vmem>>, vector<1x128xf32>,
    %c5_i32 = arith.constant 5 : i32
    %477 = arith.addi %20, %c5_i32 : i32
    %478 = arith.index_cast %477 : i32 to index
    %479 = memref.load %arg2[%478] : memref<8xf32, #tpu.memory_space<smem>>
    %480 = vector.broadcast %479 : f32 to vector<1x128xf32>
    %cst_109 = arith.constant 5.000000e-01 : f32
    %481 = arith.mulf %cst_109, %479 : f32
    %482 = vector.broadcast %481 : f32 to vector<1x128xf32>
    %cst_110 = arith.constant 0.166666672 : f32
    %483 = arith.mulf %479, %cst_110 : f32
    %484 = vector.broadcast %483 : f32 to vector<1x128xf32>
    %c1_i32_111 = arith.constant 1 : i32
    %485 = tpu.dynamic_rotate %474 by %c1_i32_111 dim 1 : vector<1x128xf32>, i32 -> vector<1x128xf32>
    %c127_i32_112 = arith.constant 127 : i32
    %486 = tpu.dynamic_rotate %474 by %c127_i32_112 dim 1 : vector<1x128xf32>, i32 -> vector<1x128xf32>
    %487 = arith.addf %485, %486 : vector<1x128xf32>
    %488 = arith.mulf %9, %474 : vector<1x128xf32>
    %489 = arith.mulf %11, %487 : vector<1x128xf32>
    %490 = arith.addf %488, %489 : vector<1x128xf32>
    %491 = vector.broadcast %474 : vector<1x128xf32> to vector<32x128xf32>
    %492 = arith.mulf %15, %491 : vector<32x128xf32>
    %493 = math.tanh %492 : vector<32x128xf32>
    %cst_113 = arith.constant dense<0.000000e+00> : vector<32x128xf32>
    %494 = tpu.matmul %16, %493, %cst_113 {dimension_numbers = #tpu.dot_dimension_numbers<[1], [0], [0], [1], [0, 0, 1, 1], [], []>, precision = #tpu.contract_precision<fp32>} : vector<32x32xf32>, vector<32x128xf32>, vector<32x128xf32> -> vector<32x128xf32>
    %495 = math.tanh %494 : vector<32x128xf32>
    %496 = arith.mulf %19, %495 : vector<32x128xf32>
    %cst_114 = arith.constant dense<0.000000e+00> : vector<128xf32>
    %497 = vector.multi_reduction <add>, %496, %cst_114 [0] : vector<32x128xf32> to vector<128xf32>
    %498 = vector.shape_cast %497 : vector<128xf32> to vector<1x128xf32>
    %499 = math.tanh %498 : vector<1x128xf32>
    %500 = arith.mulf %499, %12 : vector<1x128xf32>
    %501 = arith.addf %490, %500 : vector<1x128xf32>
    %502 = arith.mulf %482, %501 : vector<1x128xf32>
    %503 = arith.addf %474, %502 : vector<1x128xf32>
    %c1_i32_115 = arith.constant 1 : i32
    %504 = tpu.dynamic_rotate %503 by %c1_i32_115 dim 1 : vector<1x128xf32>, i32 -> vector<1x128xf32>
    %c127_i32_116 = arith.constant 127 : i32
    %505 = tpu.dynamic_rotate %503 by %c127_i32_116 dim 1 : vector<1x128xf32>, i32 -> vector<1x128xf32>
    %506 = arith.addf %504, %505 : vector<1x128xf32>
    %507 = arith.mulf %9, %503 : vector<1x128xf32>
    %508 = arith.mulf %11, %506 : vector<1x128xf32>
    %509 = arith.addf %507, %508 : vector<1x128xf32>
    %510 = vector.broadcast %503 : vector<1x128xf32> to vector<32x128xf32>
    %511 = arith.mulf %15, %510 : vector<32x128xf32>
    %512 = math.tanh %511 : vector<32x128xf32>
    %cst_117 = arith.constant dense<0.000000e+00> : vector<32x128xf32>
    %513 = tpu.matmul %16, %512, %cst_117 {dimension_numbers = #tpu.dot_dimension_numbers<[1], [0], [0], [1], [0, 0, 1, 1], [], []>, precision = #tpu.contract_precision<fp32>} : vector<32x32xf32>, vector<32x128xf32>, vector<32x128xf32> -> vector<32x128xf32>
    %514 = math.tanh %513 : vector<32x128xf32>
    %515 = arith.mulf %19, %514 : vector<32x128xf32>
    %cst_118 = arith.constant dense<0.000000e+00> : vector<128xf32>
    %516 = vector.multi_reduction <add>, %515, %cst_118 [0] : vector<32x128xf32> to vector<128xf32>
    %517 = vector.shape_cast %516 : vector<128xf32> to vector<1x128xf32>
    %518 = math.tanh %517 : vector<1x128xf32>
    %519 = arith.mulf %518, %12 : vector<1x128xf32>
    %520 = arith.addf %509, %519 : vector<1x128xf32>
    %521 = arith.mulf %482, %520 : vector<1x128xf32>
    %522 = arith.addf %474, %521 : vector<1x128xf32>
    %c1_i32_119 = arith.constant 1 : i32
    %523 = tpu.dynamic_rotate %522 by %c1_i32_119 dim 1 : vector<1x128xf32>, i32 -> vector<1x128xf32>
    %c127_i32_120 = arith.constant 127 : i32
    %524 = tpu.dynamic_rotate %522 by %c127_i32_120 dim 1 : vector<1x128xf32>, i32 -> vector<1x128xf32>
    %525 = arith.addf %523, %524 : vector<1x128xf32>
    %526 = arith.mulf %9, %522 : vector<1x128xf32>
    %527 = arith.mulf %11, %525 : vector<1x128xf32>
    %528 = arith.addf %526, %527 : vector<1x128xf32>
    %529 = vector.broadcast %522 : vector<1x128xf32> to vector<32x128xf32>
    %530 = arith.mulf %15, %529 : vector<32x128xf32>
    %531 = math.tanh %530 : vector<32x128xf32>
    %cst_121 = arith.constant dense<0.000000e+00> : vector<32x128xf32>
    %532 = tpu.matmul %16, %531, %cst_121 {dimension_numbers = #tpu.dot_dimension_numbers<[1], [0], [0], [1], [0, 0, 1, 1], [], []>, precision = #tpu.contract_precision<fp32>} : vector<32x32xf32>, vector<32x128xf32>, vector<32x128xf32> -> vector<32x128xf32>
    %533 = math.tanh %532 : vector<32x128xf32>
    %534 = arith.mulf %19, %533 : vector<32x128xf32>
    %cst_122 = arith.constant dense<0.000000e+00> : vector<128xf32>
    %535 = vector.multi_reduction <add>, %534, %cst_122 [0] : vector<32x128xf32> to vector<128xf32>
    %536 = vector.shape_cast %535 : vector<128xf32> to vector<1x128xf32>
    %537 = math.tanh %536 : vector<1x128xf32>
    %538 = arith.mulf %537, %12 : vector<1x128xf32>
    %539 = arith.addf %528, %538 : vector<1x128xf32>
    %540 = arith.mulf %480, %539 : vector<1x128xf32>
    %541 = arith.addf %474, %540 : vector<1x128xf32>
    %c1_i32_123 = arith.constant 1 : i32
    %542 = tpu.dynamic_rotate %541 by %c1_i32_123 dim 1 : vector<1x128xf32>, i32 -> vector<1x128xf32>
    %c127_i32_124 = arith.constant 127 : i32
    %543 = tpu.dynamic_rotate %541 by %c127_i32_124 dim 1 : vector<1x128xf32>, i32 -> vector<1x128xf32>
    %544 = arith.addf %542, %543 : vector<1x128xf32>
    %545 = arith.mulf %9, %541 : vector<1x128xf32>
    %546 = arith.mulf %11, %544 : vector<1x128xf32>
    %547 = arith.addf %545, %546 : vector<1x128xf32>
    %548 = vector.broadcast %541 : vector<1x128xf32> to vector<32x128xf32>
    %549 = arith.mulf %15, %548 : vector<32x128xf32>
    %550 = math.tanh %549 : vector<32x128xf32>
    %cst_125 = arith.constant dense<0.000000e+00> : vector<32x128xf32>
    %551 = tpu.matmul %16, %550, %cst_125 {dimension_numbers = #tpu.dot_dimension_numbers<[1], [0], [0], [1], [0, 0, 1, 1], [], []>, precision = #tpu.contract_precision<fp32>} : vector<32x32xf32>, vector<32x128xf32>, vector<32x128xf32> -> vector<32x128xf32>
    %552 = math.tanh %551 : vector<32x128xf32>
    %553 = arith.mulf %19, %552 : vector<32x128xf32>
    %cst_126 = arith.constant dense<0.000000e+00> : vector<128xf32>
    %554 = vector.multi_reduction <add>, %553, %cst_126 [0] : vector<32x128xf32> to vector<128xf32>
    %555 = vector.shape_cast %554 : vector<128xf32> to vector<1x128xf32>
    %556 = math.tanh %555 : vector<1x128xf32>
    %557 = arith.mulf %556, %12 : vector<1x128xf32>
    %558 = arith.addf %547, %557 : vector<1x128xf32>
    %559 = arith.addf %520, %539 : vector<1x128xf32>
    %cst_127 = arith.constant 2.000000e+00 : f32
    %560 = vector.broadcast %cst_127 : f32 to vector<1x128xf32>
    %561 = arith.mulf %560, %559 : vector<1x128xf32>
    %562 = arith.addf %501, %561 : vector<1x128xf32>
    %563 = arith.addf %562, %558 : vector<1x128xf32>
    %564 = arith.mulf %484, %563 : vector<1x128xf32>
    %565 = arith.addf %474, %564 : vector<1x128xf32>
    %566 = arith.index_cast %c5_i32 : i32 to index
    %c0_128 = arith.constant 0 : index
    %567 = vector.load %arg7[%566, %c0_128] : memref<8x128xf32, #tpu.memory_space<vmem>>, vector<1x128xf32>
    tpu.vector_store %arg7[%566, %c0_128], %565 {strides = array<i32>} : memref<8x128xf32, #tpu.memory_space<vmem>>, vector<1x128xf32>,
    %c6_i32 = arith.constant 6 : i32
    %568 = arith.addi %20, %c6_i32 : i32
    %569 = arith.index_cast %568 : i32 to index
    %570 = memref.load %arg2[%569] : memref<8xf32, #tpu.memory_space<smem>>
    %571 = vector.broadcast %570 : f32 to vector<1x128xf32>
    %cst_129 = arith.constant 5.000000e-01 : f32
    %572 = arith.mulf %cst_129, %570 : f32
    %573 = vector.broadcast %572 : f32 to vector<1x128xf32>
    %cst_130 = arith.constant 0.166666672 : f32
    %574 = arith.mulf %570, %cst_130 : f32
    %575 = vector.broadcast %574 : f32 to vector<1x128xf32>
    %c1_i32_131 = arith.constant 1 : i32
    %576 = tpu.dynamic_rotate %565 by %c1_i32_131 dim 1 : vector<1x128xf32>, i32 -> vector<1x128xf32>
    %c127_i32_132 = arith.constant 127 : i32
    %577 = tpu.dynamic_rotate %565 by %c127_i32_132 dim 1 : vector<1x128xf32>, i32 -> vector<1x128xf32>
    %578 = arith.addf %576, %577 : vector<1x128xf32>
    %579 = arith.mulf %9, %565 : vector<1x128xf32>
    %580 = arith.mulf %11, %578 : vector<1x128xf32>
    %581 = arith.addf %579, %580 : vector<1x128xf32>
    %582 = vector.broadcast %565 : vector<1x128xf32> to vector<32x128xf32>
    %583 = arith.mulf %15, %582 : vector<32x128xf32>
    %584 = math.tanh %583 : vector<32x128xf32>
    %cst_133 = arith.constant dense<0.000000e+00> : vector<32x128xf32>
    %585 = tpu.matmul %16, %584, %cst_133 {dimension_numbers = #tpu.dot_dimension_numbers<[1], [0], [0], [1], [0, 0, 1, 1], [], []>, precision = #tpu.contract_precision<fp32>} : vector<32x32xf32>, vector<32x128xf32>, vector<32x128xf32> -> vector<32x128xf32>
    %586 = math.tanh %585 : vector<32x128xf32>
    %587 = arith.mulf %19, %586 : vector<32x128xf32>
    %cst_134 = arith.constant dense<0.000000e+00> : vector<128xf32>
    %588 = vector.multi_reduction <add>, %587, %cst_134 [0] : vector<32x128xf32> to vector<128xf32>
    %589 = vector.shape_cast %588 : vector<128xf32> to vector<1x128xf32>
    %590 = math.tanh %589 : vector<1x128xf32>
    %591 = arith.mulf %590, %12 : vector<1x128xf32>
    %592 = arith.addf %581, %591 : vector<1x128xf32>
    %593 = arith.mulf %573, %592 : vector<1x128xf32>
    %594 = arith.addf %565, %593 : vector<1x128xf32>
    %c1_i32_135 = arith.constant 1 : i32
    %595 = tpu.dynamic_rotate %594 by %c1_i32_135 dim 1 : vector<1x128xf32>, i32 -> vector<1x128xf32>
    %c127_i32_136 = arith.constant 127 : i32
    %596 = tpu.dynamic_rotate %594 by %c127_i32_136 dim 1 : vector<1x128xf32>, i32 -> vector<1x128xf32>
    %597 = arith.addf %595, %596 : vector<1x128xf32>
    %598 = arith.mulf %9, %594 : vector<1x128xf32>
    %599 = arith.mulf %11, %597 : vector<1x128xf32>
    %600 = arith.addf %598, %599 : vector<1x128xf32>
    %601 = vector.broadcast %594 : vector<1x128xf32> to vector<32x128xf32>
    %602 = arith.mulf %15, %601 : vector<32x128xf32>
    %603 = math.tanh %602 : vector<32x128xf32>
    %cst_137 = arith.constant dense<0.000000e+00> : vector<32x128xf32>
    %604 = tpu.matmul %16, %603, %cst_137 {dimension_numbers = #tpu.dot_dimension_numbers<[1], [0], [0], [1], [0, 0, 1, 1], [], []>, precision = #tpu.contract_precision<fp32>} : vector<32x32xf32>, vector<32x128xf32>, vector<32x128xf32> -> vector<32x128xf32>
    %605 = math.tanh %604 : vector<32x128xf32>
    %606 = arith.mulf %19, %605 : vector<32x128xf32>
    %cst_138 = arith.constant dense<0.000000e+00> : vector<128xf32>
    %607 = vector.multi_reduction <add>, %606, %cst_138 [0] : vector<32x128xf32> to vector<128xf32>
    %608 = vector.shape_cast %607 : vector<128xf32> to vector<1x128xf32>
    %609 = math.tanh %608 : vector<1x128xf32>
    %610 = arith.mulf %609, %12 : vector<1x128xf32>
    %611 = arith.addf %600, %610 : vector<1x128xf32>
    %612 = arith.mulf %573, %611 : vector<1x128xf32>
    %613 = arith.addf %565, %612 : vector<1x128xf32>
    %c1_i32_139 = arith.constant 1 : i32
    %614 = tpu.dynamic_rotate %613 by %c1_i32_139 dim 1 : vector<1x128xf32>, i32 -> vector<1x128xf32>
    %c127_i32_140 = arith.constant 127 : i32
    %615 = tpu.dynamic_rotate %613 by %c127_i32_140 dim 1 : vector<1x128xf32>, i32 -> vector<1x128xf32>
    %616 = arith.addf %614, %615 : vector<1x128xf32>
    %617 = arith.mulf %9, %613 : vector<1x128xf32>
    %618 = arith.mulf %11, %616 : vector<1x128xf32>
    %619 = arith.addf %617, %618 : vector<1x128xf32>
    %620 = vector.broadcast %613 : vector<1x128xf32> to vector<32x128xf32>
    %621 = arith.mulf %15, %620 : vector<32x128xf32>
    %622 = math.tanh %621 : vector<32x128xf32>
    %cst_141 = arith.constant dense<0.000000e+00> : vector<32x128xf32>
    %623 = tpu.matmul %16, %622, %cst_141 {dimension_numbers = #tpu.dot_dimension_numbers<[1], [0], [0], [1], [0, 0, 1, 1], [], []>, precision = #tpu.contract_precision<fp32>} : vector<32x32xf32>, vector<32x128xf32>, vector<32x128xf32> -> vector<32x128xf32>
    %624 = math.tanh %623 : vector<32x128xf32>
    %625 = arith.mulf %19, %624 : vector<32x128xf32>
    %cst_142 = arith.constant dense<0.000000e+00> : vector<128xf32>
    %626 = vector.multi_reduction <add>, %625, %cst_142 [0] : vector<32x128xf32> to vector<128xf32>
    %627 = vector.shape_cast %626 : vector<128xf32> to vector<1x128xf32>
    %628 = math.tanh %627 : vector<1x128xf32>
    %629 = arith.mulf %628, %12 : vector<1x128xf32>
    %630 = arith.addf %619, %629 : vector<1x128xf32>
    %631 = arith.mulf %571, %630 : vector<1x128xf32>
    %632 = arith.addf %565, %631 : vector<1x128xf32>
    %c1_i32_143 = arith.constant 1 : i32
    %633 = tpu.dynamic_rotate %632 by %c1_i32_143 dim 1 : vector<1x128xf32>, i32 -> vector<1x128xf32>
    %c127_i32_144 = arith.constant 127 : i32
    %634 = tpu.dynamic_rotate %632 by %c127_i32_144 dim 1 : vector<1x128xf32>, i32 -> vector<1x128xf32>
    %635 = arith.addf %633, %634 : vector<1x128xf32>
    %636 = arith.mulf %9, %632 : vector<1x128xf32>
    %637 = arith.mulf %11, %635 : vector<1x128xf32>
    %638 = arith.addf %636, %637 : vector<1x128xf32>
    %639 = vector.broadcast %632 : vector<1x128xf32> to vector<32x128xf32>
    %640 = arith.mulf %15, %639 : vector<32x128xf32>
    %641 = math.tanh %640 : vector<32x128xf32>
    %cst_145 = arith.constant dense<0.000000e+00> : vector<32x128xf32>
    %642 = tpu.matmul %16, %641, %cst_145 {dimension_numbers = #tpu.dot_dimension_numbers<[1], [0], [0], [1], [0, 0, 1, 1], [], []>, precision = #tpu.contract_precision<fp32>} : vector<32x32xf32>, vector<32x128xf32>, vector<32x128xf32> -> vector<32x128xf32>
    %643 = math.tanh %642 : vector<32x128xf32>
    %644 = arith.mulf %19, %643 : vector<32x128xf32>
    %cst_146 = arith.constant dense<0.000000e+00> : vector<128xf32>
    %645 = vector.multi_reduction <add>, %644, %cst_146 [0] : vector<32x128xf32> to vector<128xf32>
    %646 = vector.shape_cast %645 : vector<128xf32> to vector<1x128xf32>
    %647 = math.tanh %646 : vector<1x128xf32>
    %648 = arith.mulf %647, %12 : vector<1x128xf32>
    %649 = arith.addf %638, %648 : vector<1x128xf32>
    %650 = arith.addf %611, %630 : vector<1x128xf32>
    %cst_147 = arith.constant 2.000000e+00 : f32
    %651 = vector.broadcast %cst_147 : f32 to vector<1x128xf32>
    %652 = arith.mulf %651, %650 : vector<1x128xf32>
    %653 = arith.addf %592, %652 : vector<1x128xf32>
    %654 = arith.addf %653, %649 : vector<1x128xf32>
    %655 = arith.mulf %575, %654 : vector<1x128xf32>
    %656 = arith.addf %565, %655 : vector<1x128xf32>
    %657 = arith.index_cast %c6_i32 : i32 to index
    %c0_148 = arith.constant 0 : index
    %658 = vector.load %arg7[%657, %c0_148] : memref<8x128xf32, #tpu.memory_space<vmem>>, vector<1x128xf32>
    tpu.vector_store %arg7[%657, %c0_148], %656 {strides = array<i32>} : memref<8x128xf32, #tpu.memory_space<vmem>>, vector<1x128xf32>,
    %c7_i32 = arith.constant 7 : i32
    %659 = arith.addi %20, %c7_i32 : i32
    %660 = arith.index_cast %659 : i32 to index
    %661 = memref.load %arg2[%660] : memref<8xf32, #tpu.memory_space<smem>>
    %662 = vector.broadcast %661 : f32 to vector<1x128xf32>
    %cst_149 = arith.constant 5.000000e-01 : f32
    %663 = arith.mulf %cst_149, %661 : f32
    %664 = vector.broadcast %663 : f32 to vector<1x128xf32>
    %cst_150 = arith.constant 0.166666672 : f32
    %665 = arith.mulf %661, %cst_150 : f32
    %666 = vector.broadcast %665 : f32 to vector<1x128xf32>
    %c1_i32_151 = arith.constant 1 : i32
    %667 = tpu.dynamic_rotate %656 by %c1_i32_151 dim 1 : vector<1x128xf32>, i32 -> vector<1x128xf32>
    %c127_i32_152 = arith.constant 127 : i32
    %668 = tpu.dynamic_rotate %656 by %c127_i32_152 dim 1 : vector<1x128xf32>, i32 -> vector<1x128xf32>
    %669 = arith.addf %667, %668 : vector<1x128xf32>
    %670 = arith.mulf %9, %656 : vector<1x128xf32>
    %671 = arith.mulf %11, %669 : vector<1x128xf32>
    %672 = arith.addf %670, %671 : vector<1x128xf32>
    %673 = vector.broadcast %656 : vector<1x128xf32> to vector<32x128xf32>
    %674 = arith.mulf %15, %673 : vector<32x128xf32>
    %675 = math.tanh %674 : vector<32x128xf32>
    %cst_153 = arith.constant dense<0.000000e+00> : vector<32x128xf32>
    %676 = tpu.matmul %16, %675, %cst_153 {dimension_numbers = #tpu.dot_dimension_numbers<[1], [0], [0], [1], [0, 0, 1, 1], [], []>, precision = #tpu.contract_precision<fp32>} : vector<32x32xf32>, vector<32x128xf32>, vector<32x128xf32> -> vector<32x128xf32>
    %677 = math.tanh %676 : vector<32x128xf32>
    %678 = arith.mulf %19, %677 : vector<32x128xf32>
    %cst_154 = arith.constant dense<0.000000e+00> : vector<128xf32>
    %679 = vector.multi_reduction <add>, %678, %cst_154 [0] : vector<32x128xf32> to vector<128xf32>
    %680 = vector.shape_cast %679 : vector<128xf32> to vector<1x128xf32>
    %681 = math.tanh %680 : vector<1x128xf32>
    %682 = arith.mulf %681, %12 : vector<1x128xf32>
    %683 = arith.addf %672, %682 : vector<1x128xf32>
    %684 = arith.mulf %664, %683 : vector<1x128xf32>
    %685 = arith.addf %656, %684 : vector<1x128xf32>
    %c1_i32_155 = arith.constant 1 : i32
    %686 = tpu.dynamic_rotate %685 by %c1_i32_155 dim 1 : vector<1x128xf32>, i32 -> vector<1x128xf32>
    %c127_i32_156 = arith.constant 127 : i32
    %687 = tpu.dynamic_rotate %685 by %c127_i32_156 dim 1 : vector<1x128xf32>, i32 -> vector<1x128xf32>
    %688 = arith.addf %686, %687 : vector<1x128xf32>
    %689 = arith.mulf %9, %685 : vector<1x128xf32>
    %690 = arith.mulf %11, %688 : vector<1x128xf32>
    %691 = arith.addf %689, %690 : vector<1x128xf32>
    %692 = vector.broadcast %685 : vector<1x128xf32> to vector<32x128xf32>
    %693 = arith.mulf %15, %692 : vector<32x128xf32>
    %694 = math.tanh %693 : vector<32x128xf32>
    %cst_157 = arith.constant dense<0.000000e+00> : vector<32x128xf32>
    %695 = tpu.matmul %16, %694, %cst_157 {dimension_numbers = #tpu.dot_dimension_numbers<[1], [0], [0], [1], [0, 0, 1, 1], [], []>, precision = #tpu.contract_precision<fp32>} : vector<32x32xf32>, vector<32x128xf32>, vector<32x128xf32> -> vector<32x128xf32>
    %696 = math.tanh %695 : vector<32x128xf32>
    %697 = arith.mulf %19, %696 : vector<32x128xf32>
    %cst_158 = arith.constant dense<0.000000e+00> : vector<128xf32>
    %698 = vector.multi_reduction <add>, %697, %cst_158 [0] : vector<32x128xf32> to vector<128xf32>
    %699 = vector.shape_cast %698 : vector<128xf32> to vector<1x128xf32>
    %700 = math.tanh %699 : vector<1x128xf32>
    %701 = arith.mulf %700, %12 : vector<1x128xf32>
    %702 = arith.addf %691, %701 : vector<1x128xf32>
    %703 = arith.mulf %664, %702 : vector<1x128xf32>
    %704 = arith.addf %656, %703 : vector<1x128xf32>
    %c1_i32_159 = arith.constant 1 : i32
    %705 = tpu.dynamic_rotate %704 by %c1_i32_159 dim 1 : vector<1x128xf32>, i32 -> vector<1x128xf32>
    %c127_i32_160 = arith.constant 127 : i32
    %706 = tpu.dynamic_rotate %704 by %c127_i32_160 dim 1 : vector<1x128xf32>, i32 -> vector<1x128xf32>
    %707 = arith.addf %705, %706 : vector<1x128xf32>
    %708 = arith.mulf %9, %704 : vector<1x128xf32>
    %709 = arith.mulf %11, %707 : vector<1x128xf32>
    %710 = arith.addf %708, %709 : vector<1x128xf32>
    %711 = vector.broadcast %704 : vector<1x128xf32> to vector<32x128xf32>
    %712 = arith.mulf %15, %711 : vector<32x128xf32>
    %713 = math.tanh %712 : vector<32x128xf32>
    %cst_161 = arith.constant dense<0.000000e+00> : vector<32x128xf32>
    %714 = tpu.matmul %16, %713, %cst_161 {dimension_numbers = #tpu.dot_dimension_numbers<[1], [0], [0], [1], [0, 0, 1, 1], [], []>, precision = #tpu.contract_precision<fp32>} : vector<32x32xf32>, vector<32x128xf32>, vector<32x128xf32> -> vector<32x128xf32>
    %715 = math.tanh %714 : vector<32x128xf32>
    %716 = arith.mulf %19, %715 : vector<32x128xf32>
    %cst_162 = arith.constant dense<0.000000e+00> : vector<128xf32>
    %717 = vector.multi_reduction <add>, %716, %cst_162 [0] : vector<32x128xf32> to vector<128xf32>
    %718 = vector.shape_cast %717 : vector<128xf32> to vector<1x128xf32>
    %719 = math.tanh %718 : vector<1x128xf32>
    %720 = arith.mulf %719, %12 : vector<1x128xf32>
    %721 = arith.addf %710, %720 : vector<1x128xf32>
    %722 = arith.mulf %662, %721 : vector<1x128xf32>
    %723 = arith.addf %656, %722 : vector<1x128xf32>
    %c1_i32_163 = arith.constant 1 : i32
    %724 = tpu.dynamic_rotate %723 by %c1_i32_163 dim 1 : vector<1x128xf32>, i32 -> vector<1x128xf32>
    %c127_i32_164 = arith.constant 127 : i32
    %725 = tpu.dynamic_rotate %723 by %c127_i32_164 dim 1 : vector<1x128xf32>, i32 -> vector<1x128xf32>
    %726 = arith.addf %724, %725 : vector<1x128xf32>
    %727 = arith.mulf %9, %723 : vector<1x128xf32>
    %728 = arith.mulf %11, %726 : vector<1x128xf32>
    %729 = arith.addf %727, %728 : vector<1x128xf32>
    %730 = vector.broadcast %723 : vector<1x128xf32> to vector<32x128xf32>
    %731 = arith.mulf %15, %730 : vector<32x128xf32>
    %732 = math.tanh %731 : vector<32x128xf32>
    %cst_165 = arith.constant dense<0.000000e+00> : vector<32x128xf32>
    %733 = tpu.matmul %16, %732, %cst_165 {dimension_numbers = #tpu.dot_dimension_numbers<[1], [0], [0], [1], [0, 0, 1, 1], [], []>, precision = #tpu.contract_precision<fp32>} : vector<32x32xf32>, vector<32x128xf32>, vector<32x128xf32> -> vector<32x128xf32>
    %734 = math.tanh %733 : vector<32x128xf32>
    %735 = arith.mulf %19, %734 : vector<32x128xf32>
    %cst_166 = arith.constant dense<0.000000e+00> : vector<128xf32>
    %736 = vector.multi_reduction <add>, %735, %cst_166 [0] : vector<32x128xf32> to vector<128xf32>
    %737 = vector.shape_cast %736 : vector<128xf32> to vector<1x128xf32>
    %738 = math.tanh %737 : vector<1x128xf32>
    %739 = arith.mulf %738, %12 : vector<1x128xf32>
    %740 = arith.addf %729, %739 : vector<1x128xf32>
    %741 = arith.addf %702, %721 : vector<1x128xf32>
    %cst_167 = arith.constant 2.000000e+00 : f32
    %742 = vector.broadcast %cst_167 : f32 to vector<1x128xf32>
    %743 = arith.mulf %742, %741 : vector<1x128xf32>
    %744 = arith.addf %683, %743 : vector<1x128xf32>
    %745 = arith.addf %744, %740 : vector<1x128xf32>
    %746 = arith.mulf %666, %745 : vector<1x128xf32>
    %747 = arith.addf %656, %746 : vector<1x128xf32>
    %748 = arith.index_cast %c7_i32 : i32 to index
    %c0_168 = arith.constant 0 : index
    %749 = vector.load %arg7[%748, %c0_168] : memref<8x128xf32, #tpu.memory_space<vmem>>, vector<1x128xf32>
    tpu.vector_store %arg7[%748, %c0_168], %747 {strides = array<i32>} : memref<8x128xf32, #tpu.memory_space<vmem>>, vector<1x128xf32>,
    %c8_i32_169 = arith.constant 8 : i32
    %c0_170 = arith.constant 0 : index
    %c0_171 = arith.constant 0 : index
    %750 = vector.load %arg8[%c0_170, %c0_171] : memref<1x128xf32, #tpu.memory_space<vmem>>, vector<1x128xf32>
    tpu.vector_store %arg8[%c0_170, %c0_171], %747 {strides = array<i32>} : memref<1x128xf32, #tpu.memory_space<vmem>>, vector<1x128xf32>,
    return
  }
  func.func @transform_0(%arg0: i32) -> i32 {
    %c0_i32 = arith.constant 0 : i32
    %c0_i32_0 = arith.constant 0 : i32
    return %c0_i32 : i32
  }
  func.func @transform_1(%arg0: i32) -> i32 {
    %c0_i32 = arith.constant 0 : i32
    %c0_i32_0 = arith.constant 0 : i32
    return %c0_i32 : i32
  }
  func.func @transform_2(%arg0: i32) -> (i32, i32) {
    %c0_i32 = arith.constant 0 : i32
    %c0_i32_0 = arith.constant 0 : i32
    %c0_i32_1 = arith.constant 0 : i32
    return %c0_i32, %c0_i32_0 : i32, i32
  }
  func.func @transform_3(%arg0: i32) -> (i32, i32) {
    %c0_i32 = arith.constant 0 : i32
    %c0_i32_0 = arith.constant 0 : i32
    %c0_i32_1 = arith.constant 0 : i32
    return %c0_i32, %c0_i32_0 : i32, i32
  }
  func.func @transform_4(%arg0: i32) -> (i32, i32) {
    %c0_i32 = arith.constant 0 : i32
    %c0_i32_0 = arith.constant 0 : i32
    %c0_i32_1 = arith.constant 0 : i32
    return %c0_i32, %c0_i32_0 : i32, i32
  }
  func.func @transform_5(%arg0: i32) -> (i32, i32) {
    %c0_i32 = arith.constant 0 : i32
    %c0_i32_0 = arith.constant 0 : i32
    %c0_i32_1 = arith.constant 0 : i32
    return %c0_i32, %c0_i32_0 : i32, i32
  }
  func.func @transform_6(%arg0: i32) -> (i32, i32) {
    %c0_i32 = arith.constant 0 : i32
    %c0_i32_0 = arith.constant 0 : i32
    return %arg0, %c0_i32 : i32, i32
  }
}

</mosaic_0001>

<bundles_post_ra>
// kernel: tile.6
= control target key start
LH: loop header
LB: loop body
LE: loop exit
PB: predicated region body
PF: predicated region fallthrough
CT: control target
= control target key end

     0   :  { %s22_s0 = inlined_call_operand.vmem [shape: f32[64], index: 0, kind: input, shape index: {}]   ;;  %s23_s1 = inlined_call_operand.vmem [shape: f32[2,64], index: 1, kind: output, shape index: {}]  }
   0x1   :  { %v4_v0 = vld [vmem:[%s22_s0] ss:$0 sm:$0xff] }
   0x2   :  { %5 = vst [vmem:[%s23_s1] sm:$0x3] %v4_v0 }

// kernel: tile.7
= control target key start
LH: loop header
LB: loop body
LE: loop exit
PB: predicated region body
PF: predicated region fallthrough
CT: control target
= control target key end

     0   :  { %vm7_vm0 = vcmask 523264   ;;  %vm13_vm1 = vcmask 1048064   ;;  %s39_s0 = inlined_call_operand.vmem [shape: f32[2,64], index: 0, kind: input, shape index: {}]   ;;  %s40_s1 = inlined_call_operand.vmem [shape: f32[1,128], index: 1, kind: output, shape index: {}]  }
   0x1   :  { %v4_v0 = vld [vmem:[%s39_s0] sm:$0x3]  ;;  %s22_s0 = smov 64  }
   0x2   :  { %5 = vst [vmem:[#allocation1] sm:$0x3] %v4_v0 }
   0x9   :  { %v10_v1 = vld [vmem:[#allocation1 + $0x1] sm:$0x1]   ;;  %v6_v2 = vld [vmem:[#allocation1] sm:$0x1]  }
   0xa   :  { %11 = vrot.lane.b32.xlu0 %v10_v1, %s22_s0  ;;  %8 = vst.msk [vmem:[#allocation0] sm:$0x1] %vm7_vm0, %v6_v2  }
  0x7c   :  { %v12_v3 = vpop.permute.xlu0 %11  }
  0x7d   :  { %14 = vst.msk [vmem:[#allocation0] sm:$0x1] %vm13_vm1, %v12_v3  }
  0x84   :  { %v18_v4 = vld [vmem:[#allocation0] sm:$0x1] }
  0x85   :  { %20 = vst [vmem:[%s40_s1] sm:$0x1] %v18_v4 }

// kernel: forward.1
= control target key start
LH: loop header
LB: loop body
LE: loop exit
PB: predicated region body
PF: predicated region fallthrough
CT: control target
= control target key end

     0   :  { %11 = vsyncpa [#allocation5], 0  ;;  %s30222_s0 = inlined_call_operand.vmem [shape: f32[4], index: 0, kind: input, shape index: {}]   ;;  %s30223_s1 = inlined_call_operand.vmem [shape: f32[8], index: 1, kind: input, shape index: {}]   ;;  %s30224_s2 = inlined_call_operand.vmem [shape: f32[1,128], index: 2, kind: input, shape index: {}]   ;;  %s30225_s3 = inlined_call_operand.hbm [shape: f32[32,1], index: 3, kind: input, shape index: {}]   ;;  %s30226_s4 = inlined_call_operand.hbm [shape: f32[32,32], index: 4, kind: input, shape index: {}]   ;;  %s30227_s5 = inlined_call_operand.vmem [shape: f32[32,1], index: 5, kind: input, shape index: {}]   ;;  %s30228_s6 = inlined_call_operand.vmem [shape: f32[8,128], index: 6, kind: output, shape index: {}]  }
   0x1   :  { %12 = vsyncpa [#allocation7], 0 }
   0x2   :  { %13 = vsyncpa [#allocation4], 0  ;;  %s21_s23 = sshll.u32 %s30222_s0, 4  ;;  %s22_s23 = int_to_ptr.vmem [resolvable:$true] %s21_s23 }
   0x3   :  { %14 = vsyncpa [#allocation10], 0  ;;  %s31_s26 = sshll.u32 %s30223_s1, 4  ;;  %s28317_s27 = scalar_lea.vmem %s22_s23, 16  ;;  %s32_s26 = int_to_ptr.vmem [resolvable:$true] %s31_s26 }
   0x4   :  { %p28318_p0 = scmp.ne.s32.totalorder %s22_s23, %s28317_s27  ;;  %p28322_p1 = scmp.lt.s32.totalorder %s22_s23, %s22_s23 }
   0x5   :  { %p28323_p2 = scmp.lt.s32.totalorder %s28317_s27, %s28317_s27 }
   0x7   :  { %p28324_p3 = por %p28323_p2, %p28322_p1 }
   0x9   :  { %p28325_p4 = pnand %p28324_p3, %p28318_p0 }
   0xb   :  { %28328 = shalt.err (!%p28325_p4)
}
   0xc   :  { %s28393_s28 = smov [#allocation3]   ;;  %s28329_s29 = scalar_lea.vmem %s32_s26, 16 }
   0xd   :  { %24 = dma.vmem_to_smem %s22_s23, 16, %s28393_s28, [#allocation5]  }
   0xe   :  { %p28330_p5 = scmp.ne.s32.totalorder %s32_s26, %s28329_s29  ;;  %p28334_p6 = scmp.lt.s32.totalorder %s32_s26, %s32_s26 }
   0xf   :  { %p28335_p7 = scmp.lt.s32.totalorder %s28329_s29, %s28329_s29 }
  0x11   :  { %p28336_p8 = por %p28335_p7, %p28334_p6 }
  0x13   :  { %p28337_p9 = pnand %p28336_p8, %p28330_p5 }
  0x15   :  { %28340 = shalt.err (!%p28337_p9)
}
  0x16   :  { %s28394_s0 = smov [#allocation6]   ;;  %s28395_s1 = smov [#allocation8]  }
  0x17   :  { %34 = dma.vmem_to_smem %s32_s26, 16, %s28394_s0, [#allocation7]  }
  0x18   :  { %s42_s30 = sshll.u32 %s28395_s1, 4  ;;  %s28341_s9 = scalar_lea.hbm %s30225_s3, 512  ;;  %s43_s30 = int_to_ptr.vmem [resolvable:$true] %s42_s30 }
  0x19   :  { %p28342_p10 = scmp.ne.s32.totalorder %s30225_s3, %s28341_s9  ;;  %p28345_p11 = scmp.lt.u32.totalorder %s28341_s9, %s30225_s3 }
  0x1b   :  { %p28347_p12 = pnand %p28345_p11, %p28342_p10 }
  0x1d   :  { %28350 = shalt.err (!%p28347_p12)
}
  0x1e   :  { %s28351_s14 = scalar_lea.vmem %s43_s30, 512  ;;  %p28356_p0 = scmp.lt.s32.totalorder %s43_s30, %s43_s30 }
  0x1f   :  { %p28352_p13 = scmp.ne.s32.totalorder %s43_s30, %s28351_s14  ;;  %p28357_p1 = scmp.lt.s32.totalorder %s28351_s14, %s28351_s14 }
  0x21   :  { %p28358_p2 = por %p28357_p1, %p28356_p0 }
  0x23   :  { %p28359_p3 = pnand %p28358_p2, %p28352_p13 }
  0x25   :  { %28362 = shalt.err (!%p28359_p3)
}
  0x26   :  { %s28396_s15 = smov 128   ;;  %s28397_s16 = smov 8  }
  0x27   :  { %48 = dma.hbm_to_vmem [thread:$0]  %s30225_s3, 512, %s43_s30, [#allocation4], %s28396_s15, %s28396_s15, %s28397_s16  }
  0x28   :  { %s28398_s19 = smov [#allocation9]   ;;  %s28363_s23 = scalar_lea.hbm %s30226_s4, 512 }
  0x29   :  { %s54_s20 = sshll.u32 %s28398_s19, 4  ;;  %p28364_p4 = scmp.ne.s32.totalorder %s30226_s4, %s28363_s23  ;;  %s55_s20 = int_to_ptr.vmem [resolvable:$true] %s54_s20 }
  0x2a   :  { %p28367_p5 = scmp.lt.u32.totalorder %s28363_s23, %s30226_s4 }
  0x2c   :  { %p28369_p6 = pnand %p28367_p5, %p28364_p4 }
  0x2e   :  { %28372 = shalt.err (!%p28369_p6)
}
  0x2f   :  { %s28373_s28 = scalar_lea.vmem %s55_s20, 512  ;;  %p28378_p8 = scmp.lt.s32.totalorder %s55_s20, %s55_s20 }
  0x30   :  { %p28374_p7 = scmp.ne.s32.totalorder %s55_s20, %s28373_s28  ;;  %p28379_p9 = scmp.lt.s32.totalorder %s28373_s28, %s28373_s28 }
  0x32   :  { %p28380_p10 = por %p28379_p9, %p28378_p8 }
  0x34   :  { %p28381_p11 = pnand %p28380_p10, %p28374_p7 }
  0x36   :  { %28384 = shalt.err (!%p28381_p11)
}
  0x37   :  { %60 = dma.hbm_to_vmem [thread:$0]  %s30226_s4, 512, %s55_s20, [#allocation10], %s28396_s15, %s28396_s15, %s28397_s16  }
  0x38   :  { %28385 = dma.done.wait [#allocation5], 16  }
  0x39   :  { %28386 = vsyncadd [#allocation5], 4294967280 }
  0x3a   :  { %28387 = dma.done.wait [#allocation7], 16  }
  0x3b   :  { %28388 = vsyncadd [#allocation7], 4294967280 }
  0x3c   :  { %28389 = dma.done.wait [#allocation4], 512  }
  0x3d   :  { %28390 = vsyncadd [#allocation4], 4294966784 }
  0x3e   :  { %28391 = dma.done.wait [#allocation10], 512  }
  0x3f   :  { %28392 = vsyncadd [#allocation10], 4294966784 }
  0x40   :  { %75 = sfence }
  0x41   :  { %v94_v0 = vld [vmem:[#allocation8 + $0x10] sm:$0xff]  ;;  %v92_v1 = vld [vmem:[#allocation8] sm:$0xff]  ;;  %v28399_v2 = vmov 0   ;;  %v80_v3 = vld [vmem:[%s30224_s2] sm:$0x1]  ;;  %vm174_vm0 = vcmask 261120   ;;  %v161_v18 = vlaneseq }
  0x42   :  { %27739 = vset.pattern.permute.xlu1 %v28399_v2  ;;  %27738 = vset.pattern.permute.xlu0 %v28399_v2  ;;  %v95_v4 = vld [vmem:[#allocation8 + $0x18] sm:$0xff]  ;;  %v93_v5 = vld [vmem:[#allocation8 + $0x8] sm:$0xff]  ;;  %81 = vst [vmem:[#allocation2] sm:$0x1] %v80_v3  ;;  %v116_v10 = vld [vmem:[#allocation9] sm:$0xff]  ;;  %s28401_s12 = smov 1  }
  0x43   :  { %108 = vperm.xlu1 %27739, %v94_v0   ;;  %98 = vperm.xlu0 %27738, %v92_v1   ;;  %v121_v6 = vld [vmem:[%s30227_s5 + $0x8] sm:$0xff]  ;;  %v120_v7 = vld [vmem:[%s30227_s5] sm:$0xff]  ;;  %v123_v8 = vld [vmem:[%s30227_s5 + $0x18] sm:$0xff]  ;;  %v176_v11 = vsel %vm174_vm0, %v116_v10, 0  ;;  %v162_v19 = vshrl.u32 %v161_v18, 7  ;;  %s82_s13 = sld [smem:[#allocation3]] }
  0x44   :  { %v122_v9 = vld [vmem:[%s30227_s5 + $0x10] sm:$0xff]  ;;  %v28483_v12 = vand.u32 4294901760, %v176_v11  ;;  %s28400_s5 = smov 127   ;;  %v119_v34 = vld [vmem:[#allocation9 + $0x18] sm:$0xff]  ;;  %s21320_s14 = sld [smem:[#allocation3 + $0x2]] }
  0x45   :  { %v28503_v20 = vsub.s32 0, %v162_v19  ;;  %v117_v26 = vld [vmem:[#allocation9 + $0x8] sm:$0xff]  ;;  %v118_v31 = vld [vmem:[#allocation9 + $0x10] sm:$0xff]  ;;  %v185_v37 = vsel %vm174_vm0, %v119_v34, 0  ;;  %s21319_s15 = sld [smem:[#allocation3 + $0x1]]  ;;  %s21321_s19 = sld [smem:[#allocation3 + $0x3]] }
  0x46   :  { %v28486_v13 = vsub.f32 %v176_v11, %v28483_v12  ;;  %v179_v32 = vsel %vm174_vm0, %v117_v26, 0  ;;  %v182_v33 = vsel %vm174_vm0, %v118_v31, 0  ;;  %v28529_v42 = vand.u32 4294901760, %v185_v37  ;;  %s28620_s20 = sld [smem:[#allocation6]]  ;;  %s28830_s25 = sld [smem:[#allocation6 + $0x1]] }
  0x47   :  { %113 = vperm.xlu1 %27739, %v95_v4   ;;  %103 = vperm.xlu0 %27738, %v93_v5   ;;  %v28521_v35 = vand.u32 4294901760, %v179_v32  ;;  %v28523_v36 = vand.u32 4294901760, %v182_v33  ;;  %s29035_s29 = sld [smem:[#allocation6 + $0x2]]  ;;  %s29240_s7 = sld [smem:[#allocation6 + $0x3]] }
  0x48   :  { %v28489_v14 = vand.u32 4294901760, %v28486_v13  ;;  %v28543_v52 = vsub.f32 %v185_v37, %v28529_v42  ;;  %s29445_s11 = sld [smem:[#allocation6 + $0x4]] }
  0x49   :  { %v28497_v17 = vld [vmem:[#allocation2] sm:$0x1]  ;;  %v28527_v39 = vsub.f32 %v179_v32, %v28521_v35  ;;  %v28532_v44 = vsub.f32 %v182_v33, %v28523_v36  ;;  %s86_s16 = smul.f32 2.0, %s82_s13 }
  0x4a   :  { %v259_v15 = vsub.f32 %v28486_v13, %v28489_v14  ;;  %v164_v21 = vrot.slane %v28497_v17, %v28503_v20  ;;  %v28558_v63 = vand.u32 4294901760, %v28543_v52  ;;  %s89_s17 = smul.f32 %s21320_s14, %s82_s13 }
  0x4b   :  { %131 = vperm.xlu1 %27739, %v121_v6   ;;  %126 = vperm.xlu0 %27738, %v120_v7   ;;  %v28537_v47 = vand.u32 4294901760, %v28527_v39  ;;  %v28546_v54 = vand.u32 4294901760, %v28532_v44  ;;  %s87_s18 = smul.f32 %s21319_s15, %s86_s16 }
  0x4c   :  { %v28493_v16 = vand.u32 4294901760, %v259_v15  ;;  %s148_s21 = smul.f32 0.5, %s28620_s20 }
  0x4d   :  { %v269_v58 = vsub.f32 %v28527_v39, %v28537_v47  ;;  %v279_v1 = vsub.f32 %v28532_v44, %v28546_v54  ;;  %s150_s22 = smul.f32 0.16666667, %s28620_s20 }
  0x4e   :  { %22873 = vmatprep.mubr.f32.mxu0 %v28493_v16  ;;  %22957 = vmatprep.mubr.f32.mxu1 %v28493_v16  ;;  %s2805_s26 = smul.f32 0.5, %s28830_s25 }
  0x4f   :  { %141 = vperm.xlu1 %27739, %v123_v8   ;;  %136 = vperm.xlu0 %27738, %v122_v9   ;;  %v28565_v5 = vand.u32 4294901760, %v269_v58  ;;  %v289_v8 = vsub.f32 %v28543_v52, %v28558_v63  ;;  %v28570_v10 = vand.u32 4294901760, %v279_v1  ;;  %s2807_s27 = smul.f32 0.16666667, %s28830_s25 }
  0x50   :  { %s5449_s0 = smul.f32 0.5, %s29035_s29 }
  0x51   :  { %v28573_v19 = vand.u32 4294901760, %v289_v8  ;;  %s5451_s1 = smul.f32 0.16666667, %s29035_s29 }
  0x52   :  { %s8093_s8 = smul.f32 0.5, %s29240_s7 }
  0x53   :  { %154 = vrot.lane.b32.xlu1 %v28497_v17, %s28400_s5  ;;  %152 = vrot.lane.b32.xlu0 %v28497_v17, %s28401_s12  ;;  %s8095_s9 = smul.f32 0.16666667, %s29240_s7 }
  0x54   :  { %s10737_s13 = smul.f32 0.5, %s29445_s11 }
  0x55   :  { %s10739_s14 = smul.f32 0.16666667, %s29445_s11 }
  0xc2   :  { %v28507_v22 = vpop.permute.xlu1 %108  ;;  %v28509_v23 = vpop.permute.xlu0 %98 }
  0xc3   :  { %v166_v24 = vmul.f32 %v164_v21, %v28509_v23  ;;  %v168_v25 = vmul.f32 %v164_v21, %v28507_v22 }
  0xc5   :  { %27740 = vtanh.f32 %v166_v24 }
  0xc6   :  { %v28513_v27 = vpop.permute.xlu1 %113  ;;  %v28515_v28 = vpop.permute.xlu0 %103  ;;  %27742 = vtanh.f32 %v168_v25 }
  0xc7   :  { %v167_v29 = vmul.f32 %v164_v21, %v28515_v28  ;;  %v169_v30 = vmul.f32 %v164_v21, %v28513_v27 }
  0xc9   :  { %27744 = vtanh.f32 %v167_v29 }
  0xca   :  { %27746 = vtanh.f32 %v169_v30  ;;  %v28608_v33 = vpop.permute.xlu0 %126  ;;  %v28610_v37 = vpop.permute.xlu1 %131 }
  0xcf   :  { %v27741_v38 = vpop.eup %27740 }
  0xd0   :  { %v27743_v40 = vpop.eup %27742  ;;  %v188_v41 = vand.u32 4294901760, %v27741_v38 }
  0xd1   :  { %v194_v43 = vand.u32 4294901760, %v27743_v40 }
  0xd2   :  { %v28534_v45 = vsub.f32 %v27741_v38, %v188_v41 }
  0xd3   :  { %v27745_v46 = vpop.eup %27744  ;;  %v28539_v48 = vsub.f32 %v27743_v40, %v194_v43 }
  0xd4   :  { %v27747_v49 = vpop.eup %27746  ;;  %v191_v50 = vand.u32 4294901760, %v27745_v46  ;;  %v299_v51 = vand.u32 4294901760, %v28534_v45 }
  0xd5   :  { %v197_v53 = vand.u32 4294901760, %v27747_v49  ;;  %v313_v57 = vand.u32 4294901760, %v28539_v48 }
  0xd6   :  { %v28548_v55 = vpack.c.bf16 %v191_v50, %v188_v41  ;;  %v305_v56 = vsub.f32 %v27745_v46, %v191_v50  ;;  %v300_v61 = vsub.f32 %v28534_v45, %v299_v51  ;;  %v28617_v50 = vpop.permute.xlu1 %141 }
  0xd7   :  { %v319_v59 = vsub.f32 %v27747_v49, %v197_v53  ;;  %v28554_v60 = vpack.c.bf16 %v197_v53, %v194_v43  ;;  %v314_v3 = vsub.f32 %v28539_v48, %v313_v57 }
  0xd8   :  { %25554 = vmatprep.subr.bf16.mxu0 %v28548_v55  ;;  %v306_v62 = vand.u32 4294901760, %v305_v56  ;;  %v301_v6 = vand.u32 4294901760, %v300_v61  ;;  %v25569_v21 = vpack.c.bf16 %v305_v56, %v28534_v45 }
  0xd9   :  { %25556 = vmatpush3.bf16.msra.mxu0 %v28548_v55  ;;  %v320_v0 = vand.u32 4294901760, %v319_v59  ;;  %v315_v15 = vand.u32 4294901760, %v314_v3  ;;  %v25573_v24 = vpack.c.bf16 %v319_v59, %v28539_v48  ;;  %v28614_v48 = vpop.permute.xlu0 %136  ;;  %v28624_v3 = vstv %s89_s17  ;;  %s29650_s17 = sld [smem:[#allocation6 + $0x5]] }
  0xda   :  { %25558 = vmatprep.subr.bf16.mxu0 %v28554_v60  ;;  %v307_v2 = vsub.f32 %v305_v56, %v306_v62  ;;  %v25585_v25 = vpack.c.bf16 %v306_v62, %v299_v51  ;;  %v155_v61 = vpop.permute.xlu1 %154 }
  0xdb   :  { %v321_v4 = vsub.f32 %v319_v59, %v320_v0  ;;  %v25589_v26 = vpack.c.bf16 %v320_v0, %v313_v57 }
  0xdc   :  { %v308_v7 = vand.u32 4294901760, %v307_v2  ;;  %v28622_v2 = vstv %s87_s18 }
  0xdd   :  { %25560 = vmatpush3.bf16.msra.mxu0 %v28554_v60  ;;  %v322_v9 = vand.u32 4294901760, %v321_v4  ;;  %v153_v62 = vpop.permute.xlu0 %152  ;;  %v157_v4 = vmul.f32 %v28497_v17, %v28622_v2 }
  0xde   :  { %v25561_v11 = vpack.c.bf16 %v308_v7, %v301_v6  ;;  %v156_v1 = vadd.f32 %v155_v61, %v153_v62  ;;  %v28629_v7 = vstv %s21321_s19 }
  0xdf   :  { %v25565_v18 = vpack.c.bf16 %v322_v9, %v315_v15  ;;  %v28633_v15 = vstv %s148_s21  ;;  %s13381_s18 = smul.f32 0.5, %s29650_s17 }
  0xe0   :  { %22874 = vmatmul.mubr.f32.vlgmr.msra.gmra.mrb[0].mxu0 %v28565_v5  ;;  %25562 = vmatprep.subr.bf16.mxu0 %v25561_v11  ;;  %v158_v6 = vmul.f32 %v156_v1, %v28624_v3  ;;  %s13383_s19 = smul.f32 0.16666667, %s29650_s17 }
  0xe1   :  { %25564 = vmatpush3.bf16.msra.mxu0 %v25561_v11  ;;  %22876 = vmatprep.mubr.f32.mxu0 %v28570_v10 }
  0xe2   :  { %25566 = vmatprep.subr.bf16.mxu0 %v25565_v18  ;;  %v159_v8 = vadd.f32 %v158_v6, %v157_v4 }
  0xe4   :  { %22877 = vmatmul.mubr.f32.gmra.mrb[2].mxu0 %v28573_v19 }
  0xe5   :  { %25568 = vmatpush3.bf16.msra.mxu0 %v25565_v18  ;;  %22887 = vmatprep.mubr.f32.mxu0 %v28483_v12 }
  0xe6   :  { %25570 = vmatprep.subr.bf16.mxu0 %v25569_v21 }
  0xe8   :  { %22888 = vmatmul.mubr.f32.vlgmr.msra.gmra.mrb[0].mxu0 %v28521_v35 }
  0xe9   :  { %25572 = vmatpush3.bf16.msra.mxu0 %v25569_v21  ;;  %22890 = vmatprep.mubr.f32.mxu0 %v28523_v36 }
  0xea   :  { %25574 = vmatprep.subr.bf16.mxu0 %v25573_v24 }
  0xec   :  { %22891 = vmatmul.mubr.f32.gmra.mrb[2].mxu0 %v28529_v42 }
  0xed   :  { %25576 = vmatpush3.bf16.msra.mxu0 %v25573_v24  ;;  %22901 = vmatprep.mubr.f32.mxu0 %v28486_v13 }
  0xee   :  { %25578 = vmatprep.subr.bf16.mxu0 %v28548_v55 }
  0xf0   :  { %22902 = vmatmul.mubr.f32.vlgmr.msra.gmra.mrb[0].mxu0 %v28527_v39 }
  0xf1   :  { %25580 = vmatpush3.bf16.msra.mxu0 %v28548_v55  ;;  %22904 = vmatprep.mubr.f32.mxu0 %v28532_v44 }
  0xf2   :  { %25582 = vmatprep.subr.bf16.mxu0 %v28554_v60 }
  0xf4   :  { %22905 = vmatmul.mubr.f32.gmra.mrb[2].mxu0 %v28543_v52 }
  0xf5   :  { %25584 = vmatpush3.bf16.msra.mxu0 %v28554_v60  ;;  %22915 = vmatprep.mubr.f32.mxu0 %v28489_v14 }
  0xf6   :  { %25586 = vmatprep.subr.bf16.mxu0 %v25585_v25 }
  0xf8   :  { %22916 = vmatmul.mubr.f32.vlgmr.msra.gmra.mrb[0].mxu0 %v28537_v47 }
  0xf9   :  { %25588 = vmatpush3.bf16.msra.mxu0 %v25585_v25  ;;  %22918 = vmatprep.mubr.f32.mxu0 %v28546_v54 }
  0xfa   :  { %25590 = vmatprep.subr.bf16.mxu0 %v25589_v26 }
  0xfc   :  { %22919 = vmatmul.mubr.f32.gmra.mrb[2].mxu0 %v28558_v63 }
  0xfd   :  { %25592 = vmatpush3.bf16.msra.mxu0 %v25589_v26  ;;  %22929 = vmatprep.mubr.f32.mxu0 %v28483_v12 }
  0xfe   :  { %25594 = vmatprep.subr.bf16.mxu0 %v28548_v55 }
 0x100   :  { %22930 = vmatmul.mubr.f32.vlgmr.msra.gmra.mrb[0].mxu0 %v28521_v35 }
 0x101   :  { %25596 = vmatpush3.bf16.msra.mxu0 %v28548_v55  ;;  %22932 = vmatprep.mubr.f32.mxu0 %v28523_v36 }
 0x102   :  { %25598 = vmatprep.subr.bf16.mxu0 %v28554_v60 }
 0x104   :  { %22933 = vmatmul.mubr.f32.gmra.mrb[2].mxu0 %v28529_v42 }
 0x105   :  { %25600 = vmatpush3.bf16.msra.mxu0 %v28554_v60  ;;  %22943 = vmatprep.mubr.f32.mxu0 %v28483_v12 }
 0x108   :  { %22944 = vmatmul.mubr.f32.vlgmr.msra.gmra.mrb[0].mxu0 %v28521_v35 }
 0x109   :  { %22946 = vmatprep.mubr.f32.mxu0 %v28523_v36 }
 0x10c   :  { %22947 = vmatmul.mubr.f32.gmra.mrb[2].mxu0 %v28529_v42 }
 0x10d   :  { %23041 = vmatprep.mubr.f32.mxu0 %v28493_v16 }
 0x1db   :  { %v22945_v29 = vpop.f32.mrb[0].mxu0 }
 0x1dc   :  { %27748 = vtanh.f32 %v22945_v29  ;;  %v779_v30 = vpop.f32.mrb[1].mxu0 }
 0x1dd   :  { %27750 = vtanh.f32 %v779_v30 }
 0x1df   :  { %v22948_v31 = vpop.f32.mrb[2].mxu0 }
 0x1e0   :  { %27752 = vtanh.f32 %v22948_v31  ;;  %v791_v32 = vpop.f32.mrb[3].mxu0 }
 0x1e1   :  { %27754 = vtanh.f32 %v791_v32 }
 0x1e6   :  { %v27749_v34 = vpop.eup %27748 }
 0x1e7   :  { %v27751_v38 = vpop.eup %27750  ;;  %v806_v40 = vmul.f32 %v27749_v34, %v28610_v37 }
 0x1e8   :  { %v805_v41 = vmul.f32 %v27751_v38, %v28608_v33 }
 0x1ea   :  { %v27753_v43 = vpop.eup %27752  ;;  %v809_v45 = vadd.f32 %v806_v40, %v805_v41 }
 0x1eb   :  { %v27755_v46 = vpop.eup %27754  ;;  %v808_v51 = vmul.f32 %v27753_v43, %v28617_v50 }
 0x1ec   :  { %v807_v49 = vmul.f32 %v27755_v46, %v28614_v48 }
 0x1ee   :  { %v810_v53 = vadd.f32 %v809_v45, %v807_v49 }
 0x1f0   :  { %v811_v55 = vadd.f32 %v810_v53, %v808_v51 }
 0x1f2   :  { %v812_v56 = vrot.slane %v811_v55, 4 }
 0x1f4   :  { %v813_v57 = vadd.f32 %v812_v56, %v811_v55 }
 0x1f6   :  { %v814_v58 = vrot.slane %v813_v57, 2 }
 0x1f8   :  { %v815_v59 = vadd.f32 %v814_v58, %v813_v57 }
 0x1fa   :  { %v816_v60 = vrot.slane %v815_v59, 1 }
 0x1fc   :  { %v817_v0 = vadd.f32 %v816_v60, %v815_v59 }
 0x1fe   :  { %27756 = vtanh.f32 %v817_v0 }
 0x208   :  { %v27757_v9 = vpop.eup %27756 }
 0x209   :  { %v819_v11 = vmul.f32 %v27757_v9, %v28629_v7 }
 0x20b   :  { %v28635_v18 = vadd.f32 %v819_v11, %v159_v8 }
 0x20d   :  { %v821_v21 = vmul.f32 %v28635_v18, %v28633_v15 }
 0x20f   :  { %v28640_v24 = vadd.f32 %v821_v21, %v28497_v17 }
 0x211   :  { %825 = vrot.lane.b32.xlu1 %v28640_v24, %s28400_s5  ;;  %v835_v25 = vrot.slane %v28640_v24, %v28503_v20  ;;  %823 = vrot.lane.b32.xlu0 %v28640_v24, %s28401_s12 }
 0x213   :  { %v837_v26 = vmul.f32 %v835_v25, %v28509_v23  ;;  %v838_v29 = vmul.f32 %v835_v25, %v28515_v28  ;;  %v839_v30 = vmul.f32 %v835_v25, %v28507_v22  ;;  %v840_v31 = vmul.f32 %v835_v25, %v28513_v27 }
 0x215   :  { %27758 = vtanh.f32 %v837_v26 }
 0x216   :  { %27760 = vtanh.f32 %v838_v29 }
 0x217   :  { %27762 = vtanh.f32 %v839_v30 }
 0x218   :  { %27764 = vtanh.f32 %v840_v31 }
 0x21f   :  { %v27759_v32 = vpop.eup %27758 }
 0x220   :  { %v27761_v34 = vpop.eup %27760  ;;  %v846_v38 = vand.u32 4294901760, %v27759_v32 }
 0x221   :  { %v27763_v40 = vpop.eup %27762  ;;  %v849_v41 = vand.u32 4294901760, %v27761_v34 }
 0x222   :  { %v27765_v43 = vpop.eup %27764  ;;  %v852_v45 = vand.u32 4294901760, %v27763_v40  ;;  %v956_v46 = vsub.f32 %v27759_v32, %v846_v38 }
 0x223   :  { %v25601_v49 = vpack.c.bf16 %v849_v41, %v846_v38  ;;  %v855_v51 = vand.u32 4294901760, %v27765_v43  ;;  %v963_v53 = vsub.f32 %v27761_v34, %v849_v41 }
 0x224   :  { %v957_v55 = vand.u32 4294901760, %v956_v46  ;;  %v970_v56 = vsub.f32 %v27763_v40, %v852_v45 }
 0x225   :  { %25602 = vmatprep.subr.bf16.mxu1 %v25601_v49  ;;  %v25605_v57 = vpack.c.bf16 %v855_v51, %v852_v45  ;;  %v964_v58 = vand.u32 4294901760, %v963_v53  ;;  %v977_v59 = vsub.f32 %v27765_v43, %v855_v51  ;;  %v25617_v26 = vpack.c.bf16 %v963_v53, %v956_v46 }
 0x226   :  { %25604 = vmatpush3.bf16.msra.mxu1 %v25601_v49  ;;  %v958_v60 = vsub.f32 %v956_v46, %v957_v55  ;;  %v971_v61 = vand.u32 4294901760, %v970_v56 }
 0x227   :  { %25606 = vmatprep.subr.bf16.mxu1 %v25605_v57  ;;  %v965_v62 = vsub.f32 %v963_v53, %v964_v58  ;;  %v978_v0 = vand.u32 4294901760, %v977_v59  ;;  %v25621_v29 = vpack.c.bf16 %v977_v59, %v970_v56  ;;  %v25633_v30 = vpack.c.bf16 %v964_v58, %v957_v55 }
 0x228   :  { %v959_v1 = vand.u32 4294901760, %v958_v60  ;;  %v972_v4 = vsub.f32 %v970_v56, %v971_v61 }
 0x229   :  { %v966_v6 = vand.u32 4294901760, %v965_v62  ;;  %v979_v8 = vsub.f32 %v977_v59, %v978_v0  ;;  %v25637_v31 = vpack.c.bf16 %v978_v0, %v971_v61 }
 0x22a   :  { %25608 = vmatpush3.bf16.msra.mxu1 %v25605_v57  ;;  %v973_v9 = vand.u32 4294901760, %v972_v4 }
 0x22b   :  { %v25609_v11 = vpack.c.bf16 %v966_v6, %v959_v1  ;;  %v980_v21 = vand.u32 4294901760, %v979_v8 }
 0x22d   :  { %22958 = vmatmul.mubr.f32.vlgmr.msra.gmra.mrb[0].mxu1 %v28565_v5  ;;  %25610 = vmatprep.subr.bf16.mxu1 %v25609_v11  ;;  %v25613_v25 = vpack.c.bf16 %v980_v21, %v973_v9 }
 0x22e   :  { %25612 = vmatpush3.bf16.msra.mxu1 %v25609_v11  ;;  %22960 = vmatprep.mubr.f32.mxu1 %v28570_v10  ;;  %v828_v11 = vmul.f32 %v28640_v24, %v28622_v2 }
 0x22f   :  { %25614 = vmatprep.subr.bf16.mxu1 %v25613_v25 }
 0x231   :  { %22961 = vmatmul.mubr.f32.gmra.mrb[2].mxu1 %v28573_v19 }
 0x232   :  { %25616 = vmatpush3.bf16.msra.mxu1 %v25613_v25  ;;  %22971 = vmatprep.mubr.f32.mxu1 %v28483_v12 }
 0x233   :  { %25618 = vmatprep.subr.bf16.mxu1 %v25617_v26 }
 0x235   :  { %22972 = vmatmul.mubr.f32.vlgmr.msra.gmra.mrb[0].mxu1 %v28521_v35 }
 0x236   :  { %25620 = vmatpush3.bf16.msra.mxu1 %v25617_v26  ;;  %22974 = vmatprep.mubr.f32.mxu1 %v28523_v36 }
 0x237   :  { %25622 = vmatprep.subr.bf16.mxu1 %v25621_v29 }
 0x239   :  { %22975 = vmatmul.mubr.f32.gmra.mrb[2].mxu1 %v28529_v42 }
 0x23a   :  { %25624 = vmatpush3.bf16.msra.mxu1 %v25621_v29  ;;  %22985 = vmatprep.mubr.f32.mxu1 %v28486_v13 }
 0x23b   :  { %25626 = vmatprep.subr.bf16.mxu1 %v25601_v49 }
 0x23d   :  { %22986 = vmatmul.mubr.f32.vlgmr.msra.gmra.mrb[0].mxu1 %v28527_v39 }
 0x23e   :  { %25628 = vmatpush3.bf16.msra.mxu1 %v25601_v49  ;;  %22988 = vmatprep.mubr.f32.mxu1 %v28532_v44 }
 0x23f   :  { %25630 = vmatprep.subr.bf16.mxu1 %v25605_v57 }
 0x241   :  { %22989 = vmatmul.mubr.f32.gmra.mrb[2].mxu1 %v28543_v52 }
 0x242   :  { %25632 = vmatpush3.bf16.msra.mxu1 %v25605_v57  ;;  %22999 = vmatprep.mubr.f32.mxu1 %v28489_v14 }
 0x243   :  { %25634 = vmatprep.subr.bf16.mxu1 %v25633_v30 }
 0x245   :  { %23000 = vmatmul.mubr.f32.vlgmr.msra.gmra.mrb[0].mxu1 %v28537_v47 }
 0x246   :  { %25636 = vmatpush3.bf16.msra.mxu1 %v25633_v30  ;;  %23002 = vmatprep.mubr.f32.mxu1 %v28546_v54 }
 0x247   :  { %25638 = vmatprep.subr.bf16.mxu1 %v25637_v31 }
 0x249   :  { %23003 = vmatmul.mubr.f32.gmra.mrb[2].mxu1 %v28558_v63 }
 0x24a   :  { %25640 = vmatpush3.bf16.msra.mxu1 %v25637_v31  ;;  %23013 = vmatprep.mubr.f32.mxu1 %v28483_v12 }
 0x24b   :  { %25642 = vmatprep.subr.bf16.mxu1 %v25601_v49 }
 0x24d   :  { %23014 = vmatmul.mubr.f32.vlgmr.msra.gmra.mrb[0].mxu1 %v28521_v35 }
 0x24e   :  { %25644 = vmatpush3.bf16.msra.mxu1 %v25601_v49  ;;  %23016 = vmatprep.mubr.f32.mxu1 %v28523_v36 }
 0x24f   :  { %25646 = vmatprep.subr.bf16.mxu1 %v25605_v57 }
 0x251   :  { %23017 = vmatmul.mubr.f32.gmra.mrb[2].mxu1 %v28529_v42 }
 0x252   :  { %25648 = vmatpush3.bf16.msra.mxu1 %v25605_v57  ;;  %23027 = vmatprep.mubr.f32.mxu1 %v28483_v12 }
 0x255   :  { %23028 = vmatmul.mubr.f32.vlgmr.msra.gmra.mrb[0].mxu1 %v28521_v35 }
 0x256   :  { %23030 = vmatprep.mubr.f32.mxu1 %v28523_v36 }
 0x259   :  { %23031 = vmatmul.mubr.f32.gmra.mrb[2].mxu1 %v28529_v42 }
 0x25a   :  { %23125 = vmatprep.mubr.f32.mxu1 %v28493_v16 }
 0x283   :  { %v826_v4 = vpop.permute.xlu1 %825  ;;  %v824_v6 = vpop.permute.xlu0 %823 }
 0x284   :  { %v827_v8 = vadd.f32 %v826_v4, %v824_v6 }
 0x286   :  { %v829_v9 = vmul.f32 %v827_v8, %v28624_v3 }
 0x288   :  { %v830_v25 = vadd.f32 %v829_v9, %v828_v11 }
 0x328   :  { %v23029_v32 = vpop.f32.mrb[0].mxu1 }
 0x329   :  { %27766 = vtanh.f32 %v23029_v32  ;;  %v1437_v34 = vpop.f32.mrb[1].mxu1 }
 0x32a   :  { %27768 = vtanh.f32 %v1437_v34 }
 0x32c   :  { %v23032_v38 = vpop.f32.mrb[2].mxu1 }
 0x32d   :  { %27770 = vtanh.f32 %v23032_v38  ;;  %v1449_v40 = vpop.f32.mrb[3].mxu1 }
 0x32e   :  { %27772 = vtanh.f32 %v1449_v40 }
 0x333   :  { %v27767_v41 = vpop.eup %27766 }
 0x334   :  { %v27769_v43 = vpop.eup %27768  ;;  %v1464_v45 = vmul.f32 %v27767_v41, %v28610_v37 }
 0x335   :  { %v1463_v46 = vmul.f32 %v27769_v43, %v28608_v33 }
 0x337   :  { %v27771_v49 = vpop.eup %27770  ;;  %v1467_v51 = vadd.f32 %v1464_v45, %v1463_v46 }
 0x338   :  { %v27773_v53 = vpop.eup %27772  ;;  %v1466_v56 = vmul.f32 %v27771_v49, %v28617_v50 }
 0x339   :  { %v1465_v55 = vmul.f32 %v27773_v53, %v28614_v48 }
 0x33b   :  { %v1468_v57 = vadd.f32 %v1467_v51, %v1465_v55 }
 0x33d   :  { %v1469_v58 = vadd.f32 %v1468_v57, %v1466_v56 }
 0x33f   :  { %v1470_v59 = vrot.slane %v1469_v58, 4 }
 0x341   :  { %v1471_v60 = vadd.f32 %v1470_v59, %v1469_v58 }
 0x343   :  { %v1472_v61 = vrot.slane %v1471_v60, 2 }
 0x345   :  { %v1473_v62 = vadd.f32 %v1472_v61, %v1471_v60 }
 0x347   :  { %v1474_v0 = vrot.slane %v1473_v62, 1 }
 0x349   :  { %v1475_v1 = vadd.f32 %v1474_v0, %v1473_v62 }
 0x34b   :  { %27774 = vtanh.f32 %v1475_v1 }
 0x355   :  { %v27775_v21 = vpop.eup %27774 }
 0x356   :  { %v1477_v26 = vmul.f32 %v27775_v21, %v28629_v7 }
 0x358   :  { %v28684_v29 = vadd.f32 %v1477_v26, %v830_v25 }
 0x35a   :  { %v1479_v30 = vmul.f32 %v28684_v29, %v28633_v15 }
 0x35c   :  { %v28689_v31 = vadd.f32 %v1479_v30, %v28497_v17 }
 0x35e   :  { %1483 = vrot.lane.b32.xlu1 %v28689_v31, %s28400_s5  ;;  %v1493_v32 = vrot.slane %v28689_v31, %v28503_v20  ;;  %1481 = vrot.lane.b32.xlu0 %v28689_v31, %s28401_s12 }
 0x360   :  { %v1495_v24 = vmul.f32 %v1493_v32, %v28509_v23  ;;  %v1496_v34 = vmul.f32 %v1493_v32, %v28515_v28  ;;  %v1497_v38 = vmul.f32 %v1493_v32, %v28507_v22  ;;  %v1498_v15 = vmul.f32 %v1493_v32, %v28513_v27 }
 0x362   :  { %27776 = vtanh.f32 %v1495_v24 }
 0x363   :  { %27778 = vtanh.f32 %v1496_v34 }
 0x364   :  { %27780 = vtanh.f32 %v1497_v38 }
 0x365   :  { %27782 = vtanh.f32 %v1498_v15 }
 0x36c   :  { %v27777_v40 = vpop.eup %27776 }
 0x36d   :  { %v27779_v41 = vpop.eup %27778  ;;  %v1504_v43 = vand.u32 4294901760, %v27777_v40 }
 0x36e   :  { %v27781_v45 = vpop.eup %27780  ;;  %v1507_v46 = vand.u32 4294901760, %v27779_v41 }
 0x36f   :  { %v27783_v49 = vpop.eup %27782  ;;  %v1510_v51 = vand.u32 4294901760, %v27781_v45  ;;  %v1614_v53 = vsub.f32 %v27777_v40, %v1504_v43 }
 0x370   :  { %v25649_v55 = vpack.c.bf16 %v1507_v46, %v1504_v43  ;;  %v1513_v56 = vand.u32 4294901760, %v27783_v49  ;;  %v1621_v57 = vsub.f32 %v27779_v41, %v1507_v46 }
 0x371   :  { %v1615_v58 = vand.u32 4294901760, %v1614_v53  ;;  %v1628_v59 = vsub.f32 %v27781_v45, %v1510_v51 }
 0x372   :  { %25650 = vmatprep.subr.bf16.mxu0 %v25649_v55  ;;  %v25653_v60 = vpack.c.bf16 %v1513_v56, %v1510_v51  ;;  %v1622_v61 = vand.u32 4294901760, %v1621_v57  ;;  %v1635_v62 = vsub.f32 %v27783_v49, %v1513_v56  ;;  %v25665_v24 = vpack.c.bf16 %v1621_v57, %v1614_v53 }
 0x373   :  { %25652 = vmatpush3.bf16.msra.mxu0 %v25649_v55  ;;  %v1616_v0 = vsub.f32 %v1614_v53, %v1615_v58  ;;  %v1629_v1 = vand.u32 4294901760, %v1628_v59 }
 0x374   :  { %25654 = vmatprep.subr.bf16.mxu0 %v25653_v60  ;;  %v1623_v4 = vsub.f32 %v1621_v57, %v1622_v61  ;;  %v1636_v6 = vand.u32 4294901760, %v1635_v62  ;;  %v25669_v34 = vpack.c.bf16 %v1635_v62, %v1628_v59  ;;  %v25681_v38 = vpack.c.bf16 %v1622_v61, %v1615_v58 }
 0x375   :  { %v1617_v8 = vand.u32 4294901760, %v1616_v0  ;;  %v1630_v9 = vsub.f32 %v1628_v59, %v1629_v1 }
 0x376   :  { %v1624_v11 = vand.u32 4294901760, %v1623_v4  ;;  %v1637_v21 = vsub.f32 %v1635_v62, %v1636_v6  ;;  %v25685_v15 = vpack.c.bf16 %v1636_v6, %v1629_v1 }
 0x377   :  { %25656 = vmatpush3.bf16.msra.mxu0 %v25653_v60  ;;  %v1631_v25 = vand.u32 4294901760, %v1630_v9 }
 0x378   :  { %v25657_v26 = vpack.c.bf16 %v1624_v11, %v1617_v8  ;;  %v1638_v30 = vand.u32 4294901760, %v1637_v21 }
 0x37a   :  { %23042 = vmatmul.mubr.f32.vlgmr.msra.gmra.mrb[4].mxu0 %v28565_v5  ;;  %25658 = vmatprep.subr.bf16.mxu0 %v25657_v26  ;;  %v25661_v32 = vpack.c.bf16 %v1638_v30, %v1631_v25 }
 0x37b   :  { %25660 = vmatpush3.bf16.msra.mxu0 %v25657_v26  ;;  %23044 = vmatprep.mubr.f32.mxu0 %v28570_v10  ;;  %v1486_v26 = vmul.f32 %v28689_v31, %v28622_v2 }
 0x37c   :  { %25662 = vmatprep.subr.bf16.mxu0 %v25661_v32 }
 0x37e   :  { %23045 = vmatmul.mubr.f32.gmra.mrb[6].mxu0 %v28573_v19 }
 0x37f   :  { %25664 = vmatpush3.bf16.msra.mxu0 %v25661_v32  ;;  %23055 = vmatprep.mubr.f32.mxu0 %v28483_v12 }
 0x380   :  { %25666 = vmatprep.subr.bf16.mxu0 %v25665_v24 }
 0x382   :  { %23056 = vmatmul.mubr.f32.vlgmr.msra.gmra.mrb[4].mxu0 %v28521_v35 }
 0x383   :  { %25668 = vmatpush3.bf16.msra.mxu0 %v25665_v24  ;;  %23058 = vmatprep.mubr.f32.mxu0 %v28523_v36 }
 0x384   :  { %25670 = vmatprep.subr.bf16.mxu0 %v25669_v34 }
 0x386   :  { %23059 = vmatmul.mubr.f32.gmra.mrb[6].mxu0 %v28529_v42 }
 0x387   :  { %25672 = vmatpush3.bf16.msra.mxu0 %v25669_v34  ;;  %23069 = vmatprep.mubr.f32.mxu0 %v28486_v13  ;;  %v147_v34 = vstv %s28620_s20 }
 0x388   :  { %25674 = vmatprep.subr.bf16.mxu0 %v25649_v55 }
 0x38a   :  { %23070 = vmatmul.mubr.f32.vlgmr.msra.gmra.mrb[4].mxu0 %v28527_v39 }
 0x38b   :  { %25676 = vmatpush3.bf16.msra.mxu0 %v25649_v55  ;;  %23072 = vmatprep.mubr.f32.mxu0 %v28532_v44 }
 0x38c   :  { %25678 = vmatprep.subr.bf16.mxu0 %v25653_v60 }
 0x38e   :  { %23073 = vmatmul.mubr.f32.gmra.mrb[6].mxu0 %v28543_v52 }
 0x38f   :  { %25680 = vmatpush3.bf16.msra.mxu0 %v25653_v60  ;;  %23083 = vmatprep.mubr.f32.mxu0 %v28489_v14 }
 0x390   :  { %25682 = vmatprep.subr.bf16.mxu0 %v25681_v38 }
 0x392   :  { %23084 = vmatmul.mubr.f32.vlgmr.msra.gmra.mrb[4].mxu0 %v28537_v47 }
 0x393   :  { %25684 = vmatpush3.bf16.msra.mxu0 %v25681_v38  ;;  %23086 = vmatprep.mubr.f32.mxu0 %v28546_v54 }
 0x394   :  { %25686 = vmatprep.subr.bf16.mxu0 %v25685_v15 }
 0x396   :  { %23087 = vmatmul.mubr.f32.gmra.mrb[6].mxu0 %v28558_v63 }
 0x397   :  { %25688 = vmatpush3.bf16.msra.mxu0 %v25685_v15  ;;  %23097 = vmatprep.mubr.f32.mxu0 %v28483_v12 }
 0x398   :  { %25690 = vmatprep.subr.bf16.mxu0 %v25649_v55 }
 0x39a   :  { %23098 = vmatmul.mubr.f32.vlgmr.msra.gmra.mrb[4].mxu0 %v28521_v35 }
 0x39b   :  { %25692 = vmatpush3.bf16.msra.mxu0 %v25649_v55  ;;  %23100 = vmatprep.mubr.f32.mxu0 %v28523_v36 }
 0x39c   :  { %25694 = vmatprep.subr.bf16.mxu0 %v25653_v60 }
 0x39e   :  { %23101 = vmatmul.mubr.f32.gmra.mrb[6].mxu0 %v28529_v42 }
 0x39f   :  { %25696 = vmatpush3.bf16.msra.mxu0 %v25653_v60  ;;  %23111 = vmatprep.mubr.f32.mxu0 %v28483_v12 }
 0x3a2   :  { %23112 = vmatmul.mubr.f32.vlgmr.msra.gmra.mrb[4].mxu0 %v28521_v35 }
 0x3a3   :  { %23114 = vmatprep.mubr.f32.mxu0 %v28523_v36 }
 0x3a6   :  { %23115 = vmatmul.mubr.f32.gmra.mrb[6].mxu0 %v28529_v42 }
 0x3a7   :  { %23209 = vmatprep.mubr.f32.mxu0 %v28493_v16 }
 0x3d0   :  { %v1484_v9 = vpop.permute.xlu1 %1483  ;;  %v1482_v11 = vpop.permute.xlu0 %1481 }
 0x3d1   :  { %v1485_v21 = vadd.f32 %v1484_v9, %v1482_v11 }
 0x3d3   :  { %v1487_v25 = vmul.f32 %v1485_v21, %v28624_v3 }
 0x3d5   :  { %v1488_v32 = vadd.f32 %v1487_v25, %v1486_v26 }
 0x475   :  { %v23113_v40 = vpop.f32.mrb[4].mxu0 }
 0x476   :  { %27784 = vtanh.f32 %v23113_v40  ;;  %v2095_v41 = vpop.f32.mrb[5].mxu0 }
 0x477   :  { %27786 = vtanh.f32 %v2095_v41 }
 0x479   :  { %v23116_v43 = vpop.f32.mrb[6].mxu0 }
 0x47a   :  { %27788 = vtanh.f32 %v23116_v43  ;;  %v2107_v45 = vpop.f32.mrb[7].mxu0 }
 0x47b   :  { %27790 = vtanh.f32 %v2107_v45 }
 0x480   :  { %v27785_v46 = vpop.eup %27784 }
 0x481   :  { %v27787_v49 = vpop.eup %27786  ;;  %v2122_v51 = vmul.f32 %v27785_v46, %v28610_v37 }
 0x482   :  { %v2121_v53 = vmul.f32 %v27787_v49, %v28608_v33 }
 0x484   :  { %v27789_v55 = vpop.eup %27788  ;;  %v2125_v56 = vadd.f32 %v2122_v51, %v2121_v53 }
 0x485   :  { %v27791_v57 = vpop.eup %27790  ;;  %v2124_v59 = vmul.f32 %v27789_v55, %v28617_v50 }
 0x486   :  { %v2123_v58 = vmul.f32 %v27791_v57, %v28614_v48 }
 0x488   :  { %v2126_v60 = vadd.f32 %v2125_v56, %v2123_v58 }
 0x48a   :  { %v2127_v61 = vadd.f32 %v2126_v60, %v2124_v59 }
 0x48c   :  { %v2128_v62 = vrot.slane %v2127_v61, 4 }
 0x48e   :  { %v2129_v0 = vadd.f32 %v2128_v62, %v2127_v61 }
 0x490   :  { %v2130_v1 = vrot.slane %v2129_v0, 2 }
 0x492   :  { %v2131_v4 = vadd.f32 %v2130_v1, %v2129_v0 }
 0x494   :  { %v2132_v6 = vrot.slane %v2131_v4, 1 }
 0x496   :  { %v2133_v8 = vadd.f32 %v2132_v6, %v2131_v4 }
 0x498   :  { %27792 = vtanh.f32 %v2133_v8 }
 0x4a2   :  { %v27793_v30 = vpop.eup %27792 }
 0x4a3   :  { %v2135_v24 = vmul.f32 %v27793_v30, %v28629_v7 }
 0x4a5   :  { %v28734_v38 = vadd.f32 %v2135_v24, %v1488_v32 }
 0x4a7   :  { %v2137_v15 = vmul.f32 %v28734_v38, %v147_v34 }
 0x4a9   :  { %v28738_v40 = vadd.f32 %v2137_v15, %v28497_v17 }
 0x4ab   :  { %2141 = vrot.lane.b32.xlu1 %v28738_v40, %s28400_s5  ;;  %v2151_v41 = vrot.slane %v28738_v40, %v28503_v20  ;;  %2139 = vrot.lane.b32.xlu0 %v28738_v40, %s28401_s12 }
 0x4ad   :  { %v2153_v31 = vmul.f32 %v2151_v41, %v28509_v23  ;;  %v2154_v43 = vmul.f32 %v2151_v41, %v28515_v28  ;;  %v2155_v45 = vmul.f32 %v2151_v41, %v28507_v22  ;;  %v2156_v46 = vmul.f32 %v2151_v41, %v28513_v27 }
 0x4af   :  { %27794 = vtanh.f32 %v2153_v31 }
 0x4b0   :  { %27796 = vtanh.f32 %v2154_v43 }
 0x4b1   :  { %27798 = vtanh.f32 %v2155_v45 }
 0x4b2   :  { %27800 = vtanh.f32 %v2156_v46 }
 0x4b9   :  { %v27795_v17 = vpop.eup %27794 }
 0x4ba   :  { %v27797_v49 = vpop.eup %27796  ;;  %v2162_v51 = vand.u32 4294901760, %v27795_v17 }
 0x4bb   :  { %v27799_v53 = vpop.eup %27798  ;;  %v2165_v55 = vand.u32 4294901760, %v27797_v49 }
 0x4bc   :  { %v27801_v56 = vpop.eup %27800  ;;  %v2168_v57 = vand.u32 4294901760, %v27799_v53  ;;  %v2272_v58 = vsub.f32 %v27795_v17, %v2162_v51 }
 0x4bd   :  { %v25697_v59 = vpack.c.bf16 %v2165_v55, %v2162_v51  ;;  %v2171_v60 = vand.u32 4294901760, %v27801_v56  ;;  %v2279_v61 = vsub.f32 %v27797_v49, %v2165_v55 }
 0x4be   :  { %v2273_v62 = vand.u32 4294901760, %v2272_v58  ;;  %v2286_v0 = vsub.f32 %v27799_v53, %v2168_v57 }
 0x4bf   :  { %25698 = vmatprep.subr.bf16.mxu1 %v25697_v59  ;;  %v25701_v1 = vpack.c.bf16 %v2171_v60, %v2168_v57  ;;  %v2280_v4 = vand.u32 4294901760, %v2279_v61  ;;  %v2293_v6 = vsub.f32 %v27801_v56, %v2171_v60  ;;  %v25713_v31 = vpack.c.bf16 %v2279_v61, %v2272_v58 }
 0x4c0   :  { %25700 = vmatpush3.bf16.msra.mxu1 %v25697_v59  ;;  %v2274_v8 = vsub.f32 %v2272_v58, %v2273_v62  ;;  %v2287_v9 = vand.u32 4294901760, %v2286_v0 }
 0x4c1   :  { %25702 = vmatprep.subr.bf16.mxu1 %v25701_v1  ;;  %v2281_v11 = vsub.f32 %v2279_v61, %v2280_v4  ;;  %v2294_v21 = vand.u32 4294901760, %v2293_v6  ;;  %v25717_v43 = vpack.c.bf16 %v2293_v6, %v2286_v0  ;;  %v25729_v45 = vpack.c.bf16 %v2280_v4, %v2273_v62 }
 0x4c2   :  { %v2275_v25 = vand.u32 4294901760, %v2274_v8  ;;  %v2288_v26 = vsub.f32 %v2286_v0, %v2287_v9 }
 0x4c3   :  { %v2282_v30 = vand.u32 4294901760, %v2281_v11  ;;  %v2295_v32 = vsub.f32 %v2293_v6, %v2294_v21  ;;  %v25733_v46 = vpack.c.bf16 %v2294_v21, %v2287_v9 }
 0x4c4   :  { %25704 = vmatpush3.bf16.msra.mxu1 %v25701_v1  ;;  %v2289_v24 = vand.u32 4294901760, %v2288_v26 }
 0x4c5   :  { %v25705_v34 = vpack.c.bf16 %v2282_v30, %v2275_v25  ;;  %v2296_v15 = vand.u32 4294901760, %v2295_v32 }
 0x4c7   :  { %23126 = vmatmul.mubr.f32.vlgmr.msra.gmra.mrb[4].mxu1 %v28565_v5  ;;  %25706 = vmatprep.subr.bf16.mxu1 %v25705_v34  ;;  %v25709_v41 = vpack.c.bf16 %v2296_v15, %v2289_v24  ;;  %v2795_v24 = vadd.f32 %v28734_v38, %v28684_v29 }
 0x4c8   :  { %25708 = vmatpush3.bf16.msra.mxu1 %v25705_v34  ;;  %23128 = vmatprep.mubr.f32.mxu1 %v28570_v10 }
 0x4c9   :  { %25710 = vmatprep.subr.bf16.mxu1 %v25709_v41  ;;  %v2796_v15 = vmul.f32 2.0, %v2795_v24 }
 0x4cb   :  { %23129 = vmatmul.mubr.f32.gmra.mrb[6].mxu1 %v28573_v19 }
 0x4cc   :  { %25712 = vmatpush3.bf16.msra.mxu1 %v25709_v41  ;;  %23139 = vmatprep.mubr.f32.mxu1 %v28483_v12  ;;  %v2144_v41 = vmul.f32 %v28738_v40, %v28622_v2 }
 0x4cd   :  { %25714 = vmatprep.subr.bf16.mxu1 %v25713_v31 }
 0x4cf   :  { %23140 = vmatmul.mubr.f32.vlgmr.msra.gmra.mrb[4].mxu1 %v28521_v35 }
 0x4d0   :  { %25716 = vmatpush3.bf16.msra.mxu1 %v25713_v31  ;;  %23142 = vmatprep.mubr.f32.mxu1 %v28523_v36 }
 0x4d1   :  { %25718 = vmatprep.subr.bf16.mxu1 %v25717_v43 }
 0x4d3   :  { %23143 = vmatmul.mubr.f32.gmra.mrb[6].mxu1 %v28529_v42 }
 0x4d4   :  { %25720 = vmatpush3.bf16.msra.mxu1 %v25717_v43  ;;  %23153 = vmatprep.mubr.f32.mxu1 %v28486_v13 }
 0x4d5   :  { %25722 = vmatprep.subr.bf16.mxu1 %v25697_v59 }
 0x4d7   :  { %23154 = vmatmul.mubr.f32.vlgmr.msra.gmra.mrb[4].mxu1 %v28527_v39 }
 0x4d8   :  { %25724 = vmatpush3.bf16.msra.mxu1 %v25697_v59  ;;  %23156 = vmatprep.mubr.f32.mxu1 %v28532_v44 }
 0x4d9   :  { %25726 = vmatprep.subr.bf16.mxu1 %v25701_v1 }
 0x4db   :  { %23157 = vmatmul.mubr.f32.gmra.mrb[6].mxu1 %v28543_v52 }
 0x4dc   :  { %25728 = vmatpush3.bf16.msra.mxu1 %v25701_v1  ;;  %23167 = vmatprep.mubr.f32.mxu1 %v28489_v14 }
 0x4dd   :  { %25730 = vmatprep.subr.bf16.mxu1 %v25729_v45 }
 0x4df   :  { %23168 = vmatmul.mubr.f32.vlgmr.msra.gmra.mrb[4].mxu1 %v28537_v47 }
 0x4e0   :  { %25732 = vmatpush3.bf16.msra.mxu1 %v25729_v45  ;;  %23170 = vmatprep.mubr.f32.mxu1 %v28546_v54 }
 0x4e1   :  { %25734 = vmatprep.subr.bf16.mxu1 %v25733_v46 }
 0x4e3   :  { %23171 = vmatmul.mubr.f32.gmra.mrb[6].mxu1 %v28558_v63 }
 0x4e4   :  { %25736 = vmatpush3.bf16.msra.mxu1 %v25733_v46  ;;  %23181 = vmatprep.mubr.f32.mxu1 %v28483_v12  ;;  %v2797_v46 = vadd.f32 %v2796_v15, %v28635_v18 }
 0x4e5   :  { %25738 = vmatprep.subr.bf16.mxu1 %v25697_v59 }
 0x4e7   :  { %23182 = vmatmul.mubr.f32.vlgmr.msra.gmra.mrb[4].mxu1 %v28521_v35 }
 0x4e8   :  { %25740 = vmatpush3.bf16.msra.mxu1 %v25697_v59  ;;  %23184 = vmatprep.mubr.f32.mxu1 %v28523_v36 }
 0x4e9   :  { %25742 = vmatprep.subr.bf16.mxu1 %v25701_v1 }
 0x4eb   :  { %23185 = vmatmul.mubr.f32.gmra.mrb[6].mxu1 %v28529_v42 }
 0x4ec   :  { %25744 = vmatpush3.bf16.msra.mxu1 %v25701_v1  ;;  %23195 = vmatprep.mubr.f32.mxu1 %v28483_v12 }
 0x4ef   :  { %23196 = vmatmul.mubr.f32.vlgmr.msra.gmra.mrb[4].mxu1 %v28521_v35 }
 0x4f0   :  { %23198 = vmatprep.mubr.f32.mxu1 %v28523_v36 }
 0x4f3   :  { %23199 = vmatmul.mubr.f32.gmra.mrb[6].mxu1 %v28529_v42 }
 0x4f4   :  { %23293 = vmatprep.mubr.f32.mxu1 %v28493_v16 }
 0x51d   :  { %v2142_v26 = vpop.permute.xlu1 %2141  ;;  %v2140_v30 = vpop.permute.xlu0 %2139 }
 0x51e   :  { %v2143_v32 = vadd.f32 %v2142_v26, %v2140_v30 }
 0x520   :  { %v2145_v34 = vmul.f32 %v2143_v32, %v28624_v3 }
 0x522   :  { %v2146_v43 = vadd.f32 %v2145_v34, %v2144_v41 }
 0x5c2   :  { %v23197_v17 = vpop.f32.mrb[4].mxu1 }
 0x5c3   :  { %27802 = vtanh.f32 %v23197_v17  ;;  %v2753_v49 = vpop.f32.mrb[5].mxu1 }
 0x5c4   :  { %27804 = vtanh.f32 %v2753_v49  ;;  %v151_v49 = vstv %s150_s22  ;;  %s29855_s22 = sld [smem:[#allocation6 + $0x6]] }
 0x5c6   :  { %v23200_v51 = vpop.f32.mrb[6].mxu1 }
 0x5c7   :  { %27806 = vtanh.f32 %v23200_v51  ;;  %v2765_v53 = vpop.f32.mrb[7].mxu1 }
 0x5c8   :  { %27808 = vtanh.f32 %v2765_v53 }
 0x5ca   :  { %s16025_s23 = smul.f32 0.5, %s29855_s22 }
 0x5cb   :  { %s16027_s24 = smul.f32 0.16666667, %s29855_s22 }
 0x5cd   :  { %v27803_v55 = vpop.eup %27802 }
 0x5ce   :  { %v27805_v56 = vpop.eup %27804  ;;  %v2780_v57 = vmul.f32 %v27803_v55, %v28610_v37  ;;  %v28316_v55 = vld [vmem:[#allocation2] sm:$0x1] }
 0x5cf   :  { %v2779_v58 = vmul.f32 %v27805_v56, %v28608_v33 }
 0x5d1   :  { %v27807_v59 = vpop.eup %27806  ;;  %v2783_v60 = vadd.f32 %v2780_v57, %v2779_v58 }
 0x5d2   :  { %v27809_v61 = vpop.eup %27808  ;;  %v2782_v0 = vmul.f32 %v27807_v59, %v28617_v50 }
 0x5d3   :  { %v2781_v62 = vmul.f32 %v27809_v61, %v28614_v48 }
 0x5d5   :  { %v2784_v1 = vadd.f32 %v2783_v60, %v2781_v62 }
 0x5d7   :  { %v2785_v4 = vadd.f32 %v2784_v1, %v2782_v0 }
 0x5d9   :  { %v2786_v6 = vrot.slane %v2785_v4, 4 }
 0x5db   :  { %v2787_v8 = vadd.f32 %v2786_v6, %v2785_v4 }
 0x5dd   :  { %v2788_v9 = vrot.slane %v2787_v8, 2 }
 0x5df   :  { %v2789_v11 = vadd.f32 %v2788_v9, %v2787_v8 }
 0x5e1   :  { %v2790_v21 = vrot.slane %v2789_v11, 1 }
 0x5e3   :  { %v2791_v25 = vadd.f32 %v2790_v21, %v2789_v11 }
 0x5e5   :  { %27810 = vtanh.f32 %v2791_v25 }
 0x5ef   :  { %v27811_v31 = vpop.eup %27810 }
 0x5f0   :  { %v2793_v45 = vmul.f32 %v27811_v31, %v28629_v7 }
 0x5f2   :  { %v2794_v17 = vadd.f32 %v2793_v45, %v2146_v43 }
 0x5f4   :  { %v2798_v51 = vadd.f32 %v2797_v46, %v2794_v17 }
 0x5f6   :  { %v2799_v53 = vmul.f32 %v2798_v51, %v151_v49 }
 0x5f8   :  { %v28786_v56 = vadd.f32 %v28316_v55, %v2799_v53 }
 0x5fa   :  { %2811 = vrot.lane.b32.xlu1 %v28786_v56, %s28400_s5  ;;  %2801 = vst [vmem:[%s30228_s6] sm:$0x1] %v28786_v56  ;;  %2809 = vrot.lane.b32.xlu0 %v28786_v56, %s28401_s12  ;;  %v2821_v18 = vrot.slane %v28786_v56, %v28503_v20 }
 0x5fc   :  { %v2823_v29 = vmul.f32 %v2821_v18, %v28509_v23  ;;  %v2824_v38 = vmul.f32 %v2821_v18, %v28515_v28  ;;  %v2825_v40 = vmul.f32 %v2821_v18, %v28507_v22  ;;  %v2826_v57 = vmul.f32 %v2821_v18, %v28513_v27 }
 0x5fe   :  { %27812 = vtanh.f32 %v2823_v29 }
 0x5ff   :  { %27814 = vtanh.f32 %v2824_v38 }
 0x600   :  { %27816 = vtanh.f32 %v2825_v40 }
 0x601   :  { %27818 = vtanh.f32 %v2826_v57 }
 0x608   :  { %v27813_v58 = vpop.eup %27812 }
 0x609   :  { %v27815_v59 = vpop.eup %27814  ;;  %v2832_v60 = vand.u32 4294901760, %v27813_v58 }
 0x60a   :  { %v27817_v61 = vpop.eup %27816  ;;  %v2835_v62 = vand.u32 4294901760, %v27815_v59 }
 0x60b   :  { %v27819_v0 = vpop.eup %27818  ;;  %v2838_v1 = vand.u32 4294901760, %v27817_v61  ;;  %v2942_v4 = vsub.f32 %v27813_v58, %v2832_v60 }
 0x60c   :  { %v25745_v6 = vpack.c.bf16 %v2835_v62, %v2832_v60  ;;  %v2841_v8 = vand.u32 4294901760, %v27819_v0  ;;  %v2949_v9 = vsub.f32 %v27815_v59, %v2835_v62 }
 0x60d   :  { %v2943_v11 = vand.u32 4294901760, %v2942_v4  ;;  %v2956_v21 = vsub.f32 %v27817_v61, %v2838_v1 }
 0x60e   :  { %25746 = vmatprep.subr.bf16.mxu0 %v25745_v6  ;;  %v25749_v25 = vpack.c.bf16 %v2841_v8, %v2838_v1  ;;  %v2950_v26 = vand.u32 4294901760, %v2949_v9  ;;  %v2963_v30 = vsub.f32 %v27819_v0, %v2841_v8  ;;  %v25761_v53 = vpack.c.bf16 %v2949_v9, %v2942_v4 }
 0x60f   :  { %25748 = vmatpush3.bf16.msra.mxu0 %v25745_v6  ;;  %v2944_v32 = vsub.f32 %v2942_v4, %v2943_v11  ;;  %v2957_v24 = vand.u32 4294901760, %v2956_v21 }
 0x610   :  { %25750 = vmatprep.subr.bf16.mxu0 %v25749_v25  ;;  %v2951_v34 = vsub.f32 %v2949_v9, %v2950_v26  ;;  %v2964_v15 = vand.u32 4294901760, %v2963_v30  ;;  %v25765_v55 = vpack.c.bf16 %v2963_v30, %v2956_v21  ;;  %v25777_v18 = vpack.c.bf16 %v2950_v26, %v2943_v11 }
 0x611   :  { %v2945_v41 = vand.u32 4294901760, %v2944_v32  ;;  %v2958_v31 = vsub.f32 %v2956_v21, %v2957_v24 }
 0x612   :  { %v2952_v43 = vand.u32 4294901760, %v2951_v34  ;;  %v2965_v45 = vsub.f32 %v2963_v30, %v2964_v15  ;;  %v25781_v29 = vpack.c.bf16 %v2964_v15, %v2957_v24 }
 0x613   :  { %25752 = vmatpush3.bf16.msra.mxu0 %v25749_v25  ;;  %v2959_v46 = vand.u32 4294901760, %v2958_v31 }
 0x614   :  { %v25753_v17 = vpack.c.bf16 %v2952_v43, %v2945_v41  ;;  %v2966_v49 = vand.u32 4294901760, %v2965_v45  ;;  %v2814_v43 = vmul.f32 %v28786_v56, %v28622_v2 }
 0x616   :  { %23210 = vmatmul.mubr.f32.vlgmr.msra.gmra.mrb[8].mxu0 %v28565_v5  ;;  %25754 = vmatprep.subr.bf16.mxu0 %v25753_v17  ;;  %v25757_v51 = vpack.c.bf16 %v2966_v49, %v2959_v46  ;;  %v28837_v49 = vstv %s2805_s26 }
 0x617   :  { %25756 = vmatpush3.bf16.msra.mxu0 %v25753_v17  ;;  %23212 = vmatprep.mubr.f32.mxu0 %v28570_v10 }
 0x618   :  { %25758 = vmatprep.subr.bf16.mxu0 %v25757_v51 }
 0x61a   :  { %23213 = vmatmul.mubr.f32.gmra.mrb[10].mxu0 %v28573_v19 }
 0x61b   :  { %25760 = vmatpush3.bf16.msra.mxu0 %v25757_v51  ;;  %23223 = vmatprep.mubr.f32.mxu0 %v28483_v12 }
 0x61c   :  { %25762 = vmatprep.subr.bf16.mxu0 %v25761_v53 }
 0x61e   :  { %23224 = vmatmul.mubr.f32.vlgmr.msra.gmra.mrb[8].mxu0 %v28521_v35 }
 0x61f   :  { %25764 = vmatpush3.bf16.msra.mxu0 %v25761_v53  ;;  %23226 = vmatprep.mubr.f32.mxu0 %v28523_v36 }
 0x620   :  { %25766 = vmatprep.subr.bf16.mxu0 %v25765_v55 }
 0x622   :  { %23227 = vmatmul.mubr.f32.gmra.mrb[10].mxu0 %v28529_v42 }
 0x623   :  { %25768 = vmatpush3.bf16.msra.mxu0 %v25765_v55  ;;  %23237 = vmatprep.mubr.f32.mxu0 %v28486_v13 }
 0x624   :  { %25770 = vmatprep.subr.bf16.mxu0 %v25745_v6 }
 0x626   :  { %23238 = vmatmul.mubr.f32.vlgmr.msra.gmra.mrb[8].mxu0 %v28527_v39 }
 0x627   :  { %25772 = vmatpush3.bf16.msra.mxu0 %v25745_v6  ;;  %23240 = vmatprep.mubr.f32.mxu0 %v28532_v44 }
 0x628   :  { %25774 = vmatprep.subr.bf16.mxu0 %v25749_v25 }
 0x62a   :  { %23241 = vmatmul.mubr.f32.gmra.mrb[10].mxu0 %v28543_v52 }
 0x62b   :  { %25776 = vmatpush3.bf16.msra.mxu0 %v25749_v25  ;;  %23251 = vmatprep.mubr.f32.mxu0 %v28489_v14 }
 0x62c   :  { %25778 = vmatprep.subr.bf16.mxu0 %v25777_v18 }
 0x62e   :  { %23252 = vmatmul.mubr.f32.vlgmr.msra.gmra.mrb[8].mxu0 %v28537_v47 }
 0x62f   :  { %25780 = vmatpush3.bf16.msra.mxu0 %v25777_v18  ;;  %23254 = vmatprep.mubr.f32.mxu0 %v28546_v54 }
 0x630   :  { %25782 = vmatprep.subr.bf16.mxu0 %v25781_v29 }
 0x632   :  { %23255 = vmatmul.mubr.f32.gmra.mrb[10].mxu0 %v28558_v63 }
 0x633   :  { %25784 = vmatpush3.bf16.msra.mxu0 %v25781_v29  ;;  %23265 = vmatprep.mubr.f32.mxu0 %v28483_v12 }
 0x634   :  { %25786 = vmatprep.subr.bf16.mxu0 %v25745_v6 }
 0x636   :  { %23266 = vmatmul.mubr.f32.vlgmr.msra.gmra.mrb[8].mxu0 %v28521_v35 }
 0x637   :  { %25788 = vmatpush3.bf16.msra.mxu0 %v25745_v6  ;;  %23268 = vmatprep.mubr.f32.mxu0 %v28523_v36 }
 0x638   :  { %25790 = vmatprep.subr.bf16.mxu0 %v25749_v25 }
 0x63a   :  { %23269 = vmatmul.mubr.f32.gmra.mrb[10].mxu0 %v28529_v42 }
 0x63b   :  { %25792 = vmatpush3.bf16.msra.mxu0 %v25749_v25  ;;  %23279 = vmatprep.mubr.f32.mxu0 %v28483_v12 }
 0x63e   :  { %23280 = vmatmul.mubr.f32.vlgmr.msra.gmra.mrb[8].mxu0 %v28521_v35 }
 0x63f   :  { %23282 = vmatprep.mubr.f32.mxu0 %v28523_v36 }
 0x642   :  { %23283 = vmatmul.mubr.f32.gmra.mrb[10].mxu0 %v28529_v42 }
 0x643   :  { %23377 = vmatprep.mubr.f32.mxu0 %v28493_v16 }
 0x66c   :  { %v2812_v34 = vpop.permute.xlu1 %2811  ;;  %v2810_v15 = vpop.permute.xlu0 %2809 }
 0x66d   :  { %v2813_v41 = vadd.f32 %v2812_v34, %v2810_v15 }
 0x66f   :  { %v2815_v31 = vmul.f32 %v2813_v41, %v28624_v3 }
 0x671   :  { %v2816_v46 = vadd.f32 %v2815_v31, %v2814_v43 }
 0x711   :  { %v23281_v38 = vpop.f32.mrb[8].mxu0 }
 0x712   :  { %27820 = vtanh.f32 %v23281_v38  ;;  %v3423_v40 = vpop.f32.mrb[9].mxu0 }
 0x713   :  { %27822 = vtanh.f32 %v3423_v40 }
 0x715   :  { %v23284_v57 = vpop.f32.mrb[10].mxu0 }
 0x716   :  { %27824 = vtanh.f32 %v23284_v57  ;;  %v3435_v58 = vpop.f32.mrb[11].mxu0 }
 0x717   :  { %27826 = vtanh.f32 %v3435_v58 }
 0x71c   :  { %v27821_v59 = vpop.eup %27820 }
 0x71d   :  { %v27823_v60 = vpop.eup %27822  ;;  %v3450_v61 = vmul.f32 %v27821_v59, %v28610_v37 }
 0x71e   :  { %v3449_v62 = vmul.f32 %v27823_v60, %v28608_v33 }
 0x720   :  { %v27825_v0 = vpop.eup %27824  ;;  %v3453_v1 = vadd.f32 %v3450_v61, %v3449_v62 }
 0x721   :  { %v27827_v4 = vpop.eup %27826  ;;  %v3452_v8 = vmul.f32 %v27825_v0, %v28617_v50 }
 0x722   :  { %v3451_v6 = vmul.f32 %v27827_v4, %v28614_v48 }
 0x724   :  { %v3454_v9 = vadd.f32 %v3453_v1, %v3451_v6 }
 0x726   :  { %v3455_v11 = vadd.f32 %v3454_v9, %v3452_v8 }
 0x728   :  { %v3456_v21 = vrot.slane %v3455_v11, 4 }
 0x72a   :  { %v3457_v25 = vadd.f32 %v3456_v21, %v3455_v11 }
 0x72c   :  { %v3458_v26 = vrot.slane %v3457_v25, 2 }
 0x72e   :  { %v3459_v30 = vadd.f32 %v3458_v26, %v3457_v25 }
 0x730   :  { %v3460_v32 = vrot.slane %v3459_v30, 1 }
 0x732   :  { %v3461_v24 = vadd.f32 %v3460_v32, %v3459_v30 }
 0x734   :  { %27828 = vtanh.f32 %v3461_v24 }
 0x73e   :  { %v27829_v45 = vpop.eup %27828 }
 0x73f   :  { %v3463_v17 = vmul.f32 %v27829_v45, %v28629_v7 }
 0x741   :  { %v28839_v51 = vadd.f32 %v3463_v17, %v2816_v46 }
 0x743   :  { %v3465_v53 = vmul.f32 %v28839_v51, %v28837_v49 }
 0x745   :  { %v28844_v55 = vadd.f32 %v3465_v53, %v28786_v56 }
 0x747   :  { %3469 = vrot.lane.b32.xlu1 %v28844_v55, %s28400_s5  ;;  %v3479_v18 = vrot.slane %v28844_v55, %v28503_v20  ;;  %3467 = vrot.lane.b32.xlu0 %v28844_v55, %s28401_s12 }
 0x749   :  { %v3481_v29 = vmul.f32 %v3479_v18, %v28509_v23  ;;  %v3482_v38 = vmul.f32 %v3479_v18, %v28515_v28  ;;  %v3483_v40 = vmul.f32 %v3479_v18, %v28507_v22  ;;  %v3484_v57 = vmul.f32 %v3479_v18, %v28513_v27 }
 0x74b   :  { %27830 = vtanh.f32 %v3481_v29 }
 0x74c   :  { %27832 = vtanh.f32 %v3482_v38 }
 0x74d   :  { %27834 = vtanh.f32 %v3483_v40 }
 0x74e   :  { %27836 = vtanh.f32 %v3484_v57 }
 0x755   :  { %v27831_v58 = vpop.eup %27830 }
 0x756   :  { %v27833_v59 = vpop.eup %27832  ;;  %v3490_v60 = vand.u32 4294901760, %v27831_v58 }
 0x757   :  { %v27835_v61 = vpop.eup %27834  ;;  %v3493_v62 = vand.u32 4294901760, %v27833_v59 }
 0x758   :  { %v27837_v0 = vpop.eup %27836  ;;  %v3496_v1 = vand.u32 4294901760, %v27835_v61  ;;  %v3600_v4 = vsub.f32 %v27831_v58, %v3490_v60 }
 0x759   :  { %v25793_v6 = vpack.c.bf16 %v3493_v62, %v3490_v60  ;;  %v3499_v8 = vand.u32 4294901760, %v27837_v0  ;;  %v3607_v9 = vsub.f32 %v27833_v59, %v3493_v62 }
 0x75a   :  { %v3601_v11 = vand.u32 4294901760, %v3600_v4  ;;  %v3614_v21 = vsub.f32 %v27835_v61, %v3496_v1 }
 0x75b   :  { %25794 = vmatprep.subr.bf16.mxu1 %v25793_v6  ;;  %v25797_v25 = vpack.c.bf16 %v3499_v8, %v3496_v1  ;;  %v3608_v26 = vand.u32 4294901760, %v3607_v9  ;;  %v3621_v30 = vsub.f32 %v27837_v0, %v3499_v8  ;;  %v25809_v29 = vpack.c.bf16 %v3607_v9, %v3600_v4 }
 0x75c   :  { %25796 = vmatpush3.bf16.msra.mxu1 %v25793_v6  ;;  %v3602_v32 = vsub.f32 %v3600_v4, %v3601_v11  ;;  %v3615_v24 = vand.u32 4294901760, %v3614_v21 }
 0x75d   :  { %25798 = vmatprep.subr.bf16.mxu1 %v25797_v25  ;;  %v3609_v34 = vsub.f32 %v3607_v9, %v3608_v26  ;;  %v3622_v15 = vand.u32 4294901760, %v3621_v30  ;;  %v25813_v38 = vpack.c.bf16 %v3621_v30, %v3614_v21  ;;  %v25825_v40 = vpack.c.bf16 %v3608_v26, %v3601_v11 }
 0x75e   :  { %v3603_v41 = vand.u32 4294901760, %v3602_v32  ;;  %v3616_v31 = vsub.f32 %v3614_v21, %v3615_v24 }
 0x75f   :  { %v3610_v43 = vand.u32 4294901760, %v3609_v34  ;;  %v3623_v45 = vsub.f32 %v3621_v30, %v3622_v15  ;;  %v25829_v57 = vpack.c.bf16 %v3622_v15, %v3615_v24 }
 0x760   :  { %25800 = vmatpush3.bf16.msra.mxu1 %v25797_v25  ;;  %v3617_v46 = vand.u32 4294901760, %v3616_v31 }
 0x761   :  { %v25801_v17 = vpack.c.bf16 %v3610_v43, %v3603_v41  ;;  %v3624_v53 = vand.u32 4294901760, %v3623_v45 }
 0x763   :  { %23294 = vmatmul.mubr.f32.vlgmr.msra.gmra.mrb[8].mxu1 %v28565_v5  ;;  %25802 = vmatprep.subr.bf16.mxu1 %v25801_v17  ;;  %v25805_v18 = vpack.c.bf16 %v3624_v53, %v3617_v46 }
 0x764   :  { %25804 = vmatpush3.bf16.msra.mxu1 %v25801_v17  ;;  %23296 = vmatprep.mubr.f32.mxu1 %v28570_v10  ;;  %v3472_v17 = vmul.f32 %v28844_v55, %v28622_v2 }
 0x765   :  { %25806 = vmatprep.subr.bf16.mxu1 %v25805_v18 }
 0x767   :  { %23297 = vmatmul.mubr.f32.gmra.mrb[10].mxu1 %v28573_v19 }
 0x768   :  { %25808 = vmatpush3.bf16.msra.mxu1 %v25805_v18  ;;  %23307 = vmatprep.mubr.f32.mxu1 %v28483_v12 }
 0x769   :  { %25810 = vmatprep.subr.bf16.mxu1 %v25809_v29 }
 0x76b   :  { %23308 = vmatmul.mubr.f32.vlgmr.msra.gmra.mrb[8].mxu1 %v28521_v35 }
 0x76c   :  { %25812 = vmatpush3.bf16.msra.mxu1 %v25809_v29  ;;  %23310 = vmatprep.mubr.f32.mxu1 %v28523_v36 }
 0x76d   :  { %25814 = vmatprep.subr.bf16.mxu1 %v25813_v38 }
 0x76f   :  { %23311 = vmatmul.mubr.f32.gmra.mrb[10].mxu1 %v28529_v42 }
 0x770   :  { %25816 = vmatpush3.bf16.msra.mxu1 %v25813_v38  ;;  %23321 = vmatprep.mubr.f32.mxu1 %v28486_v13 }
 0x771   :  { %25818 = vmatprep.subr.bf16.mxu1 %v25793_v6 }
 0x773   :  { %23322 = vmatmul.mubr.f32.vlgmr.msra.gmra.mrb[8].mxu1 %v28527_v39 }
 0x774   :  { %25820 = vmatpush3.bf16.msra.mxu1 %v25793_v6  ;;  %23324 = vmatprep.mubr.f32.mxu1 %v28532_v44 }
 0x775   :  { %25822 = vmatprep.subr.bf16.mxu1 %v25797_v25 }
 0x777   :  { %23325 = vmatmul.mubr.f32.gmra.mrb[10].mxu1 %v28543_v52 }
 0x778   :  { %25824 = vmatpush3.bf16.msra.mxu1 %v25797_v25  ;;  %23335 = vmatprep.mubr.f32.mxu1 %v28489_v14 }
 0x779   :  { %25826 = vmatprep.subr.bf16.mxu1 %v25825_v40 }
 0x77b   :  { %23336 = vmatmul.mubr.f32.vlgmr.msra.gmra.mrb[8].mxu1 %v28537_v47 }
 0x77c   :  { %25828 = vmatpush3.bf16.msra.mxu1 %v25825_v40  ;;  %23338 = vmatprep.mubr.f32.mxu1 %v28546_v54 }
 0x77d   :  { %25830 = vmatprep.subr.bf16.mxu1 %v25829_v57 }
 0x77f   :  { %23339 = vmatmul.mubr.f32.gmra.mrb[10].mxu1 %v28558_v63 }
 0x780   :  { %25832 = vmatpush3.bf16.msra.mxu1 %v25829_v57  ;;  %23349 = vmatprep.mubr.f32.mxu1 %v28483_v12 }
 0x781   :  { %25834 = vmatprep.subr.bf16.mxu1 %v25793_v6 }
 0x783   :  { %23350 = vmatmul.mubr.f32.vlgmr.msra.gmra.mrb[8].mxu1 %v28521_v35 }
 0x784   :  { %25836 = vmatpush3.bf16.msra.mxu1 %v25793_v6  ;;  %23352 = vmatprep.mubr.f32.mxu1 %v28523_v36 }
 0x785   :  { %25838 = vmatprep.subr.bf16.mxu1 %v25797_v25 }
 0x787   :  { %23353 = vmatmul.mubr.f32.gmra.mrb[10].mxu1 %v28529_v42 }
 0x788   :  { %25840 = vmatpush3.bf16.msra.mxu1 %v25797_v25  ;;  %23363 = vmatprep.mubr.f32.mxu1 %v28483_v12 }
 0x78b   :  { %23364 = vmatmul.mubr.f32.vlgmr.msra.gmra.mrb[8].mxu1 %v28521_v35 }
 0x78c   :  { %23366 = vmatprep.mubr.f32.mxu1 %v28523_v36 }
 0x78f   :  { %23367 = vmatmul.mubr.f32.gmra.mrb[10].mxu1 %v28529_v42 }
 0x790   :  { %23461 = vmatprep.mubr.f32.mxu1 %v28493_v16 }
 0x7b9   :  { %v3470_v31 = vpop.permute.xlu1 %3469  ;;  %v3468_v43 = vpop.permute.xlu0 %3467 }
 0x7ba   :  { %v3471_v45 = vadd.f32 %v3470_v31, %v3468_v43 }
 0x7bc   :  { %v3473_v46 = vmul.f32 %v3471_v45, %v28624_v3 }
 0x7be   :  { %v3474_v18 = vadd.f32 %v3473_v46, %v3472_v17 }
 0x85e   :  { %v23365_v58 = vpop.f32.mrb[8].mxu1 }
 0x85f   :  { %27838 = vtanh.f32 %v23365_v58  ;;  %v4081_v59 = vpop.f32.mrb[9].mxu1 }
 0x860   :  { %27840 = vtanh.f32 %v4081_v59 }
 0x862   :  { %v23368_v60 = vpop.f32.mrb[10].mxu1 }
 0x863   :  { %27842 = vtanh.f32 %v23368_v60  ;;  %v4093_v61 = vpop.f32.mrb[11].mxu1 }
 0x864   :  { %27844 = vtanh.f32 %v4093_v61 }
 0x869   :  { %v27839_v62 = vpop.eup %27838 }
 0x86a   :  { %v27841_v0 = vpop.eup %27840  ;;  %v4108_v1 = vmul.f32 %v27839_v62, %v28610_v37 }
 0x86b   :  { %v4107_v4 = vmul.f32 %v27841_v0, %v28608_v33 }
 0x86d   :  { %v27843_v6 = vpop.eup %27842  ;;  %v4111_v8 = vadd.f32 %v4108_v1, %v4107_v4 }
 0x86e   :  { %v27845_v9 = vpop.eup %27844  ;;  %v4110_v21 = vmul.f32 %v27843_v6, %v28617_v50 }
 0x86f   :  { %v4109_v11 = vmul.f32 %v27845_v9, %v28614_v48 }
 0x871   :  { %v4112_v25 = vadd.f32 %v4111_v8, %v4109_v11 }
 0x873   :  { %v4113_v26 = vadd.f32 %v4112_v25, %v4110_v21 }
 0x875   :  { %v4114_v30 = vrot.slane %v4113_v26, 4 }
 0x877   :  { %v4115_v32 = vadd.f32 %v4114_v30, %v4113_v26 }
 0x879   :  { %v4116_v24 = vrot.slane %v4115_v32, 2 }
 0x87b   :  { %v4117_v34 = vadd.f32 %v4116_v24, %v4115_v32 }
 0x87d   :  { %v4118_v15 = vrot.slane %v4117_v34, 1 }
 0x87f   :  { %v4119_v41 = vadd.f32 %v4118_v15, %v4117_v34 }
 0x881   :  { %27846 = vtanh.f32 %v4119_v41 }
 0x88b   :  { %v27847_v53 = vpop.eup %27846 }
 0x88c   :  { %v4121_v29 = vmul.f32 %v27847_v53, %v28629_v7 }
 0x88e   :  { %v28888_v38 = vadd.f32 %v4121_v29, %v3474_v18 }
 0x890   :  { %v4123_v40 = vmul.f32 %v28888_v38, %v28837_v49 }
 0x892   :  { %v28893_v57 = vadd.f32 %v4123_v40, %v28786_v56 }
 0x894   :  { %4127 = vrot.lane.b32.xlu1 %v28893_v57, %s28400_s5  ;;  %v4137_v58 = vrot.slane %v28893_v57, %v28503_v20  ;;  %4125 = vrot.lane.b32.xlu0 %v28893_v57, %s28401_s12 }
 0x896   :  { %v4139_v55 = vmul.f32 %v4137_v58, %v28509_v23  ;;  %v4140_v59 = vmul.f32 %v4137_v58, %v28515_v28  ;;  %v4141_v60 = vmul.f32 %v4137_v58, %v28507_v22  ;;  %v4142_v49 = vmul.f32 %v4137_v58, %v28513_v27 }
 0x898   :  { %27848 = vtanh.f32 %v4139_v55 }
 0x899   :  { %27850 = vtanh.f32 %v4140_v59 }
 0x89a   :  { %27852 = vtanh.f32 %v4141_v60 }
 0x89b   :  { %27854 = vtanh.f32 %v4142_v49 }
 0x8a2   :  { %v27849_v61 = vpop.eup %27848 }
 0x8a3   :  { %v27851_v62 = vpop.eup %27850  ;;  %v4148_v0 = vand.u32 4294901760, %v27849_v61 }
 0x8a4   :  { %v27853_v1 = vpop.eup %27852  ;;  %v4151_v4 = vand.u32 4294901760, %v27851_v62 }
 0x8a5   :  { %v27855_v6 = vpop.eup %27854  ;;  %v4154_v8 = vand.u32 4294901760, %v27853_v1  ;;  %v4258_v9 = vsub.f32 %v27849_v61, %v4148_v0 }
 0x8a6   :  { %v25841_v11 = vpack.c.bf16 %v4151_v4, %v4148_v0  ;;  %v4157_v21 = vand.u32 4294901760, %v27855_v6  ;;  %v4265_v25 = vsub.f32 %v27851_v62, %v4151_v4 }
 0x8a7   :  { %v4259_v26 = vand.u32 4294901760, %v4258_v9  ;;  %v4272_v30 = vsub.f32 %v27853_v1, %v4154_v8 }
 0x8a8   :  { %25842 = vmatprep.subr.bf16.mxu0 %v25841_v11  ;;  %v25845_v32 = vpack.c.bf16 %v4157_v21, %v4154_v8  ;;  %v4266_v24 = vand.u32 4294901760, %v4265_v25  ;;  %v4279_v34 = vsub.f32 %v27855_v6, %v4157_v21  ;;  %v25857_v55 = vpack.c.bf16 %v4265_v25, %v4258_v9 }
 0x8a9   :  { %25844 = vmatpush3.bf16.msra.mxu0 %v25841_v11  ;;  %v4260_v15 = vsub.f32 %v4258_v9, %v4259_v26  ;;  %v4273_v41 = vand.u32 4294901760, %v4272_v30 }
 0x8aa   :  { %25846 = vmatprep.subr.bf16.mxu0 %v25845_v32  ;;  %v4267_v31 = vsub.f32 %v4265_v25, %v4266_v24  ;;  %v4280_v43 = vand.u32 4294901760, %v4279_v34  ;;  %v25861_v59 = vpack.c.bf16 %v4279_v34, %v4272_v30  ;;  %v25873_v60 = vpack.c.bf16 %v4266_v24, %v4259_v26 }
 0x8ab   :  { %v4261_v45 = vand.u32 4294901760, %v4260_v15  ;;  %v4274_v46 = vsub.f32 %v4272_v30, %v4273_v41 }
 0x8ac   :  { %v4268_v17 = vand.u32 4294901760, %v4267_v31  ;;  %v4281_v53 = vsub.f32 %v4279_v34, %v4280_v43  ;;  %v25877_v49 = vpack.c.bf16 %v4280_v43, %v4273_v41 }
 0x8ad   :  { %25848 = vmatpush3.bf16.msra.mxu0 %v25845_v32  ;;  %v4275_v18 = vand.u32 4294901760, %v4274_v46 }
 0x8ae   :  { %v25849_v29 = vpack.c.bf16 %v4268_v17, %v4261_v45  ;;  %v4282_v40 = vand.u32 4294901760, %v4281_v53 }
 0x8b0   :  { %23378 = vmatmul.mubr.f32.vlgmr.msra.gmra.mrb[12].mxu0 %v28565_v5  ;;  %25850 = vmatprep.subr.bf16.mxu0 %v25849_v29  ;;  %v25853_v58 = vpack.c.bf16 %v4282_v40, %v4275_v18 }
 0x8b1   :  { %25852 = vmatpush3.bf16.msra.mxu0 %v25849_v29  ;;  %23380 = vmatprep.mubr.f32.mxu0 %v28570_v10  ;;  %v4130_v29 = vmul.f32 %v28893_v57, %v28622_v2 }
 0x8b2   :  { %25854 = vmatprep.subr.bf16.mxu0 %v25853_v58 }
 0x8b4   :  { %23381 = vmatmul.mubr.f32.gmra.mrb[14].mxu0 %v28573_v19 }
 0x8b5   :  { %25856 = vmatpush3.bf16.msra.mxu0 %v25853_v58  ;;  %23391 = vmatprep.mubr.f32.mxu0 %v28483_v12 }
 0x8b6   :  { %25858 = vmatprep.subr.bf16.mxu0 %v25857_v55 }
 0x8b8   :  { %23392 = vmatmul.mubr.f32.vlgmr.msra.gmra.mrb[12].mxu0 %v28521_v35 }
 0x8b9   :  { %25860 = vmatpush3.bf16.msra.mxu0 %v25857_v55  ;;  %23394 = vmatprep.mubr.f32.mxu0 %v28523_v36 }
 0x8ba   :  { %25862 = vmatprep.subr.bf16.mxu0 %v25861_v59 }
 0x8bc   :  { %23395 = vmatmul.mubr.f32.gmra.mrb[14].mxu0 %v28529_v42 }
 0x8bd   :  { %25864 = vmatpush3.bf16.msra.mxu0 %v25861_v59  ;;  %23405 = vmatprep.mubr.f32.mxu0 %v28486_v13  ;;  %v2804_v59 = vstv %s28830_s25 }
 0x8be   :  { %25866 = vmatprep.subr.bf16.mxu0 %v25841_v11 }
 0x8c0   :  { %23406 = vmatmul.mubr.f32.vlgmr.msra.gmra.mrb[12].mxu0 %v28527_v39 }
 0x8c1   :  { %25868 = vmatpush3.bf16.msra.mxu0 %v25841_v11  ;;  %23408 = vmatprep.mubr.f32.mxu0 %v28532_v44 }
 0x8c2   :  { %25870 = vmatprep.subr.bf16.mxu0 %v25845_v32 }
 0x8c4   :  { %23409 = vmatmul.mubr.f32.gmra.mrb[14].mxu0 %v28543_v52 }
 0x8c5   :  { %25872 = vmatpush3.bf16.msra.mxu0 %v25845_v32  ;;  %23419 = vmatprep.mubr.f32.mxu0 %v28489_v14 }
 0x8c6   :  { %25874 = vmatprep.subr.bf16.mxu0 %v25873_v60 }
 0x8c8   :  { %23420 = vmatmul.mubr.f32.vlgmr.msra.gmra.mrb[12].mxu0 %v28537_v47 }
 0x8c9   :  { %25876 = vmatpush3.bf16.msra.mxu0 %v25873_v60  ;;  %23422 = vmatprep.mubr.f32.mxu0 %v28546_v54 }
 0x8ca   :  { %25878 = vmatprep.subr.bf16.mxu0 %v25877_v49 }
 0x8cc   :  { %23423 = vmatmul.mubr.f32.gmra.mrb[14].mxu0 %v28558_v63 }
 0x8cd   :  { %25880 = vmatpush3.bf16.msra.mxu0 %v25877_v49  ;;  %23433 = vmatprep.mubr.f32.mxu0 %v28483_v12 }
 0x8ce   :  { %25882 = vmatprep.subr.bf16.mxu0 %v25841_v11 }
 0x8d0   :  { %23434 = vmatmul.mubr.f32.vlgmr.msra.gmra.mrb[12].mxu0 %v28521_v35 }
 0x8d1   :  { %25884 = vmatpush3.bf16.msra.mxu0 %v25841_v11  ;;  %23436 = vmatprep.mubr.f32.mxu0 %v28523_v36 }
 0x8d2   :  { %25886 = vmatprep.subr.bf16.mxu0 %v25845_v32 }
 0x8d4   :  { %23437 = vmatmul.mubr.f32.gmra.mrb[14].mxu0 %v28529_v42 }
 0x8d5   :  { %25888 = vmatpush3.bf16.msra.mxu0 %v25845_v32  ;;  %23447 = vmatprep.mubr.f32.mxu0 %v28483_v12 }
 0x8d8   :  { %23448 = vmatmul.mubr.f32.vlgmr.msra.gmra.mrb[12].mxu0 %v28521_v35 }
 0x8d9   :  { %23450 = vmatprep.mubr.f32.mxu0 %v28523_v36 }
 0x8dc   :  { %23451 = vmatmul.mubr.f32.gmra.mrb[14].mxu0 %v28529_v42 }
 0x8dd   :  { %23545 = vmatprep.mubr.f32.mxu0 %v28493_v16 }
 0x906   :  { %v4128_v46 = vpop.permute.xlu1 %4127  ;;  %v4126_v17 = vpop.permute.xlu0 %4125 }
 0x907   :  { %v4129_v53 = vadd.f32 %v4128_v46, %v4126_v17 }
 0x909   :  { %v4131_v18 = vmul.f32 %v4129_v53, %v28624_v3 }
 0x90b   :  { %v4132_v58 = vadd.f32 %v4131_v18, %v4130_v29 }
 0x9ab   :  { %v23449_v61 = vpop.f32.mrb[12].mxu0 }
 0x9ac   :  { %27856 = vtanh.f32 %v23449_v61  ;;  %v4739_v62 = vpop.f32.mrb[13].mxu0 }
 0x9ad   :  { %27858 = vtanh.f32 %v4739_v62 }
 0x9af   :  { %v23452_v0 = vpop.f32.mrb[14].mxu0 }
 0x9b0   :  { %27860 = vtanh.f32 %v23452_v0  ;;  %v4751_v1 = vpop.f32.mrb[15].mxu0 }
 0x9b1   :  { %27862 = vtanh.f32 %v4751_v1 }
 0x9b6   :  { %v27857_v4 = vpop.eup %27856 }
 0x9b7   :  { %v27859_v6 = vpop.eup %27858  ;;  %v4766_v8 = vmul.f32 %v27857_v4, %v28610_v37 }
 0x9b8   :  { %v4765_v9 = vmul.f32 %v27859_v6, %v28608_v33 }
 0x9ba   :  { %v27861_v11 = vpop.eup %27860  ;;  %v4769_v21 = vadd.f32 %v4766_v8, %v4765_v9 }
 0x9bb   :  { %v27863_v25 = vpop.eup %27862  ;;  %v4768_v30 = vmul.f32 %v27861_v11, %v28617_v50 }
 0x9bc   :  { %v4767_v26 = vmul.f32 %v27863_v25, %v28614_v48 }
 0x9be   :  { %v4770_v32 = vadd.f32 %v4769_v21, %v4767_v26 }
 0x9c0   :  { %v4771_v24 = vadd.f32 %v4770_v32, %v4768_v30 }
 0x9c2   :  { %v4772_v34 = vrot.slane %v4771_v24, 4 }
 0x9c4   :  { %v4773_v15 = vadd.f32 %v4772_v34, %v4771_v24 }
 0x9c6   :  { %v4774_v41 = vrot.slane %v4773_v15, 2 }
 0x9c8   :  { %v4775_v31 = vadd.f32 %v4774_v41, %v4773_v15 }
 0x9ca   :  { %v4776_v43 = vrot.slane %v4775_v31, 1 }
 0x9cc   :  { %v4777_v45 = vadd.f32 %v4776_v43, %v4775_v31 }
 0x9ce   :  { %27864 = vtanh.f32 %v4777_v45 }
 0x9d8   :  { %v27865_v40 = vpop.eup %27864 }
 0x9d9   :  { %v4779_v55 = vmul.f32 %v27865_v40, %v28629_v7 }
 0x9db   :  { %v28938_v60 = vadd.f32 %v4779_v55, %v4132_v58 }
 0x9dd   :  { %v4781_v49 = vmul.f32 %v28938_v60, %v2804_v59 }
 0x9df   :  { %v28942_v61 = vadd.f32 %v4781_v49, %v28786_v56 }
 0x9e1   :  { %4785 = vrot.lane.b32.xlu1 %v28942_v61, %s28400_s5  ;;  %v4795_v62 = vrot.slane %v28942_v61, %v28503_v20  ;;  %4783 = vrot.lane.b32.xlu0 %v28942_v61, %s28401_s12 }
 0x9e3   :  { %v4797_v57 = vmul.f32 %v4795_v62, %v28509_v23  ;;  %v4798_v0 = vmul.f32 %v4795_v62, %v28515_v28  ;;  %v4799_v1 = vmul.f32 %v4795_v62, %v28507_v22  ;;  %v4800_v4 = vmul.f32 %v4795_v62, %v28513_v27 }
 0x9e5   :  { %27866 = vtanh.f32 %v4797_v57 }
 0x9e6   :  { %27868 = vtanh.f32 %v4798_v0 }
 0x9e7   :  { %27870 = vtanh.f32 %v4799_v1 }
 0x9e8   :  { %27872 = vtanh.f32 %v4800_v4 }
 0x9ef   :  { %v27867_v6 = vpop.eup %27866 }
 0x9f0   :  { %v27869_v8 = vpop.eup %27868  ;;  %v4806_v9 = vand.u32 4294901760, %v27867_v6 }
 0x9f1   :  { %v27871_v11 = vpop.eup %27870  ;;  %v4809_v21 = vand.u32 4294901760, %v27869_v8 }
 0x9f2   :  { %v27873_v25 = vpop.eup %27872  ;;  %v4812_v26 = vand.u32 4294901760, %v27871_v11  ;;  %v4916_v30 = vsub.f32 %v27867_v6, %v4806_v9 }
 0x9f3   :  { %v25889_v32 = vpack.c.bf16 %v4809_v21, %v4806_v9  ;;  %v4815_v24 = vand.u32 4294901760, %v27873_v25  ;;  %v4923_v34 = vsub.f32 %v27869_v8, %v4809_v21 }
 0x9f4   :  { %v4917_v15 = vand.u32 4294901760, %v4916_v30  ;;  %v4930_v41 = vsub.f32 %v27871_v11, %v4812_v26 }
 0x9f5   :  { %25890 = vmatprep.subr.bf16.mxu1 %v25889_v32  ;;  %v25893_v31 = vpack.c.bf16 %v4815_v24, %v4812_v26  ;;  %v4924_v43 = vand.u32 4294901760, %v4923_v34  ;;  %v4937_v45 = vsub.f32 %v27873_v25, %v4815_v24  ;;  %v25905_v0 = vpack.c.bf16 %v4923_v34, %v4916_v30 }
 0x9f6   :  { %25892 = vmatpush3.bf16.msra.mxu1 %v25889_v32  ;;  %v4918_v46 = vsub.f32 %v4916_v30, %v4917_v15  ;;  %v4931_v17 = vand.u32 4294901760, %v4930_v41 }
 0x9f7   :  { %25894 = vmatprep.subr.bf16.mxu1 %v25893_v31  ;;  %v4925_v53 = vsub.f32 %v4923_v34, %v4924_v43  ;;  %v4938_v18 = vand.u32 4294901760, %v4937_v45  ;;  %v25909_v1 = vpack.c.bf16 %v4937_v45, %v4930_v41  ;;  %v25921_v4 = vpack.c.bf16 %v4924_v43, %v4917_v15 }
 0x9f8   :  { %v4919_v29 = vand.u32 4294901760, %v4918_v46  ;;  %v4932_v40 = vsub.f32 %v4930_v41, %v4931_v17 }
 0x9f9   :  { %v4926_v58 = vand.u32 4294901760, %v4925_v53  ;;  %v4939_v55 = vsub.f32 %v4937_v45, %v4938_v18  ;;  %v25925_v6 = vpack.c.bf16 %v4938_v18, %v4931_v17 }
 0x9fa   :  { %25896 = vmatpush3.bf16.msra.mxu1 %v25893_v31  ;;  %v4933_v59 = vand.u32 4294901760, %v4932_v40 }
 0x9fb   :  { %v25897_v49 = vpack.c.bf16 %v4926_v58, %v4919_v29  ;;  %v4940_v62 = vand.u32 4294901760, %v4939_v55 }
 0x9fd   :  { %23462 = vmatmul.mubr.f32.vlgmr.msra.gmra.mrb[12].mxu1 %v28565_v5  ;;  %25898 = vmatprep.subr.bf16.mxu1 %v25897_v49  ;;  %v25901_v57 = vpack.c.bf16 %v4940_v62, %v4933_v59 }
 0x9fe   :  { %25900 = vmatpush3.bf16.msra.mxu1 %v25897_v49  ;;  %23464 = vmatprep.mubr.f32.mxu1 %v28570_v10  ;;  %v5439_v49 = vadd.f32 %v28938_v60, %v28888_v38 }
 0x9ff   :  { %25902 = vmatprep.subr.bf16.mxu1 %v25901_v57 }
 0xa01   :  { %23465 = vmatmul.mubr.f32.gmra.mrb[14].mxu1 %v28573_v19 }
 0xa02   :  { %25904 = vmatpush3.bf16.msra.mxu1 %v25901_v57  ;;  %23475 = vmatprep.mubr.f32.mxu1 %v28483_v12  ;;  %v5440_v57 = vmul.f32 2.0, %v5439_v49 }
 0xa03   :  { %25906 = vmatprep.subr.bf16.mxu1 %v25905_v0 }
 0xa05   :  { %23476 = vmatmul.mubr.f32.vlgmr.msra.gmra.mrb[12].mxu1 %v28521_v35 }
 0xa06   :  { %25908 = vmatpush3.bf16.msra.mxu1 %v25905_v0  ;;  %23478 = vmatprep.mubr.f32.mxu1 %v28523_v36  ;;  %v4788_v0 = vmul.f32 %v28942_v61, %v28622_v2 }
 0xa07   :  { %25910 = vmatprep.subr.bf16.mxu1 %v25909_v1 }
 0xa09   :  { %23479 = vmatmul.mubr.f32.gmra.mrb[14].mxu1 %v28529_v42 }
 0xa0a   :  { %25912 = vmatpush3.bf16.msra.mxu1 %v25909_v1  ;;  %23489 = vmatprep.mubr.f32.mxu1 %v28486_v13 }
 0xa0b   :  { %25914 = vmatprep.subr.bf16.mxu1 %v25889_v32 }
 0xa0d   :  { %23490 = vmatmul.mubr.f32.vlgmr.msra.gmra.mrb[12].mxu1 %v28527_v39 }
 0xa0e   :  { %25916 = vmatpush3.bf16.msra.mxu1 %v25889_v32  ;;  %23492 = vmatprep.mubr.f32.mxu1 %v28532_v44 }
 0xa0f   :  { %25918 = vmatprep.subr.bf16.mxu1 %v25893_v31 }
 0xa11   :  { %23493 = vmatmul.mubr.f32.gmra.mrb[14].mxu1 %v28543_v52 }
 0xa12   :  { %25920 = vmatpush3.bf16.msra.mxu1 %v25893_v31  ;;  %23503 = vmatprep.mubr.f32.mxu1 %v28489_v14 }
 0xa13   :  { %25922 = vmatprep.subr.bf16.mxu1 %v25921_v4 }
 0xa15   :  { %23504 = vmatmul.mubr.f32.vlgmr.msra.gmra.mrb[12].mxu1 %v28537_v47 }
 0xa16   :  { %25924 = vmatpush3.bf16.msra.mxu1 %v25921_v4  ;;  %23506 = vmatprep.mubr.f32.mxu1 %v28546_v54 }
 0xa17   :  { %25926 = vmatprep.subr.bf16.mxu1 %v25925_v6 }
 0xa19   :  { %23507 = vmatmul.mubr.f32.gmra.mrb[14].mxu1 %v28558_v63 }
 0xa1a   :  { %25928 = vmatpush3.bf16.msra.mxu1 %v25925_v6  ;;  %23517 = vmatprep.mubr.f32.mxu1 %v28483_v12 }
 0xa1b   :  { %25930 = vmatprep.subr.bf16.mxu1 %v25889_v32 }
 0xa1d   :  { %23518 = vmatmul.mubr.f32.vlgmr.msra.gmra.mrb[12].mxu1 %v28521_v35 }
 0xa1e   :  { %25932 = vmatpush3.bf16.msra.mxu1 %v25889_v32  ;;  %23520 = vmatprep.mubr.f32.mxu1 %v28523_v36 }
 0xa1f   :  { %25934 = vmatprep.subr.bf16.mxu1 %v25893_v31 }
 0xa21   :  { %23521 = vmatmul.mubr.f32.gmra.mrb[14].mxu1 %v28529_v42 }
 0xa22   :  { %25936 = vmatpush3.bf16.msra.mxu1 %v25893_v31  ;;  %23531 = vmatprep.mubr.f32.mxu1 %v28483_v12 }
 0xa25   :  { %23532 = vmatmul.mubr.f32.vlgmr.msra.gmra.mrb[12].mxu1 %v28521_v35 }
 0xa26   :  { %23534 = vmatprep.mubr.f32.mxu1 %v28523_v36 }
 0xa29   :  { %23535 = vmatmul.mubr.f32.gmra.mrb[14].mxu1 %v28529_v42 }
 0xa2a   :  { %23629 = vmatprep.mubr.f32.mxu1 %v28493_v16 }
 0xa53   :  { %v4786_v58 = vpop.permute.xlu1 %4785  ;;  %v4784_v55 = vpop.permute.xlu0 %4783 }
 0xa54   :  { %v4787_v59 = vadd.f32 %v4786_v58, %v4784_v55 }
 0xa56   :  { %v4789_v62 = vmul.f32 %v4787_v59, %v28624_v3 }
 0xa58   :  { %v4790_v4 = vadd.f32 %v4789_v62, %v4788_v0 }
 0xaf8   :  { %v23533_v8 = vpop.f32.mrb[12].mxu1 }
 0xaf9   :  { %27874 = vtanh.f32 %v23533_v8  ;;  %v5397_v9 = vpop.f32.mrb[13].mxu1  ;;  %v5441_v8 = vadd.f32 %v5440_v57, %v28839_v51 }
 0xafa   :  { %27876 = vtanh.f32 %v5397_v9 }
 0xafc   :  { %v23536_v11 = vpop.f32.mrb[14].mxu1 }
 0xafd   :  { %27878 = vtanh.f32 %v23536_v11  ;;  %v5409_v21 = vpop.f32.mrb[15].mxu1  ;;  %v2808_v11 = vstv %s2807_s27  ;;  %s30060_s27 = sld [smem:[#allocation6 + $0x7]] }
 0xafe   :  { %27880 = vtanh.f32 %v5409_v21 }
 0xb03   :  { %v27875_v25 = vpop.eup %27874  ;;  %s18669_s28 = smul.f32 0.5, %s30060_s27 }
 0xb04   :  { %v27877_v26 = vpop.eup %27876  ;;  %v5424_v30 = vmul.f32 %v27875_v25, %v28610_v37 }
 0xb05   :  { %v5423_v32 = vmul.f32 %v27877_v26, %v28608_v33 }
 0xb07   :  { %v27879_v24 = vpop.eup %27878  ;;  %v5427_v34 = vadd.f32 %v5424_v30, %v5423_v32 }
 0xb08   :  { %v27881_v15 = vpop.eup %27880  ;;  %v5426_v31 = vmul.f32 %v27879_v24, %v28617_v50 }
 0xb09   :  { %v5425_v41 = vmul.f32 %v27881_v15, %v28614_v48 }
 0xb0b   :  { %v5428_v43 = vadd.f32 %v5427_v34, %v5425_v41 }
 0xb0d   :  { %v5429_v45 = vadd.f32 %v5428_v43, %v5426_v31 }
 0xb0f   :  { %v5430_v46 = vrot.slane %v5429_v45, 4 }
 0xb11   :  { %v5431_v17 = vadd.f32 %v5430_v46, %v5429_v45 }
 0xb13   :  { %v5432_v53 = vrot.slane %v5431_v17, 2 }
 0xb15   :  { %v5433_v18 = vadd.f32 %v5432_v53, %v5431_v17 }
 0xb17   :  { %v5434_v29 = vrot.slane %v5433_v18, 1 }
 0xb19   :  { %v5435_v40 = vadd.f32 %v5434_v29, %v5433_v18 }
 0xb1b   :  { %27882 = vtanh.f32 %v5435_v40 }
 0xb25   :  { %v27883_v1 = vpop.eup %27882 }
 0xb26   :  { %v5437_v6 = vmul.f32 %v27883_v1, %v28629_v7 }
 0xb28   :  { %v5438_v9 = vadd.f32 %v5437_v6, %v4790_v4 }
 0xb2a   :  { %v5442_v21 = vadd.f32 %v5441_v8, %v5438_v9 }
 0xb2c   :  { %v5443_v25 = vmul.f32 %v5442_v21, %v2808_v11 }
 0xb2e   :  { %v28991_v26 = vadd.f32 %v5443_v25, %v28786_v56 }
 0xb30   :  { %5455 = vrot.lane.b32.xlu1 %v28991_v26, %s28400_s5  ;;  %5445 = vst [vmem:[%s30228_s6 + $0x1] sm:$0x1] %v28991_v26  ;;  %5453 = vrot.lane.b32.xlu0 %v28991_v26, %s28401_s12  ;;  %v5465_v51 = vrot.slane %v28991_v26, %v28503_v20 }
 0xb32   :  { %v5467_v38 = vmul.f32 %v5465_v51, %v28509_v23  ;;  %v5468_v60 = vmul.f32 %v5465_v51, %v28515_v28  ;;  %v5469_v56 = vmul.f32 %v5465_v51, %v28507_v22  ;;  %v5470_v61 = vmul.f32 %v5465_v51, %v28513_v27 }
 0xb34   :  { %27884 = vtanh.f32 %v5467_v38 }
 0xb35   :  { %27886 = vtanh.f32 %v5468_v60 }
 0xb36   :  { %27888 = vtanh.f32 %v5469_v56 }
 0xb37   :  { %27890 = vtanh.f32 %v5470_v61 }
 0xb3e   :  { %v27885_v30 = vpop.eup %27884 }
 0xb3f   :  { %v27887_v32 = vpop.eup %27886  ;;  %v5476_v24 = vand.u32 4294901760, %v27885_v30 }
 0xb40   :  { %v27889_v34 = vpop.eup %27888  ;;  %v5479_v15 = vand.u32 4294901760, %v27887_v32 }
 0xb41   :  { %v27891_v41 = vpop.eup %27890  ;;  %v5482_v31 = vand.u32 4294901760, %v27889_v34  ;;  %v5586_v43 = vsub.f32 %v27885_v30, %v5476_v24 }
 0xb42   :  { %v25937_v45 = vpack.c.bf16 %v5479_v15, %v5476_v24  ;;  %v5485_v46 = vand.u32 4294901760, %v27891_v41  ;;  %v5593_v17 = vsub.f32 %v27887_v32, %v5479_v15 }
 0xb43   :  { %v5587_v53 = vand.u32 4294901760, %v5586_v43  ;;  %v5600_v18 = vsub.f32 %v27889_v34, %v5482_v31 }
 0xb44   :  { %25938 = vmatprep.subr.bf16.mxu0 %v25937_v45  ;;  %v25941_v29 = vpack.c.bf16 %v5485_v46, %v5482_v31  ;;  %v5594_v40 = vand.u32 4294901760, %v5593_v17  ;;  %v5607_v58 = vsub.f32 %v27891_v41, %v5485_v46  ;;  %v25953_v21 = vpack.c.bf16 %v5593_v17, %v5586_v43 }
 0xb45   :  { %25940 = vmatpush3.bf16.msra.mxu0 %v25937_v45  ;;  %v5588_v55 = vsub.f32 %v5586_v43, %v5587_v53  ;;  %v5601_v59 = vand.u32 4294901760, %v5600_v18 }
 0xb46   :  { %25942 = vmatprep.subr.bf16.mxu0 %v25941_v29  ;;  %v5595_v49 = vsub.f32 %v5593_v17, %v5594_v40  ;;  %v5608_v62 = vand.u32 4294901760, %v5607_v58  ;;  %v25957_v25 = vpack.c.bf16 %v5607_v58, %v5600_v18  ;;  %v25969_v51 = vpack.c.bf16 %v5594_v40, %v5587_v53 }
 0xb47   :  { %v5589_v57 = vand.u32 4294901760, %v5588_v55  ;;  %v5602_v0 = vsub.f32 %v5600_v18, %v5601_v59 }
 0xb48   :  { %v5596_v1 = vand.u32 4294901760, %v5595_v49  ;;  %v5609_v4 = vsub.f32 %v5607_v58, %v5608_v62  ;;  %v25973_v38 = vpack.c.bf16 %v5608_v62, %v5601_v59 }
 0xb49   :  { %25944 = vmatpush3.bf16.msra.mxu0 %v25941_v29  ;;  %v5603_v6 = vand.u32 4294901760, %v5602_v0 }
 0xb4a   :  { %v25945_v8 = vpack.c.bf16 %v5596_v1, %v5589_v57  ;;  %v5610_v9 = vand.u32 4294901760, %v5609_v4  ;;  %v5458_v1 = vmul.f32 %v28991_v26, %v28622_v2 }
 0xb4c   :  { %23546 = vmatmul.mubr.f32.vlgmr.msra.gmra.mrb[16].mxu0 %v28565_v5  ;;  %25946 = vmatprep.subr.bf16.mxu0 %v25945_v8  ;;  %v25949_v11 = vpack.c.bf16 %v5610_v9, %v5603_v6  ;;  %v29042_v9 = vstv %s5449_s0 }
 0xb4d   :  { %25948 = vmatpush3.bf16.msra.mxu0 %v25945_v8  ;;  %23548 = vmatprep.mubr.f32.mxu0 %v28570_v10 }
 0xb4e   :  { %25950 = vmatprep.subr.bf16.mxu0 %v25949_v11 }
 0xb50   :  { %23549 = vmatmul.mubr.f32.gmra.mrb[18].mxu0 %v28573_v19 }
 0xb51   :  { %25952 = vmatpush3.bf16.msra.mxu0 %v25949_v11  ;;  %23559 = vmatprep.mubr.f32.mxu0 %v28483_v12 }
 0xb52   :  { %25954 = vmatprep.subr.bf16.mxu0 %v25953_v21 }
 0xb54   :  { %23560 = vmatmul.mubr.f32.vlgmr.msra.gmra.mrb[16].mxu0 %v28521_v35 }
 0xb55   :  { %25956 = vmatpush3.bf16.msra.mxu0 %v25953_v21  ;;  %23562 = vmatprep.mubr.f32.mxu0 %v28523_v36 }
 0xb56   :  { %25958 = vmatprep.subr.bf16.mxu0 %v25957_v25 }
 0xb58   :  { %23563 = vmatmul.mubr.f32.gmra.mrb[18].mxu0 %v28529_v42 }
 0xb59   :  { %25960 = vmatpush3.bf16.msra.mxu0 %v25957_v25  ;;  %23573 = vmatprep.mubr.f32.mxu0 %v28486_v13 }
 0xb5a   :  { %25962 = vmatprep.subr.bf16.mxu0 %v25937_v45 }
 0xb5c   :  { %23574 = vmatmul.mubr.f32.vlgmr.msra.gmra.mrb[16].mxu0 %v28527_v39 }
 0xb5d   :  { %25964 = vmatpush3.bf16.msra.mxu0 %v25937_v45  ;;  %23576 = vmatprep.mubr.f32.mxu0 %v28532_v44 }
 0xb5e   :  { %25966 = vmatprep.subr.bf16.mxu0 %v25941_v29 }
 0xb60   :  { %23577 = vmatmul.mubr.f32.gmra.mrb[18].mxu0 %v28543_v52 }
 0xb61   :  { %25968 = vmatpush3.bf16.msra.mxu0 %v25941_v29  ;;  %23587 = vmatprep.mubr.f32.mxu0 %v28489_v14 }
 0xb62   :  { %25970 = vmatprep.subr.bf16.mxu0 %v25969_v51 }
 0xb64   :  { %23588 = vmatmul.mubr.f32.vlgmr.msra.gmra.mrb[16].mxu0 %v28537_v47 }
 0xb65   :  { %25972 = vmatpush3.bf16.msra.mxu0 %v25969_v51  ;;  %23590 = vmatprep.mubr.f32.mxu0 %v28546_v54 }
 0xb66   :  { %25974 = vmatprep.subr.bf16.mxu0 %v25973_v38 }
 0xb68   :  { %23591 = vmatmul.mubr.f32.gmra.mrb[18].mxu0 %v28558_v63 }
 0xb69   :  { %25976 = vmatpush3.bf16.msra.mxu0 %v25973_v38  ;;  %23601 = vmatprep.mubr.f32.mxu0 %v28483_v12 }
 0xb6a   :  { %25978 = vmatprep.subr.bf16.mxu0 %v25937_v45 }
 0xb6c   :  { %23602 = vmatmul.mubr.f32.vlgmr.msra.gmra.mrb[16].mxu0 %v28521_v35 }
 0xb6d   :  { %25980 = vmatpush3.bf16.msra.mxu0 %v25937_v45  ;;  %23604 = vmatprep.mubr.f32.mxu0 %v28523_v36 }
 0xb6e   :  { %25982 = vmatprep.subr.bf16.mxu0 %v25941_v29 }
 0xb70   :  { %23605 = vmatmul.mubr.f32.gmra.mrb[18].mxu0 %v28529_v42 }
 0xb71   :  { %25984 = vmatpush3.bf16.msra.mxu0 %v25941_v29  ;;  %23615 = vmatprep.mubr.f32.mxu0 %v28483_v12 }
 0xb74   :  { %23616 = vmatmul.mubr.f32.vlgmr.msra.gmra.mrb[16].mxu0 %v28521_v35 }
 0xb75   :  { %23618 = vmatprep.mubr.f32.mxu0 %v28523_v36 }
 0xb78   :  { %23619 = vmatmul.mubr.f32.gmra.mrb[18].mxu0 %v28529_v42 }
 0xb79   :  { %23713 = vmatprep.mubr.f32.mxu0 %v28493_v16 }
 0xba2   :  { %v5456_v49 = vpop.permute.xlu1 %5455  ;;  %v5454_v62 = vpop.permute.xlu0 %5453 }
 0xba3   :  { %v5457_v57 = vadd.f32 %v5456_v49, %v5454_v62 }
 0xba5   :  { %v5459_v0 = vmul.f32 %v5457_v57, %v28624_v3 }
 0xba7   :  { %v5460_v6 = vadd.f32 %v5459_v0, %v5458_v1 }
 0xc47   :  { %v23617_v60 = vpop.f32.mrb[16].mxu0 }
 0xc48   :  { %27892 = vtanh.f32 %v23617_v60  ;;  %v6067_v56 = vpop.f32.mrb[17].mxu0 }
 0xc49   :  { %27894 = vtanh.f32 %v6067_v56 }
 0xc4b   :  { %v23620_v61 = vpop.f32.mrb[18].mxu0 }
 0xc4c   :  { %27896 = vtanh.f32 %v23620_v61  ;;  %v6079_v30 = vpop.f32.mrb[19].mxu0 }
 0xc4d   :  { %27898 = vtanh.f32 %v6079_v30 }
 0xc52   :  { %v27893_v32 = vpop.eup %27892 }
 0xc53   :  { %v27895_v24 = vpop.eup %27894  ;;  %v6094_v34 = vmul.f32 %v27893_v32, %v28610_v37 }
 0xc54   :  { %v6093_v15 = vmul.f32 %v27895_v24, %v28608_v33 }
 0xc56   :  { %v27897_v41 = vpop.eup %27896  ;;  %v6097_v31 = vadd.f32 %v6094_v34, %v6093_v15 }
 0xc57   :  { %v27899_v43 = vpop.eup %27898  ;;  %v6096_v46 = vmul.f32 %v27897_v41, %v28617_v50 }
 0xc58   :  { %v6095_v45 = vmul.f32 %v27899_v43, %v28614_v48 }
 0xc5a   :  { %v6098_v17 = vadd.f32 %v6097_v31, %v6095_v45 }
 0xc5c   :  { %v6099_v53 = vadd.f32 %v6098_v17, %v6096_v46 }
 0xc5e   :  { %v6100_v18 = vrot.slane %v6099_v53, 4 }
 0xc60   :  { %v6101_v29 = vadd.f32 %v6100_v18, %v6099_v53 }
 0xc62   :  { %v6102_v40 = vrot.slane %v6101_v29, 2 }
 0xc64   :  { %v6103_v58 = vadd.f32 %v6102_v40, %v6101_v29 }
 0xc66   :  { %v6104_v55 = vrot.slane %v6103_v58, 1 }
 0xc68   :  { %v6105_v59 = vadd.f32 %v6104_v55, %v6103_v58 }
 0xc6a   :  { %27900 = vtanh.f32 %v6105_v59 }
 0xc74   :  { %v27901_v4 = vpop.eup %27900 }
 0xc75   :  { %v6107_v8 = vmul.f32 %v27901_v4, %v28629_v7 }
 0xc77   :  { %v29044_v11 = vadd.f32 %v6107_v8, %v5460_v6 }
 0xc79   :  { %v6109_v21 = vmul.f32 %v29044_v11, %v29042_v9 }
 0xc7b   :  { %v29049_v25 = vadd.f32 %v6109_v21, %v28991_v26 }
 0xc7d   :  { %6113 = vrot.lane.b32.xlu1 %v29049_v25, %s28400_s5  ;;  %v6123_v51 = vrot.slane %v29049_v25, %v28503_v20  ;;  %6111 = vrot.lane.b32.xlu0 %v29049_v25, %s28401_s12 }
 0xc7f   :  { %v6125_v38 = vmul.f32 %v6123_v51, %v28509_v23  ;;  %v6126_v60 = vmul.f32 %v6123_v51, %v28515_v28  ;;  %v6127_v56 = vmul.f32 %v6123_v51, %v28507_v22  ;;  %v6128_v61 = vmul.f32 %v6123_v51, %v28513_v27 }
 0xc81   :  { %27902 = vtanh.f32 %v6125_v38 }
 0xc82   :  { %27904 = vtanh.f32 %v6126_v60 }
 0xc83   :  { %27906 = vtanh.f32 %v6127_v56 }
 0xc84   :  { %27908 = vtanh.f32 %v6128_v61 }
 0xc8b   :  { %v27903_v30 = vpop.eup %27902 }
 0xc8c   :  { %v27905_v32 = vpop.eup %27904  ;;  %v6134_v24 = vand.u32 4294901760, %v27903_v30 }
 0xc8d   :  { %v27907_v34 = vpop.eup %27906  ;;  %v6137_v15 = vand.u32 4294901760, %v27905_v32 }
 0xc8e   :  { %v27909_v41 = vpop.eup %27908  ;;  %v6140_v31 = vand.u32 4294901760, %v27907_v34  ;;  %v6244_v43 = vsub.f32 %v27903_v30, %v6134_v24 }
 0xc8f   :  { %v25985_v45 = vpack.c.bf16 %v6137_v15, %v6134_v24  ;;  %v6143_v46 = vand.u32 4294901760, %v27909_v41  ;;  %v6251_v17 = vsub.f32 %v27905_v32, %v6137_v15 }
 0xc90   :  { %v6245_v53 = vand.u32 4294901760, %v6244_v43  ;;  %v6258_v18 = vsub.f32 %v27907_v34, %v6140_v31 }
 0xc91   :  { %25986 = vmatprep.subr.bf16.mxu1 %v25985_v45  ;;  %v25989_v29 = vpack.c.bf16 %v6143_v46, %v6140_v31  ;;  %v6252_v40 = vand.u32 4294901760, %v6251_v17  ;;  %v6265_v58 = vsub.f32 %v27909_v41, %v6143_v46  ;;  %v26001_v38 = vpack.c.bf16 %v6251_v17, %v6244_v43 }
 0xc92   :  { %25988 = vmatpush3.bf16.msra.mxu1 %v25985_v45  ;;  %v6246_v55 = vsub.f32 %v6244_v43, %v6245_v53  ;;  %v6259_v59 = vand.u32 4294901760, %v6258_v18 }
 0xc93   :  { %25990 = vmatprep.subr.bf16.mxu1 %v25989_v29  ;;  %v6253_v49 = vsub.f32 %v6251_v17, %v6252_v40  ;;  %v6266_v62 = vand.u32 4294901760, %v6265_v58  ;;  %v26005_v60 = vpack.c.bf16 %v6265_v58, %v6258_v18  ;;  %v26017_v56 = vpack.c.bf16 %v6252_v40, %v6245_v53 }
 0xc94   :  { %v6247_v57 = vand.u32 4294901760, %v6246_v55  ;;  %v6260_v0 = vsub.f32 %v6258_v18, %v6259_v59 }
 0xc95   :  { %v6254_v1 = vand.u32 4294901760, %v6253_v49  ;;  %v6267_v4 = vsub.f32 %v6265_v58, %v6266_v62  ;;  %v26021_v61 = vpack.c.bf16 %v6266_v62, %v6259_v59 }
 0xc96   :  { %25992 = vmatpush3.bf16.msra.mxu1 %v25989_v29  ;;  %v6261_v6 = vand.u32 4294901760, %v6260_v0 }
 0xc97   :  { %v25993_v8 = vpack.c.bf16 %v6254_v1, %v6247_v57  ;;  %v6268_v21 = vand.u32 4294901760, %v6267_v4 }
 0xc99   :  { %23630 = vmatmul.mubr.f32.vlgmr.msra.gmra.mrb[16].mxu1 %v28565_v5  ;;  %25994 = vmatprep.subr.bf16.mxu1 %v25993_v8  ;;  %v25997_v51 = vpack.c.bf16 %v6268_v21, %v6261_v6 }
 0xc9a   :  { %25996 = vmatpush3.bf16.msra.mxu1 %v25993_v8  ;;  %23632 = vmatprep.mubr.f32.mxu1 %v28570_v10  ;;  %v6116_v8 = vmul.f32 %v29049_v25, %v28622_v2 }
 0xc9b   :  { %25998 = vmatprep.subr.bf16.mxu1 %v25997_v51 }
 0xc9d   :  { %23633 = vmatmul.mubr.f32.gmra.mrb[18].mxu1 %v28573_v19 }
 0xc9e   :  { %26000 = vmatpush3.bf16.msra.mxu1 %v25997_v51  ;;  %23643 = vmatprep.mubr.f32.mxu1 %v28483_v12 }
 0xc9f   :  { %26002 = vmatprep.subr.bf16.mxu1 %v26001_v38 }
 0xca1   :  { %23644 = vmatmul.mubr.f32.vlgmr.msra.gmra.mrb[16].mxu1 %v28521_v35 }
 0xca2   :  { %26004 = vmatpush3.bf16.msra.mxu1 %v26001_v38  ;;  %23646 = vmatprep.mubr.f32.mxu1 %v28523_v36 }
 0xca3   :  { %26006 = vmatprep.subr.bf16.mxu1 %v26005_v60 }
 0xca5   :  { %23647 = vmatmul.mubr.f32.gmra.mrb[18].mxu1 %v28529_v42 }
 0xca6   :  { %26008 = vmatpush3.bf16.msra.mxu1 %v26005_v60  ;;  %23657 = vmatprep.mubr.f32.mxu1 %v28486_v13 }
 0xca7   :  { %26010 = vmatprep.subr.bf16.mxu1 %v25985_v45 }
 0xca9   :  { %23658 = vmatmul.mubr.f32.vlgmr.msra.gmra.mrb[16].mxu1 %v28527_v39 }
 0xcaa   :  { %26012 = vmatpush3.bf16.msra.mxu1 %v25985_v45  ;;  %23660 = vmatprep.mubr.f32.mxu1 %v28532_v44 }
 0xcab   :  { %26014 = vmatprep.subr.bf16.mxu1 %v25989_v29 }
 0xcad   :  { %23661 = vmatmul.mubr.f32.gmra.mrb[18].mxu1 %v28543_v52 }
 0xcae   :  { %26016 = vmatpush3.bf16.msra.mxu1 %v25989_v29  ;;  %23671 = vmatprep.mubr.f32.mxu1 %v28489_v14 }
 0xcaf   :  { %26018 = vmatprep.subr.bf16.mxu1 %v26017_v56 }
 0xcb1   :  { %23672 = vmatmul.mubr.f32.vlgmr.msra.gmra.mrb[16].mxu1 %v28537_v47 }
 0xcb2   :  { %26020 = vmatpush3.bf16.msra.mxu1 %v26017_v56  ;;  %23674 = vmatprep.mubr.f32.mxu1 %v28546_v54 }
 0xcb3   :  { %26022 = vmatprep.subr.bf16.mxu1 %v26021_v61 }
 0xcb5   :  { %23675 = vmatmul.mubr.f32.gmra.mrb[18].mxu1 %v28558_v63 }
 0xcb6   :  { %26024 = vmatpush3.bf16.msra.mxu1 %v26021_v61  ;;  %23685 = vmatprep.mubr.f32.mxu1 %v28483_v12 }
 0xcb7   :  { %26026 = vmatprep.subr.bf16.mxu1 %v25985_v45 }
 0xcb9   :  { %23686 = vmatmul.mubr.f32.vlgmr.msra.gmra.mrb[16].mxu1 %v28521_v35 }
 0xcba   :  { %26028 = vmatpush3.bf16.msra.mxu1 %v25985_v45  ;;  %23688 = vmatprep.mubr.f32.mxu1 %v28523_v36 }
 0xcbb   :  { %26030 = vmatprep.subr.bf16.mxu1 %v25989_v29 }
 0xcbd   :  { %23689 = vmatmul.mubr.f32.gmra.mrb[18].mxu1 %v28529_v42 }
 0xcbe   :  { %26032 = vmatpush3.bf16.msra.mxu1 %v25989_v29  ;;  %23699 = vmatprep.mubr.f32.mxu1 %v28483_v12 }
 0xcc1   :  { %23700 = vmatmul.mubr.f32.vlgmr.msra.gmra.mrb[16].mxu1 %v28521_v35 }
 0xcc2   :  { %23702 = vmatprep.mubr.f32.mxu1 %v28523_v36 }
 0xcc5   :  { %23703 = vmatmul.mubr.f32.gmra.mrb[18].mxu1 %v28529_v42 }
 0xcc6   :  { %23797 = vmatprep.mubr.f32.mxu1 %v28493_v16 }
 0xcef   :  { %v6114_v0 = vpop.permute.xlu1 %6113  ;;  %v6112_v1 = vpop.permute.xlu0 %6111 }
 0xcf0   :  { %v6115_v4 = vadd.f32 %v6114_v0, %v6112_v1 }
 0xcf2   :  { %v6117_v6 = vmul.f32 %v6115_v4, %v28624_v3 }
 0xcf4   :  { %v6118_v51 = vadd.f32 %v6117_v6, %v6116_v8 }
 0xd94   :  { %v23701_v30 = vpop.f32.mrb[16].mxu1 }
 0xd95   :  { %27910 = vtanh.f32 %v23701_v30  ;;  %v6725_v32 = vpop.f32.mrb[17].mxu1 }
 0xd96   :  { %27912 = vtanh.f32 %v6725_v32 }
 0xd98   :  { %v23704_v24 = vpop.f32.mrb[18].mxu1 }
 0xd99   :  { %27914 = vtanh.f32 %v23704_v24  ;;  %v6737_v34 = vpop.f32.mrb[19].mxu1 }
 0xd9a   :  { %27916 = vtanh.f32 %v6737_v34 }
 0xd9f   :  { %v27911_v15 = vpop.eup %27910 }
 0xda0   :  { %v27913_v41 = vpop.eup %27912  ;;  %v6752_v31 = vmul.f32 %v27911_v15, %v28610_v37 }
 0xda1   :  { %v6751_v43 = vmul.f32 %v27913_v41, %v28608_v33 }
 0xda3   :  { %v27915_v45 = vpop.eup %27914  ;;  %v6755_v46 = vadd.f32 %v6752_v31, %v6751_v43 }
 0xda4   :  { %v27917_v17 = vpop.eup %27916  ;;  %v6754_v18 = vmul.f32 %v27915_v45, %v28617_v50 }
 0xda5   :  { %v6753_v53 = vmul.f32 %v27917_v17, %v28614_v48 }
 0xda7   :  { %v6756_v29 = vadd.f32 %v6755_v46, %v6753_v53 }
 0xda9   :  { %v6757_v40 = vadd.f32 %v6756_v29, %v6754_v18 }
 0xdab   :  { %v6758_v58 = vrot.slane %v6757_v40, 4 }
 0xdad   :  { %v6759_v55 = vadd.f32 %v6758_v58, %v6757_v40 }
 0xdaf   :  { %v6760_v59 = vrot.slane %v6759_v55, 2 }
 0xdb1   :  { %v6761_v49 = vadd.f32 %v6760_v59, %v6759_v55 }
 0xdb3   :  { %v6762_v62 = vrot.slane %v6761_v49, 1 }
 0xdb5   :  { %v6763_v57 = vadd.f32 %v6762_v62, %v6761_v49 }
 0xdb7   :  { %27918 = vtanh.f32 %v6763_v57 }
 0xdc1   :  { %v27919_v21 = vpop.eup %27918 }
 0xdc2   :  { %v6765_v38 = vmul.f32 %v27919_v21, %v28629_v7 }
 0xdc4   :  { %v29093_v60 = vadd.f32 %v6765_v38, %v6118_v51 }
 0xdc6   :  { %v6767_v56 = vmul.f32 %v29093_v60, %v29042_v9 }
 0xdc8   :  { %v29098_v61 = vadd.f32 %v6767_v56, %v28991_v26 }
 0xdca   :  { %6771 = vrot.lane.b32.xlu1 %v29098_v61, %s28400_s5  ;;  %v6781_v30 = vrot.slane %v29098_v61, %v28503_v20  ;;  %6769 = vrot.lane.b32.xlu0 %v29098_v61, %s28401_s12 }
 0xdcc   :  { %v6783_v25 = vmul.f32 %v6781_v30, %v28509_v23  ;;  %v6784_v32 = vmul.f32 %v6781_v30, %v28515_v28  ;;  %v6785_v24 = vmul.f32 %v6781_v30, %v28507_v22  ;;  %v6786_v9 = vmul.f32 %v6781_v30, %v28513_v27 }
 0xdce   :  { %27920 = vtanh.f32 %v6783_v25 }
 0xdcf   :  { %27922 = vtanh.f32 %v6784_v32 }
 0xdd0   :  { %27924 = vtanh.f32 %v6785_v24 }
 0xdd1   :  { %27926 = vtanh.f32 %v6786_v9 }
 0xdd8   :  { %v27921_v34 = vpop.eup %27920 }
 0xdd9   :  { %v27923_v15 = vpop.eup %27922  ;;  %v6792_v41 = vand.u32 4294901760, %v27921_v34 }
 0xdda   :  { %v27925_v31 = vpop.eup %27924  ;;  %v6795_v43 = vand.u32 4294901760, %v27923_v15 }
 0xddb   :  { %v27927_v45 = vpop.eup %27926  ;;  %v6798_v46 = vand.u32 4294901760, %v27925_v31  ;;  %v6902_v17 = vsub.f32 %v27921_v34, %v6792_v41 }
 0xddc   :  { %v26033_v53 = vpack.c.bf16 %v6795_v43, %v6792_v41  ;;  %v6801_v18 = vand.u32 4294901760, %v27927_v45  ;;  %v6909_v29 = vsub.f32 %v27923_v15, %v6795_v43 }
 0xddd   :  { %v6903_v40 = vand.u32 4294901760, %v6902_v17  ;;  %v6916_v58 = vsub.f32 %v27925_v31, %v6798_v46 }
 0xdde   :  { %26034 = vmatprep.subr.bf16.mxu0 %v26033_v53  ;;  %v26037_v55 = vpack.c.bf16 %v6801_v18, %v6798_v46  ;;  %v6910_v59 = vand.u32 4294901760, %v6909_v29  ;;  %v6923_v49 = vsub.f32 %v27927_v45, %v6801_v18  ;;  %v26049_v25 = vpack.c.bf16 %v6909_v29, %v6902_v17 }
 0xddf   :  { %26036 = vmatpush3.bf16.msra.mxu0 %v26033_v53  ;;  %v6904_v62 = vsub.f32 %v6902_v17, %v6903_v40  ;;  %v6917_v57 = vand.u32 4294901760, %v6916_v58 }
 0xde0   :  { %26038 = vmatprep.subr.bf16.mxu0 %v26037_v55  ;;  %v6911_v0 = vsub.f32 %v6909_v29, %v6910_v59  ;;  %v6924_v1 = vand.u32 4294901760, %v6923_v49  ;;  %v26053_v32 = vpack.c.bf16 %v6923_v49, %v6916_v58  ;;  %v26065_v24 = vpack.c.bf16 %v6910_v59, %v6903_v40 }
 0xde1   :  { %v6905_v4 = vand.u32 4294901760, %v6904_v62  ;;  %v6918_v6 = vsub.f32 %v6916_v58, %v6917_v57 }
 0xde2   :  { %v6912_v8 = vand.u32 4294901760, %v6911_v0  ;;  %v6925_v21 = vsub.f32 %v6923_v49, %v6924_v1  ;;  %v26069_v9 = vpack.c.bf16 %v6924_v1, %v6917_v57 }
 0xde3   :  { %26040 = vmatpush3.bf16.msra.mxu0 %v26037_v55  ;;  %v6919_v51 = vand.u32 4294901760, %v6918_v6 }
 0xde4   :  { %v26041_v38 = vpack.c.bf16 %v6912_v8, %v6905_v4  ;;  %v6926_v56 = vand.u32 4294901760, %v6925_v21 }
 0xde6   :  { %23714 = vmatmul.mubr.f32.vlgmr.msra.gmra.mrb[20].mxu0 %v28565_v5  ;;  %26042 = vmatprep.subr.bf16.mxu0 %v26041_v38  ;;  %v26045_v30 = vpack.c.bf16 %v6926_v56, %v6919_v51 }
 0xde7   :  { %26044 = vmatpush3.bf16.msra.mxu0 %v26041_v38  ;;  %23716 = vmatprep.mubr.f32.mxu0 %v28570_v10  ;;  %v6774_v38 = vmul.f32 %v29098_v61, %v28622_v2 }
 0xde8   :  { %26046 = vmatprep.subr.bf16.mxu0 %v26045_v30 }
 0xdea   :  { %23717 = vmatmul.mubr.f32.gmra.mrb[22].mxu0 %v28573_v19 }
 0xdeb   :  { %26048 = vmatpush3.bf16.msra.mxu0 %v26045_v30  ;;  %23727 = vmatprep.mubr.f32.mxu0 %v28483_v12 }
 0xdec   :  { %26050 = vmatprep.subr.bf16.mxu0 %v26049_v25 }
 0xdee   :  { %23728 = vmatmul.mubr.f32.vlgmr.msra.gmra.mrb[20].mxu0 %v28521_v35 }
 0xdef   :  { %26052 = vmatpush3.bf16.msra.mxu0 %v26049_v25  ;;  %23730 = vmatprep.mubr.f32.mxu0 %v28523_v36 }
 0xdf0   :  { %26054 = vmatprep.subr.bf16.mxu0 %v26053_v32 }
 0xdf2   :  { %23731 = vmatmul.mubr.f32.gmra.mrb[22].mxu0 %v28529_v42 }
 0xdf3   :  { %26056 = vmatpush3.bf16.msra.mxu0 %v26053_v32  ;;  %23741 = vmatprep.mubr.f32.mxu0 %v28486_v13  ;;  %v5448_v32 = vstv %s29035_s29 }
 0xdf4   :  { %26058 = vmatprep.subr.bf16.mxu0 %v26033_v53 }
 0xdf6   :  { %23742 = vmatmul.mubr.f32.vlgmr.msra.gmra.mrb[20].mxu0 %v28527_v39 }
 0xdf7   :  { %26060 = vmatpush3.bf16.msra.mxu0 %v26033_v53  ;;  %23744 = vmatprep.mubr.f32.mxu0 %v28532_v44 }
 0xdf8   :  { %26062 = vmatprep.subr.bf16.mxu0 %v26037_v55 }
 0xdfa   :  { %23745 = vmatmul.mubr.f32.gmra.mrb[22].mxu0 %v28543_v52 }
 0xdfb   :  { %26064 = vmatpush3.bf16.msra.mxu0 %v26037_v55  ;;  %23755 = vmatprep.mubr.f32.mxu0 %v28489_v14 }
 0xdfc   :  { %26066 = vmatprep.subr.bf16.mxu0 %v26065_v24 }
 0xdfe   :  { %23756 = vmatmul.mubr.f32.vlgmr.msra.gmra.mrb[20].mxu0 %v28537_v47 }
 0xdff   :  { %26068 = vmatpush3.bf16.msra.mxu0 %v26065_v24  ;;  %23758 = vmatprep.mubr.f32.mxu0 %v28546_v54 }
 0xe00   :  { %26070 = vmatprep.subr.bf16.mxu0 %v26069_v9 }
 0xe02   :  { %23759 = vmatmul.mubr.f32.gmra.mrb[22].mxu0 %v28558_v63 }
 0xe03   :  { %26072 = vmatpush3.bf16.msra.mxu0 %v26069_v9  ;;  %23769 = vmatprep.mubr.f32.mxu0 %v28483_v12 }
 0xe04   :  { %26074 = vmatprep.subr.bf16.mxu0 %v26033_v53 }
 0xe06   :  { %23770 = vmatmul.mubr.f32.vlgmr.msra.gmra.mrb[20].mxu0 %v28521_v35 }
 0xe07   :  { %26076 = vmatpush3.bf16.msra.mxu0 %v26033_v53  ;;  %23772 = vmatprep.mubr.f32.mxu0 %v28523_v36 }
 0xe08   :  { %26078 = vmatprep.subr.bf16.mxu0 %v26037_v55 }
 0xe0a   :  { %23773 = vmatmul.mubr.f32.gmra.mrb[22].mxu0 %v28529_v42 }
 0xe0b   :  { %26080 = vmatpush3.bf16.msra.mxu0 %v26037_v55  ;;  %23783 = vmatprep.mubr.f32.mxu0 %v28483_v12 }
 0xe0e   :  { %23784 = vmatmul.mubr.f32.vlgmr.msra.gmra.mrb[20].mxu0 %v28521_v35 }
 0xe0f   :  { %23786 = vmatprep.mubr.f32.mxu0 %v28523_v36 }
 0xe12   :  { %23787 = vmatmul.mubr.f32.gmra.mrb[22].mxu0 %v28529_v42 }
 0xe13   :  { %23881 = vmatprep.mubr.f32.mxu0 %v28493_v16 }
 0xe3c   :  { %v6772_v6 = vpop.permute.xlu1 %6771  ;;  %v6770_v8 = vpop.permute.xlu0 %6769 }
 0xe3d   :  { %v6773_v21 = vadd.f32 %v6772_v6, %v6770_v8 }
 0xe3f   :  { %v6775_v51 = vmul.f32 %v6773_v21, %v28624_v3 }
 0xe41   :  { %v6776_v30 = vadd.f32 %v6775_v51, %v6774_v38 }
 0xee1   :  { %v23785_v34 = vpop.f32.mrb[20].mxu0 }
 0xee2   :  { %27928 = vtanh.f32 %v23785_v34  ;;  %v7383_v15 = vpop.f32.mrb[21].mxu0 }
 0xee3   :  { %27930 = vtanh.f32 %v7383_v15 }
 0xee5   :  { %v23788_v41 = vpop.f32.mrb[22].mxu0 }
 0xee6   :  { %27932 = vtanh.f32 %v23788_v41  ;;  %v7395_v31 = vpop.f32.mrb[23].mxu0 }
 0xee7   :  { %27934 = vtanh.f32 %v7395_v31 }
 0xeec   :  { %v27929_v43 = vpop.eup %27928 }
 0xeed   :  { %v27931_v45 = vpop.eup %27930  ;;  %v7410_v46 = vmul.f32 %v27929_v43, %v28610_v37 }
 0xeee   :  { %v7409_v17 = vmul.f32 %v27931_v45, %v28608_v33 }
 0xef0   :  { %v27933_v53 = vpop.eup %27932  ;;  %v7413_v18 = vadd.f32 %v7410_v46, %v7409_v17 }
 0xef1   :  { %v27935_v29 = vpop.eup %27934  ;;  %v7412_v58 = vmul.f32 %v27933_v53, %v28617_v50 }
 0xef2   :  { %v7411_v40 = vmul.f32 %v27935_v29, %v28614_v48 }
 0xef4   :  { %v7414_v55 = vadd.f32 %v7413_v18, %v7411_v40 }
 0xef6   :  { %v7415_v59 = vadd.f32 %v7414_v55, %v7412_v58 }
 0xef8   :  { %v7416_v49 = vrot.slane %v7415_v59, 4 }
 0xefa   :  { %v7417_v62 = vadd.f32 %v7416_v49, %v7415_v59 }
 0xefc   :  { %v7418_v57 = vrot.slane %v7417_v62, 2 }
 0xefe   :  { %v7419_v0 = vadd.f32 %v7418_v57, %v7417_v62 }
 0xf00   :  { %v7420_v1 = vrot.slane %v7419_v0, 1 }
 0xf02   :  { %v7421_v4 = vadd.f32 %v7420_v1, %v7419_v0 }
 0xf04   :  { %27936 = vtanh.f32 %v7421_v4 }
 0xf0e   :  { %v27937_v56 = vpop.eup %27936 }
 0xf0f   :  { %v7423_v25 = vmul.f32 %v27937_v56, %v28629_v7 }
 0xf11   :  { %v29143_v24 = vadd.f32 %v7423_v25, %v6776_v30 }
 0xf13   :  { %v7425_v9 = vmul.f32 %v29143_v24, %v5448_v32 }
 0xf15   :  { %v29147_v34 = vadd.f32 %v7425_v9, %v28991_v26 }
 0xf17   :  { %7429 = vrot.lane.b32.xlu1 %v29147_v34, %s28400_s5  ;;  %v7439_v15 = vrot.slane %v29147_v34, %v28503_v20  ;;  %7427 = vrot.lane.b32.xlu0 %v29147_v34, %s28401_s12 }
 0xf19   :  { %v7441_v61 = vmul.f32 %v7439_v15, %v28509_v23  ;;  %v7442_v41 = vmul.f32 %v7439_v15, %v28515_v28  ;;  %v7443_v31 = vmul.f32 %v7439_v15, %v28507_v22  ;;  %v7444_v43 = vmul.f32 %v7439_v15, %v28513_v27 }
 0xf1b   :  { %27938 = vtanh.f32 %v7441_v61 }
 0xf1c   :  { %27940 = vtanh.f32 %v7442_v41 }
 0xf1d   :  { %27942 = vtanh.f32 %v7443_v31 }
 0xf1e   :  { %27944 = vtanh.f32 %v7444_v43 }
 0xf25   :  { %v27939_v45 = vpop.eup %27938 }
 0xf26   :  { %v27941_v46 = vpop.eup %27940  ;;  %v7450_v17 = vand.u32 4294901760, %v27939_v45 }
 0xf27   :  { %v27943_v53 = vpop.eup %27942  ;;  %v7453_v18 = vand.u32 4294901760, %v27941_v46 }
 0xf28   :  { %v27945_v29 = vpop.eup %27944  ;;  %v7456_v40 = vand.u32 4294901760, %v27943_v53  ;;  %v7560_v58 = vsub.f32 %v27939_v45, %v7450_v17 }
 0xf29   :  { %v26081_v55 = vpack.c.bf16 %v7453_v18, %v7450_v17  ;;  %v7459_v59 = vand.u32 4294901760, %v27945_v29  ;;  %v7567_v49 = vsub.f32 %v27941_v46, %v7453_v18 }
 0xf2a   :  { %v7561_v62 = vand.u32 4294901760, %v7560_v58  ;;  %v7574_v57 = vsub.f32 %v27943_v53, %v7456_v40 }
 0xf2b   :  { %26082 = vmatprep.subr.bf16.mxu1 %v26081_v55  ;;  %v26085_v0 = vpack.c.bf16 %v7459_v59, %v7456_v40  ;;  %v7568_v1 = vand.u32 4294901760, %v7567_v49  ;;  %v7581_v4 = vsub.f32 %v27945_v29, %v7459_v59  ;;  %v26097_v41 = vpack.c.bf16 %v7567_v49, %v7560_v58 }
 0xf2c   :  { %26084 = vmatpush3.bf16.msra.mxu1 %v26081_v55  ;;  %v7562_v6 = vsub.f32 %v7560_v58, %v7561_v62  ;;  %v7575_v8 = vand.u32 4294901760, %v7574_v57 }
 0xf2d   :  { %26086 = vmatprep.subr.bf16.mxu1 %v26085_v0  ;;  %v7569_v21 = vsub.f32 %v7567_v49, %v7568_v1  ;;  %v7582_v51 = vand.u32 4294901760, %v7581_v4  ;;  %v26101_v31 = vpack.c.bf16 %v7581_v4, %v7574_v57  ;;  %v26113_v43 = vpack.c.bf16 %v7568_v1, %v7561_v62 }
 0xf2e   :  { %v7563_v38 = vand.u32 4294901760, %v7562_v6  ;;  %v7576_v56 = vsub.f32 %v7574_v57, %v7575_v8 }
 0xf2f   :  { %v7570_v30 = vand.u32 4294901760, %v7569_v21  ;;  %v7583_v25 = vsub.f32 %v7581_v4, %v7582_v51  ;;  %v26117_v45 = vpack.c.bf16 %v7582_v51, %v7575_v8 }
 0xf30   :  { %26088 = vmatpush3.bf16.msra.mxu1 %v26085_v0  ;;  %v7577_v32 = vand.u32 4294901760, %v7576_v56 }
 0xf31   :  { %v26089_v9 = vpack.c.bf16 %v7570_v30, %v7563_v38  ;;  %v7584_v15 = vand.u32 4294901760, %v7583_v25 }
 0xf33   :  { %23798 = vmatmul.mubr.f32.vlgmr.msra.gmra.mrb[20].mxu1 %v28565_v5  ;;  %26090 = vmatprep.subr.bf16.mxu1 %v26089_v9  ;;  %v26093_v61 = vpack.c.bf16 %v7584_v15, %v7577_v32 }
 0xf34   :  { %26092 = vmatpush3.bf16.msra.mxu1 %v26089_v9  ;;  %23800 = vmatprep.mubr.f32.mxu1 %v28570_v10  ;;  %v8083_v9 = vadd.f32 %v29143_v24, %v29093_v60 }
 0xf35   :  { %26094 = vmatprep.subr.bf16.mxu1 %v26093_v61 }
 0xf37   :  { %23801 = vmatmul.mubr.f32.gmra.mrb[22].mxu1 %v28573_v19 }
 0xf38   :  { %26096 = vmatpush3.bf16.msra.mxu1 %v26093_v61  ;;  %23811 = vmatprep.mubr.f32.mxu1 %v28483_v12  ;;  %v8084_v61 = vmul.f32 2.0, %v8083_v9 }
 0xf39   :  { %26098 = vmatprep.subr.bf16.mxu1 %v26097_v41 }
 0xf3b   :  { %23812 = vmatmul.mubr.f32.vlgmr.msra.gmra.mrb[20].mxu1 %v28521_v35 }
 0xf3c   :  { %26100 = vmatpush3.bf16.msra.mxu1 %v26097_v41  ;;  %23814 = vmatprep.mubr.f32.mxu1 %v28523_v36  ;;  %v7432_v41 = vmul.f32 %v29147_v34, %v28622_v2 }
 0xf3d   :  { %26102 = vmatprep.subr.bf16.mxu1 %v26101_v31 }
 0xf3f   :  { %23815 = vmatmul.mubr.f32.gmra.mrb[22].mxu1 %v28529_v42 }
 0xf40   :  { %26104 = vmatpush3.bf16.msra.mxu1 %v26101_v31  ;;  %23825 = vmatprep.mubr.f32.mxu1 %v28486_v13 }
 0xf41   :  { %26106 = vmatprep.subr.bf16.mxu1 %v26081_v55 }
 0xf43   :  { %23826 = vmatmul.mubr.f32.vlgmr.msra.gmra.mrb[20].mxu1 %v28527_v39 }
 0xf44   :  { %26108 = vmatpush3.bf16.msra.mxu1 %v26081_v55  ;;  %23828 = vmatprep.mubr.f32.mxu1 %v28532_v44 }
 0xf45   :  { %26110 = vmatprep.subr.bf16.mxu1 %v26085_v0 }
 0xf47   :  { %23829 = vmatmul.mubr.f32.gmra.mrb[22].mxu1 %v28543_v52 }
 0xf48   :  { %26112 = vmatpush3.bf16.msra.mxu1 %v26085_v0  ;;  %23839 = vmatprep.mubr.f32.mxu1 %v28489_v14 }
 0xf49   :  { %26114 = vmatprep.subr.bf16.mxu1 %v26113_v43 }
 0xf4b   :  { %23840 = vmatmul.mubr.f32.vlgmr.msra.gmra.mrb[20].mxu1 %v28537_v47 }
 0xf4c   :  { %26116 = vmatpush3.bf16.msra.mxu1 %v26113_v43  ;;  %23842 = vmatprep.mubr.f32.mxu1 %v28546_v54 }
 0xf4d   :  { %26118 = vmatprep.subr.bf16.mxu1 %v26117_v45 }
 0xf4f   :  { %23843 = vmatmul.mubr.f32.gmra.mrb[22].mxu1 %v28558_v63 }
 0xf50   :  { %26120 = vmatpush3.bf16.msra.mxu1 %v26117_v45  ;;  %23853 = vmatprep.mubr.f32.mxu1 %v28483_v12 }
 0xf51   :  { %26122 = vmatprep.subr.bf16.mxu1 %v26081_v55 }
 0xf53   :  { %23854 = vmatmul.mubr.f32.vlgmr.msra.gmra.mrb[20].mxu1 %v28521_v35 }
 0xf54   :  { %26124 = vmatpush3.bf16.msra.mxu1 %v26081_v55  ;;  %23856 = vmatprep.mubr.f32.mxu1 %v28523_v36 }
 0xf55   :  { %26126 = vmatprep.subr.bf16.mxu1 %v26085_v0 }
 0xf57   :  { %23857 = vmatmul.mubr.f32.gmra.mrb[22].mxu1 %v28529_v42 }
 0xf58   :  { %26128 = vmatpush3.bf16.msra.mxu1 %v26085_v0  ;;  %23867 = vmatprep.mubr.f32.mxu1 %v28483_v12 }
 0xf5b   :  { %23868 = vmatmul.mubr.f32.vlgmr.msra.gmra.mrb[20].mxu1 %v28521_v35 }
 0xf5c   :  { %23870 = vmatprep.mubr.f32.mxu1 %v28523_v36 }
 0xf5f   :  { %23871 = vmatmul.mubr.f32.gmra.mrb[22].mxu1 %v28529_v42 }
 0xf60   :  { %23965 = vmatprep.mubr.f32.mxu1 %v28493_v16 }
 0xf89   :  { %v7430_v30 = vpop.permute.xlu1 %7429  ;;  %v7428_v25 = vpop.permute.xlu0 %7427 }
 0xf8a   :  { %v7431_v32 = vadd.f32 %v7430_v30, %v7428_v25 }
 0xf8c   :  { %v7433_v15 = vmul.f32 %v7431_v32, %v28624_v3 }
 0xf8e   :  { %v7434_v43 = vadd.f32 %v7433_v15, %v7432_v41 }
0x102e   :  { %v23869_v46 = vpop.f32.mrb[20].mxu1 }
0x102f   :  { %27946 = vtanh.f32 %v23869_v46  ;;  %v8041_v17 = vpop.f32.mrb[21].mxu1  ;;  %v8085_v46 = vadd.f32 %v8084_v61, %v29044_v11 }
0x1030   :  { %27948 = vtanh.f32 %v8041_v17 }
0x1032   :  { %v23872_v53 = vpop.f32.mrb[22].mxu1 }
0x1033   :  { %27950 = vtanh.f32 %v23872_v53  ;;  %v8053_v18 = vpop.f32.mrb[23].mxu1  ;;  %v5452_v53 = vstv %s5451_s1 }
0x1034   :  { %27952 = vtanh.f32 %v8053_v18 }
0x1039   :  { %v27947_v29 = vpop.eup %27946 }
0x103a   :  { %v27949_v40 = vpop.eup %27948  ;;  %v8068_v58 = vmul.f32 %v27947_v29, %v28610_v37 }
0x103b   :  { %v8067_v55 = vmul.f32 %v27949_v40, %v28608_v33 }
0x103d   :  { %v27951_v59 = vpop.eup %27950  ;;  %v8071_v49 = vadd.f32 %v8068_v58, %v8067_v55 }
0x103e   :  { %v27953_v62 = vpop.eup %27952  ;;  %v8070_v0 = vmul.f32 %v27951_v59, %v28617_v50 }
0x103f   :  { %v8069_v57 = vmul.f32 %v27953_v62, %v28614_v48 }
0x1041   :  { %v8072_v1 = vadd.f32 %v8071_v49, %v8069_v57 }
0x1043   :  { %v8073_v4 = vadd.f32 %v8072_v1, %v8070_v0 }
0x1045   :  { %v8074_v6 = vrot.slane %v8073_v4, 4 }
0x1047   :  { %v8075_v8 = vadd.f32 %v8074_v6, %v8073_v4 }
0x1049   :  { %v8076_v21 = vrot.slane %v8075_v8, 2 }
0x104b   :  { %v8077_v51 = vadd.f32 %v8076_v21, %v8075_v8 }
0x104d   :  { %v8078_v38 = vrot.slane %v8077_v51, 1 }
0x104f   :  { %v8079_v56 = vadd.f32 %v8078_v38, %v8077_v51 }
0x1051   :  { %27954 = vtanh.f32 %v8079_v56 }
0x105b   :  { %v27955_v31 = vpop.eup %27954 }
0x105c   :  { %v8081_v45 = vmul.f32 %v27955_v31, %v28629_v7 }
0x105e   :  { %v8082_v17 = vadd.f32 %v8081_v45, %v7434_v43 }
0x1060   :  { %v8086_v18 = vadd.f32 %v8085_v46, %v8082_v17 }
0x1062   :  { %v8087_v29 = vmul.f32 %v8086_v18, %v5452_v53 }
0x1064   :  { %v29196_v40 = vadd.f32 %v8087_v29, %v28991_v26 }
0x1066   :  { %8099 = vrot.lane.b32.xlu1 %v29196_v40, %s28400_s5  ;;  %8089 = vst [vmem:[%s30228_s6 + $0x2] sm:$0x1] %v29196_v40  ;;  %8097 = vrot.lane.b32.xlu0 %v29196_v40, %s28401_s12  ;;  %v8109_v11 = vrot.slane %v29196_v40, %v28503_v20 }
0x1068   :  { %v8111_v60 = vmul.f32 %v8109_v11, %v28509_v23  ;;  %v8112_v24 = vmul.f32 %v8109_v11, %v28515_v28  ;;  %v8113_v26 = vmul.f32 %v8109_v11, %v28507_v22  ;;  %v8114_v34 = vmul.f32 %v8109_v11, %v28513_v27 }
0x106a   :  { %27956 = vtanh.f32 %v8111_v60 }
0x106b   :  { %27958 = vtanh.f32 %v8112_v24 }
0x106c   :  { %27960 = vtanh.f32 %v8113_v26 }
0x106d   :  { %27962 = vtanh.f32 %v8114_v34 }
0x1074   :  { %v27957_v58 = vpop.eup %27956 }
0x1075   :  { %v27959_v55 = vpop.eup %27958  ;;  %v8120_v59 = vand.u32 4294901760, %v27957_v58 }
0x1076   :  { %v27961_v49 = vpop.eup %27960  ;;  %v8123_v62 = vand.u32 4294901760, %v27959_v55 }
0x1077   :  { %v27963_v57 = vpop.eup %27962  ;;  %v8126_v0 = vand.u32 4294901760, %v27961_v49  ;;  %v8230_v1 = vsub.f32 %v27957_v58, %v8120_v59 }
0x1078   :  { %v26129_v4 = vpack.c.bf16 %v8123_v62, %v8120_v59  ;;  %v8129_v6 = vand.u32 4294901760, %v27963_v57  ;;  %v8237_v8 = vsub.f32 %v27959_v55, %v8123_v62 }
0x1079   :  { %v8231_v21 = vand.u32 4294901760, %v8230_v1  ;;  %v8244_v51 = vsub.f32 %v27961_v49, %v8126_v0 }
0x107a   :  { %26130 = vmatprep.subr.bf16.mxu0 %v26129_v4  ;;  %v26133_v38 = vpack.c.bf16 %v8129_v6, %v8126_v0  ;;  %v8238_v56 = vand.u32 4294901760, %v8237_v8  ;;  %v8251_v30 = vsub.f32 %v27963_v57, %v8129_v6  ;;  %v26145_v18 = vpack.c.bf16 %v8237_v8, %v8230_v1 }
0x107b   :  { %26132 = vmatpush3.bf16.msra.mxu0 %v26129_v4  ;;  %v8232_v25 = vsub.f32 %v8230_v1, %v8231_v21  ;;  %v8245_v32 = vand.u32 4294901760, %v8244_v51 }
0x107c   :  { %26134 = vmatprep.subr.bf16.mxu0 %v26133_v38  ;;  %v8239_v9 = vsub.f32 %v8237_v8, %v8238_v56  ;;  %v8252_v15 = vand.u32 4294901760, %v8251_v30  ;;  %v26149_v29 = vpack.c.bf16 %v8251_v30, %v8244_v51  ;;  %v26161_v11 = vpack.c.bf16 %v8238_v56, %v8231_v21 }
0x107d   :  { %v8233_v61 = vand.u32 4294901760, %v8232_v25  ;;  %v8246_v41 = vsub.f32 %v8244_v51, %v8245_v32 }
0x107e   :  { %v8240_v31 = vand.u32 4294901760, %v8239_v9  ;;  %v8253_v43 = vsub.f32 %v8251_v30, %v8252_v15  ;;  %v26165_v60 = vpack.c.bf16 %v8252_v15, %v8245_v32 }
0x107f   :  { %26136 = vmatpush3.bf16.msra.mxu0 %v26133_v38  ;;  %v8247_v45 = vand.u32 4294901760, %v8246_v41 }
0x1080   :  { %v26137_v46 = vpack.c.bf16 %v8240_v31, %v8233_v61  ;;  %v8254_v17 = vand.u32 4294901760, %v8253_v43  ;;  %v8102_v31 = vmul.f32 %v29196_v40, %v28622_v2 }
0x1082   :  { %23882 = vmatmul.mubr.f32.vlgmr.msra.gmra.mrb[24].mxu0 %v28565_v5  ;;  %26138 = vmatprep.subr.bf16.mxu0 %v26137_v46  ;;  %v26141_v53 = vpack.c.bf16 %v8254_v17, %v8247_v45  ;;  %v29247_v17 = vstv %s8093_s8 }
0x1083   :  { %26140 = vmatpush3.bf16.msra.mxu0 %v26137_v46  ;;  %23884 = vmatprep.mubr.f32.mxu0 %v28570_v10 }
0x1084   :  { %26142 = vmatprep.subr.bf16.mxu0 %v26141_v53 }
0x1086   :  { %23885 = vmatmul.mubr.f32.gmra.mrb[26].mxu0 %v28573_v19 }
0x1087   :  { %26144 = vmatpush3.bf16.msra.mxu0 %v26141_v53  ;;  %23895 = vmatprep.mubr.f32.mxu0 %v28483_v12 }
0x1088   :  { %26146 = vmatprep.subr.bf16.mxu0 %v26145_v18 }
0x108a   :  { %23896 = vmatmul.mubr.f32.vlgmr.msra.gmra.mrb[24].mxu0 %v28521_v35 }
0x108b   :  { %26148 = vmatpush3.bf16.msra.mxu0 %v26145_v18  ;;  %23898 = vmatprep.mubr.f32.mxu0 %v28523_v36 }
0x108c   :  { %26150 = vmatprep.subr.bf16.mxu0 %v26149_v29 }
0x108e   :  { %23899 = vmatmul.mubr.f32.gmra.mrb[26].mxu0 %v28529_v42 }
0x108f   :  { %26152 = vmatpush3.bf16.msra.mxu0 %v26149_v29  ;;  %23909 = vmatprep.mubr.f32.mxu0 %v28486_v13 }
0x1090   :  { %26154 = vmatprep.subr.bf16.mxu0 %v26129_v4 }
0x1092   :  { %23910 = vmatmul.mubr.f32.vlgmr.msra.gmra.mrb[24].mxu0 %v28527_v39 }
0x1093   :  { %26156 = vmatpush3.bf16.msra.mxu0 %v26129_v4  ;;  %23912 = vmatprep.mubr.f32.mxu0 %v28532_v44 }
0x1094   :  { %26158 = vmatprep.subr.bf16.mxu0 %v26133_v38 }
0x1096   :  { %23913 = vmatmul.mubr.f32.gmra.mrb[26].mxu0 %v28543_v52 }
0x1097   :  { %26160 = vmatpush3.bf16.msra.mxu0 %v26133_v38  ;;  %23923 = vmatprep.mubr.f32.mxu0 %v28489_v14 }
0x1098   :  { %26162 = vmatprep.subr.bf16.mxu0 %v26161_v11 }
0x109a   :  { %23924 = vmatmul.mubr.f32.vlgmr.msra.gmra.mrb[24].mxu0 %v28537_v47 }
0x109b   :  { %26164 = vmatpush3.bf16.msra.mxu0 %v26161_v11  ;;  %23926 = vmatprep.mubr.f32.mxu0 %v28546_v54 }
0x109c   :  { %26166 = vmatprep.subr.bf16.mxu0 %v26165_v60 }
0x109e   :  { %23927 = vmatmul.mubr.f32.gmra.mrb[26].mxu0 %v28558_v63 }
0x109f   :  { %26168 = vmatpush3.bf16.msra.mxu0 %v26165_v60  ;;  %23937 = vmatprep.mubr.f32.mxu0 %v28483_v12 }
0x10a0   :  { %26170 = vmatprep.subr.bf16.mxu0 %v26129_v4 }
0x10a2   :  { %23938 = vmatmul.mubr.f32.vlgmr.msra.gmra.mrb[24].mxu0 %v28521_v35 }
0x10a3   :  { %26172 = vmatpush3.bf16.msra.mxu0 %v26129_v4  ;;  %23940 = vmatprep.mubr.f32.mxu0 %v28523_v36 }
0x10a4   :  { %26174 = vmatprep.subr.bf16.mxu0 %v26133_v38 }
0x10a6   :  { %23941 = vmatmul.mubr.f32.gmra.mrb[26].mxu0 %v28529_v42 }
0x10a7   :  { %26176 = vmatpush3.bf16.msra.mxu0 %v26133_v38  ;;  %23951 = vmatprep.mubr.f32.mxu0 %v28483_v12 }
0x10aa   :  { %23952 = vmatmul.mubr.f32.vlgmr.msra.gmra.mrb[24].mxu0 %v28521_v35 }
0x10ab   :  { %23954 = vmatprep.mubr.f32.mxu0 %v28523_v36 }
0x10ae   :  { %23955 = vmatmul.mubr.f32.gmra.mrb[26].mxu0 %v28529_v42 }
0x10af   :  { %24049 = vmatprep.mubr.f32.mxu0 %v28493_v16 }
0x10d8   :  { %v8100_v9 = vpop.permute.xlu1 %8099  ;;  %v8098_v15 = vpop.permute.xlu0 %8097 }
0x10d9   :  { %v8101_v61 = vadd.f32 %v8100_v9, %v8098_v15 }
0x10db   :  { %v8103_v41 = vmul.f32 %v8101_v61, %v28624_v3 }
0x10dd   :  { %v8104_v45 = vadd.f32 %v8103_v41, %v8102_v31 }
0x117d   :  { %v23953_v24 = vpop.f32.mrb[24].mxu0 }
0x117e   :  { %27964 = vtanh.f32 %v23953_v24  ;;  %v8711_v26 = vpop.f32.mrb[25].mxu0 }
0x117f   :  { %27966 = vtanh.f32 %v8711_v26 }
0x1181   :  { %v23956_v34 = vpop.f32.mrb[26].mxu0 }
0x1182   :  { %27968 = vtanh.f32 %v23956_v34  ;;  %v8723_v58 = vpop.f32.mrb[27].mxu0 }
0x1183   :  { %27970 = vtanh.f32 %v8723_v58 }
0x1188   :  { %v27965_v55 = vpop.eup %27964 }
0x1189   :  { %v27967_v59 = vpop.eup %27966  ;;  %v8738_v49 = vmul.f32 %v27965_v55, %v28610_v37 }
0x118a   :  { %v8737_v62 = vmul.f32 %v27967_v59, %v28608_v33 }
0x118c   :  { %v27969_v57 = vpop.eup %27968  ;;  %v8741_v0 = vadd.f32 %v8738_v49, %v8737_v62 }
0x118d   :  { %v27971_v1 = vpop.eup %27970  ;;  %v8740_v6 = vmul.f32 %v27969_v57, %v28617_v50 }
0x118e   :  { %v8739_v4 = vmul.f32 %v27971_v1, %v28614_v48 }
0x1190   :  { %v8742_v8 = vadd.f32 %v8741_v0, %v8739_v4 }
0x1192   :  { %v8743_v21 = vadd.f32 %v8742_v8, %v8740_v6 }
0x1194   :  { %v8744_v51 = vrot.slane %v8743_v21, 4 }
0x1196   :  { %v8745_v38 = vadd.f32 %v8744_v51, %v8743_v21 }
0x1198   :  { %v8746_v56 = vrot.slane %v8745_v38, 2 }
0x119a   :  { %v8747_v30 = vadd.f32 %v8746_v56, %v8745_v38 }
0x119c   :  { %v8748_v25 = vrot.slane %v8747_v30, 1 }
0x119e   :  { %v8749_v32 = vadd.f32 %v8748_v25, %v8747_v30 }
0x11a0   :  { %27972 = vtanh.f32 %v8749_v32 }
0x11aa   :  { %v27973_v43 = vpop.eup %27972 }
0x11ab   :  { %v8751_v46 = vmul.f32 %v27973_v43, %v28629_v7 }
0x11ad   :  { %v29249_v53 = vadd.f32 %v8751_v46, %v8104_v45 }
0x11af   :  { %v8753_v18 = vmul.f32 %v29249_v53, %v29247_v17 }
0x11b1   :  { %v29254_v29 = vadd.f32 %v8753_v18, %v29196_v40 }
0x11b3   :  { %8757 = vrot.lane.b32.xlu1 %v29254_v29, %s28400_s5  ;;  %v8767_v11 = vrot.slane %v29254_v29, %v28503_v20  ;;  %8755 = vrot.lane.b32.xlu0 %v29254_v29, %s28401_s12 }
0x11b5   :  { %v8769_v60 = vmul.f32 %v8767_v11, %v28509_v23  ;;  %v8770_v24 = vmul.f32 %v8767_v11, %v28515_v28  ;;  %v8771_v26 = vmul.f32 %v8767_v11, %v28507_v22  ;;  %v8772_v34 = vmul.f32 %v8767_v11, %v28513_v27 }
0x11b7   :  { %27974 = vtanh.f32 %v8769_v60 }
0x11b8   :  { %27976 = vtanh.f32 %v8770_v24 }
0x11b9   :  { %27978 = vtanh.f32 %v8771_v26 }
0x11ba   :  { %27980 = vtanh.f32 %v8772_v34 }
0x11c1   :  { %v27975_v58 = vpop.eup %27974 }
0x11c2   :  { %v27977_v55 = vpop.eup %27976  ;;  %v8778_v59 = vand.u32 4294901760, %v27975_v58 }
0x11c3   :  { %v27979_v49 = vpop.eup %27978  ;;  %v8781_v62 = vand.u32 4294901760, %v27977_v55 }
0x11c4   :  { %v27981_v57 = vpop.eup %27980  ;;  %v8784_v0 = vand.u32 4294901760, %v27979_v49  ;;  %v8888_v1 = vsub.f32 %v27975_v58, %v8778_v59 }
0x11c5   :  { %v26177_v4 = vpack.c.bf16 %v8781_v62, %v8778_v59  ;;  %v8787_v6 = vand.u32 4294901760, %v27981_v57  ;;  %v8895_v8 = vsub.f32 %v27977_v55, %v8781_v62 }
0x11c6   :  { %v8889_v21 = vand.u32 4294901760, %v8888_v1  ;;  %v8902_v51 = vsub.f32 %v27979_v49, %v8784_v0 }
0x11c7   :  { %26178 = vmatprep.subr.bf16.mxu1 %v26177_v4  ;;  %v26181_v38 = vpack.c.bf16 %v8787_v6, %v8784_v0  ;;  %v8896_v56 = vand.u32 4294901760, %v8895_v8  ;;  %v8909_v30 = vsub.f32 %v27981_v57, %v8787_v6  ;;  %v26193_v60 = vpack.c.bf16 %v8895_v8, %v8888_v1 }
0x11c8   :  { %26180 = vmatpush3.bf16.msra.mxu1 %v26177_v4  ;;  %v8890_v25 = vsub.f32 %v8888_v1, %v8889_v21  ;;  %v8903_v32 = vand.u32 4294901760, %v8902_v51 }
0x11c9   :  { %26182 = vmatprep.subr.bf16.mxu1 %v26181_v38  ;;  %v8897_v9 = vsub.f32 %v8895_v8, %v8896_v56  ;;  %v8910_v15 = vand.u32 4294901760, %v8909_v30  ;;  %v26197_v24 = vpack.c.bf16 %v8909_v30, %v8902_v51  ;;  %v26209_v26 = vpack.c.bf16 %v8896_v56, %v8889_v21 }
0x11ca   :  { %v8891_v61 = vand.u32 4294901760, %v8890_v25  ;;  %v8904_v41 = vsub.f32 %v8902_v51, %v8903_v32 }
0x11cb   :  { %v8898_v31 = vand.u32 4294901760, %v8897_v9  ;;  %v8911_v43 = vsub.f32 %v8909_v30, %v8910_v15  ;;  %v26213_v34 = vpack.c.bf16 %v8910_v15, %v8903_v32 }
0x11cc   :  { %26184 = vmatpush3.bf16.msra.mxu1 %v26181_v38  ;;  %v8905_v45 = vand.u32 4294901760, %v8904_v41 }
0x11cd   :  { %v26185_v46 = vpack.c.bf16 %v8898_v31, %v8891_v61  ;;  %v8912_v18 = vand.u32 4294901760, %v8911_v43 }
0x11cf   :  { %23966 = vmatmul.mubr.f32.vlgmr.msra.gmra.mrb[24].mxu1 %v28565_v5  ;;  %26186 = vmatprep.subr.bf16.mxu1 %v26185_v46  ;;  %v26189_v11 = vpack.c.bf16 %v8912_v18, %v8905_v45 }
0x11d0   :  { %26188 = vmatpush3.bf16.msra.mxu1 %v26185_v46  ;;  %23968 = vmatprep.mubr.f32.mxu1 %v28570_v10  ;;  %v8760_v46 = vmul.f32 %v29254_v29, %v28622_v2 }
0x11d1   :  { %26190 = vmatprep.subr.bf16.mxu1 %v26189_v11 }
0x11d3   :  { %23969 = vmatmul.mubr.f32.gmra.mrb[26].mxu1 %v28573_v19 }
0x11d4   :  { %26192 = vmatpush3.bf16.msra.mxu1 %v26189_v11  ;;  %23979 = vmatprep.mubr.f32.mxu1 %v28483_v12 }
0x11d5   :  { %26194 = vmatprep.subr.bf16.mxu1 %v26193_v60 }
0x11d7   :  { %23980 = vmatmul.mubr.f32.vlgmr.msra.gmra.mrb[24].mxu1 %v28521_v35 }
0x11d8   :  { %26196 = vmatpush3.bf16.msra.mxu1 %v26193_v60  ;;  %23982 = vmatprep.mubr.f32.mxu1 %v28523_v36 }
0x11d9   :  { %26198 = vmatprep.subr.bf16.mxu1 %v26197_v24 }
0x11db   :  { %23983 = vmatmul.mubr.f32.gmra.mrb[26].mxu1 %v28529_v42 }
0x11dc   :  { %26200 = vmatpush3.bf16.msra.mxu1 %v26197_v24  ;;  %23993 = vmatprep.mubr.f32.mxu1 %v28486_v13 }
0x11dd   :  { %26202 = vmatprep.subr.bf16.mxu1 %v26177_v4 }
0x11df   :  { %23994 = vmatmul.mubr.f32.vlgmr.msra.gmra.mrb[24].mxu1 %v28527_v39 }
0x11e0   :  { %26204 = vmatpush3.bf16.msra.mxu1 %v26177_v4  ;;  %23996 = vmatprep.mubr.f32.mxu1 %v28532_v44 }
0x11e1   :  { %26206 = vmatprep.subr.bf16.mxu1 %v26181_v38 }
0x11e3   :  { %23997 = vmatmul.mubr.f32.gmra.mrb[26].mxu1 %v28543_v52 }
0x11e4   :  { %26208 = vmatpush3.bf16.msra.mxu1 %v26181_v38  ;;  %24007 = vmatprep.mubr.f32.mxu1 %v28489_v14 }
0x11e5   :  { %26210 = vmatprep.subr.bf16.mxu1 %v26209_v26 }
0x11e7   :  { %24008 = vmatmul.mubr.f32.vlgmr.msra.gmra.mrb[24].mxu1 %v28537_v47 }
0x11e8   :  { %26212 = vmatpush3.bf16.msra.mxu1 %v26209_v26  ;;  %24010 = vmatprep.mubr.f32.mxu1 %v28546_v54 }
0x11e9   :  { %26214 = vmatprep.subr.bf16.mxu1 %v26213_v34 }
0x11eb   :  { %24011 = vmatmul.mubr.f32.gmra.mrb[26].mxu1 %v28558_v63 }
0x11ec   :  { %26216 = vmatpush3.bf16.msra.mxu1 %v26213_v34  ;;  %24021 = vmatprep.mubr.f32.mxu1 %v28483_v12 }
0x11ed   :  { %26218 = vmatprep.subr.bf16.mxu1 %v26177_v4 }
0x11ef   :  { %24022 = vmatmul.mubr.f32.vlgmr.msra.gmra.mrb[24].mxu1 %v28521_v35 }
0x11f0   :  { %26220 = vmatpush3.bf16.msra.mxu1 %v26177_v4  ;;  %24024 = vmatprep.mubr.f32.mxu1 %v28523_v36 }
0x11f1   :  { %26222 = vmatprep.subr.bf16.mxu1 %v26181_v38 }
0x11f3   :  { %24025 = vmatmul.mubr.f32.gmra.mrb[26].mxu1 %v28529_v42 }
0x11f4   :  { %26224 = vmatpush3.bf16.msra.mxu1 %v26181_v38  ;;  %24035 = vmatprep.mubr.f32.mxu1 %v28483_v12 }
0x11f7   :  { %24036 = vmatmul.mubr.f32.vlgmr.msra.gmra.mrb[24].mxu1 %v28521_v35 }
0x11f8   :  { %24038 = vmatprep.mubr.f32.mxu1 %v28523_v36 }
0x11fb   :  { %24039 = vmatmul.mubr.f32.gmra.mrb[26].mxu1 %v28529_v42 }
0x11fc   :  { %24133 = vmatprep.mubr.f32.mxu1 %v28493_v16 }
0x1225   :  { %v8758_v41 = vpop.permute.xlu1 %8757  ;;  %v8756_v31 = vpop.permute.xlu0 %8755 }
0x1226   :  { %v8759_v43 = vadd.f32 %v8758_v41, %v8756_v31 }
0x1228   :  { %v8761_v45 = vmul.f32 %v8759_v43, %v28624_v3 }
0x122a   :  { %v8762_v11 = vadd.f32 %v8761_v45, %v8760_v46 }
0x12ca   :  { %v24037_v58 = vpop.f32.mrb[24].mxu1 }
0x12cb   :  { %27982 = vtanh.f32 %v24037_v58  ;;  %v9369_v55 = vpop.f32.mrb[25].mxu1 }
0x12cc   :  { %27984 = vtanh.f32 %v9369_v55 }
0x12ce   :  { %v24040_v59 = vpop.f32.mrb[26].mxu1 }
0x12cf   :  { %27986 = vtanh.f32 %v24040_v59  ;;  %v9381_v49 = vpop.f32.mrb[27].mxu1 }
0x12d0   :  { %27988 = vtanh.f32 %v9381_v49 }
0x12d5   :  { %v27983_v62 = vpop.eup %27982 }
0x12d6   :  { %v27985_v57 = vpop.eup %27984  ;;  %v9396_v0 = vmul.f32 %v27983_v62, %v28610_v37 }
0x12d7   :  { %v9395_v1 = vmul.f32 %v27985_v57, %v28608_v33 }
0x12d9   :  { %v27987_v4 = vpop.eup %27986  ;;  %v9399_v6 = vadd.f32 %v9396_v0, %v9395_v1 }
0x12da   :  { %v27989_v8 = vpop.eup %27988  ;;  %v9398_v51 = vmul.f32 %v27987_v4, %v28617_v50 }
0x12db   :  { %v9397_v21 = vmul.f32 %v27989_v8, %v28614_v48 }
0x12dd   :  { %v9400_v38 = vadd.f32 %v9399_v6, %v9397_v21 }
0x12df   :  { %v9401_v56 = vadd.f32 %v9400_v38, %v9398_v51 }
0x12e1   :  { %v9402_v30 = vrot.slane %v9401_v56, 4 }
0x12e3   :  { %v9403_v25 = vadd.f32 %v9402_v30, %v9401_v56 }
0x12e5   :  { %v9404_v32 = vrot.slane %v9403_v25, 2 }
0x12e7   :  { %v9405_v9 = vadd.f32 %v9404_v32, %v9403_v25 }
0x12e9   :  { %v9406_v15 = vrot.slane %v9405_v9, 1 }
0x12eb   :  { %v9407_v61 = vadd.f32 %v9406_v15, %v9405_v9 }
0x12ed   :  { %27990 = vtanh.f32 %v9407_v61 }
0x12f7   :  { %v27991_v18 = vpop.eup %27990 }
0x12f8   :  { %v9409_v60 = vmul.f32 %v27991_v18, %v28629_v7 }
0x12fa   :  { %v29298_v24 = vadd.f32 %v9409_v60, %v8762_v11 }
0x12fc   :  { %v9411_v26 = vmul.f32 %v29298_v24, %v29247_v17 }
0x12fe   :  { %v29303_v34 = vadd.f32 %v9411_v26, %v29196_v40 }
0x1300   :  { %9415 = vrot.lane.b32.xlu1 %v29303_v34, %s28400_s5  ;;  %v9425_v58 = vrot.slane %v29303_v34, %v28503_v20  ;;  %9413 = vrot.lane.b32.xlu0 %v29303_v34, %s28401_s12 }
0x1302   :  { %v9427_v29 = vmul.f32 %v9425_v58, %v28509_v23  ;;  %v9428_v55 = vmul.f32 %v9425_v58, %v28515_v28  ;;  %v9429_v59 = vmul.f32 %v9425_v58, %v28507_v22  ;;  %v9430_v17 = vmul.f32 %v9425_v58, %v28513_v27 }
0x1304   :  { %27992 = vtanh.f32 %v9427_v29 }
0x1305   :  { %27994 = vtanh.f32 %v9428_v55 }
0x1306   :  { %27996 = vtanh.f32 %v9429_v59 }
0x1307   :  { %27998 = vtanh.f32 %v9430_v17 }
0x130e   :  { %v27993_v49 = vpop.eup %27992 }
0x130f   :  { %v27995_v62 = vpop.eup %27994  ;;  %v9436_v57 = vand.u32 4294901760, %v27993_v49 }
0x1310   :  { %v27997_v0 = vpop.eup %27996  ;;  %v9439_v1 = vand.u32 4294901760, %v27995_v62 }
0x1311   :  { %v27999_v4 = vpop.eup %27998  ;;  %v9442_v6 = vand.u32 4294901760, %v27997_v0  ;;  %v9546_v8 = vsub.f32 %v27993_v49, %v9436_v57 }
0x1312   :  { %v26225_v21 = vpack.c.bf16 %v9439_v1, %v9436_v57  ;;  %v9445_v51 = vand.u32 4294901760, %v27999_v4  ;;  %v9553_v38 = vsub.f32 %v27995_v62, %v9439_v1 }
0x1313   :  { %v9547_v56 = vand.u32 4294901760, %v9546_v8  ;;  %v9560_v30 = vsub.f32 %v27997_v0, %v9442_v6 }
0x1314   :  { %26226 = vmatprep.subr.bf16.mxu0 %v26225_v21  ;;  %v26229_v25 = vpack.c.bf16 %v9445_v51, %v9442_v6  ;;  %v9554_v32 = vand.u32 4294901760, %v9553_v38  ;;  %v9567_v9 = vsub.f32 %v27999_v4, %v9445_v51  ;;  %v26241_v29 = vpack.c.bf16 %v9553_v38, %v9546_v8 }
0x1315   :  { %26228 = vmatpush3.bf16.msra.mxu0 %v26225_v21  ;;  %v9548_v15 = vsub.f32 %v9546_v8, %v9547_v56  ;;  %v9561_v61 = vand.u32 4294901760, %v9560_v30 }
0x1316   :  { %26230 = vmatprep.subr.bf16.mxu0 %v26229_v25  ;;  %v9555_v41 = vsub.f32 %v9553_v38, %v9554_v32  ;;  %v9568_v31 = vand.u32 4294901760, %v9567_v9  ;;  %v26245_v55 = vpack.c.bf16 %v9567_v9, %v9560_v30  ;;  %v26257_v59 = vpack.c.bf16 %v9554_v32, %v9547_v56 }
0x1317   :  { %v9549_v43 = vand.u32 4294901760, %v9548_v15  ;;  %v9562_v45 = vsub.f32 %v9560_v30, %v9561_v61 }
0x1318   :  { %v9556_v46 = vand.u32 4294901760, %v9555_v41  ;;  %v9569_v18 = vsub.f32 %v9567_v9, %v9568_v31  ;;  %v26261_v17 = vpack.c.bf16 %v9568_v31, %v9561_v61 }
0x1319   :  { %26232 = vmatpush3.bf16.msra.mxu0 %v26229_v25  ;;  %v9563_v11 = vand.u32 4294901760, %v9562_v45 }
0x131a   :  { %v26233_v60 = vpack.c.bf16 %v9556_v46, %v9549_v43  ;;  %v9570_v26 = vand.u32 4294901760, %v9569_v18 }
0x131c   :  { %24050 = vmatmul.mubr.f32.vlgmr.msra.gmra.mrb[28].mxu0 %v28565_v5  ;;  %26234 = vmatprep.subr.bf16.mxu0 %v26233_v60  ;;  %v26237_v58 = vpack.c.bf16 %v9570_v26, %v9563_v11 }
0x131d   :  { %26236 = vmatpush3.bf16.msra.mxu0 %v26233_v60  ;;  %24052 = vmatprep.mubr.f32.mxu0 %v28570_v10  ;;  %v9418_v60 = vmul.f32 %v29303_v34, %v28622_v2 }
0x131e   :  { %26238 = vmatprep.subr.bf16.mxu0 %v26237_v58 }
0x1320   :  { %24053 = vmatmul.mubr.f32.gmra.mrb[30].mxu0 %v28573_v19 }
0x1321   :  { %26240 = vmatpush3.bf16.msra.mxu0 %v26237_v58  ;;  %24063 = vmatprep.mubr.f32.mxu0 %v28483_v12 }
0x1322   :  { %26242 = vmatprep.subr.bf16.mxu0 %v26241_v29 }
0x1324   :  { %24064 = vmatmul.mubr.f32.vlgmr.msra.gmra.mrb[28].mxu0 %v28521_v35 }
0x1325   :  { %26244 = vmatpush3.bf16.msra.mxu0 %v26241_v29  ;;  %24066 = vmatprep.mubr.f32.mxu0 %v28523_v36 }
0x1326   :  { %26246 = vmatprep.subr.bf16.mxu0 %v26245_v55 }
0x1328   :  { %24067 = vmatmul.mubr.f32.gmra.mrb[30].mxu0 %v28529_v42 }
0x1329   :  { %26248 = vmatpush3.bf16.msra.mxu0 %v26245_v55  ;;  %24077 = vmatprep.mubr.f32.mxu0 %v28486_v13  ;;  %v8092_v55 = vstv %s29240_s7 }
0x132a   :  { %26250 = vmatprep.subr.bf16.mxu0 %v26225_v21 }
0x132c   :  { %24078 = vmatmul.mubr.f32.vlgmr.msra.gmra.mrb[28].mxu0 %v28527_v39 }
0x132d   :  { %26252 = vmatpush3.bf16.msra.mxu0 %v26225_v21  ;;  %24080 = vmatprep.mubr.f32.mxu0 %v28532_v44 }
0x132e   :  { %26254 = vmatprep.subr.bf16.mxu0 %v26229_v25 }
0x1330   :  { %24081 = vmatmul.mubr.f32.gmra.mrb[30].mxu0 %v28543_v52 }
0x1331   :  { %26256 = vmatpush3.bf16.msra.mxu0 %v26229_v25  ;;  %24091 = vmatprep.mubr.f32.mxu0 %v28489_v14 }
0x1332   :  { %26258 = vmatprep.subr.bf16.mxu0 %v26257_v59 }
0x1334   :  { %24092 = vmatmul.mubr.f32.vlgmr.msra.gmra.mrb[28].mxu0 %v28537_v47 }
0x1335   :  { %26260 = vmatpush3.bf16.msra.mxu0 %v26257_v59  ;;  %24094 = vmatprep.mubr.f32.mxu0 %v28546_v54 }
0x1336   :  { %26262 = vmatprep.subr.bf16.mxu0 %v26261_v17 }
0x1338   :  { %24095 = vmatmul.mubr.f32.gmra.mrb[30].mxu0 %v28558_v63 }
0x1339   :  { %26264 = vmatpush3.bf16.msra.mxu0 %v26261_v17  ;;  %24105 = vmatprep.mubr.f32.mxu0 %v28483_v12 }
0x133a   :  { %26266 = vmatprep.subr.bf16.mxu0 %v26225_v21 }
0x133c   :  { %24106 = vmatmul.mubr.f32.vlgmr.msra.gmra.mrb[28].mxu0 %v28521_v35 }
0x133d   :  { %26268 = vmatpush3.bf16.msra.mxu0 %v26225_v21  ;;  %24108 = vmatprep.mubr.f32.mxu0 %v28523_v36 }
0x133e   :  { %26270 = vmatprep.subr.bf16.mxu0 %v26229_v25 }
0x1340   :  { %24109 = vmatmul.mubr.f32.gmra.mrb[30].mxu0 %v28529_v42 }
0x1341   :  { %26272 = vmatpush3.bf16.msra.mxu0 %v26229_v25  ;;  %24119 = vmatprep.mubr.f32.mxu0 %v28483_v12 }
0x1344   :  { %24120 = vmatmul.mubr.f32.vlgmr.msra.gmra.mrb[28].mxu0 %v28521_v35 }
0x1345   :  { %24122 = vmatprep.mubr.f32.mxu0 %v28523_v36 }
0x1348   :  { %24123 = vmatmul.mubr.f32.gmra.mrb[30].mxu0 %v28529_v42 }
0x1349   :  { %24217 = vmatprep.mubr.f32.mxu0 %v28493_v16 }
0x1372   :  { %v9416_v45 = vpop.permute.xlu1 %9415  ;;  %v9414_v46 = vpop.permute.xlu0 %9413 }
0x1373   :  { %v9417_v18 = vadd.f32 %v9416_v45, %v9414_v46 }
0x1375   :  { %v9419_v11 = vmul.f32 %v9417_v18, %v28624_v3 }
0x1377   :  { %v9420_v58 = vadd.f32 %v9419_v11, %v9418_v60 }
0x1417   :  { %v24121_v49 = vpop.f32.mrb[28].mxu0 }
0x1418   :  { %28000 = vtanh.f32 %v24121_v49  ;;  %v10027_v62 = vpop.f32.mrb[29].mxu0 }
0x1419   :  { %28002 = vtanh.f32 %v10027_v62 }
0x141b   :  { %v24124_v57 = vpop.f32.mrb[30].mxu0 }
0x141c   :  { %28004 = vtanh.f32 %v24124_v57  ;;  %v10039_v0 = vpop.f32.mrb[31].mxu0 }
0x141d   :  { %28006 = vtanh.f32 %v10039_v0 }
0x1422   :  { %v28001_v1 = vpop.eup %28000 }
0x1423   :  { %v28003_v4 = vpop.eup %28002  ;;  %v10054_v6 = vmul.f32 %v28001_v1, %v28610_v37 }
0x1424   :  { %v10053_v8 = vmul.f32 %v28003_v4, %v28608_v33 }
0x1426   :  { %v28005_v21 = vpop.eup %28004  ;;  %v10057_v51 = vadd.f32 %v10054_v6, %v10053_v8 }
0x1427   :  { %v28007_v38 = vpop.eup %28006  ;;  %v10056_v30 = vmul.f32 %v28005_v21, %v28617_v50 }
0x1428   :  { %v10055_v56 = vmul.f32 %v28007_v38, %v28614_v48 }
0x142a   :  { %v10058_v25 = vadd.f32 %v10057_v51, %v10055_v56 }
0x142c   :  { %v10059_v32 = vadd.f32 %v10058_v25, %v10056_v30 }
0x142e   :  { %v10060_v9 = vrot.slane %v10059_v32, 4 }
0x1430   :  { %v10061_v15 = vadd.f32 %v10060_v9, %v10059_v32 }
0x1432   :  { %v10062_v61 = vrot.slane %v10061_v15, 2 }
0x1434   :  { %v10063_v41 = vadd.f32 %v10062_v61, %v10061_v15 }
0x1436   :  { %v10064_v31 = vrot.slane %v10063_v41, 1 }
0x1438   :  { %v10065_v43 = vadd.f32 %v10064_v31, %v10063_v41 }
0x143a   :  { %28008 = vtanh.f32 %v10065_v43 }
0x1444   :  { %v28009_v26 = vpop.eup %28008 }
0x1445   :  { %v10067_v29 = vmul.f32 %v28009_v26, %v28629_v7 }
0x1447   :  { %v29348_v59 = vadd.f32 %v10067_v29, %v9420_v58 }
0x1449   :  { %v10069_v17 = vmul.f32 %v29348_v59, %v8092_v55 }
0x144b   :  { %v29352_v49 = vadd.f32 %v10069_v17, %v29196_v40 }
0x144d   :  { %10073 = vrot.lane.b32.xlu1 %v29352_v49, %s28400_s5  ;;  %v10083_v62 = vrot.slane %v29352_v49, %v28503_v20  ;;  %10071 = vrot.lane.b32.xlu0 %v29352_v49, %s28401_s12 }
0x144f   :  { %v10085_v34 = vmul.f32 %v10083_v62, %v28509_v23  ;;  %v10086_v57 = vmul.f32 %v10083_v62, %v28515_v28  ;;  %v10087_v0 = vmul.f32 %v10083_v62, %v28507_v22  ;;  %v10088_v1 = vmul.f32 %v10083_v62, %v28513_v27 }
0x1451   :  { %28010 = vtanh.f32 %v10085_v34 }
0x1452   :  { %28012 = vtanh.f32 %v10086_v57 }
0x1453   :  { %28014 = vtanh.f32 %v10087_v0 }
0x1454   :  { %28016 = vtanh.f32 %v10088_v1 }
0x145b   :  { %v28011_v4 = vpop.eup %28010 }
0x145c   :  { %v28013_v6 = vpop.eup %28012  ;;  %v10094_v8 = vand.u32 4294901760, %v28011_v4 }
0x145d   :  { %v28015_v21 = vpop.eup %28014  ;;  %v10097_v51 = vand.u32 4294901760, %v28013_v6 }
0x145e   :  { %v28017_v38 = vpop.eup %28016  ;;  %v10100_v56 = vand.u32 4294901760, %v28015_v21  ;;  %v10204_v30 = vsub.f32 %v28011_v4, %v10094_v8 }
0x145f   :  { %v26273_v25 = vpack.c.bf16 %v10097_v51, %v10094_v8  ;;  %v10103_v32 = vand.u32 4294901760, %v28017_v38  ;;  %v10211_v9 = vsub.f32 %v28013_v6, %v10097_v51 }
0x1460   :  { %v10205_v15 = vand.u32 4294901760, %v10204_v30  ;;  %v10218_v61 = vsub.f32 %v28015_v21, %v10100_v56 }
0x1461   :  { %26274 = vmatprep.subr.bf16.mxu1 %v26273_v25  ;;  %v26277_v41 = vpack.c.bf16 %v10103_v32, %v10100_v56  ;;  %v10212_v31 = vand.u32 4294901760, %v10211_v9  ;;  %v10225_v43 = vsub.f32 %v28017_v38, %v10103_v32  ;;  %v26289_v57 = vpack.c.bf16 %v10211_v9, %v10204_v30 }
0x1462   :  { %26276 = vmatpush3.bf16.msra.mxu1 %v26273_v25  ;;  %v10206_v45 = vsub.f32 %v10204_v30, %v10205_v15  ;;  %v10219_v46 = vand.u32 4294901760, %v10218_v61 }
0x1463   :  { %26278 = vmatprep.subr.bf16.mxu1 %v26277_v41  ;;  %v10213_v18 = vsub.f32 %v10211_v9, %v10212_v31  ;;  %v10226_v11 = vand.u32 4294901760, %v10225_v43  ;;  %v26293_v0 = vpack.c.bf16 %v10225_v43, %v10218_v61  ;;  %v26305_v1 = vpack.c.bf16 %v10212_v31, %v10205_v15 }
0x1464   :  { %v10207_v60 = vand.u32 4294901760, %v10206_v45  ;;  %v10220_v26 = vsub.f32 %v10218_v61, %v10219_v46 }
0x1465   :  { %v10214_v58 = vand.u32 4294901760, %v10213_v18  ;;  %v10227_v29 = vsub.f32 %v10225_v43, %v10226_v11  ;;  %v26309_v4 = vpack.c.bf16 %v10226_v11, %v10219_v46 }
0x1466   :  { %26280 = vmatpush3.bf16.msra.mxu1 %v26277_v41  ;;  %v10221_v55 = vand.u32 4294901760, %v10220_v26 }
0x1467   :  { %v26281_v17 = vpack.c.bf16 %v10214_v58, %v10207_v60  ;;  %v10228_v62 = vand.u32 4294901760, %v10227_v29 }
0x1469   :  { %24134 = vmatmul.mubr.f32.vlgmr.msra.gmra.mrb[28].mxu1 %v28565_v5  ;;  %26282 = vmatprep.subr.bf16.mxu1 %v26281_v17  ;;  %v26285_v34 = vpack.c.bf16 %v10228_v62, %v10221_v55 }
0x146a   :  { %26284 = vmatpush3.bf16.msra.mxu1 %v26281_v17  ;;  %24136 = vmatprep.mubr.f32.mxu1 %v28570_v10  ;;  %v10727_v17 = vadd.f32 %v29348_v59, %v29298_v24 }
0x146b   :  { %26286 = vmatprep.subr.bf16.mxu1 %v26285_v34 }
0x146d   :  { %24137 = vmatmul.mubr.f32.gmra.mrb[30].mxu1 %v28573_v19 }
0x146e   :  { %26288 = vmatpush3.bf16.msra.mxu1 %v26285_v34  ;;  %24147 = vmatprep.mubr.f32.mxu1 %v28483_v12  ;;  %v10728_v34 = vmul.f32 2.0, %v10727_v17 }
0x146f   :  { %26290 = vmatprep.subr.bf16.mxu1 %v26289_v57 }
0x1471   :  { %24148 = vmatmul.mubr.f32.vlgmr.msra.gmra.mrb[28].mxu1 %v28521_v35 }
0x1472   :  { %26292 = vmatpush3.bf16.msra.mxu1 %v26289_v57  ;;  %24150 = vmatprep.mubr.f32.mxu1 %v28523_v36  ;;  %v10076_v57 = vmul.f32 %v29352_v49, %v28622_v2 }
0x1473   :  { %26294 = vmatprep.subr.bf16.mxu1 %v26293_v0 }
0x1475   :  { %24151 = vmatmul.mubr.f32.gmra.mrb[30].mxu1 %v28529_v42 }
0x1476   :  { %26296 = vmatpush3.bf16.msra.mxu1 %v26293_v0  ;;  %24161 = vmatprep.mubr.f32.mxu1 %v28486_v13 }
0x1477   :  { %26298 = vmatprep.subr.bf16.mxu1 %v26273_v25 }
0x1479   :  { %24162 = vmatmul.mubr.f32.vlgmr.msra.gmra.mrb[28].mxu1 %v28527_v39 }
0x147a   :  { %26300 = vmatpush3.bf16.msra.mxu1 %v26273_v25  ;;  %24164 = vmatprep.mubr.f32.mxu1 %v28532_v44 }
0x147b   :  { %26302 = vmatprep.subr.bf16.mxu1 %v26277_v41 }
0x147d   :  { %24165 = vmatmul.mubr.f32.gmra.mrb[30].mxu1 %v28543_v52 }
0x147e   :  { %26304 = vmatpush3.bf16.msra.mxu1 %v26277_v41  ;;  %24175 = vmatprep.mubr.f32.mxu1 %v28489_v14 }
0x147f   :  { %26306 = vmatprep.subr.bf16.mxu1 %v26305_v1 }
0x1481   :  { %24176 = vmatmul.mubr.f32.vlgmr.msra.gmra.mrb[28].mxu1 %v28537_v47 }
0x1482   :  { %26308 = vmatpush3.bf16.msra.mxu1 %v26305_v1  ;;  %24178 = vmatprep.mubr.f32.mxu1 %v28546_v54 }
0x1483   :  { %26310 = vmatprep.subr.bf16.mxu1 %v26309_v4 }
0x1485   :  { %24179 = vmatmul.mubr.f32.gmra.mrb[30].mxu1 %v28558_v63 }
0x1486   :  { %26312 = vmatpush3.bf16.msra.mxu1 %v26309_v4  ;;  %24189 = vmatprep.mubr.f32.mxu1 %v28483_v12 }
0x1487   :  { %26314 = vmatprep.subr.bf16.mxu1 %v26273_v25 }
0x1489   :  { %24190 = vmatmul.mubr.f32.vlgmr.msra.gmra.mrb[28].mxu1 %v28521_v35 }
0x148a   :  { %26316 = vmatpush3.bf16.msra.mxu1 %v26273_v25  ;;  %24192 = vmatprep.mubr.f32.mxu1 %v28523_v36 }
0x148b   :  { %26318 = vmatprep.subr.bf16.mxu1 %v26277_v41 }
0x148d   :  { %24193 = vmatmul.mubr.f32.gmra.mrb[30].mxu1 %v28529_v42 }
0x148e   :  { %26320 = vmatpush3.bf16.msra.mxu1 %v26277_v41  ;;  %24203 = vmatprep.mubr.f32.mxu1 %v28483_v12 }
0x1491   :  { %24204 = vmatmul.mubr.f32.vlgmr.msra.gmra.mrb[28].mxu1 %v28521_v35 }
0x1492   :  { %24206 = vmatprep.mubr.f32.mxu1 %v28523_v36 }
0x1495   :  { %24207 = vmatmul.mubr.f32.gmra.mrb[30].mxu1 %v28529_v42 }
0x1496   :  { %24301 = vmatprep.mubr.f32.mxu1 %v28493_v16 }
0x14bf   :  { %v10074_v58 = vpop.permute.xlu1 %10073  ;;  %v10072_v29 = vpop.permute.xlu0 %10071 }
0x14c0   :  { %v10075_v55 = vadd.f32 %v10074_v58, %v10072_v29 }
0x14c2   :  { %v10077_v62 = vmul.f32 %v10075_v55, %v28624_v3 }
0x14c4   :  { %v10078_v1 = vadd.f32 %v10077_v62, %v10076_v57 }
0x1564   :  { %v24205_v6 = vpop.f32.mrb[28].mxu1 }
0x1565   :  { %28018 = vtanh.f32 %v24205_v6  ;;  %v10685_v8 = vpop.f32.mrb[29].mxu1  ;;  %v10729_v6 = vadd.f32 %v10728_v34, %v29249_v53 }
0x1566   :  { %28020 = vtanh.f32 %v10685_v8 }
0x1568   :  { %v24208_v21 = vpop.f32.mrb[30].mxu1 }
0x1569   :  { %28022 = vtanh.f32 %v24208_v21  ;;  %v10697_v51 = vpop.f32.mrb[31].mxu1  ;;  %v8096_v21 = vstv %s8095_s9 }
0x156a   :  { %28024 = vtanh.f32 %v10697_v51 }
0x156f   :  { %v28019_v38 = vpop.eup %28018 }
0x1570   :  { %v28021_v56 = vpop.eup %28020  ;;  %v10712_v30 = vmul.f32 %v28019_v38, %v28610_v37 }
0x1571   :  { %v10711_v25 = vmul.f32 %v28021_v56, %v28608_v33 }
0x1573   :  { %v28023_v32 = vpop.eup %28022  ;;  %v10715_v9 = vadd.f32 %v10712_v30, %v10711_v25 }
0x1574   :  { %v28025_v15 = vpop.eup %28024  ;;  %v10714_v41 = vmul.f32 %v28023_v32, %v28617_v50 }
0x1575   :  { %v10713_v61 = vmul.f32 %v28025_v15, %v28614_v48 }
0x1577   :  { %v10716_v31 = vadd.f32 %v10715_v9, %v10713_v61 }
0x1579   :  { %v10717_v43 = vadd.f32 %v10716_v31, %v10714_v41 }
0x157b   :  { %v10718_v45 = vrot.slane %v10717_v43, 4 }
0x157d   :  { %v10719_v46 = vadd.f32 %v10718_v45, %v10717_v43 }
0x157f   :  { %v10720_v18 = vrot.slane %v10719_v46, 2 }
0x1581   :  { %v10721_v11 = vadd.f32 %v10720_v18, %v10719_v46 }
0x1583   :  { %v10722_v60 = vrot.slane %v10721_v11, 1 }
0x1585   :  { %v10723_v26 = vadd.f32 %v10722_v60, %v10721_v11 }
0x1587   :  { %28026 = vtanh.f32 %v10723_v26 }
0x1591   :  { %v28027_v0 = vpop.eup %28026 }
0x1592   :  { %v10725_v4 = vmul.f32 %v28027_v0, %v28629_v7 }
0x1594   :  { %v10726_v8 = vadd.f32 %v10725_v4, %v10078_v1 }
0x1596   :  { %v10730_v51 = vadd.f32 %v10729_v6, %v10726_v8 }
0x1598   :  { %v10731_v38 = vmul.f32 %v10730_v51, %v8096_v21 }
0x159a   :  { %v29401_v56 = vadd.f32 %v10731_v38, %v29196_v40 }
0x159c   :  { %10743 = vrot.lane.b32.xlu1 %v29401_v56, %s28400_s5  ;;  %10733 = vst [vmem:[%s30228_s6 + $0x3] sm:$0x1] %v29401_v56  ;;  %10741 = vrot.lane.b32.xlu0 %v29401_v56, %s28401_s12  ;;  %v10753_v53 = vrot.slane %v29401_v56, %v28503_v20 }
0x159e   :  { %v10755_v24 = vmul.f32 %v10753_v53, %v28509_v23  ;;  %v10756_v59 = vmul.f32 %v10753_v53, %v28515_v28  ;;  %v10757_v40 = vmul.f32 %v10753_v53, %v28507_v22  ;;  %v10758_v49 = vmul.f32 %v10753_v53, %v28513_v27 }
0x15a0   :  { %28028 = vtanh.f32 %v10755_v24 }
0x15a1   :  { %28030 = vtanh.f32 %v10756_v59 }
0x15a2   :  { %28032 = vtanh.f32 %v10757_v40 }
0x15a3   :  { %28034 = vtanh.f32 %v10758_v49 }
0x15aa   :  { %v28029_v30 = vpop.eup %28028 }
0x15ab   :  { %v28031_v25 = vpop.eup %28030  ;;  %v10764_v32 = vand.u32 4294901760, %v28029_v30 }
0x15ac   :  { %v28033_v9 = vpop.eup %28032  ;;  %v10767_v15 = vand.u32 4294901760, %v28031_v25 }
0x15ad   :  { %v28035_v61 = vpop.eup %28034  ;;  %v10770_v41 = vand.u32 4294901760, %v28033_v9  ;;  %v10874_v31 = vsub.f32 %v28029_v30, %v10764_v32 }
0x15ae   :  { %v26321_v43 = vpack.c.bf16 %v10767_v15, %v10764_v32  ;;  %v10773_v45 = vand.u32 4294901760, %v28035_v61  ;;  %v10881_v46 = vsub.f32 %v28031_v25, %v10767_v15 }
0x15af   :  { %v10875_v18 = vand.u32 4294901760, %v10874_v31  ;;  %v10888_v11 = vsub.f32 %v28033_v9, %v10770_v41 }
0x15b0   :  { %26322 = vmatprep.subr.bf16.mxu0 %v26321_v43  ;;  %v26325_v60 = vpack.c.bf16 %v10773_v45, %v10770_v41  ;;  %v10882_v26 = vand.u32 4294901760, %v10881_v46  ;;  %v10895_v58 = vsub.f32 %v28035_v61, %v10773_v45  ;;  %v26337_v51 = vpack.c.bf16 %v10881_v46, %v10874_v31 }
0x15b1   :  { %26324 = vmatpush3.bf16.msra.mxu0 %v26321_v43  ;;  %v10876_v29 = vsub.f32 %v10874_v31, %v10875_v18  ;;  %v10889_v55 = vand.u32 4294901760, %v10888_v11 }
0x15b2   :  { %26326 = vmatprep.subr.bf16.mxu0 %v26325_v60  ;;  %v10883_v17 = vsub.f32 %v10881_v46, %v10882_v26  ;;  %v10896_v62 = vand.u32 4294901760, %v10895_v58  ;;  %v26341_v38 = vpack.c.bf16 %v10895_v58, %v10888_v11  ;;  %v26353_v53 = vpack.c.bf16 %v10882_v26, %v10875_v18 }
0x15b3   :  { %v10877_v34 = vand.u32 4294901760, %v10876_v29  ;;  %v10890_v57 = vsub.f32 %v10888_v11, %v10889_v55 }
0x15b4   :  { %v10884_v0 = vand.u32 4294901760, %v10883_v17  ;;  %v10897_v1 = vsub.f32 %v10895_v58, %v10896_v62  ;;  %v26357_v24 = vpack.c.bf16 %v10896_v62, %v10889_v55 }
0x15b5   :  { %26328 = vmatpush3.bf16.msra.mxu0 %v26325_v60  ;;  %v10891_v4 = vand.u32 4294901760, %v10890_v57 }
0x15b6   :  { %v26329_v6 = vpack.c.bf16 %v10884_v0, %v10877_v34  ;;  %v10898_v8 = vand.u32 4294901760, %v10897_v1  ;;  %v10746_v0 = vmul.f32 %v29401_v56, %v28622_v2 }
0x15b8   :  { %24218 = vmatmul.mubr.f32.vlgmr.msra.gmra.mrb[32].mxu0 %v28565_v5  ;;  %26330 = vmatprep.subr.bf16.mxu0 %v26329_v6  ;;  %v26333_v21 = vpack.c.bf16 %v10898_v8, %v10891_v4  ;;  %v29452_v8 = vstv %s10737_s13 }
0x15b9   :  { %26332 = vmatpush3.bf16.msra.mxu0 %v26329_v6  ;;  %24220 = vmatprep.mubr.f32.mxu0 %v28570_v10 }
0x15ba   :  { %26334 = vmatprep.subr.bf16.mxu0 %v26333_v21 }
0x15bc   :  { %24221 = vmatmul.mubr.f32.gmra.mrb[34].mxu0 %v28573_v19 }
0x15bd   :  { %26336 = vmatpush3.bf16.msra.mxu0 %v26333_v21  ;;  %24231 = vmatprep.mubr.f32.mxu0 %v28483_v12 }
0x15be   :  { %26338 = vmatprep.subr.bf16.mxu0 %v26337_v51 }
0x15c0   :  { %24232 = vmatmul.mubr.f32.vlgmr.msra.gmra.mrb[32].mxu0 %v28521_v35 }
0x15c1   :  { %26340 = vmatpush3.bf16.msra.mxu0 %v26337_v51  ;;  %24234 = vmatprep.mubr.f32.mxu0 %v28523_v36 }
0x15c2   :  { %26342 = vmatprep.subr.bf16.mxu0 %v26341_v38 }
0x15c4   :  { %24235 = vmatmul.mubr.f32.gmra.mrb[34].mxu0 %v28529_v42 }
0x15c5   :  { %26344 = vmatpush3.bf16.msra.mxu0 %v26341_v38  ;;  %24245 = vmatprep.mubr.f32.mxu0 %v28486_v13 }
0x15c6   :  { %26346 = vmatprep.subr.bf16.mxu0 %v26321_v43 }
0x15c8   :  { %24246 = vmatmul.mubr.f32.vlgmr.msra.gmra.mrb[32].mxu0 %v28527_v39 }
0x15c9   :  { %26348 = vmatpush3.bf16.msra.mxu0 %v26321_v43  ;;  %24248 = vmatprep.mubr.f32.mxu0 %v28532_v44 }
0x15ca   :  { %26350 = vmatprep.subr.bf16.mxu0 %v26325_v60 }
0x15cc   :  { %24249 = vmatmul.mubr.f32.gmra.mrb[34].mxu0 %v28543_v52 }
0x15cd   :  { %26352 = vmatpush3.bf16.msra.mxu0 %v26325_v60  ;;  %24259 = vmatprep.mubr.f32.mxu0 %v28489_v14 }
0x15ce   :  { %26354 = vmatprep.subr.bf16.mxu0 %v26353_v53 }
0x15d0   :  { %24260 = vmatmul.mubr.f32.vlgmr.msra.gmra.mrb[32].mxu0 %v28537_v47 }
0x15d1   :  { %26356 = vmatpush3.bf16.msra.mxu0 %v26353_v53  ;;  %24262 = vmatprep.mubr.f32.mxu0 %v28546_v54 }
0x15d2   :  { %26358 = vmatprep.subr.bf16.mxu0 %v26357_v24 }
0x15d4   :  { %24263 = vmatmul.mubr.f32.gmra.mrb[34].mxu0 %v28558_v63 }
0x15d5   :  { %26360 = vmatpush3.bf16.msra.mxu0 %v26357_v24  ;;  %24273 = vmatprep.mubr.f32.mxu0 %v28483_v12 }
0x15d6   :  { %26362 = vmatprep.subr.bf16.mxu0 %v26321_v43 }
0x15d8   :  { %24274 = vmatmul.mubr.f32.vlgmr.msra.gmra.mrb[32].mxu0 %v28521_v35 }
0x15d9   :  { %26364 = vmatpush3.bf16.msra.mxu0 %v26321_v43  ;;  %24276 = vmatprep.mubr.f32.mxu0 %v28523_v36 }
0x15da   :  { %26366 = vmatprep.subr.bf16.mxu0 %v26325_v60 }
0x15dc   :  { %24277 = vmatmul.mubr.f32.gmra.mrb[34].mxu0 %v28529_v42 }
0x15dd   :  { %26368 = vmatpush3.bf16.msra.mxu0 %v26325_v60  ;;  %24287 = vmatprep.mubr.f32.mxu0 %v28483_v12 }
0x15e0   :  { %24288 = vmatmul.mubr.f32.vlgmr.msra.gmra.mrb[32].mxu0 %v28521_v35 }
0x15e1   :  { %24290 = vmatprep.mubr.f32.mxu0 %v28523_v36 }
0x15e4   :  { %24291 = vmatmul.mubr.f32.gmra.mrb[34].mxu0 %v28529_v42 }
0x15e5   :  { %24385 = vmatprep.mubr.f32.mxu0 %v28493_v16 }
0x160e   :  { %v10744_v17 = vpop.permute.xlu1 %10743  ;;  %v10742_v62 = vpop.permute.xlu0 %10741 }
0x160f   :  { %v10745_v34 = vadd.f32 %v10744_v17, %v10742_v62 }
0x1611   :  { %v10747_v57 = vmul.f32 %v10745_v34, %v28624_v3 }
0x1613   :  { %v10748_v4 = vadd.f32 %v10747_v57, %v10746_v0 }
0x16b3   :  { %v24289_v59 = vpop.f32.mrb[32].mxu0 }
0x16b4   :  { %28036 = vtanh.f32 %v24289_v59  ;;  %v11355_v40 = vpop.f32.mrb[33].mxu0 }
0x16b5   :  { %28038 = vtanh.f32 %v11355_v40 }
0x16b7   :  { %v24292_v49 = vpop.f32.mrb[34].mxu0 }
0x16b8   :  { %28040 = vtanh.f32 %v24292_v49  ;;  %v11367_v30 = vpop.f32.mrb[35].mxu0 }
0x16b9   :  { %28042 = vtanh.f32 %v11367_v30 }
0x16be   :  { %v28037_v25 = vpop.eup %28036 }
0x16bf   :  { %v28039_v32 = vpop.eup %28038  ;;  %v11382_v9 = vmul.f32 %v28037_v25, %v28610_v37 }
0x16c0   :  { %v11381_v15 = vmul.f32 %v28039_v32, %v28608_v33 }
0x16c2   :  { %v28041_v61 = vpop.eup %28040  ;;  %v11385_v41 = vadd.f32 %v11382_v9, %v11381_v15 }
0x16c3   :  { %v28043_v31 = vpop.eup %28042  ;;  %v11384_v45 = vmul.f32 %v28041_v61, %v28617_v50 }
0x16c4   :  { %v11383_v43 = vmul.f32 %v28043_v31, %v28614_v48 }
0x16c6   :  { %v11386_v46 = vadd.f32 %v11385_v41, %v11383_v43 }
0x16c8   :  { %v11387_v18 = vadd.f32 %v11386_v46, %v11384_v45 }
0x16ca   :  { %v11388_v11 = vrot.slane %v11387_v18, 4 }
0x16cc   :  { %v11389_v60 = vadd.f32 %v11388_v11, %v11387_v18 }
0x16ce   :  { %v11390_v26 = vrot.slane %v11389_v60, 2 }
0x16d0   :  { %v11391_v58 = vadd.f32 %v11390_v26, %v11389_v60 }
0x16d2   :  { %v11392_v29 = vrot.slane %v11391_v58, 1 }
0x16d4   :  { %v11393_v55 = vadd.f32 %v11392_v29, %v11391_v58 }
0x16d6   :  { %28044 = vtanh.f32 %v11393_v55 }
0x16e0   :  { %v28045_v1 = vpop.eup %28044 }
0x16e1   :  { %v11395_v6 = vmul.f32 %v28045_v1, %v28629_v7 }
0x16e3   :  { %v29454_v21 = vadd.f32 %v11395_v6, %v10748_v4 }
0x16e5   :  { %v11397_v51 = vmul.f32 %v29454_v21, %v29452_v8 }
0x16e7   :  { %v29459_v38 = vadd.f32 %v11397_v51, %v29401_v56 }
0x16e9   :  { %11401 = vrot.lane.b32.xlu1 %v29459_v38, %s28400_s5  ;;  %v11411_v53 = vrot.slane %v29459_v38, %v28503_v20  ;;  %11399 = vrot.lane.b32.xlu0 %v29459_v38, %s28401_s12 }
0x16eb   :  { %v11413_v24 = vmul.f32 %v11411_v53, %v28509_v23  ;;  %v11414_v59 = vmul.f32 %v11411_v53, %v28515_v28  ;;  %v11415_v40 = vmul.f32 %v11411_v53, %v28507_v22  ;;  %v11416_v49 = vmul.f32 %v11411_v53, %v28513_v27 }
0x16ed   :  { %28046 = vtanh.f32 %v11413_v24 }
0x16ee   :  { %28048 = vtanh.f32 %v11414_v59 }
0x16ef   :  { %28050 = vtanh.f32 %v11415_v40 }
0x16f0   :  { %28052 = vtanh.f32 %v11416_v49 }
0x16f7   :  { %v28047_v30 = vpop.eup %28046 }
0x16f8   :  { %v28049_v25 = vpop.eup %28048  ;;  %v11422_v32 = vand.u32 4294901760, %v28047_v30 }
0x16f9   :  { %v28051_v9 = vpop.eup %28050  ;;  %v11425_v15 = vand.u32 4294901760, %v28049_v25 }
0x16fa   :  { %v28053_v61 = vpop.eup %28052  ;;  %v11428_v41 = vand.u32 4294901760, %v28051_v9  ;;  %v11532_v31 = vsub.f32 %v28047_v30, %v11422_v32 }
0x16fb   :  { %v26369_v43 = vpack.c.bf16 %v11425_v15, %v11422_v32  ;;  %v11431_v45 = vand.u32 4294901760, %v28053_v61  ;;  %v11539_v46 = vsub.f32 %v28049_v25, %v11425_v15 }
0x16fc   :  { %v11533_v18 = vand.u32 4294901760, %v11532_v31  ;;  %v11546_v11 = vsub.f32 %v28051_v9, %v11428_v41 }
0x16fd   :  { %26370 = vmatprep.subr.bf16.mxu1 %v26369_v43  ;;  %v26373_v60 = vpack.c.bf16 %v11431_v45, %v11428_v41  ;;  %v11540_v26 = vand.u32 4294901760, %v11539_v46  ;;  %v11553_v58 = vsub.f32 %v28053_v61, %v11431_v45  ;;  %v26385_v24 = vpack.c.bf16 %v11539_v46, %v11532_v31 }
0x16fe   :  { %26372 = vmatpush3.bf16.msra.mxu1 %v26369_v43  ;;  %v11534_v29 = vsub.f32 %v11532_v31, %v11533_v18  ;;  %v11547_v55 = vand.u32 4294901760, %v11546_v11 }
0x16ff   :  { %26374 = vmatprep.subr.bf16.mxu1 %v26373_v60  ;;  %v11541_v17 = vsub.f32 %v11539_v46, %v11540_v26  ;;  %v11554_v62 = vand.u32 4294901760, %v11553_v58  ;;  %v26389_v59 = vpack.c.bf16 %v11553_v58, %v11546_v11  ;;  %v26401_v40 = vpack.c.bf16 %v11540_v26, %v11533_v18 }
0x1700   :  { %v11535_v34 = vand.u32 4294901760, %v11534_v29  ;;  %v11548_v57 = vsub.f32 %v11546_v11, %v11547_v55 }
0x1701   :  { %v11542_v0 = vand.u32 4294901760, %v11541_v17  ;;  %v11555_v1 = vsub.f32 %v11553_v58, %v11554_v62  ;;  %v26405_v49 = vpack.c.bf16 %v11554_v62, %v11547_v55 }
0x1702   :  { %26376 = vmatpush3.bf16.msra.mxu1 %v26373_v60  ;;  %v11549_v4 = vand.u32 4294901760, %v11548_v57 }
0x1703   :  { %v26377_v6 = vpack.c.bf16 %v11542_v0, %v11535_v34  ;;  %v11556_v51 = vand.u32 4294901760, %v11555_v1 }
0x1705   :  { %24302 = vmatmul.mubr.f32.vlgmr.msra.gmra.mrb[32].mxu1 %v28565_v5  ;;  %26378 = vmatprep.subr.bf16.mxu1 %v26377_v6  ;;  %v26381_v53 = vpack.c.bf16 %v11556_v51, %v11549_v4 }
0x1706   :  { %26380 = vmatpush3.bf16.msra.mxu1 %v26377_v6  ;;  %24304 = vmatprep.mubr.f32.mxu1 %v28570_v10  ;;  %v11404_v6 = vmul.f32 %v29459_v38, %v28622_v2 }
0x1707   :  { %26382 = vmatprep.subr.bf16.mxu1 %v26381_v53 }
0x1709   :  { %24305 = vmatmul.mubr.f32.gmra.mrb[34].mxu1 %v28573_v19 }
0x170a   :  { %26384 = vmatpush3.bf16.msra.mxu1 %v26381_v53  ;;  %24315 = vmatprep.mubr.f32.mxu1 %v28483_v12 }
0x170b   :  { %26386 = vmatprep.subr.bf16.mxu1 %v26385_v24 }
0x170d   :  { %24316 = vmatmul.mubr.f32.vlgmr.msra.gmra.mrb[32].mxu1 %v28521_v35 }
0x170e   :  { %26388 = vmatpush3.bf16.msra.mxu1 %v26385_v24  ;;  %24318 = vmatprep.mubr.f32.mxu1 %v28523_v36 }
0x170f   :  { %26390 = vmatprep.subr.bf16.mxu1 %v26389_v59 }
0x1711   :  { %24319 = vmatmul.mubr.f32.gmra.mrb[34].mxu1 %v28529_v42 }
0x1712   :  { %26392 = vmatpush3.bf16.msra.mxu1 %v26389_v59  ;;  %24329 = vmatprep.mubr.f32.mxu1 %v28486_v13 }
0x1713   :  { %26394 = vmatprep.subr.bf16.mxu1 %v26369_v43 }
0x1715   :  { %24330 = vmatmul.mubr.f32.vlgmr.msra.gmra.mrb[32].mxu1 %v28527_v39 }
0x1716   :  { %26396 = vmatpush3.bf16.msra.mxu1 %v26369_v43  ;;  %24332 = vmatprep.mubr.f32.mxu1 %v28532_v44 }
0x1717   :  { %26398 = vmatprep.subr.bf16.mxu1 %v26373_v60 }
0x1719   :  { %24333 = vmatmul.mubr.f32.gmra.mrb[34].mxu1 %v28543_v52 }
0x171a   :  { %26400 = vmatpush3.bf16.msra.mxu1 %v26373_v60  ;;  %24343 = vmatprep.mubr.f32.mxu1 %v28489_v14 }
0x171b   :  { %26402 = vmatprep.subr.bf16.mxu1 %v26401_v40 }
0x171d   :  { %24344 = vmatmul.mubr.f32.vlgmr.msra.gmra.mrb[32].mxu1 %v28537_v47 }
0x171e   :  { %26404 = vmatpush3.bf16.msra.mxu1 %v26401_v40  ;;  %24346 = vmatprep.mubr.f32.mxu1 %v28546_v54 }
0x171f   :  { %26406 = vmatprep.subr.bf16.mxu1 %v26405_v49 }
0x1721   :  { %24347 = vmatmul.mubr.f32.gmra.mrb[34].mxu1 %v28558_v63 }
0x1722   :  { %26408 = vmatpush3.bf16.msra.mxu1 %v26405_v49  ;;  %24357 = vmatprep.mubr.f32.mxu1 %v28483_v12 }
0x1723   :  { %26410 = vmatprep.subr.bf16.mxu1 %v26369_v43 }
0x1725   :  { %24358 = vmatmul.mubr.f32.vlgmr.msra.gmra.mrb[32].mxu1 %v28521_v35 }
0x1726   :  { %26412 = vmatpush3.bf16.msra.mxu1 %v26369_v43  ;;  %24360 = vmatprep.mubr.f32.mxu1 %v28523_v36 }
0x1727   :  { %26414 = vmatprep.subr.bf16.mxu1 %v26373_v60 }
0x1729   :  { %24361 = vmatmul.mubr.f32.gmra.mrb[34].mxu1 %v28529_v42 }
0x172a   :  { %26416 = vmatpush3.bf16.msra.mxu1 %v26373_v60  ;;  %24371 = vmatprep.mubr.f32.mxu1 %v28483_v12 }
0x172d   :  { %24372 = vmatmul.mubr.f32.vlgmr.msra.gmra.mrb[32].mxu1 %v28521_v35 }
0x172e   :  { %24374 = vmatprep.mubr.f32.mxu1 %v28523_v36 }
0x1731   :  { %24375 = vmatmul.mubr.f32.gmra.mrb[34].mxu1 %v28529_v42 }
0x1732   :  { %24469 = vmatprep.mubr.f32.mxu1 %v28493_v16 }
0x175b   :  { %v11402_v57 = vpop.permute.xlu1 %11401  ;;  %v11400_v0 = vpop.permute.xlu0 %11399 }
0x175c   :  { %v11403_v1 = vadd.f32 %v11402_v57, %v11400_v0 }
0x175e   :  { %v11405_v4 = vmul.f32 %v11403_v1, %v28624_v3 }
0x1760   :  { %v11406_v53 = vadd.f32 %v11405_v4, %v11404_v6 }
0x1800   :  { %v24373_v30 = vpop.f32.mrb[32].mxu1 }
0x1801   :  { %28054 = vtanh.f32 %v24373_v30  ;;  %v12013_v25 = vpop.f32.mrb[33].mxu1 }
0x1802   :  { %28056 = vtanh.f32 %v12013_v25 }
0x1804   :  { %v24376_v32 = vpop.f32.mrb[34].mxu1 }
0x1805   :  { %28058 = vtanh.f32 %v24376_v32  ;;  %v12025_v9 = vpop.f32.mrb[35].mxu1 }
0x1806   :  { %28060 = vtanh.f32 %v12025_v9 }
0x180b   :  { %v28055_v15 = vpop.eup %28054 }
0x180c   :  { %v28057_v61 = vpop.eup %28056  ;;  %v12040_v41 = vmul.f32 %v28055_v15, %v28610_v37 }
0x180d   :  { %v12039_v31 = vmul.f32 %v28057_v61, %v28608_v33 }
0x180f   :  { %v28059_v43 = vpop.eup %28058  ;;  %v12043_v45 = vadd.f32 %v12040_v41, %v12039_v31 }
0x1810   :  { %v28061_v46 = vpop.eup %28060  ;;  %v12042_v11 = vmul.f32 %v28059_v43, %v28617_v50 }
0x1811   :  { %v12041_v18 = vmul.f32 %v28061_v46, %v28614_v48 }
0x1813   :  { %v12044_v60 = vadd.f32 %v12043_v45, %v12041_v18 }
0x1815   :  { %v12045_v26 = vadd.f32 %v12044_v60, %v12042_v11 }
0x1817   :  { %v12046_v58 = vrot.slane %v12045_v26, 4 }
0x1819   :  { %v12047_v29 = vadd.f32 %v12046_v58, %v12045_v26 }
0x181b   :  { %v12048_v55 = vrot.slane %v12047_v29, 2 }
0x181d   :  { %v12049_v17 = vadd.f32 %v12048_v55, %v12047_v29 }
0x181f   :  { %v12050_v62 = vrot.slane %v12049_v17, 1 }
0x1821   :  { %v12051_v34 = vadd.f32 %v12050_v62, %v12049_v17 }
0x1823   :  { %28062 = vtanh.f32 %v12051_v34 }
0x182d   :  { %v28063_v51 = vpop.eup %28062 }
0x182e   :  { %v12053_v24 = vmul.f32 %v28063_v51, %v28629_v7 }
0x1830   :  { %v29503_v59 = vadd.f32 %v12053_v24, %v11406_v53 }
0x1832   :  { %v12055_v40 = vmul.f32 %v29503_v59, %v29452_v8 }
0x1834   :  { %v29508_v49 = vadd.f32 %v12055_v40, %v29401_v56 }
0x1836   :  { %12059 = vrot.lane.b32.xlu1 %v29508_v49, %s28400_s5  ;;  %v12069_v30 = vrot.slane %v29508_v49, %v28503_v20  ;;  %12057 = vrot.lane.b32.xlu0 %v29508_v49, %s28401_s12 }
0x1838   :  { %v12071_v38 = vmul.f32 %v12069_v30, %v28509_v23  ;;  %v12072_v25 = vmul.f32 %v12069_v30, %v28515_v28  ;;  %v12073_v32 = vmul.f32 %v12069_v30, %v28507_v22  ;;  %v12074_v8 = vmul.f32 %v12069_v30, %v28513_v27 }
0x183a   :  { %28064 = vtanh.f32 %v12071_v38 }
0x183b   :  { %28066 = vtanh.f32 %v12072_v25 }
0x183c   :  { %28068 = vtanh.f32 %v12073_v32 }
0x183d   :  { %28070 = vtanh.f32 %v12074_v8 }
0x1844   :  { %v28065_v9 = vpop.eup %28064 }
0x1845   :  { %v28067_v15 = vpop.eup %28066  ;;  %v12080_v61 = vand.u32 4294901760, %v28065_v9 }
0x1846   :  { %v28069_v41 = vpop.eup %28068  ;;  %v12083_v31 = vand.u32 4294901760, %v28067_v15 }
0x1847   :  { %v28071_v43 = vpop.eup %28070  ;;  %v12086_v45 = vand.u32 4294901760, %v28069_v41  ;;  %v12190_v46 = vsub.f32 %v28065_v9, %v12080_v61 }
0x1848   :  { %v26417_v18 = vpack.c.bf16 %v12083_v31, %v12080_v61  ;;  %v12089_v11 = vand.u32 4294901760, %v28071_v43  ;;  %v12197_v60 = vsub.f32 %v28067_v15, %v12083_v31 }
0x1849   :  { %v12191_v26 = vand.u32 4294901760, %v12190_v46  ;;  %v12204_v58 = vsub.f32 %v28069_v41, %v12086_v45 }
0x184a   :  { %26418 = vmatprep.subr.bf16.mxu0 %v26417_v18  ;;  %v26421_v29 = vpack.c.bf16 %v12089_v11, %v12086_v45  ;;  %v12198_v55 = vand.u32 4294901760, %v12197_v60  ;;  %v12211_v17 = vsub.f32 %v28071_v43, %v12089_v11  ;;  %v26433_v38 = vpack.c.bf16 %v12197_v60, %v12190_v46 }
0x184b   :  { %26420 = vmatpush3.bf16.msra.mxu0 %v26417_v18  ;;  %v12192_v62 = vsub.f32 %v12190_v46, %v12191_v26  ;;  %v12205_v34 = vand.u32 4294901760, %v12204_v58 }
0x184c   :  { %26422 = vmatprep.subr.bf16.mxu0 %v26421_v29  ;;  %v12199_v57 = vsub.f32 %v12197_v60, %v12198_v55  ;;  %v12212_v0 = vand.u32 4294901760, %v12211_v17  ;;  %v26437_v25 = vpack.c.bf16 %v12211_v17, %v12204_v58  ;;  %v26449_v32 = vpack.c.bf16 %v12198_v55, %v12191_v26 }
0x184d   :  { %v12193_v1 = vand.u32 4294901760, %v12192_v62  ;;  %v12206_v4 = vsub.f32 %v12204_v58, %v12205_v34 }
0x184e   :  { %v12200_v6 = vand.u32 4294901760, %v12199_v57  ;;  %v12213_v51 = vsub.f32 %v12211_v17, %v12212_v0  ;;  %v26453_v8 = vpack.c.bf16 %v12212_v0, %v12205_v34 }
0x184f   :  { %26424 = vmatpush3.bf16.msra.mxu0 %v26421_v29  ;;  %v12207_v53 = vand.u32 4294901760, %v12206_v4 }
0x1850   :  { %v26425_v24 = vpack.c.bf16 %v12200_v6, %v12193_v1  ;;  %v12214_v40 = vand.u32 4294901760, %v12213_v51 }
0x1852   :  { %24386 = vmatmul.mubr.f32.vlgmr.msra.gmra.mrb[36].mxu0 %v28565_v5  ;;  %26426 = vmatprep.subr.bf16.mxu0 %v26425_v24  ;;  %v26429_v30 = vpack.c.bf16 %v12214_v40, %v12207_v53 }
0x1853   :  { %26428 = vmatpush3.bf16.msra.mxu0 %v26425_v24  ;;  %24388 = vmatprep.mubr.f32.mxu0 %v28570_v10  ;;  %v12062_v24 = vmul.f32 %v29508_v49, %v28622_v2 }
0x1854   :  { %26430 = vmatprep.subr.bf16.mxu0 %v26429_v30 }
0x1856   :  { %24389 = vmatmul.mubr.f32.gmra.mrb[38].mxu0 %v28573_v19 }
0x1857   :  { %26432 = vmatpush3.bf16.msra.mxu0 %v26429_v30  ;;  %24399 = vmatprep.mubr.f32.mxu0 %v28483_v12 }
0x1858   :  { %26434 = vmatprep.subr.bf16.mxu0 %v26433_v38 }
0x185a   :  { %24400 = vmatmul.mubr.f32.vlgmr.msra.gmra.mrb[36].mxu0 %v28521_v35 }
0x185b   :  { %26436 = vmatpush3.bf16.msra.mxu0 %v26433_v38  ;;  %24402 = vmatprep.mubr.f32.mxu0 %v28523_v36 }
0x185c   :  { %26438 = vmatprep.subr.bf16.mxu0 %v26437_v25 }
0x185e   :  { %24403 = vmatmul.mubr.f32.gmra.mrb[38].mxu0 %v28529_v42 }
0x185f   :  { %26440 = vmatpush3.bf16.msra.mxu0 %v26437_v25  ;;  %24413 = vmatprep.mubr.f32.mxu0 %v28486_v13  ;;  %v10736_v25 = vstv %s29445_s11 }
0x1860   :  { %26442 = vmatprep.subr.bf16.mxu0 %v26417_v18 }
0x1862   :  { %24414 = vmatmul.mubr.f32.vlgmr.msra.gmra.mrb[36].mxu0 %v28527_v39 }
0x1863   :  { %26444 = vmatpush3.bf16.msra.mxu0 %v26417_v18  ;;  %24416 = vmatprep.mubr.f32.mxu0 %v28532_v44 }
0x1864   :  { %26446 = vmatprep.subr.bf16.mxu0 %v26421_v29 }
0x1866   :  { %24417 = vmatmul.mubr.f32.gmra.mrb[38].mxu0 %v28543_v52 }
0x1867   :  { %26448 = vmatpush3.bf16.msra.mxu0 %v26421_v29  ;;  %24427 = vmatprep.mubr.f32.mxu0 %v28489_v14 }
0x1868   :  { %26450 = vmatprep.subr.bf16.mxu0 %v26449_v32 }
0x186a   :  { %24428 = vmatmul.mubr.f32.vlgmr.msra.gmra.mrb[36].mxu0 %v28537_v47 }
0x186b   :  { %26452 = vmatpush3.bf16.msra.mxu0 %v26449_v32  ;;  %24430 = vmatprep.mubr.f32.mxu0 %v28546_v54 }
0x186c   :  { %26454 = vmatprep.subr.bf16.mxu0 %v26453_v8 }
0x186e   :  { %24431 = vmatmul.mubr.f32.gmra.mrb[38].mxu0 %v28558_v63 }
0x186f   :  { %26456 = vmatpush3.bf16.msra.mxu0 %v26453_v8  ;;  %24441 = vmatprep.mubr.f32.mxu0 %v28483_v12 }
0x1870   :  { %26458 = vmatprep.subr.bf16.mxu0 %v26417_v18 }
0x1872   :  { %24442 = vmatmul.mubr.f32.vlgmr.msra.gmra.mrb[36].mxu0 %v28521_v35 }
0x1873   :  { %26460 = vmatpush3.bf16.msra.mxu0 %v26417_v18  ;;  %24444 = vmatprep.mubr.f32.mxu0 %v28523_v36 }
0x1874   :  { %26462 = vmatprep.subr.bf16.mxu0 %v26421_v29 }
0x1876   :  { %24445 = vmatmul.mubr.f32.gmra.mrb[38].mxu0 %v28529_v42 }
0x1877   :  { %26464 = vmatpush3.bf16.msra.mxu0 %v26421_v29  ;;  %24455 = vmatprep.mubr.f32.mxu0 %v28483_v12 }
0x187a   :  { %24456 = vmatmul.mubr.f32.vlgmr.msra.gmra.mrb[36].mxu0 %v28521_v35 }
0x187b   :  { %24458 = vmatprep.mubr.f32.mxu0 %v28523_v36 }
0x187e   :  { %24459 = vmatmul.mubr.f32.gmra.mrb[38].mxu0 %v28529_v42 }
0x187f   :  { %24553 = vmatprep.mubr.f32.mxu0 %v28493_v16 }
0x18a8   :  { %v12060_v4 = vpop.permute.xlu1 %12059  ;;  %v12058_v6 = vpop.permute.xlu0 %12057 }
0x18a9   :  { %v12061_v51 = vadd.f32 %v12060_v4, %v12058_v6 }
0x18ab   :  { %v12063_v53 = vmul.f32 %v12061_v51, %v28624_v3 }
0x18ad   :  { %v12064_v30 = vadd.f32 %v12063_v53, %v12062_v24 }
0x194d   :  { %v24457_v9 = vpop.f32.mrb[36].mxu0 }
0x194e   :  { %28072 = vtanh.f32 %v24457_v9  ;;  %v12671_v15 = vpop.f32.mrb[37].mxu0 }
0x194f   :  { %28074 = vtanh.f32 %v12671_v15 }
0x1951   :  { %v24460_v61 = vpop.f32.mrb[38].mxu0 }
0x1952   :  { %28076 = vtanh.f32 %v24460_v61  ;;  %v12683_v41 = vpop.f32.mrb[39].mxu0 }
0x1953   :  { %28078 = vtanh.f32 %v12683_v41 }
0x1958   :  { %v28073_v31 = vpop.eup %28072 }
0x1959   :  { %v28075_v43 = vpop.eup %28074  ;;  %v12698_v45 = vmul.f32 %v28073_v31, %v28610_v37 }
0x195a   :  { %v12697_v46 = vmul.f32 %v28075_v43, %v28608_v33 }
0x195c   :  { %v28077_v18 = vpop.eup %28076  ;;  %v12701_v11 = vadd.f32 %v12698_v45, %v12697_v46 }
0x195d   :  { %v28079_v60 = vpop.eup %28078  ;;  %v12700_v58 = vmul.f32 %v28077_v18, %v28617_v50 }
0x195e   :  { %v12699_v26 = vmul.f32 %v28079_v60, %v28614_v48 }
0x1960   :  { %v12702_v29 = vadd.f32 %v12701_v11, %v12699_v26 }
0x1962   :  { %v12703_v55 = vadd.f32 %v12702_v29, %v12700_v58 }
0x1964   :  { %v12704_v17 = vrot.slane %v12703_v55, 4 }
0x1966   :  { %v12705_v62 = vadd.f32 %v12704_v17, %v12703_v55 }
0x1968   :  { %v12706_v34 = vrot.slane %v12705_v62, 2 }
0x196a   :  { %v12707_v57 = vadd.f32 %v12706_v34, %v12705_v62 }
0x196c   :  { %v12708_v0 = vrot.slane %v12707_v57, 1 }
0x196e   :  { %v12709_v1 = vadd.f32 %v12708_v0, %v12707_v57 }
0x1970   :  { %28080 = vtanh.f32 %v12709_v1 }
0x197a   :  { %v28081_v40 = vpop.eup %28080 }
0x197b   :  { %v12711_v38 = vmul.f32 %v28081_v40, %v28629_v7 }
0x197d   :  { %v29553_v32 = vadd.f32 %v12711_v38, %v12064_v30 }
0x197f   :  { %v12713_v8 = vmul.f32 %v29553_v32, %v10736_v25 }
0x1981   :  { %v29557_v9 = vadd.f32 %v12713_v8, %v29401_v56 }
0x1983   :  { %12717 = vrot.lane.b32.xlu1 %v29557_v9, %s28400_s5  ;;  %v12727_v15 = vrot.slane %v29557_v9, %v28503_v20  ;;  %12715 = vrot.lane.b32.xlu0 %v29557_v9, %s28401_s12 }
0x1985   :  { %v12729_v49 = vmul.f32 %v12727_v15, %v28509_v23  ;;  %v12730_v61 = vmul.f32 %v12727_v15, %v28515_v28  ;;  %v12731_v41 = vmul.f32 %v12727_v15, %v28507_v22  ;;  %v12732_v31 = vmul.f32 %v12727_v15, %v28513_v27 }
0x1987   :  { %28082 = vtanh.f32 %v12729_v49 }
0x1988   :  { %28084 = vtanh.f32 %v12730_v61 }
0x1989   :  { %28086 = vtanh.f32 %v12731_v41 }
0x198a   :  { %28088 = vtanh.f32 %v12732_v31 }
0x1991   :  { %v28083_v43 = vpop.eup %28082 }
0x1992   :  { %v28085_v45 = vpop.eup %28084  ;;  %v12738_v46 = vand.u32 4294901760, %v28083_v43 }
0x1993   :  { %v28087_v18 = vpop.eup %28086  ;;  %v12741_v11 = vand.u32 4294901760, %v28085_v45 }
0x1994   :  { %v28089_v60 = vpop.eup %28088  ;;  %v12744_v26 = vand.u32 4294901760, %v28087_v18  ;;  %v12848_v58 = vsub.f32 %v28083_v43, %v12738_v46 }
0x1995   :  { %v26465_v29 = vpack.c.bf16 %v12741_v11, %v12738_v46  ;;  %v12747_v55 = vand.u32 4294901760, %v28089_v60  ;;  %v12855_v17 = vsub.f32 %v28085_v45, %v12741_v11 }
0x1996   :  { %v12849_v62 = vand.u32 4294901760, %v12848_v58  ;;  %v12862_v34 = vsub.f32 %v28087_v18, %v12744_v26 }
0x1997   :  { %26466 = vmatprep.subr.bf16.mxu1 %v26465_v29  ;;  %v26469_v57 = vpack.c.bf16 %v12747_v55, %v12744_v26  ;;  %v12856_v0 = vand.u32 4294901760, %v12855_v17  ;;  %v12869_v1 = vsub.f32 %v28089_v60, %v12747_v55  ;;  %v26481_v61 = vpack.c.bf16 %v12855_v17, %v12848_v58 }
0x1998   :  { %26468 = vmatpush3.bf16.msra.mxu1 %v26465_v29  ;;  %v12850_v4 = vsub.f32 %v12848_v58, %v12849_v62  ;;  %v12863_v6 = vand.u32 4294901760, %v12862_v34 }
0x1999   :  { %26470 = vmatprep.subr.bf16.mxu1 %v26469_v57  ;;  %v12857_v51 = vsub.f32 %v12855_v17, %v12856_v0  ;;  %v12870_v53 = vand.u32 4294901760, %v12869_v1  ;;  %v26485_v41 = vpack.c.bf16 %v12869_v1, %v12862_v34  ;;  %v26497_v31 = vpack.c.bf16 %v12856_v0, %v12849_v62 }
0x199a   :  { %v12851_v24 = vand.u32 4294901760, %v12850_v4  ;;  %v12864_v40 = vsub.f32 %v12862_v34, %v12863_v6 }
0x199b   :  { %v12858_v30 = vand.u32 4294901760, %v12857_v51  ;;  %v12871_v38 = vsub.f32 %v12869_v1, %v12870_v53  ;;  %v26501_v43 = vpack.c.bf16 %v12870_v53, %v12863_v6 }
0x199c   :  { %26472 = vmatpush3.bf16.msra.mxu1 %v26469_v57  ;;  %v12865_v25 = vand.u32 4294901760, %v12864_v40 }
0x199d   :  { %v26473_v8 = vpack.c.bf16 %v12858_v30, %v12851_v24  ;;  %v12872_v15 = vand.u32 4294901760, %v12871_v38 }
0x199f   :  { %24470 = vmatmul.mubr.f32.vlgmr.msra.gmra.mrb[36].mxu1 %v28565_v5  ;;  %26474 = vmatprep.subr.bf16.mxu1 %v26473_v8  ;;  %v26477_v49 = vpack.c.bf16 %v12872_v15, %v12865_v25 }
0x19a0   :  { %26476 = vmatpush3.bf16.msra.mxu1 %v26473_v8  ;;  %24472 = vmatprep.mubr.f32.mxu1 %v28570_v10  ;;  %v13371_v8 = vadd.f32 %v29553_v32, %v29503_v59 }
0x19a1   :  { %26478 = vmatprep.subr.bf16.mxu1 %v26477_v49 }
0x19a3   :  { %24473 = vmatmul.mubr.f32.gmra.mrb[38].mxu1 %v28573_v19 }
0x19a4   :  { %26480 = vmatpush3.bf16.msra.mxu1 %v26477_v49  ;;  %24483 = vmatprep.mubr.f32.mxu1 %v28483_v12  ;;  %v13372_v49 = vmul.f32 2.0, %v13371_v8 }
0x19a5   :  { %26482 = vmatprep.subr.bf16.mxu1 %v26481_v61 }
0x19a7   :  { %24484 = vmatmul.mubr.f32.vlgmr.msra.gmra.mrb[36].mxu1 %v28521_v35 }
0x19a8   :  { %26484 = vmatpush3.bf16.msra.mxu1 %v26481_v61  ;;  %24486 = vmatprep.mubr.f32.mxu1 %v28523_v36  ;;  %v12720_v61 = vmul.f32 %v29557_v9, %v28622_v2 }
0x19a9   :  { %26486 = vmatprep.subr.bf16.mxu1 %v26485_v41 }
0x19ab   :  { %24487 = vmatmul.mubr.f32.gmra.mrb[38].mxu1 %v28529_v42 }
0x19ac   :  { %26488 = vmatpush3.bf16.msra.mxu1 %v26485_v41  ;;  %24497 = vmatprep.mubr.f32.mxu1 %v28486_v13 }
0x19ad   :  { %26490 = vmatprep.subr.bf16.mxu1 %v26465_v29 }
0x19af   :  { %24498 = vmatmul.mubr.f32.vlgmr.msra.gmra.mrb[36].mxu1 %v28527_v39 }
0x19b0   :  { %26492 = vmatpush3.bf16.msra.mxu1 %v26465_v29  ;;  %24500 = vmatprep.mubr.f32.mxu1 %v28532_v44 }
0x19b1   :  { %26494 = vmatprep.subr.bf16.mxu1 %v26469_v57 }
0x19b3   :  { %24501 = vmatmul.mubr.f32.gmra.mrb[38].mxu1 %v28543_v52 }
0x19b4   :  { %26496 = vmatpush3.bf16.msra.mxu1 %v26469_v57  ;;  %24511 = vmatprep.mubr.f32.mxu1 %v28489_v14 }
0x19b5   :  { %26498 = vmatprep.subr.bf16.mxu1 %v26497_v31 }
0x19b7   :  { %24512 = vmatmul.mubr.f32.vlgmr.msra.gmra.mrb[36].mxu1 %v28537_v47 }
0x19b8   :  { %26500 = vmatpush3.bf16.msra.mxu1 %v26497_v31  ;;  %24514 = vmatprep.mubr.f32.mxu1 %v28546_v54 }
0x19b9   :  { %26502 = vmatprep.subr.bf16.mxu1 %v26501_v43 }
0x19bb   :  { %24515 = vmatmul.mubr.f32.gmra.mrb[38].mxu1 %v28558_v63 }
0x19bc   :  { %26504 = vmatpush3.bf16.msra.mxu1 %v26501_v43  ;;  %24525 = vmatprep.mubr.f32.mxu1 %v28483_v12 }
0x19bd   :  { %26506 = vmatprep.subr.bf16.mxu1 %v26465_v29 }
0x19bf   :  { %24526 = vmatmul.mubr.f32.vlgmr.msra.gmra.mrb[36].mxu1 %v28521_v35 }
0x19c0   :  { %26508 = vmatpush3.bf16.msra.mxu1 %v26465_v29  ;;  %24528 = vmatprep.mubr.f32.mxu1 %v28523_v36 }
0x19c1   :  { %26510 = vmatprep.subr.bf16.mxu1 %v26469_v57 }
0x19c3   :  { %24529 = vmatmul.mubr.f32.gmra.mrb[38].mxu1 %v28529_v42 }
0x19c4   :  { %26512 = vmatpush3.bf16.msra.mxu1 %v26469_v57  ;;  %24539 = vmatprep.mubr.f32.mxu1 %v28483_v12 }
0x19c7   :  { %24540 = vmatmul.mubr.f32.vlgmr.msra.gmra.mrb[36].mxu1 %v28521_v35 }
0x19c8   :  { %24542 = vmatprep.mubr.f32.mxu1 %v28523_v36 }
0x19cb   :  { %24543 = vmatmul.mubr.f32.gmra.mrb[38].mxu1 %v28529_v42 }
0x19cc   :  { %24637 = vmatprep.mubr.f32.mxu1 %v28493_v16 }
0x19f5   :  { %v12718_v30 = vpop.permute.xlu1 %12717  ;;  %v12716_v38 = vpop.permute.xlu0 %12715 }
0x19f6   :  { %v12719_v25 = vadd.f32 %v12718_v30, %v12716_v38 }
0x19f8   :  { %v12721_v15 = vmul.f32 %v12719_v25, %v28624_v3 }
0x19fa   :  { %v12722_v31 = vadd.f32 %v12721_v15, %v12720_v61 }
0x1a9a   :  { %v24541_v45 = vpop.f32.mrb[36].mxu1 }
0x1a9b   :  { %28090 = vtanh.f32 %v24541_v45  ;;  %v13329_v46 = vpop.f32.mrb[37].mxu1  ;;  %v13373_v45 = vadd.f32 %v13372_v49, %v29454_v21 }
0x1a9c   :  { %28092 = vtanh.f32 %v13329_v46 }
0x1a9e   :  { %v24544_v18 = vpop.f32.mrb[38].mxu1 }
0x1a9f   :  { %28094 = vtanh.f32 %v24544_v18  ;;  %v13341_v11 = vpop.f32.mrb[39].mxu1  ;;  %v10740_v18 = vstv %s10739_s14 }
0x1aa0   :  { %28096 = vtanh.f32 %v13341_v11 }
0x1aa5   :  { %v28091_v60 = vpop.eup %28090 }
0x1aa6   :  { %v28093_v26 = vpop.eup %28092  ;;  %v13356_v58 = vmul.f32 %v28091_v60, %v28610_v37 }
0x1aa7   :  { %v13355_v29 = vmul.f32 %v28093_v26, %v28608_v33 }
0x1aa9   :  { %v28095_v55 = vpop.eup %28094  ;;  %v13359_v17 = vadd.f32 %v13356_v58, %v13355_v29 }
0x1aaa   :  { %v28097_v62 = vpop.eup %28096  ;;  %v13358_v57 = vmul.f32 %v28095_v55, %v28617_v50 }
0x1aab   :  { %v13357_v34 = vmul.f32 %v28097_v62, %v28614_v48 }
0x1aad   :  { %v13360_v0 = vadd.f32 %v13359_v17, %v13357_v34 }
0x1aaf   :  { %v13361_v1 = vadd.f32 %v13360_v0, %v13358_v57 }
0x1ab1   :  { %v13362_v4 = vrot.slane %v13361_v1, 4 }
0x1ab3   :  { %v13363_v6 = vadd.f32 %v13362_v4, %v13361_v1 }
0x1ab5   :  { %v13364_v51 = vrot.slane %v13363_v6, 2 }
0x1ab7   :  { %v13365_v53 = vadd.f32 %v13364_v51, %v13363_v6 }
0x1ab9   :  { %v13366_v24 = vrot.slane %v13365_v53, 1 }
0x1abb   :  { %v13367_v40 = vadd.f32 %v13366_v24, %v13365_v53 }
0x1abd   :  { %28098 = vtanh.f32 %v13367_v40 }
0x1ac7   :  { %v28099_v41 = vpop.eup %28098 }
0x1ac8   :  { %v13369_v43 = vmul.f32 %v28099_v41, %v28629_v7 }
0x1aca   :  { %v13370_v46 = vadd.f32 %v13369_v43, %v12722_v31 }
0x1acc   :  { %v13374_v11 = vadd.f32 %v13373_v45, %v13370_v46 }
0x1ace   :  { %v13375_v60 = vmul.f32 %v13374_v11, %v10740_v18 }
0x1ad0   :  { %v29606_v26 = vadd.f32 %v13375_v60, %v29401_v56 }
0x1ad2   :  { %13387 = vrot.lane.b32.xlu1 %v29606_v26, %s28400_s5  ;;  %13377 = vst [vmem:[%s30228_s6 + $0x4] sm:$0x1] %v29606_v26  ;;  %13385 = vrot.lane.b32.xlu0 %v29606_v26, %s28401_s12  ;;  %v13397_v21 = vrot.slane %v29606_v26, %v28503_v20 }
0x1ad4   :  { %v13399_v59 = vmul.f32 %v13397_v21, %v28509_v23  ;;  %v13400_v32 = vmul.f32 %v13397_v21, %v28515_v28  ;;  %v13401_v56 = vmul.f32 %v13397_v21, %v28507_v22  ;;  %v13402_v9 = vmul.f32 %v13397_v21, %v28513_v27 }
0x1ad6   :  { %28100 = vtanh.f32 %v13399_v59 }
0x1ad7   :  { %28102 = vtanh.f32 %v13400_v32 }
0x1ad8   :  { %28104 = vtanh.f32 %v13401_v56 }
0x1ad9   :  { %28106 = vtanh.f32 %v13402_v9 }
0x1ae0   :  { %v28101_v58 = vpop.eup %28100 }
0x1ae1   :  { %v28103_v29 = vpop.eup %28102  ;;  %v13408_v55 = vand.u32 4294901760, %v28101_v58 }
0x1ae2   :  { %v28105_v17 = vpop.eup %28104  ;;  %v13411_v62 = vand.u32 4294901760, %v28103_v29 }
0x1ae3   :  { %v28107_v34 = vpop.eup %28106  ;;  %v13414_v57 = vand.u32 4294901760, %v28105_v17  ;;  %v13518_v0 = vsub.f32 %v28101_v58, %v13408_v55 }
0x1ae4   :  { %v26513_v1 = vpack.c.bf16 %v13411_v62, %v13408_v55  ;;  %v13417_v4 = vand.u32 4294901760, %v28107_v34  ;;  %v13525_v6 = vsub.f32 %v28103_v29, %v13411_v62 }
0x1ae5   :  { %v13519_v51 = vand.u32 4294901760, %v13518_v0  ;;  %v13532_v53 = vsub.f32 %v28105_v17, %v13414_v57 }
0x1ae6   :  { %26514 = vmatprep.subr.bf16.mxu0 %v26513_v1  ;;  %v26517_v24 = vpack.c.bf16 %v13417_v4, %v13414_v57  ;;  %v13526_v40 = vand.u32 4294901760, %v13525_v6  ;;  %v13539_v30 = vsub.f32 %v28107_v34, %v13417_v4  ;;  %v26529_v11 = vpack.c.bf16 %v13525_v6, %v13518_v0 }
0x1ae7   :  { %26516 = vmatpush3.bf16.msra.mxu0 %v26513_v1  ;;  %v13520_v38 = vsub.f32 %v13518_v0, %v13519_v51  ;;  %v13533_v25 = vand.u32 4294901760, %v13532_v53 }
0x1ae8   :  { %26518 = vmatprep.subr.bf16.mxu0 %v26517_v24  ;;  %v13527_v8 = vsub.f32 %v13525_v6, %v13526_v40  ;;  %v13540_v15 = vand.u32 4294901760, %v13539_v30  ;;  %v26533_v60 = vpack.c.bf16 %v13539_v30, %v13532_v53  ;;  %v26545_v21 = vpack.c.bf16 %v13526_v40, %v13519_v51 }
0x1ae9   :  { %v13521_v49 = vand.u32 4294901760, %v13520_v38  ;;  %v13534_v61 = vsub.f32 %v13532_v53, %v13533_v25 }
0x1aea   :  { %v13528_v41 = vand.u32 4294901760, %v13527_v8  ;;  %v13541_v31 = vsub.f32 %v13539_v30, %v13540_v15  ;;  %v26549_v59 = vpack.c.bf16 %v13540_v15, %v13533_v25 }
0x1aeb   :  { %26520 = vmatpush3.bf16.msra.mxu0 %v26517_v24  ;;  %v13535_v43 = vand.u32 4294901760, %v13534_v61 }
0x1aec   :  { %v26521_v45 = vpack.c.bf16 %v13528_v41, %v13521_v49  ;;  %v13542_v46 = vand.u32 4294901760, %v13541_v31  ;;  %v13390_v41 = vmul.f32 %v29606_v26, %v28622_v2 }
0x1aee   :  { %24554 = vmatmul.mubr.f32.vlgmr.msra.gmra.mrb[40].mxu0 %v28565_v5  ;;  %26522 = vmatprep.subr.bf16.mxu0 %v26521_v45  ;;  %v26525_v18 = vpack.c.bf16 %v13542_v46, %v13535_v43  ;;  %v29657_v46 = vstv %s13381_s18 }
0x1aef   :  { %26524 = vmatpush3.bf16.msra.mxu0 %v26521_v45  ;;  %24556 = vmatprep.mubr.f32.mxu0 %v28570_v10 }
0x1af0   :  { %26526 = vmatprep.subr.bf16.mxu0 %v26525_v18 }
0x1af2   :  { %24557 = vmatmul.mubr.f32.gmra.mrb[42].mxu0 %v28573_v19 }
0x1af3   :  { %26528 = vmatpush3.bf16.msra.mxu0 %v26525_v18  ;;  %24567 = vmatprep.mubr.f32.mxu0 %v28483_v12 }
0x1af4   :  { %26530 = vmatprep.subr.bf16.mxu0 %v26529_v11 }
0x1af6   :  { %24568 = vmatmul.mubr.f32.vlgmr.msra.gmra.mrb[40].mxu0 %v28521_v35 }
0x1af7   :  { %26532 = vmatpush3.bf16.msra.mxu0 %v26529_v11  ;;  %24570 = vmatprep.mubr.f32.mxu0 %v28523_v36 }
0x1af8   :  { %26534 = vmatprep.subr.bf16.mxu0 %v26533_v60 }
0x1afa   :  { %24571 = vmatmul.mubr.f32.gmra.mrb[42].mxu0 %v28529_v42 }
0x1afb   :  { %26536 = vmatpush3.bf16.msra.mxu0 %v26533_v60  ;;  %24581 = vmatprep.mubr.f32.mxu0 %v28486_v13 }
0x1afc   :  { %26538 = vmatprep.subr.bf16.mxu0 %v26513_v1 }
0x1afe   :  { %24582 = vmatmul.mubr.f32.vlgmr.msra.gmra.mrb[40].mxu0 %v28527_v39 }
0x1aff   :  { %26540 = vmatpush3.bf16.msra.mxu0 %v26513_v1  ;;  %24584 = vmatprep.mubr.f32.mxu0 %v28532_v44 }
0x1b00   :  { %26542 = vmatprep.subr.bf16.mxu0 %v26517_v24 }
0x1b02   :  { %24585 = vmatmul.mubr.f32.gmra.mrb[42].mxu0 %v28543_v52 }
0x1b03   :  { %26544 = vmatpush3.bf16.msra.mxu0 %v26517_v24  ;;  %24595 = vmatprep.mubr.f32.mxu0 %v28489_v14 }
0x1b04   :  { %26546 = vmatprep.subr.bf16.mxu0 %v26545_v21 }
0x1b06   :  { %24596 = vmatmul.mubr.f32.vlgmr.msra.gmra.mrb[40].mxu0 %v28537_v47 }
0x1b07   :  { %26548 = vmatpush3.bf16.msra.mxu0 %v26545_v21  ;;  %24598 = vmatprep.mubr.f32.mxu0 %v28546_v54 }
0x1b08   :  { %26550 = vmatprep.subr.bf16.mxu0 %v26549_v59 }
0x1b0a   :  { %24599 = vmatmul.mubr.f32.gmra.mrb[42].mxu0 %v28558_v63 }
0x1b0b   :  { %26552 = vmatpush3.bf16.msra.mxu0 %v26549_v59  ;;  %24609 = vmatprep.mubr.f32.mxu0 %v28483_v12 }
0x1b0c   :  { %26554 = vmatprep.subr.bf16.mxu0 %v26513_v1 }
0x1b0e   :  { %24610 = vmatmul.mubr.f32.vlgmr.msra.gmra.mrb[40].mxu0 %v28521_v35 }
0x1b0f   :  { %26556 = vmatpush3.bf16.msra.mxu0 %v26513_v1  ;;  %24612 = vmatprep.mubr.f32.mxu0 %v28523_v36 }
0x1b10   :  { %26558 = vmatprep.subr.bf16.mxu0 %v26517_v24 }
0x1b12   :  { %24613 = vmatmul.mubr.f32.gmra.mrb[42].mxu0 %v28529_v42 }
0x1b13   :  { %26560 = vmatpush3.bf16.msra.mxu0 %v26517_v24  ;;  %24623 = vmatprep.mubr.f32.mxu0 %v28483_v12 }
0x1b16   :  { %24624 = vmatmul.mubr.f32.vlgmr.msra.gmra.mrb[40].mxu0 %v28521_v35 }
0x1b17   :  { %24626 = vmatprep.mubr.f32.mxu0 %v28523_v36 }
0x1b1a   :  { %24627 = vmatmul.mubr.f32.gmra.mrb[42].mxu0 %v28529_v42 }
0x1b1b   :  { %24721 = vmatprep.mubr.f32.mxu0 %v28493_v16 }
0x1b44   :  { %v13388_v8 = vpop.permute.xlu1 %13387  ;;  %v13386_v15 = vpop.permute.xlu0 %13385 }
0x1b45   :  { %v13389_v49 = vadd.f32 %v13388_v8, %v13386_v15 }
0x1b47   :  { %v13391_v61 = vmul.f32 %v13389_v49, %v28624_v3 }
0x1b49   :  { %v13392_v43 = vadd.f32 %v13391_v61, %v13390_v41 }
0x1be9   :  { %v24625_v32 = vpop.f32.mrb[40].mxu0 }
0x1bea   :  { %28108 = vtanh.f32 %v24625_v32  ;;  %v13999_v56 = vpop.f32.mrb[41].mxu0 }
0x1beb   :  { %28110 = vtanh.f32 %v13999_v56 }
0x1bed   :  { %v24628_v9 = vpop.f32.mrb[42].mxu0 }
0x1bee   :  { %28112 = vtanh.f32 %v24628_v9  ;;  %v14011_v58 = vpop.f32.mrb[43].mxu0 }
0x1bef   :  { %28114 = vtanh.f32 %v14011_v58 }
0x1bf4   :  { %v28109_v29 = vpop.eup %28108 }
0x1bf5   :  { %v28111_v55 = vpop.eup %28110  ;;  %v14026_v17 = vmul.f32 %v28109_v29, %v28610_v37 }
0x1bf6   :  { %v14025_v62 = vmul.f32 %v28111_v55, %v28608_v33 }
0x1bf8   :  { %v28113_v34 = vpop.eup %28112  ;;  %v14029_v57 = vadd.f32 %v14026_v17, %v14025_v62 }
0x1bf9   :  { %v28115_v0 = vpop.eup %28114  ;;  %v14028_v4 = vmul.f32 %v28113_v34, %v28617_v50 }
0x1bfa   :  { %v14027_v1 = vmul.f32 %v28115_v0, %v28614_v48 }
0x1bfc   :  { %v14030_v6 = vadd.f32 %v14029_v57, %v14027_v1 }
0x1bfe   :  { %v14031_v51 = vadd.f32 %v14030_v6, %v14028_v4 }
0x1c00   :  { %v14032_v53 = vrot.slane %v14031_v51, 4 }
0x1c02   :  { %v14033_v24 = vadd.f32 %v14032_v53, %v14031_v51 }
0x1c04   :  { %v14034_v40 = vrot.slane %v14033_v24, 2 }
0x1c06   :  { %v14035_v30 = vadd.f32 %v14034_v40, %v14033_v24 }
0x1c08   :  { %v14036_v38 = vrot.slane %v14035_v30, 1 }
0x1c0a   :  { %v14037_v25 = vadd.f32 %v14036_v38, %v14035_v30 }
0x1c0c   :  { %28116 = vtanh.f32 %v14037_v25 }
0x1c16   :  { %v28117_v31 = vpop.eup %28116 }
0x1c17   :  { %v14039_v45 = vmul.f32 %v28117_v31, %v28629_v7 }
0x1c19   :  { %v29659_v18 = vadd.f32 %v14039_v45, %v13392_v43 }
0x1c1b   :  { %v14041_v11 = vmul.f32 %v29659_v18, %v29657_v46 }
0x1c1d   :  { %v29664_v60 = vadd.f32 %v14041_v11, %v29606_v26 }
0x1c1f   :  { %14045 = vrot.lane.b32.xlu1 %v29664_v60, %s28400_s5  ;;  %v14055_v21 = vrot.slane %v29664_v60, %v28503_v20  ;;  %14043 = vrot.lane.b32.xlu0 %v29664_v60, %s28401_s12 }
0x1c21   :  { %v14057_v59 = vmul.f32 %v14055_v21, %v28509_v23  ;;  %v14058_v32 = vmul.f32 %v14055_v21, %v28515_v28  ;;  %v14059_v56 = vmul.f32 %v14055_v21, %v28507_v22  ;;  %v14060_v9 = vmul.f32 %v14055_v21, %v28513_v27 }
0x1c23   :  { %28118 = vtanh.f32 %v14057_v59 }
0x1c24   :  { %28120 = vtanh.f32 %v14058_v32 }
0x1c25   :  { %28122 = vtanh.f32 %v14059_v56 }
0x1c26   :  { %28124 = vtanh.f32 %v14060_v9 }
0x1c2d   :  { %v28119_v58 = vpop.eup %28118 }
0x1c2e   :  { %v28121_v29 = vpop.eup %28120  ;;  %v14066_v55 = vand.u32 4294901760, %v28119_v58 }
0x1c2f   :  { %v28123_v17 = vpop.eup %28122  ;;  %v14069_v62 = vand.u32 4294901760, %v28121_v29 }
0x1c30   :  { %v28125_v34 = vpop.eup %28124  ;;  %v14072_v57 = vand.u32 4294901760, %v28123_v17  ;;  %v14176_v0 = vsub.f32 %v28119_v58, %v14066_v55 }
0x1c31   :  { %v26561_v1 = vpack.c.bf16 %v14069_v62, %v14066_v55  ;;  %v14075_v4 = vand.u32 4294901760, %v28125_v34  ;;  %v14183_v6 = vsub.f32 %v28121_v29, %v14069_v62 }
0x1c32   :  { %v14177_v51 = vand.u32 4294901760, %v14176_v0  ;;  %v14190_v53 = vsub.f32 %v28123_v17, %v14072_v57 }
0x1c33   :  { %26562 = vmatprep.subr.bf16.mxu1 %v26561_v1  ;;  %v26565_v24 = vpack.c.bf16 %v14075_v4, %v14072_v57  ;;  %v14184_v40 = vand.u32 4294901760, %v14183_v6  ;;  %v14197_v30 = vsub.f32 %v28125_v34, %v14075_v4  ;;  %v26577_v59 = vpack.c.bf16 %v14183_v6, %v14176_v0 }
0x1c34   :  { %26564 = vmatpush3.bf16.msra.mxu1 %v26561_v1  ;;  %v14178_v38 = vsub.f32 %v14176_v0, %v14177_v51  ;;  %v14191_v25 = vand.u32 4294901760, %v14190_v53 }
0x1c35   :  { %26566 = vmatprep.subr.bf16.mxu1 %v26565_v24  ;;  %v14185_v8 = vsub.f32 %v14183_v6, %v14184_v40  ;;  %v14198_v15 = vand.u32 4294901760, %v14197_v30  ;;  %v26581_v32 = vpack.c.bf16 %v14197_v30, %v14190_v53  ;;  %v26593_v56 = vpack.c.bf16 %v14184_v40, %v14177_v51 }
0x1c36   :  { %v14179_v49 = vand.u32 4294901760, %v14178_v38  ;;  %v14192_v61 = vsub.f32 %v14190_v53, %v14191_v25 }
0x1c37   :  { %v14186_v41 = vand.u32 4294901760, %v14185_v8  ;;  %v14199_v31 = vsub.f32 %v14197_v30, %v14198_v15  ;;  %v26597_v9 = vpack.c.bf16 %v14198_v15, %v14191_v25 }
0x1c38   :  { %26568 = vmatpush3.bf16.msra.mxu1 %v26565_v24  ;;  %v14193_v43 = vand.u32 4294901760, %v14192_v61 }
0x1c39   :  { %v26569_v45 = vpack.c.bf16 %v14186_v41, %v14179_v49  ;;  %v14200_v11 = vand.u32 4294901760, %v14199_v31 }
0x1c3b   :  { %24638 = vmatmul.mubr.f32.vlgmr.msra.gmra.mrb[40].mxu1 %v28565_v5  ;;  %26570 = vmatprep.subr.bf16.mxu1 %v26569_v45  ;;  %v26573_v21 = vpack.c.bf16 %v14200_v11, %v14193_v43 }
0x1c3c   :  { %26572 = vmatpush3.bf16.msra.mxu1 %v26569_v45  ;;  %24640 = vmatprep.mubr.f32.mxu1 %v28570_v10  ;;  %v14048_v45 = vmul.f32 %v29664_v60, %v28622_v2 }
0x1c3d   :  { %26574 = vmatprep.subr.bf16.mxu1 %v26573_v21 }
0x1c3f   :  { %24641 = vmatmul.mubr.f32.gmra.mrb[42].mxu1 %v28573_v19 }
0x1c40   :  { %26576 = vmatpush3.bf16.msra.mxu1 %v26573_v21  ;;  %24651 = vmatprep.mubr.f32.mxu1 %v28483_v12 }
0x1c41   :  { %26578 = vmatprep.subr.bf16.mxu1 %v26577_v59 }
0x1c43   :  { %24652 = vmatmul.mubr.f32.vlgmr.msra.gmra.mrb[40].mxu1 %v28521_v35 }
0x1c44   :  { %26580 = vmatpush3.bf16.msra.mxu1 %v26577_v59  ;;  %24654 = vmatprep.mubr.f32.mxu1 %v28523_v36 }
0x1c45   :  { %26582 = vmatprep.subr.bf16.mxu1 %v26581_v32 }
0x1c47   :  { %24655 = vmatmul.mubr.f32.gmra.mrb[42].mxu1 %v28529_v42 }
0x1c48   :  { %26584 = vmatpush3.bf16.msra.mxu1 %v26581_v32  ;;  %24665 = vmatprep.mubr.f32.mxu1 %v28486_v13 }
0x1c49   :  { %26586 = vmatprep.subr.bf16.mxu1 %v26561_v1 }
0x1c4b   :  { %24666 = vmatmul.mubr.f32.vlgmr.msra.gmra.mrb[40].mxu1 %v28527_v39 }
0x1c4c   :  { %26588 = vmatpush3.bf16.msra.mxu1 %v26561_v1  ;;  %24668 = vmatprep.mubr.f32.mxu1 %v28532_v44 }
0x1c4d   :  { %26590 = vmatprep.subr.bf16.mxu1 %v26565_v24 }
0x1c4f   :  { %24669 = vmatmul.mubr.f32.gmra.mrb[42].mxu1 %v28543_v52 }
0x1c50   :  { %26592 = vmatpush3.bf16.msra.mxu1 %v26565_v24  ;;  %24679 = vmatprep.mubr.f32.mxu1 %v28489_v14 }
0x1c51   :  { %26594 = vmatprep.subr.bf16.mxu1 %v26593_v56 }
0x1c53   :  { %24680 = vmatmul.mubr.f32.vlgmr.msra.gmra.mrb[40].mxu1 %v28537_v47 }
0x1c54   :  { %26596 = vmatpush3.bf16.msra.mxu1 %v26593_v56  ;;  %24682 = vmatprep.mubr.f32.mxu1 %v28546_v54 }
0x1c55   :  { %26598 = vmatprep.subr.bf16.mxu1 %v26597_v9 }
0x1c57   :  { %24683 = vmatmul.mubr.f32.gmra.mrb[42].mxu1 %v28558_v63 }
0x1c58   :  { %26600 = vmatpush3.bf16.msra.mxu1 %v26597_v9  ;;  %24693 = vmatprep.mubr.f32.mxu1 %v28483_v12 }
0x1c59   :  { %26602 = vmatprep.subr.bf16.mxu1 %v26561_v1 }
0x1c5b   :  { %24694 = vmatmul.mubr.f32.vlgmr.msra.gmra.mrb[40].mxu1 %v28521_v35 }
0x1c5c   :  { %26604 = vmatpush3.bf16.msra.mxu1 %v26561_v1  ;;  %24696 = vmatprep.mubr.f32.mxu1 %v28523_v36 }
0x1c5d   :  { %26606 = vmatprep.subr.bf16.mxu1 %v26565_v24 }
0x1c5f   :  { %24697 = vmatmul.mubr.f32.gmra.mrb[42].mxu1 %v28529_v42 }
0x1c60   :  { %26608 = vmatpush3.bf16.msra.mxu1 %v26565_v24  ;;  %24707 = vmatprep.mubr.f32.mxu1 %v28483_v12 }
0x1c63   :  { %24708 = vmatmul.mubr.f32.vlgmr.msra.gmra.mrb[40].mxu1 %v28521_v35 }
0x1c64   :  { %24710 = vmatprep.mubr.f32.mxu1 %v28523_v36 }
0x1c67   :  { %24711 = vmatmul.mubr.f32.gmra.mrb[42].mxu1 %v28529_v42 }
0x1c68   :  { %24805 = vmatprep.mubr.f32.mxu1 %v28493_v16 }
0x1c91   :  { %v14046_v61 = vpop.permute.xlu1 %14045  ;;  %v14044_v41 = vpop.permute.xlu0 %14043 }
0x1c92   :  { %v14047_v31 = vadd.f32 %v14046_v61, %v14044_v41 }
0x1c94   :  { %v14049_v43 = vmul.f32 %v14047_v31, %v28624_v3 }
0x1c96   :  { %v14050_v21 = vadd.f32 %v14049_v43, %v14048_v45 }
0x1d36   :  { %v24709_v58 = vpop.f32.mrb[40].mxu1 }
0x1d37   :  { %28126 = vtanh.f32 %v24709_v58  ;;  %v14657_v29 = vpop.f32.mrb[41].mxu1 }
0x1d38   :  { %28128 = vtanh.f32 %v14657_v29 }
0x1d3a   :  { %v24712_v55 = vpop.f32.mrb[42].mxu1 }
0x1d3b   :  { %28130 = vtanh.f32 %v24712_v55  ;;  %v14669_v17 = vpop.f32.mrb[43].mxu1 }
0x1d3c   :  { %28132 = vtanh.f32 %v14669_v17 }
0x1d41   :  { %v28127_v62 = vpop.eup %28126 }
0x1d42   :  { %v28129_v34 = vpop.eup %28128  ;;  %v14684_v57 = vmul.f32 %v28127_v62, %v28610_v37 }
0x1d43   :  { %v14683_v0 = vmul.f32 %v28129_v34, %v28608_v33 }
0x1d45   :  { %v28131_v1 = vpop.eup %28130  ;;  %v14687_v4 = vadd.f32 %v14684_v57, %v14683_v0 }
0x1d46   :  { %v28133_v6 = vpop.eup %28132  ;;  %v14686_v53 = vmul.f32 %v28131_v1, %v28617_v50 }
0x1d47   :  { %v14685_v51 = vmul.f32 %v28133_v6, %v28614_v48 }
0x1d49   :  { %v14688_v24 = vadd.f32 %v14687_v4, %v14685_v51 }
0x1d4b   :  { %v14689_v40 = vadd.f32 %v14688_v24, %v14686_v53 }
0x1d4d   :  { %v14690_v30 = vrot.slane %v14689_v40, 4 }
0x1d4f   :  { %v14691_v38 = vadd.f32 %v14690_v30, %v14689_v40 }
0x1d51   :  { %v14692_v25 = vrot.slane %v14691_v38, 2 }
0x1d53   :  { %v14693_v8 = vadd.f32 %v14692_v25, %v14691_v38 }
0x1d55   :  { %v14694_v15 = vrot.slane %v14693_v8, 1 }
0x1d57   :  { %v14695_v49 = vadd.f32 %v14694_v15, %v14693_v8 }
0x1d59   :  { %28134 = vtanh.f32 %v14695_v49 }
0x1d63   :  { %v28135_v11 = vpop.eup %28134 }
0x1d64   :  { %v14697_v59 = vmul.f32 %v28135_v11, %v28629_v7 }
0x1d66   :  { %v29708_v32 = vadd.f32 %v14697_v59, %v14050_v21 }
0x1d68   :  { %v14699_v56 = vmul.f32 %v29708_v32, %v29657_v46 }
0x1d6a   :  { %v29713_v9 = vadd.f32 %v14699_v56, %v29606_v26 }
0x1d6c   :  { %14703 = vrot.lane.b32.xlu1 %v29713_v9, %s28400_s5  ;;  %v14713_v58 = vrot.slane %v29713_v9, %v28503_v20  ;;  %14701 = vrot.lane.b32.xlu0 %v29713_v9, %s28401_s12 }
0x1d6e   :  { %v14715_v60 = vmul.f32 %v14713_v58, %v28509_v23  ;;  %v14716_v29 = vmul.f32 %v14713_v58, %v28515_v28  ;;  %v14717_v55 = vmul.f32 %v14713_v58, %v28507_v22  ;;  %v14718_v46 = vmul.f32 %v14713_v58, %v28513_v27 }
0x1d70   :  { %28136 = vtanh.f32 %v14715_v60 }
0x1d71   :  { %28138 = vtanh.f32 %v14716_v29 }
0x1d72   :  { %28140 = vtanh.f32 %v14717_v55 }
0x1d73   :  { %28142 = vtanh.f32 %v14718_v46 }
0x1d7a   :  { %v28137_v17 = vpop.eup %28136 }
0x1d7b   :  { %v28139_v62 = vpop.eup %28138  ;;  %v14724_v34 = vand.u32 4294901760, %v28137_v17 }
0x1d7c   :  { %v28141_v57 = vpop.eup %28140  ;;  %v14727_v0 = vand.u32 4294901760, %v28139_v62 }
0x1d7d   :  { %v28143_v1 = vpop.eup %28142  ;;  %v14730_v4 = vand.u32 4294901760, %v28141_v57  ;;  %v14834_v6 = vsub.f32 %v28137_v17, %v14724_v34 }
0x1d7e   :  { %v26609_v51 = vpack.c.bf16 %v14727_v0, %v14724_v34  ;;  %v14733_v53 = vand.u32 4294901760, %v28143_v1  ;;  %v14841_v24 = vsub.f32 %v28139_v62, %v14727_v0 }
0x1d7f   :  { %v14835_v40 = vand.u32 4294901760, %v14834_v6  ;;  %v14848_v30 = vsub.f32 %v28141_v57, %v14730_v4 }
0x1d80   :  { %26610 = vmatprep.subr.bf16.mxu0 %v26609_v51  ;;  %v26613_v38 = vpack.c.bf16 %v14733_v53, %v14730_v4  ;;  %v14842_v25 = vand.u32 4294901760, %v14841_v24  ;;  %v14855_v8 = vsub.f32 %v28143_v1, %v14733_v53  ;;  %v26625_v60 = vpack.c.bf16 %v14841_v24, %v14834_v6 }
0x1d81   :  { %26612 = vmatpush3.bf16.msra.mxu0 %v26609_v51  ;;  %v14836_v15 = vsub.f32 %v14834_v6, %v14835_v40  ;;  %v14849_v49 = vand.u32 4294901760, %v14848_v30 }
0x1d82   :  { %26614 = vmatprep.subr.bf16.mxu0 %v26613_v38  ;;  %v14843_v61 = vsub.f32 %v14841_v24, %v14842_v25  ;;  %v14856_v41 = vand.u32 4294901760, %v14855_v8  ;;  %v26629_v29 = vpack.c.bf16 %v14855_v8, %v14848_v30  ;;  %v26641_v55 = vpack.c.bf16 %v14842_v25, %v14835_v40 }
0x1d83   :  { %v14837_v31 = vand.u32 4294901760, %v14836_v15  ;;  %v14850_v43 = vsub.f32 %v14848_v30, %v14849_v49 }
0x1d84   :  { %v14844_v45 = vand.u32 4294901760, %v14843_v61  ;;  %v14857_v11 = vsub.f32 %v14855_v8, %v14856_v41  ;;  %v26645_v46 = vpack.c.bf16 %v14856_v41, %v14849_v49 }
0x1d85   :  { %26616 = vmatpush3.bf16.msra.mxu0 %v26613_v38  ;;  %v14851_v21 = vand.u32 4294901760, %v14850_v43 }
0x1d86   :  { %v26617_v59 = vpack.c.bf16 %v14844_v45, %v14837_v31  ;;  %v14858_v56 = vand.u32 4294901760, %v14857_v11 }
0x1d88   :  { %24722 = vmatmul.mubr.f32.vlgmr.msra.gmra.mrb[44].mxu0 %v28565_v5  ;;  %26618 = vmatprep.subr.bf16.mxu0 %v26617_v59  ;;  %v26621_v58 = vpack.c.bf16 %v14858_v56, %v14851_v21 }
0x1d89   :  { %26620 = vmatpush3.bf16.msra.mxu0 %v26617_v59  ;;  %24724 = vmatprep.mubr.f32.mxu0 %v28570_v10  ;;  %v14706_v59 = vmul.f32 %v29713_v9, %v28622_v2 }
0x1d8a   :  { %26622 = vmatprep.subr.bf16.mxu0 %v26621_v58 }
0x1d8c   :  { %24725 = vmatmul.mubr.f32.gmra.mrb[46].mxu0 %v28573_v19 }
0x1d8d   :  { %26624 = vmatpush3.bf16.msra.mxu0 %v26621_v58  ;;  %24735 = vmatprep.mubr.f32.mxu0 %v28483_v12 }
0x1d8e   :  { %26626 = vmatprep.subr.bf16.mxu0 %v26625_v60 }
0x1d90   :  { %24736 = vmatmul.mubr.f32.vlgmr.msra.gmra.mrb[44].mxu0 %v28521_v35 }
0x1d91   :  { %26628 = vmatpush3.bf16.msra.mxu0 %v26625_v60  ;;  %24738 = vmatprep.mubr.f32.mxu0 %v28523_v36 }
0x1d92   :  { %26630 = vmatprep.subr.bf16.mxu0 %v26629_v29 }
0x1d94   :  { %24739 = vmatmul.mubr.f32.gmra.mrb[46].mxu0 %v28529_v42 }
0x1d95   :  { %26632 = vmatpush3.bf16.msra.mxu0 %v26629_v29  ;;  %24749 = vmatprep.mubr.f32.mxu0 %v28486_v13  ;;  %v13380_v29 = vstv %s29650_s17 }
0x1d96   :  { %26634 = vmatprep.subr.bf16.mxu0 %v26609_v51 }
0x1d98   :  { %24750 = vmatmul.mubr.f32.vlgmr.msra.gmra.mrb[44].mxu0 %v28527_v39 }
0x1d99   :  { %26636 = vmatpush3.bf16.msra.mxu0 %v26609_v51  ;;  %24752 = vmatprep.mubr.f32.mxu0 %v28532_v44 }
0x1d9a   :  { %26638 = vmatprep.subr.bf16.mxu0 %v26613_v38 }
0x1d9c   :  { %24753 = vmatmul.mubr.f32.gmra.mrb[46].mxu0 %v28543_v52 }
0x1d9d   :  { %26640 = vmatpush3.bf16.msra.mxu0 %v26613_v38  ;;  %24763 = vmatprep.mubr.f32.mxu0 %v28489_v14 }
0x1d9e   :  { %26642 = vmatprep.subr.bf16.mxu0 %v26641_v55 }
0x1da0   :  { %24764 = vmatmul.mubr.f32.vlgmr.msra.gmra.mrb[44].mxu0 %v28537_v47 }
0x1da1   :  { %26644 = vmatpush3.bf16.msra.mxu0 %v26641_v55  ;;  %24766 = vmatprep.mubr.f32.mxu0 %v28546_v54 }
0x1da2   :  { %26646 = vmatprep.subr.bf16.mxu0 %v26645_v46 }
0x1da4   :  { %24767 = vmatmul.mubr.f32.gmra.mrb[46].mxu0 %v28558_v63 }
0x1da5   :  { %26648 = vmatpush3.bf16.msra.mxu0 %v26645_v46  ;;  %24777 = vmatprep.mubr.f32.mxu0 %v28483_v12 }
0x1da6   :  { %26650 = vmatprep.subr.bf16.mxu0 %v26609_v51 }
0x1da8   :  { %24778 = vmatmul.mubr.f32.vlgmr.msra.gmra.mrb[44].mxu0 %v28521_v35 }
0x1da9   :  { %26652 = vmatpush3.bf16.msra.mxu0 %v26609_v51  ;;  %24780 = vmatprep.mubr.f32.mxu0 %v28523_v36 }
0x1daa   :  { %26654 = vmatprep.subr.bf16.mxu0 %v26613_v38 }
0x1dac   :  { %24781 = vmatmul.mubr.f32.gmra.mrb[46].mxu0 %v28529_v42 }
0x1dad   :  { %26656 = vmatpush3.bf16.msra.mxu0 %v26613_v38  ;;  %24791 = vmatprep.mubr.f32.mxu0 %v28483_v12 }
0x1db0   :  { %24792 = vmatmul.mubr.f32.vlgmr.msra.gmra.mrb[44].mxu0 %v28521_v35 }
0x1db1   :  { %24794 = vmatprep.mubr.f32.mxu0 %v28523_v36 }
0x1db4   :  { %24795 = vmatmul.mubr.f32.gmra.mrb[46].mxu0 %v28529_v42 }
0x1db5   :  { %24889 = vmatprep.mubr.f32.mxu0 %v28493_v16 }
0x1dde   :  { %v14704_v43 = vpop.permute.xlu1 %14703  ;;  %v14702_v45 = vpop.permute.xlu0 %14701 }
0x1ddf   :  { %v14705_v11 = vadd.f32 %v14704_v43, %v14702_v45 }
0x1de1   :  { %v14707_v21 = vmul.f32 %v14705_v11, %v28624_v3 }
0x1de3   :  { %v14708_v58 = vadd.f32 %v14707_v21, %v14706_v59 }
0x1e83   :  { %v24793_v17 = vpop.f32.mrb[44].mxu0 }
0x1e84   :  { %28144 = vtanh.f32 %v24793_v17  ;;  %v15315_v62 = vpop.f32.mrb[45].mxu0 }
0x1e85   :  { %28146 = vtanh.f32 %v15315_v62 }
0x1e87   :  { %v24796_v34 = vpop.f32.mrb[46].mxu0 }
0x1e88   :  { %28148 = vtanh.f32 %v24796_v34  ;;  %v15327_v57 = vpop.f32.mrb[47].mxu0 }
0x1e89   :  { %28150 = vtanh.f32 %v15327_v57 }
0x1e8e   :  { %v28145_v0 = vpop.eup %28144 }
0x1e8f   :  { %v28147_v1 = vpop.eup %28146  ;;  %v15342_v4 = vmul.f32 %v28145_v0, %v28610_v37 }
0x1e90   :  { %v15341_v6 = vmul.f32 %v28147_v1, %v28608_v33 }
0x1e92   :  { %v28149_v51 = vpop.eup %28148  ;;  %v15345_v53 = vadd.f32 %v15342_v4, %v15341_v6 }
0x1e93   :  { %v28151_v24 = vpop.eup %28150  ;;  %v15344_v30 = vmul.f32 %v28149_v51, %v28617_v50 }
0x1e94   :  { %v15343_v40 = vmul.f32 %v28151_v24, %v28614_v48 }
0x1e96   :  { %v15346_v38 = vadd.f32 %v15345_v53, %v15343_v40 }
0x1e98   :  { %v15347_v25 = vadd.f32 %v15346_v38, %v15344_v30 }
0x1e9a   :  { %v15348_v8 = vrot.slane %v15347_v25, 4 }
0x1e9c   :  { %v15349_v15 = vadd.f32 %v15348_v8, %v15347_v25 }
0x1e9e   :  { %v15350_v49 = vrot.slane %v15349_v15, 2 }
0x1ea0   :  { %v15351_v61 = vadd.f32 %v15350_v49, %v15349_v15 }
0x1ea2   :  { %v15352_v41 = vrot.slane %v15351_v61, 1 }
0x1ea4   :  { %v15353_v31 = vadd.f32 %v15352_v41, %v15351_v61 }
0x1ea6   :  { %28152 = vtanh.f32 %v15353_v31 }
0x1eb0   :  { %v28153_v56 = vpop.eup %28152 }
0x1eb1   :  { %v15355_v60 = vmul.f32 %v28153_v56, %v28629_v7 }
0x1eb3   :  { %v29758_v55 = vadd.f32 %v15355_v60, %v14708_v58 }
0x1eb5   :  { %v15357_v46 = vmul.f32 %v29758_v55, %v13380_v29 }
0x1eb7   :  { %v29762_v17 = vadd.f32 %v15357_v46, %v29606_v26 }
0x1eb9   :  { %15361 = vrot.lane.b32.xlu1 %v29762_v17, %s28400_s5  ;;  %v15371_v62 = vrot.slane %v29762_v17, %v28503_v20  ;;  %15359 = vrot.lane.b32.xlu0 %v29762_v17, %s28401_s12 }
0x1ebb   :  { %v15373_v9 = vmul.f32 %v15371_v62, %v28509_v23  ;;  %v15374_v34 = vmul.f32 %v15371_v62, %v28515_v28  ;;  %v15375_v57 = vmul.f32 %v15371_v62, %v28507_v22  ;;  %v15376_v0 = vmul.f32 %v15371_v62, %v28513_v27 }
0x1ebd   :  { %28154 = vtanh.f32 %v15373_v9 }
0x1ebe   :  { %28156 = vtanh.f32 %v15374_v34 }
0x1ebf   :  { %28158 = vtanh.f32 %v15375_v57 }
0x1ec0   :  { %28160 = vtanh.f32 %v15376_v0 }
0x1ec7   :  { %v28155_v1 = vpop.eup %28154 }
0x1ec8   :  { %v28157_v4 = vpop.eup %28156  ;;  %v15382_v6 = vand.u32 4294901760, %v28155_v1 }
0x1ec9   :  { %v28159_v51 = vpop.eup %28158  ;;  %v15385_v53 = vand.u32 4294901760, %v28157_v4 }
0x1eca   :  { %v28161_v24 = vpop.eup %28160  ;;  %v15388_v40 = vand.u32 4294901760, %v28159_v51  ;;  %v15492_v30 = vsub.f32 %v28155_v1, %v15382_v6 }
0x1ecb   :  { %v26657_v38 = vpack.c.bf16 %v15385_v53, %v15382_v6  ;;  %v15391_v25 = vand.u32 4294901760, %v28161_v24  ;;  %v15499_v8 = vsub.f32 %v28157_v4, %v15385_v53 }
0x1ecc   :  { %v15493_v15 = vand.u32 4294901760, %v15492_v30  ;;  %v15506_v49 = vsub.f32 %v28159_v51, %v15388_v40 }
0x1ecd   :  { %26658 = vmatprep.subr.bf16.mxu1 %v26657_v38  ;;  %v26661_v61 = vpack.c.bf16 %v15391_v25, %v15388_v40  ;;  %v15500_v41 = vand.u32 4294901760, %v15499_v8  ;;  %v15513_v31 = vsub.f32 %v28161_v24, %v15391_v25  ;;  %v26673_v34 = vpack.c.bf16 %v15499_v8, %v15492_v30 }
0x1ece   :  { %26660 = vmatpush3.bf16.msra.mxu1 %v26657_v38  ;;  %v15494_v43 = vsub.f32 %v15492_v30, %v15493_v15  ;;  %v15507_v45 = vand.u32 4294901760, %v15506_v49 }
0x1ecf   :  { %26662 = vmatprep.subr.bf16.mxu1 %v26661_v61  ;;  %v15501_v11 = vsub.f32 %v15499_v8, %v15500_v41  ;;  %v15514_v21 = vand.u32 4294901760, %v15513_v31  ;;  %v26677_v57 = vpack.c.bf16 %v15513_v31, %v15506_v49  ;;  %v26689_v0 = vpack.c.bf16 %v15500_v41, %v15493_v15 }
0x1ed0   :  { %v15495_v59 = vand.u32 4294901760, %v15494_v43  ;;  %v15508_v56 = vsub.f32 %v15506_v49, %v15507_v45 }
0x1ed1   :  { %v15502_v58 = vand.u32 4294901760, %v15501_v11  ;;  %v15515_v60 = vsub.f32 %v15513_v31, %v15514_v21  ;;  %v26693_v1 = vpack.c.bf16 %v15514_v21, %v15507_v45 }
0x1ed2   :  { %26664 = vmatpush3.bf16.msra.mxu1 %v26661_v61  ;;  %v15509_v29 = vand.u32 4294901760, %v15508_v56 }
0x1ed3   :  { %v26665_v46 = vpack.c.bf16 %v15502_v58, %v15495_v59  ;;  %v15516_v62 = vand.u32 4294901760, %v15515_v60 }
0x1ed5   :  { %24806 = vmatmul.mubr.f32.vlgmr.msra.gmra.mrb[44].mxu1 %v28565_v5  ;;  %26666 = vmatprep.subr.bf16.mxu1 %v26665_v46  ;;  %v26669_v9 = vpack.c.bf16 %v15516_v62, %v15509_v29 }
0x1ed6   :  { %26668 = vmatpush3.bf16.msra.mxu1 %v26665_v46  ;;  %24808 = vmatprep.mubr.f32.mxu1 %v28570_v10  ;;  %v16015_v46 = vadd.f32 %v29758_v55, %v29708_v32 }
0x1ed7   :  { %26670 = vmatprep.subr.bf16.mxu1 %v26669_v9 }
0x1ed9   :  { %24809 = vmatmul.mubr.f32.gmra.mrb[46].mxu1 %v28573_v19 }
0x1eda   :  { %26672 = vmatpush3.bf16.msra.mxu1 %v26669_v9  ;;  %24819 = vmatprep.mubr.f32.mxu1 %v28483_v12  ;;  %v16016_v9 = vmul.f32 2.0, %v16015_v46 }
0x1edb   :  { %26674 = vmatprep.subr.bf16.mxu1 %v26673_v34 }
0x1edd   :  { %24820 = vmatmul.mubr.f32.vlgmr.msra.gmra.mrb[44].mxu1 %v28521_v35 }
0x1ede   :  { %26676 = vmatpush3.bf16.msra.mxu1 %v26673_v34  ;;  %24822 = vmatprep.mubr.f32.mxu1 %v28523_v36  ;;  %v15364_v34 = vmul.f32 %v29762_v17, %v28622_v2 }
0x1edf   :  { %26678 = vmatprep.subr.bf16.mxu1 %v26677_v57 }
0x1ee1   :  { %24823 = vmatmul.mubr.f32.gmra.mrb[46].mxu1 %v28529_v42 }
0x1ee2   :  { %26680 = vmatpush3.bf16.msra.mxu1 %v26677_v57  ;;  %24833 = vmatprep.mubr.f32.mxu1 %v28486_v13 }
0x1ee3   :  { %26682 = vmatprep.subr.bf16.mxu1 %v26657_v38 }
0x1ee5   :  { %24834 = vmatmul.mubr.f32.vlgmr.msra.gmra.mrb[44].mxu1 %v28527_v39 }
0x1ee6   :  { %26684 = vmatpush3.bf16.msra.mxu1 %v26657_v38  ;;  %24836 = vmatprep.mubr.f32.mxu1 %v28532_v44 }
0x1ee7   :  { %26686 = vmatprep.subr.bf16.mxu1 %v26661_v61 }
0x1ee9   :  { %24837 = vmatmul.mubr.f32.gmra.mrb[46].mxu1 %v28543_v52 }
0x1eea   :  { %26688 = vmatpush3.bf16.msra.mxu1 %v26661_v61  ;;  %24847 = vmatprep.mubr.f32.mxu1 %v28489_v14 }
0x1eeb   :  { %26690 = vmatprep.subr.bf16.mxu1 %v26689_v0 }
0x1eed   :  { %24848 = vmatmul.mubr.f32.vlgmr.msra.gmra.mrb[44].mxu1 %v28537_v47 }
0x1eee   :  { %26692 = vmatpush3.bf16.msra.mxu1 %v26689_v0  ;;  %24850 = vmatprep.mubr.f32.mxu1 %v28546_v54 }
0x1eef   :  { %26694 = vmatprep.subr.bf16.mxu1 %v26693_v1 }
0x1ef1   :  { %24851 = vmatmul.mubr.f32.gmra.mrb[46].mxu1 %v28558_v63 }
0x1ef2   :  { %26696 = vmatpush3.bf16.msra.mxu1 %v26693_v1  ;;  %24861 = vmatprep.mubr.f32.mxu1 %v28483_v12 }
0x1ef3   :  { %26698 = vmatprep.subr.bf16.mxu1 %v26657_v38 }
0x1ef5   :  { %24862 = vmatmul.mubr.f32.vlgmr.msra.gmra.mrb[44].mxu1 %v28521_v35 }
0x1ef6   :  { %26700 = vmatpush3.bf16.msra.mxu1 %v26657_v38  ;;  %24864 = vmatprep.mubr.f32.mxu1 %v28523_v36 }
0x1ef7   :  { %26702 = vmatprep.subr.bf16.mxu1 %v26661_v61 }
0x1ef9   :  { %24865 = vmatmul.mubr.f32.gmra.mrb[46].mxu1 %v28529_v42 }
0x1efa   :  { %26704 = vmatpush3.bf16.msra.mxu1 %v26661_v61  ;;  %24875 = vmatprep.mubr.f32.mxu1 %v28483_v12 }
0x1efd   :  { %24876 = vmatmul.mubr.f32.vlgmr.msra.gmra.mrb[44].mxu1 %v28521_v35 }
0x1efe   :  { %24878 = vmatprep.mubr.f32.mxu1 %v28523_v36 }
0x1f01   :  { %24879 = vmatmul.mubr.f32.gmra.mrb[46].mxu1 %v28529_v42 }
0x1f02   :  { %24973 = vmatprep.mubr.f32.mxu1 %v28493_v16 }
0x1f2b   :  { %v15362_v58 = vpop.permute.xlu1 %15361  ;;  %v15360_v60 = vpop.permute.xlu0 %15359 }
0x1f2c   :  { %v15363_v29 = vadd.f32 %v15362_v58, %v15360_v60 }
0x1f2e   :  { %v15365_v62 = vmul.f32 %v15363_v29, %v28624_v3 }
0x1f30   :  { %v15366_v0 = vadd.f32 %v15365_v62, %v15364_v34 }
0x1fd0   :  { %v24877_v4 = vpop.f32.mrb[44].mxu1 }
0x1fd1   :  { %28162 = vtanh.f32 %v24877_v4  ;;  %v15973_v6 = vpop.f32.mrb[45].mxu1  ;;  %v16017_v4 = vadd.f32 %v16016_v9, %v29659_v18 }
0x1fd2   :  { %28164 = vtanh.f32 %v15973_v6 }
0x1fd4   :  { %v24880_v51 = vpop.f32.mrb[46].mxu1 }
0x1fd5   :  { %28166 = vtanh.f32 %v24880_v51  ;;  %v15985_v53 = vpop.f32.mrb[47].mxu1  ;;  %v13384_v51 = vstv %s13383_s19 }
0x1fd6   :  { %28168 = vtanh.f32 %v15985_v53 }
0x1fdb   :  { %v28163_v24 = vpop.eup %28162 }
0x1fdc   :  { %v28165_v40 = vpop.eup %28164  ;;  %v16000_v30 = vmul.f32 %v28163_v24, %v28610_v37 }
0x1fdd   :  { %v15999_v38 = vmul.f32 %v28165_v40, %v28608_v33 }
0x1fdf   :  { %v28167_v25 = vpop.eup %28166  ;;  %v16003_v8 = vadd.f32 %v16000_v30, %v15999_v38 }
0x1fe0   :  { %v28169_v15 = vpop.eup %28168  ;;  %v16002_v61 = vmul.f32 %v28167_v25, %v28617_v50 }
0x1fe1   :  { %v16001_v49 = vmul.f32 %v28169_v15, %v28614_v48 }
0x1fe3   :  { %v16004_v41 = vadd.f32 %v16003_v8, %v16001_v49 }
0x1fe5   :  { %v16005_v31 = vadd.f32 %v16004_v41, %v16002_v61 }
0x1fe7   :  { %v16006_v43 = vrot.slane %v16005_v31, 4 }
0x1fe9   :  { %v16007_v45 = vadd.f32 %v16006_v43, %v16005_v31 }
0x1feb   :  { %v16008_v11 = vrot.slane %v16007_v45, 2 }
0x1fed   :  { %v16009_v21 = vadd.f32 %v16008_v11, %v16007_v45 }
0x1fef   :  { %v16010_v59 = vrot.slane %v16009_v21, 1 }
0x1ff1   :  { %v16011_v56 = vadd.f32 %v16010_v59, %v16009_v21 }
0x1ff3   :  { %28170 = vtanh.f32 %v16011_v56 }
0x1ffd   :  { %v28171_v57 = vpop.eup %28170 }
0x1ffe   :  { %v16013_v1 = vmul.f32 %v28171_v57, %v28629_v7 }
0x2000   :  { %v16014_v6 = vadd.f32 %v16013_v1, %v15366_v0 }
0x2002   :  { %v16018_v53 = vadd.f32 %v16017_v4, %v16014_v6 }
0x2004   :  { %v16019_v24 = vmul.f32 %v16018_v53, %v13384_v51 }
0x2006   :  { %v29811_v40 = vadd.f32 %v16019_v24, %v29606_v26 }
0x2008   :  { %16031 = vrot.lane.b32.xlu1 %v29811_v40, %s28400_s5  ;;  %16021 = vst [vmem:[%s30228_s6 + $0x5] sm:$0x1] %v29811_v40  ;;  %16029 = vrot.lane.b32.xlu0 %v29811_v40, %s28401_s12  ;;  %v16041_v18 = vrot.slane %v29811_v40, %v28503_v20 }
0x200a   :  { %v16043_v32 = vmul.f32 %v16041_v18, %v28509_v23  ;;  %v16044_v55 = vmul.f32 %v16041_v18, %v28515_v28  ;;  %v16045_v26 = vmul.f32 %v16041_v18, %v28507_v22  ;;  %v16046_v17 = vmul.f32 %v16041_v18, %v28513_v27 }
0x200c   :  { %28172 = vtanh.f32 %v16043_v32 }
0x200d   :  { %28174 = vtanh.f32 %v16044_v55 }
0x200e   :  { %28176 = vtanh.f32 %v16045_v26 }
0x200f   :  { %28178 = vtanh.f32 %v16046_v17 }
0x2016   :  { %v28173_v30 = vpop.eup %28172 }
0x2017   :  { %v28175_v38 = vpop.eup %28174  ;;  %v16052_v25 = vand.u32 4294901760, %v28173_v30 }
0x2018   :  { %v28177_v8 = vpop.eup %28176  ;;  %v16055_v15 = vand.u32 4294901760, %v28175_v38 }
0x2019   :  { %v28179_v49 = vpop.eup %28178  ;;  %v16058_v61 = vand.u32 4294901760, %v28177_v8  ;;  %v16162_v41 = vsub.f32 %v28173_v30, %v16052_v25 }
0x201a   :  { %v26705_v31 = vpack.c.bf16 %v16055_v15, %v16052_v25  ;;  %v16061_v43 = vand.u32 4294901760, %v28179_v49  ;;  %v16169_v45 = vsub.f32 %v28175_v38, %v16055_v15 }
0x201b   :  { %v16163_v11 = vand.u32 4294901760, %v16162_v41  ;;  %v16176_v21 = vsub.f32 %v28177_v8, %v16058_v61 }
0x201c   :  { %26706 = vmatprep.subr.bf16.mxu0 %v26705_v31  ;;  %v26709_v59 = vpack.c.bf16 %v16061_v43, %v16058_v61  ;;  %v16170_v56 = vand.u32 4294901760, %v16169_v45  ;;  %v16183_v58 = vsub.f32 %v28179_v49, %v16061_v43  ;;  %v26721_v53 = vpack.c.bf16 %v16169_v45, %v16162_v41 }
0x201d   :  { %26708 = vmatpush3.bf16.msra.mxu0 %v26705_v31  ;;  %v16164_v60 = vsub.f32 %v16162_v41, %v16163_v11  ;;  %v16177_v29 = vand.u32 4294901760, %v16176_v21 }
0x201e   :  { %26710 = vmatprep.subr.bf16.mxu0 %v26709_v59  ;;  %v16171_v46 = vsub.f32 %v16169_v45, %v16170_v56  ;;  %v16184_v62 = vand.u32 4294901760, %v16183_v58  ;;  %v26725_v24 = vpack.c.bf16 %v16183_v58, %v16176_v21  ;;  %v26737_v18 = vpack.c.bf16 %v16170_v56, %v16163_v11 }
0x201f   :  { %v16165_v9 = vand.u32 4294901760, %v16164_v60  ;;  %v16178_v34 = vsub.f32 %v16176_v21, %v16177_v29 }
0x2020   :  { %v16172_v57 = vand.u32 4294901760, %v16171_v46  ;;  %v16185_v0 = vsub.f32 %v16183_v58, %v16184_v62  ;;  %v26741_v32 = vpack.c.bf16 %v16184_v62, %v16177_v29 }
0x2021   :  { %26712 = vmatpush3.bf16.msra.mxu0 %v26709_v59  ;;  %v16179_v1 = vand.u32 4294901760, %v16178_v34 }
0x2022   :  { %v26713_v4 = vpack.c.bf16 %v16172_v57, %v16165_v9  ;;  %v16186_v6 = vand.u32 4294901760, %v16185_v0  ;;  %v16034_v57 = vmul.f32 %v29811_v40, %v28622_v2 }
0x2024   :  { %24890 = vmatmul.mubr.f32.vlgmr.msra.gmra.mrb[48].mxu0 %v28565_v5  ;;  %26714 = vmatprep.subr.bf16.mxu0 %v26713_v4  ;;  %v26717_v51 = vpack.c.bf16 %v16186_v6, %v16179_v1  ;;  %v29862_v6 = vstv %s16025_s23 }
0x2025   :  { %26716 = vmatpush3.bf16.msra.mxu0 %v26713_v4  ;;  %24892 = vmatprep.mubr.f32.mxu0 %v28570_v10 }
0x2026   :  { %26718 = vmatprep.subr.bf16.mxu0 %v26717_v51 }
0x2028   :  { %24893 = vmatmul.mubr.f32.gmra.mrb[50].mxu0 %v28573_v19 }
0x2029   :  { %26720 = vmatpush3.bf16.msra.mxu0 %v26717_v51  ;;  %24903 = vmatprep.mubr.f32.mxu0 %v28483_v12 }
0x202a   :  { %26722 = vmatprep.subr.bf16.mxu0 %v26721_v53 }
0x202c   :  { %24904 = vmatmul.mubr.f32.vlgmr.msra.gmra.mrb[48].mxu0 %v28521_v35 }
0x202d   :  { %26724 = vmatpush3.bf16.msra.mxu0 %v26721_v53  ;;  %24906 = vmatprep.mubr.f32.mxu0 %v28523_v36 }
0x202e   :  { %26726 = vmatprep.subr.bf16.mxu0 %v26725_v24 }
0x2030   :  { %24907 = vmatmul.mubr.f32.gmra.mrb[50].mxu0 %v28529_v42 }
0x2031   :  { %26728 = vmatpush3.bf16.msra.mxu0 %v26725_v24  ;;  %24917 = vmatprep.mubr.f32.mxu0 %v28486_v13 }
0x2032   :  { %26730 = vmatprep.subr.bf16.mxu0 %v26705_v31 }
0x2034   :  { %24918 = vmatmul.mubr.f32.vlgmr.msra.gmra.mrb[48].mxu0 %v28527_v39 }
0x2035   :  { %26732 = vmatpush3.bf16.msra.mxu0 %v26705_v31  ;;  %24920 = vmatprep.mubr.f32.mxu0 %v28532_v44 }
0x2036   :  { %26734 = vmatprep.subr.bf16.mxu0 %v26709_v59 }
0x2038   :  { %24921 = vmatmul.mubr.f32.gmra.mrb[50].mxu0 %v28543_v52 }
0x2039   :  { %26736 = vmatpush3.bf16.msra.mxu0 %v26709_v59  ;;  %24931 = vmatprep.mubr.f32.mxu0 %v28489_v14 }
0x203a   :  { %26738 = vmatprep.subr.bf16.mxu0 %v26737_v18 }
0x203c   :  { %24932 = vmatmul.mubr.f32.vlgmr.msra.gmra.mrb[48].mxu0 %v28537_v47 }
0x203d   :  { %26740 = vmatpush3.bf16.msra.mxu0 %v26737_v18  ;;  %24934 = vmatprep.mubr.f32.mxu0 %v28546_v54 }
0x203e   :  { %26742 = vmatprep.subr.bf16.mxu0 %v26741_v32 }
0x2040   :  { %24935 = vmatmul.mubr.f32.gmra.mrb[50].mxu0 %v28558_v63 }
0x2041   :  { %26744 = vmatpush3.bf16.msra.mxu0 %v26741_v32  ;;  %24945 = vmatprep.mubr.f32.mxu0 %v28483_v12 }
0x2042   :  { %26746 = vmatprep.subr.bf16.mxu0 %v26705_v31 }
0x2044   :  { %24946 = vmatmul.mubr.f32.vlgmr.msra.gmra.mrb[48].mxu0 %v28521_v35 }
0x2045   :  { %26748 = vmatpush3.bf16.msra.mxu0 %v26705_v31  ;;  %24948 = vmatprep.mubr.f32.mxu0 %v28523_v36 }
0x2046   :  { %26750 = vmatprep.subr.bf16.mxu0 %v26709_v59 }
0x2048   :  { %24949 = vmatmul.mubr.f32.gmra.mrb[50].mxu0 %v28529_v42 }
0x2049   :  { %26752 = vmatpush3.bf16.msra.mxu0 %v26709_v59  ;;  %24959 = vmatprep.mubr.f32.mxu0 %v28483_v12 }
0x204c   :  { %24960 = vmatmul.mubr.f32.vlgmr.msra.gmra.mrb[48].mxu0 %v28521_v35 }
0x204d   :  { %24962 = vmatprep.mubr.f32.mxu0 %v28523_v36 }
0x2050   :  { %24963 = vmatmul.mubr.f32.gmra.mrb[50].mxu0 %v28529_v42 }
0x2051   :  { %25057 = vmatprep.mubr.f32.mxu0 %v28493_v16 }
0x207a   :  { %v16032_v46 = vpop.permute.xlu1 %16031  ;;  %v16030_v62 = vpop.permute.xlu0 %16029 }
0x207b   :  { %v16033_v9 = vadd.f32 %v16032_v46, %v16030_v62 }
0x207d   :  { %v16035_v34 = vmul.f32 %v16033_v9, %v28624_v3 }
0x207f   :  { %v16036_v1 = vadd.f32 %v16035_v34, %v16034_v57 }
0x211f   :  { %v24961_v55 = vpop.f32.mrb[48].mxu0 }
0x2120   :  { %28180 = vtanh.f32 %v24961_v55  ;;  %v16643_v26 = vpop.f32.mrb[49].mxu0 }
0x2121   :  { %28182 = vtanh.f32 %v16643_v26 }
0x2123   :  { %v24964_v17 = vpop.f32.mrb[50].mxu0 }
0x2124   :  { %28184 = vtanh.f32 %v24964_v17  ;;  %v16655_v30 = vpop.f32.mrb[51].mxu0 }
0x2125   :  { %28186 = vtanh.f32 %v16655_v30 }
0x212a   :  { %v28181_v38 = vpop.eup %28180 }
0x212b   :  { %v28183_v25 = vpop.eup %28182  ;;  %v16670_v8 = vmul.f32 %v28181_v38, %v28610_v37 }
0x212c   :  { %v16669_v15 = vmul.f32 %v28183_v25, %v28608_v33 }
0x212e   :  { %v28185_v49 = vpop.eup %28184  ;;  %v16673_v61 = vadd.f32 %v16670_v8, %v16669_v15 }
0x212f   :  { %v28187_v41 = vpop.eup %28186  ;;  %v16672_v43 = vmul.f32 %v28185_v49, %v28617_v50 }
0x2130   :  { %v16671_v31 = vmul.f32 %v28187_v41, %v28614_v48 }
0x2132   :  { %v16674_v45 = vadd.f32 %v16673_v61, %v16671_v31 }
0x2134   :  { %v16675_v11 = vadd.f32 %v16674_v45, %v16672_v43 }
0x2136   :  { %v16676_v21 = vrot.slane %v16675_v11, 4 }
0x2138   :  { %v16677_v59 = vadd.f32 %v16676_v21, %v16675_v11 }
0x213a   :  { %v16678_v56 = vrot.slane %v16677_v59, 2 }
0x213c   :  { %v16679_v58 = vadd.f32 %v16678_v56, %v16677_v59 }
0x213e   :  { %v16680_v60 = vrot.slane %v16679_v58, 1 }
0x2140   :  { %v16681_v29 = vadd.f32 %v16680_v60, %v16679_v58 }
0x2142   :  { %28188 = vtanh.f32 %v16681_v29 }
0x214c   :  { %v28189_v0 = vpop.eup %28188 }
0x214d   :  { %v16683_v4 = vmul.f32 %v28189_v0, %v28629_v7 }
0x214f   :  { %v29864_v51 = vadd.f32 %v16683_v4, %v16036_v1 }
0x2151   :  { %v16685_v53 = vmul.f32 %v29864_v51, %v29862_v6 }
0x2153   :  { %v29869_v24 = vadd.f32 %v16685_v53, %v29811_v40 }
0x2155   :  { %16689 = vrot.lane.b32.xlu1 %v29869_v24, %s28400_s5  ;;  %v16699_v18 = vrot.slane %v29869_v24, %v28503_v20  ;;  %16687 = vrot.lane.b32.xlu0 %v29869_v24, %s28401_s12 }
0x2157   :  { %v16701_v32 = vmul.f32 %v16699_v18, %v28509_v23  ;;  %v16702_v55 = vmul.f32 %v16699_v18, %v28515_v28  ;;  %v16703_v26 = vmul.f32 %v16699_v18, %v28507_v22  ;;  %v16704_v17 = vmul.f32 %v16699_v18, %v28513_v27 }
0x2159   :  { %28190 = vtanh.f32 %v16701_v32 }
0x215a   :  { %28192 = vtanh.f32 %v16702_v55 }
0x215b   :  { %28194 = vtanh.f32 %v16703_v26 }
0x215c   :  { %28196 = vtanh.f32 %v16704_v17 }
0x2163   :  { %v28191_v30 = vpop.eup %28190 }
0x2164   :  { %v28193_v38 = vpop.eup %28192  ;;  %v16710_v25 = vand.u32 4294901760, %v28191_v30 }
0x2165   :  { %v28195_v8 = vpop.eup %28194  ;;  %v16713_v15 = vand.u32 4294901760, %v28193_v38 }
0x2166   :  { %v28197_v49 = vpop.eup %28196  ;;  %v16716_v61 = vand.u32 4294901760, %v28195_v8  ;;  %v16820_v41 = vsub.f32 %v28191_v30, %v16710_v25 }
0x2167   :  { %v26753_v31 = vpack.c.bf16 %v16713_v15, %v16710_v25  ;;  %v16719_v43 = vand.u32 4294901760, %v28197_v49  ;;  %v16827_v45 = vsub.f32 %v28193_v38, %v16713_v15 }
0x2168   :  { %v16821_v11 = vand.u32 4294901760, %v16820_v41  ;;  %v16834_v21 = vsub.f32 %v28195_v8, %v16716_v61 }
0x2169   :  { %26754 = vmatprep.subr.bf16.mxu1 %v26753_v31  ;;  %v26757_v59 = vpack.c.bf16 %v16719_v43, %v16716_v61  ;;  %v16828_v56 = vand.u32 4294901760, %v16827_v45  ;;  %v16841_v58 = vsub.f32 %v28197_v49, %v16719_v43  ;;  %v26769_v32 = vpack.c.bf16 %v16827_v45, %v16820_v41 }
0x216a   :  { %26756 = vmatpush3.bf16.msra.mxu1 %v26753_v31  ;;  %v16822_v60 = vsub.f32 %v16820_v41, %v16821_v11  ;;  %v16835_v29 = vand.u32 4294901760, %v16834_v21 }
0x216b   :  { %26758 = vmatprep.subr.bf16.mxu1 %v26757_v59  ;;  %v16829_v46 = vsub.f32 %v16827_v45, %v16828_v56  ;;  %v16842_v62 = vand.u32 4294901760, %v16841_v58  ;;  %v26773_v55 = vpack.c.bf16 %v16841_v58, %v16834_v21  ;;  %v26785_v26 = vpack.c.bf16 %v16828_v56, %v16821_v11 }
0x216c   :  { %v16823_v9 = vand.u32 4294901760, %v16822_v60  ;;  %v16836_v34 = vsub.f32 %v16834_v21, %v16835_v29 }
0x216d   :  { %v16830_v57 = vand.u32 4294901760, %v16829_v46  ;;  %v16843_v0 = vsub.f32 %v16841_v58, %v16842_v62  ;;  %v26789_v17 = vpack.c.bf16 %v16842_v62, %v16835_v29 }
0x216e   :  { %26760 = vmatpush3.bf16.msra.mxu1 %v26757_v59  ;;  %v16837_v1 = vand.u32 4294901760, %v16836_v34 }
0x216f   :  { %v26761_v4 = vpack.c.bf16 %v16830_v57, %v16823_v9  ;;  %v16844_v53 = vand.u32 4294901760, %v16843_v0 }
0x2171   :  { %24974 = vmatmul.mubr.f32.vlgmr.msra.gmra.mrb[48].mxu1 %v28565_v5  ;;  %26762 = vmatprep.subr.bf16.mxu1 %v26761_v4  ;;  %v26765_v18 = vpack.c.bf16 %v16844_v53, %v16837_v1 }
0x2172   :  { %26764 = vmatpush3.bf16.msra.mxu1 %v26761_v4  ;;  %24976 = vmatprep.mubr.f32.mxu1 %v28570_v10  ;;  %v16692_v4 = vmul.f32 %v29869_v24, %v28622_v2 }
0x2173   :  { %26766 = vmatprep.subr.bf16.mxu1 %v26765_v18 }
0x2175   :  { %24977 = vmatmul.mubr.f32.gmra.mrb[50].mxu1 %v28573_v19 }
0x2176   :  { %26768 = vmatpush3.bf16.msra.mxu1 %v26765_v18  ;;  %24987 = vmatprep.mubr.f32.mxu1 %v28483_v12 }
0x2177   :  { %26770 = vmatprep.subr.bf16.mxu1 %v26769_v32 }
0x2179   :  { %24988 = vmatmul.mubr.f32.vlgmr.msra.gmra.mrb[48].mxu1 %v28521_v35 }
0x217a   :  { %26772 = vmatpush3.bf16.msra.mxu1 %v26769_v32  ;;  %24990 = vmatprep.mubr.f32.mxu1 %v28523_v36 }
0x217b   :  { %26774 = vmatprep.subr.bf16.mxu1 %v26773_v55 }
0x217d   :  { %24991 = vmatmul.mubr.f32.gmra.mrb[50].mxu1 %v28529_v42 }
0x217e   :  { %26776 = vmatpush3.bf16.msra.mxu1 %v26773_v55  ;;  %25001 = vmatprep.mubr.f32.mxu1 %v28486_v13 }
0x217f   :  { %26778 = vmatprep.subr.bf16.mxu1 %v26753_v31 }
0x2181   :  { %25002 = vmatmul.mubr.f32.vlgmr.msra.gmra.mrb[48].mxu1 %v28527_v39 }
0x2182   :  { %26780 = vmatpush3.bf16.msra.mxu1 %v26753_v31  ;;  %25004 = vmatprep.mubr.f32.mxu1 %v28532_v44 }
0x2183   :  { %26782 = vmatprep.subr.bf16.mxu1 %v26757_v59 }
0x2185   :  { %25005 = vmatmul.mubr.f32.gmra.mrb[50].mxu1 %v28543_v52 }
0x2186   :  { %26784 = vmatpush3.bf16.msra.mxu1 %v26757_v59  ;;  %25015 = vmatprep.mubr.f32.mxu1 %v28489_v14 }
0x2187   :  { %26786 = vmatprep.subr.bf16.mxu1 %v26785_v26 }
0x2189   :  { %25016 = vmatmul.mubr.f32.vlgmr.msra.gmra.mrb[48].mxu1 %v28537_v47 }
0x218a   :  { %26788 = vmatpush3.bf16.msra.mxu1 %v26785_v26  ;;  %25018 = vmatprep.mubr.f32.mxu1 %v28546_v54 }
0x218b   :  { %26790 = vmatprep.subr.bf16.mxu1 %v26789_v17 }
0x218d   :  { %25019 = vmatmul.mubr.f32.gmra.mrb[50].mxu1 %v28558_v63 }
0x218e   :  { %26792 = vmatpush3.bf16.msra.mxu1 %v26789_v17  ;;  %25029 = vmatprep.mubr.f32.mxu1 %v28483_v12 }
0x218f   :  { %26794 = vmatprep.subr.bf16.mxu1 %v26753_v31 }
0x2191   :  { %25030 = vmatmul.mubr.f32.vlgmr.msra.gmra.mrb[48].mxu1 %v28521_v35 }
0x2192   :  { %26796 = vmatpush3.bf16.msra.mxu1 %v26753_v31  ;;  %25032 = vmatprep.mubr.f32.mxu1 %v28523_v36 }
0x2193   :  { %26798 = vmatprep.subr.bf16.mxu1 %v26757_v59 }
0x2195   :  { %25033 = vmatmul.mubr.f32.gmra.mrb[50].mxu1 %v28529_v42 }
0x2196   :  { %26800 = vmatpush3.bf16.msra.mxu1 %v26757_v59  ;;  %25043 = vmatprep.mubr.f32.mxu1 %v28483_v12 }
0x2199   :  { %25044 = vmatmul.mubr.f32.vlgmr.msra.gmra.mrb[48].mxu1 %v28521_v35 }
0x219a   :  { %25046 = vmatprep.mubr.f32.mxu1 %v28523_v36 }
0x219d   :  { %25047 = vmatmul.mubr.f32.gmra.mrb[50].mxu1 %v28529_v42 }
0x219e   :  { %25141 = vmatprep.mubr.f32.mxu1 %v28493_v16 }
0x21c7   :  { %v16690_v34 = vpop.permute.xlu1 %16689  ;;  %v16688_v57 = vpop.permute.xlu0 %16687 }
0x21c8   :  { %v16691_v0 = vadd.f32 %v16690_v34, %v16688_v57 }
0x21ca   :  { %v16693_v1 = vmul.f32 %v16691_v0, %v28624_v3 }
0x21cc   :  { %v16694_v18 = vadd.f32 %v16693_v1, %v16692_v4 }
0x226c   :  { %v25045_v30 = vpop.f32.mrb[48].mxu1 }
0x226d   :  { %28198 = vtanh.f32 %v25045_v30  ;;  %v17301_v38 = vpop.f32.mrb[49].mxu1 }
0x226e   :  { %28200 = vtanh.f32 %v17301_v38 }
0x2270   :  { %v25048_v25 = vpop.f32.mrb[50].mxu1 }
0x2271   :  { %28202 = vtanh.f32 %v25048_v25  ;;  %v17313_v8 = vpop.f32.mrb[51].mxu1 }
0x2272   :  { %28204 = vtanh.f32 %v17313_v8 }
0x2277   :  { %v28199_v15 = vpop.eup %28198 }
0x2278   :  { %v28201_v49 = vpop.eup %28200  ;;  %v17328_v61 = vmul.f32 %v28199_v15, %v28610_v37 }
0x2279   :  { %v17327_v41 = vmul.f32 %v28201_v49, %v28608_v33 }
0x227b   :  { %v28203_v31 = vpop.eup %28202  ;;  %v17331_v43 = vadd.f32 %v17328_v61, %v17327_v41 }
0x227c   :  { %v28205_v45 = vpop.eup %28204  ;;  %v17330_v21 = vmul.f32 %v28203_v31, %v28617_v50 }
0x227d   :  { %v17329_v11 = vmul.f32 %v28205_v45, %v28614_v48 }
0x227f   :  { %v17332_v59 = vadd.f32 %v17331_v43, %v17329_v11 }
0x2281   :  { %v17333_v56 = vadd.f32 %v17332_v59, %v17330_v21 }
0x2283   :  { %v17334_v58 = vrot.slane %v17333_v56, 4 }
0x2285   :  { %v17335_v60 = vadd.f32 %v17334_v58, %v17333_v56 }
0x2287   :  { %v17336_v29 = vrot.slane %v17335_v60, 2 }
0x2289   :  { %v17337_v46 = vadd.f32 %v17336_v29, %v17335_v60 }
0x228b   :  { %v17338_v62 = vrot.slane %v17337_v46, 1 }
0x228d   :  { %v17339_v9 = vadd.f32 %v17338_v62, %v17337_v46 }
0x228f   :  { %28206 = vtanh.f32 %v17339_v9 }
0x2299   :  { %v28207_v53 = vpop.eup %28206 }
0x229a   :  { %v17341_v32 = vmul.f32 %v28207_v53, %v28629_v7 }
0x229c   :  { %v29913_v55 = vadd.f32 %v17341_v32, %v16694_v18 }
0x229e   :  { %v17343_v26 = vmul.f32 %v29913_v55, %v29862_v6 }
0x22a0   :  { %v29918_v17 = vadd.f32 %v17343_v26, %v29811_v40 }
0x22a2   :  { %17347 = vrot.lane.b32.xlu1 %v29918_v17, %s28400_s5  ;;  %v17357_v30 = vrot.slane %v29918_v17, %v28503_v20  ;;  %17345 = vrot.lane.b32.xlu0 %v29918_v17, %s28401_s12 }
0x22a4   :  { %v17359_v24 = vmul.f32 %v17357_v30, %v28509_v23  ;;  %v17360_v38 = vmul.f32 %v17357_v30, %v28515_v28  ;;  %v17361_v25 = vmul.f32 %v17357_v30, %v28507_v22  ;;  %v17362_v6 = vmul.f32 %v17357_v30, %v28513_v27 }
0x22a6   :  { %28208 = vtanh.f32 %v17359_v24 }
0x22a7   :  { %28210 = vtanh.f32 %v17360_v38 }
0x22a8   :  { %28212 = vtanh.f32 %v17361_v25 }
0x22a9   :  { %28214 = vtanh.f32 %v17362_v6 }
0x22b0   :  { %v28209_v8 = vpop.eup %28208 }
0x22b1   :  { %v28211_v15 = vpop.eup %28210  ;;  %v17368_v49 = vand.u32 4294901760, %v28209_v8 }
0x22b2   :  { %v28213_v61 = vpop.eup %28212  ;;  %v17371_v41 = vand.u32 4294901760, %v28211_v15 }
0x22b3   :  { %v28215_v31 = vpop.eup %28214  ;;  %v17374_v43 = vand.u32 4294901760, %v28213_v61  ;;  %v17478_v45 = vsub.f32 %v28209_v8, %v17368_v49 }
0x22b4   :  { %v26801_v11 = vpack.c.bf16 %v17371_v41, %v17368_v49  ;;  %v17377_v21 = vand.u32 4294901760, %v28215_v31  ;;  %v17485_v59 = vsub.f32 %v28211_v15, %v17371_v41 }
0x22b5   :  { %v17479_v56 = vand.u32 4294901760, %v17478_v45  ;;  %v17492_v58 = vsub.f32 %v28213_v61, %v17374_v43 }
0x22b6   :  { %26802 = vmatprep.subr.bf16.mxu0 %v26801_v11  ;;  %v26805_v60 = vpack.c.bf16 %v17377_v21, %v17374_v43  ;;  %v17486_v29 = vand.u32 4294901760, %v17485_v59  ;;  %v17499_v46 = vsub.f32 %v28215_v31, %v17377_v21  ;;  %v26817_v24 = vpack.c.bf16 %v17485_v59, %v17478_v45 }
0x22b7   :  { %26804 = vmatpush3.bf16.msra.mxu0 %v26801_v11  ;;  %v17480_v62 = vsub.f32 %v17478_v45, %v17479_v56  ;;  %v17493_v9 = vand.u32 4294901760, %v17492_v58 }
0x22b8   :  { %26806 = vmatprep.subr.bf16.mxu0 %v26805_v60  ;;  %v17487_v34 = vsub.f32 %v17485_v59, %v17486_v29  ;;  %v17500_v57 = vand.u32 4294901760, %v17499_v46  ;;  %v26821_v38 = vpack.c.bf16 %v17499_v46, %v17492_v58  ;;  %v26833_v25 = vpack.c.bf16 %v17486_v29, %v17479_v56 }
0x22b9   :  { %v17481_v0 = vand.u32 4294901760, %v17480_v62  ;;  %v17494_v1 = vsub.f32 %v17492_v58, %v17493_v9 }
0x22ba   :  { %v17488_v4 = vand.u32 4294901760, %v17487_v34  ;;  %v17501_v53 = vsub.f32 %v17499_v46, %v17500_v57  ;;  %v26837_v6 = vpack.c.bf16 %v17500_v57, %v17493_v9 }
0x22bb   :  { %26808 = vmatpush3.bf16.msra.mxu0 %v26805_v60  ;;  %v17495_v18 = vand.u32 4294901760, %v17494_v1 }
0x22bc   :  { %v26809_v32 = vpack.c.bf16 %v17488_v4, %v17481_v0  ;;  %v17502_v26 = vand.u32 4294901760, %v17501_v53 }
0x22be   :  { %25058 = vmatmul.mubr.f32.vlgmr.msra.gmra.mrb[52].mxu0 %v28565_v5  ;;  %26810 = vmatprep.subr.bf16.mxu0 %v26809_v32  ;;  %v26813_v30 = vpack.c.bf16 %v17502_v26, %v17495_v18 }
0x22bf   :  { %26812 = vmatpush3.bf16.msra.mxu0 %v26809_v32  ;;  %25060 = vmatprep.mubr.f32.mxu0 %v28570_v10  ;;  %v17350_v32 = vmul.f32 %v29918_v17, %v28622_v2 }
0x22c0   :  { %26814 = vmatprep.subr.bf16.mxu0 %v26813_v30 }
0x22c2   :  { %25061 = vmatmul.mubr.f32.gmra.mrb[54].mxu0 %v28573_v19 }
0x22c3   :  { %26816 = vmatpush3.bf16.msra.mxu0 %v26813_v30  ;;  %25071 = vmatprep.mubr.f32.mxu0 %v28483_v12 }
0x22c4   :  { %26818 = vmatprep.subr.bf16.mxu0 %v26817_v24 }
0x22c6   :  { %25072 = vmatmul.mubr.f32.vlgmr.msra.gmra.mrb[52].mxu0 %v28521_v35 }
0x22c7   :  { %26820 = vmatpush3.bf16.msra.mxu0 %v26817_v24  ;;  %25074 = vmatprep.mubr.f32.mxu0 %v28523_v36 }
0x22c8   :  { %26822 = vmatprep.subr.bf16.mxu0 %v26821_v38 }
0x22ca   :  { %25075 = vmatmul.mubr.f32.gmra.mrb[54].mxu0 %v28529_v42 }
0x22cb   :  { %26824 = vmatpush3.bf16.msra.mxu0 %v26821_v38  ;;  %25085 = vmatprep.mubr.f32.mxu0 %v28486_v13  ;;  %v16024_v38 = vstv %s29855_s22 }
0x22cc   :  { %26826 = vmatprep.subr.bf16.mxu0 %v26801_v11 }
0x22ce   :  { %25086 = vmatmul.mubr.f32.vlgmr.msra.gmra.mrb[52].mxu0 %v28527_v39 }
0x22cf   :  { %26828 = vmatpush3.bf16.msra.mxu0 %v26801_v11  ;;  %25088 = vmatprep.mubr.f32.mxu0 %v28532_v44 }
0x22d0   :  { %26830 = vmatprep.subr.bf16.mxu0 %v26805_v60 }
0x22d2   :  { %25089 = vmatmul.mubr.f32.gmra.mrb[54].mxu0 %v28543_v52 }
0x22d3   :  { %26832 = vmatpush3.bf16.msra.mxu0 %v26805_v60  ;;  %25099 = vmatprep.mubr.f32.mxu0 %v28489_v14 }
0x22d4   :  { %26834 = vmatprep.subr.bf16.mxu0 %v26833_v25 }
0x22d6   :  { %25100 = vmatmul.mubr.f32.vlgmr.msra.gmra.mrb[52].mxu0 %v28537_v47 }
0x22d7   :  { %26836 = vmatpush3.bf16.msra.mxu0 %v26833_v25  ;;  %25102 = vmatprep.mubr.f32.mxu0 %v28546_v54 }
0x22d8   :  { %26838 = vmatprep.subr.bf16.mxu0 %v26837_v6 }
0x22da   :  { %25103 = vmatmul.mubr.f32.gmra.mrb[54].mxu0 %v28558_v63 }
0x22db   :  { %26840 = vmatpush3.bf16.msra.mxu0 %v26837_v6  ;;  %25113 = vmatprep.mubr.f32.mxu0 %v28483_v12 }
0x22dc   :  { %26842 = vmatprep.subr.bf16.mxu0 %v26801_v11 }
0x22de   :  { %25114 = vmatmul.mubr.f32.vlgmr.msra.gmra.mrb[52].mxu0 %v28521_v35 }
0x22df   :  { %26844 = vmatpush3.bf16.msra.mxu0 %v26801_v11  ;;  %25116 = vmatprep.mubr.f32.mxu0 %v28523_v36 }
0x22e0   :  { %26846 = vmatprep.subr.bf16.mxu0 %v26805_v60 }
0x22e2   :  { %25117 = vmatmul.mubr.f32.gmra.mrb[54].mxu0 %v28529_v42 }
0x22e3   :  { %26848 = vmatpush3.bf16.msra.mxu0 %v26805_v60  ;;  %25127 = vmatprep.mubr.f32.mxu0 %v28483_v12 }
0x22e6   :  { %25128 = vmatmul.mubr.f32.vlgmr.msra.gmra.mrb[52].mxu0 %v28521_v35 }
0x22e7   :  { %25130 = vmatprep.mubr.f32.mxu0 %v28523_v36 }
0x22ea   :  { %25131 = vmatmul.mubr.f32.gmra.mrb[54].mxu0 %v28529_v42 }
0x22eb   :  { %25225 = vmatprep.mubr.f32.mxu0 %v28493_v16 }
0x2314   :  { %v17348_v1 = vpop.permute.xlu1 %17347  ;;  %v17346_v4 = vpop.permute.xlu0 %17345 }
0x2315   :  { %v17349_v53 = vadd.f32 %v17348_v1, %v17346_v4 }
0x2317   :  { %v17351_v18 = vmul.f32 %v17349_v53, %v28624_v3 }
0x2319   :  { %v17352_v30 = vadd.f32 %v17351_v18, %v17350_v32 }
0x23b9   :  { %v25129_v8 = vpop.f32.mrb[52].mxu0 }
0x23ba   :  { %28216 = vtanh.f32 %v25129_v8  ;;  %v17959_v15 = vpop.f32.mrb[53].mxu0 }
0x23bb   :  { %28218 = vtanh.f32 %v17959_v15 }
0x23bd   :  { %v25132_v49 = vpop.f32.mrb[54].mxu0 }
0x23be   :  { %28220 = vtanh.f32 %v25132_v49  ;;  %v17971_v61 = vpop.f32.mrb[55].mxu0 }
0x23bf   :  { %28222 = vtanh.f32 %v17971_v61 }
0x23c4   :  { %v28217_v41 = vpop.eup %28216 }
0x23c5   :  { %v28219_v31 = vpop.eup %28218  ;;  %v17986_v43 = vmul.f32 %v28217_v41, %v28610_v37 }
0x23c6   :  { %v17985_v45 = vmul.f32 %v28219_v31, %v28608_v33 }
0x23c8   :  { %v28221_v11 = vpop.eup %28220  ;;  %v17989_v21 = vadd.f32 %v17986_v43, %v17985_v45 }
0x23c9   :  { %v28223_v59 = vpop.eup %28222  ;;  %v17988_v58 = vmul.f32 %v28221_v11, %v28617_v50 }
0x23ca   :  { %v17987_v56 = vmul.f32 %v28223_v59, %v28614_v48 }
0x23cc   :  { %v17990_v60 = vadd.f32 %v17989_v21, %v17987_v56 }
0x23ce   :  { %v17991_v29 = vadd.f32 %v17990_v60, %v17988_v58 }
0x23d0   :  { %v17992_v46 = vrot.slane %v17991_v29, 4 }
0x23d2   :  { %v17993_v62 = vadd.f32 %v17992_v46, %v17991_v29 }
0x23d4   :  { %v17994_v9 = vrot.slane %v17993_v62, 2 }
0x23d6   :  { %v17995_v34 = vadd.f32 %v17994_v9, %v17993_v62 }
0x23d8   :  { %v17996_v57 = vrot.slane %v17995_v34, 1 }
0x23da   :  { %v17997_v0 = vadd.f32 %v17996_v57, %v17995_v34 }
0x23dc   :  { %28224 = vtanh.f32 %v17997_v0 }
0x23e6   :  { %v28225_v26 = vpop.eup %28224 }
0x23e7   :  { %v17999_v24 = vmul.f32 %v28225_v26, %v28629_v7 }
0x23e9   :  { %v29963_v25 = vadd.f32 %v17999_v24, %v17352_v30 }
0x23eb   :  { %v18001_v6 = vmul.f32 %v29963_v25, %v16024_v38 }
0x23ed   :  { %v29967_v8 = vadd.f32 %v18001_v6, %v29811_v40 }
0x23ef   :  { %18005 = vrot.lane.b32.xlu1 %v29967_v8, %s28400_s5  ;;  %v18015_v15 = vrot.slane %v29967_v8, %v28503_v20  ;;  %18003 = vrot.lane.b32.xlu0 %v29967_v8, %s28401_s12 }
0x23f1   :  { %v18017_v17 = vmul.f32 %v18015_v15, %v28509_v23  ;;  %v18018_v49 = vmul.f32 %v18015_v15, %v28515_v28  ;;  %v18019_v61 = vmul.f32 %v18015_v15, %v28507_v22  ;;  %v18020_v41 = vmul.f32 %v18015_v15, %v28513_v27 }
0x23f3   :  { %28226 = vtanh.f32 %v18017_v17 }
0x23f4   :  { %28228 = vtanh.f32 %v18018_v49 }
0x23f5   :  { %28230 = vtanh.f32 %v18019_v61 }
0x23f6   :  { %28232 = vtanh.f32 %v18020_v41 }
0x23fd   :  { %v28227_v31 = vpop.eup %28226 }
0x23fe   :  { %v28229_v43 = vpop.eup %28228  ;;  %v18026_v45 = vand.u32 4294901760, %v28227_v31 }
0x23ff   :  { %v28231_v11 = vpop.eup %28230  ;;  %v18029_v21 = vand.u32 4294901760, %v28229_v43 }
0x2400   :  { %v28233_v59 = vpop.eup %28232  ;;  %v18032_v56 = vand.u32 4294901760, %v28231_v11  ;;  %v18136_v58 = vsub.f32 %v28227_v31, %v18026_v45 }
0x2401   :  { %v26849_v60 = vpack.c.bf16 %v18029_v21, %v18026_v45  ;;  %v18035_v29 = vand.u32 4294901760, %v28233_v59  ;;  %v18143_v46 = vsub.f32 %v28229_v43, %v18029_v21 }
0x2402   :  { %v18137_v62 = vand.u32 4294901760, %v18136_v58  ;;  %v18150_v9 = vsub.f32 %v28231_v11, %v18032_v56 }
0x2403   :  { %26850 = vmatprep.subr.bf16.mxu1 %v26849_v60  ;;  %v26853_v34 = vpack.c.bf16 %v18035_v29, %v18032_v56  ;;  %v18144_v57 = vand.u32 4294901760, %v18143_v46  ;;  %v18157_v0 = vsub.f32 %v28233_v59, %v18035_v29  ;;  %v26865_v49 = vpack.c.bf16 %v18143_v46, %v18136_v58 }
0x2404   :  { %26852 = vmatpush3.bf16.msra.mxu1 %v26849_v60  ;;  %v18138_v1 = vsub.f32 %v18136_v58, %v18137_v62  ;;  %v18151_v4 = vand.u32 4294901760, %v18150_v9 }
0x2405   :  { %26854 = vmatprep.subr.bf16.mxu1 %v26853_v34  ;;  %v18145_v53 = vsub.f32 %v18143_v46, %v18144_v57  ;;  %v18158_v18 = vand.u32 4294901760, %v18157_v0  ;;  %v26869_v61 = vpack.c.bf16 %v18157_v0, %v18150_v9  ;;  %v26881_v41 = vpack.c.bf16 %v18144_v57, %v18137_v62 }
0x2406   :  { %v18139_v32 = vand.u32 4294901760, %v18138_v1  ;;  %v18152_v26 = vsub.f32 %v18150_v9, %v18151_v4 }
0x2407   :  { %v18146_v30 = vand.u32 4294901760, %v18145_v53  ;;  %v18159_v24 = vsub.f32 %v18157_v0, %v18158_v18  ;;  %v26885_v31 = vpack.c.bf16 %v18158_v18, %v18151_v4 }
0x2408   :  { %26856 = vmatpush3.bf16.msra.mxu1 %v26853_v34  ;;  %v18153_v38 = vand.u32 4294901760, %v18152_v26 }
0x2409   :  { %v26857_v6 = vpack.c.bf16 %v18146_v30, %v18139_v32  ;;  %v18160_v15 = vand.u32 4294901760, %v18159_v24 }
0x240b   :  { %25142 = vmatmul.mubr.f32.vlgmr.msra.gmra.mrb[52].mxu1 %v28565_v5  ;;  %26858 = vmatprep.subr.bf16.mxu1 %v26857_v6  ;;  %v26861_v17 = vpack.c.bf16 %v18160_v15, %v18153_v38 }
0x240c   :  { %26860 = vmatpush3.bf16.msra.mxu1 %v26857_v6  ;;  %25144 = vmatprep.mubr.f32.mxu1 %v28570_v10  ;;  %v18659_v6 = vadd.f32 %v29963_v25, %v29913_v55 }
0x240d   :  { %26862 = vmatprep.subr.bf16.mxu1 %v26861_v17 }
0x240f   :  { %25145 = vmatmul.mubr.f32.gmra.mrb[54].mxu1 %v28573_v19 }
0x2410   :  { %26864 = vmatpush3.bf16.msra.mxu1 %v26861_v17  ;;  %25155 = vmatprep.mubr.f32.mxu1 %v28483_v12  ;;  %v18660_v17 = vmul.f32 2.0, %v18659_v6 }
0x2411   :  { %26866 = vmatprep.subr.bf16.mxu1 %v26865_v49 }
0x2413   :  { %25156 = vmatmul.mubr.f32.vlgmr.msra.gmra.mrb[52].mxu1 %v28521_v35 }
0x2414   :  { %26868 = vmatpush3.bf16.msra.mxu1 %v26865_v49  ;;  %25158 = vmatprep.mubr.f32.mxu1 %v28523_v36  ;;  %v18008_v49 = vmul.f32 %v29967_v8, %v28622_v2 }
0x2415   :  { %26870 = vmatprep.subr.bf16.mxu1 %v26869_v61 }
0x2417   :  { %25159 = vmatmul.mubr.f32.gmra.mrb[54].mxu1 %v28529_v42 }
0x2418   :  { %26872 = vmatpush3.bf16.msra.mxu1 %v26869_v61  ;;  %25169 = vmatprep.mubr.f32.mxu1 %v28486_v13 }
0x2419   :  { %26874 = vmatprep.subr.bf16.mxu1 %v26849_v60 }
0x241b   :  { %25170 = vmatmul.mubr.f32.vlgmr.msra.gmra.mrb[52].mxu1 %v28527_v39 }
0x241c   :  { %26876 = vmatpush3.bf16.msra.mxu1 %v26849_v60  ;;  %25172 = vmatprep.mubr.f32.mxu1 %v28532_v44 }
0x241d   :  { %26878 = vmatprep.subr.bf16.mxu1 %v26853_v34 }
0x241f   :  { %25173 = vmatmul.mubr.f32.gmra.mrb[54].mxu1 %v28543_v52 }
0x2420   :  { %26880 = vmatpush3.bf16.msra.mxu1 %v26853_v34  ;;  %25183 = vmatprep.mubr.f32.mxu1 %v28489_v14 }
0x2421   :  { %26882 = vmatprep.subr.bf16.mxu1 %v26881_v41 }
0x2423   :  { %25184 = vmatmul.mubr.f32.vlgmr.msra.gmra.mrb[52].mxu1 %v28537_v47 }
0x2424   :  { %26884 = vmatpush3.bf16.msra.mxu1 %v26881_v41  ;;  %25186 = vmatprep.mubr.f32.mxu1 %v28546_v54 }
0x2425   :  { %26886 = vmatprep.subr.bf16.mxu1 %v26885_v31 }
0x2427   :  { %25187 = vmatmul.mubr.f32.gmra.mrb[54].mxu1 %v28558_v63 }
0x2428   :  { %26888 = vmatpush3.bf16.msra.mxu1 %v26885_v31  ;;  %25197 = vmatprep.mubr.f32.mxu1 %v28483_v12 }
0x2429   :  { %26890 = vmatprep.subr.bf16.mxu1 %v26849_v60 }
0x242b   :  { %25198 = vmatmul.mubr.f32.vlgmr.msra.gmra.mrb[52].mxu1 %v28521_v35 }
0x242c   :  { %26892 = vmatpush3.bf16.msra.mxu1 %v26849_v60  ;;  %25200 = vmatprep.mubr.f32.mxu1 %v28523_v36 }
0x242d   :  { %26894 = vmatprep.subr.bf16.mxu1 %v26853_v34 }
0x242f   :  { %25201 = vmatmul.mubr.f32.gmra.mrb[54].mxu1 %v28529_v42 }
0x2430   :  { %26896 = vmatpush3.bf16.msra.mxu1 %v26853_v34  ;;  %25211 = vmatprep.mubr.f32.mxu1 %v28483_v12 }
0x2433   :  { %25212 = vmatmul.mubr.f32.vlgmr.msra.gmra.mrb[52].mxu1 %v28521_v35 }
0x2434   :  { %25214 = vmatprep.mubr.f32.mxu1 %v28523_v36 }
0x2437   :  { %25215 = vmatmul.mubr.f32.gmra.mrb[54].mxu1 %v28529_v42 }
0x2438   :  { %25309 = vmatprep.mubr.f32.mxu1 %v28493_v16 }
0x2461   :  { %v18006_v30 = vpop.permute.xlu1 %18005  ;;  %v18004_v24 = vpop.permute.xlu0 %18003 }
0x2462   :  { %v18007_v38 = vadd.f32 %v18006_v30, %v18004_v24 }
0x2464   :  { %v18009_v15 = vmul.f32 %v18007_v38, %v28624_v3 }
0x2466   :  { %v18010_v41 = vadd.f32 %v18009_v15, %v18008_v49 }
0x2506   :  { %v25213_v43 = vpop.f32.mrb[52].mxu1 }
0x2507   :  { %28234 = vtanh.f32 %v25213_v43  ;;  %v18617_v45 = vpop.f32.mrb[53].mxu1  ;;  %v18661_v43 = vadd.f32 %v18660_v17, %v29864_v51 }
0x2508   :  { %28236 = vtanh.f32 %v18617_v45 }
0x250a   :  { %v25216_v11 = vpop.f32.mrb[54].mxu1 }
0x250b   :  { %28238 = vtanh.f32 %v25216_v11  ;;  %v18629_v21 = vpop.f32.mrb[55].mxu1  ;;  %v16028_v11 = vstv %s16027_s24 }
0x250c   :  { %28240 = vtanh.f32 %v18629_v21 }
0x2511   :  { %v28235_v59 = vpop.eup %28234 }
0x2512   :  { %v28237_v56 = vpop.eup %28236  ;;  %v18644_v58 = vmul.f32 %v28235_v59, %v28610_v37 }
0x2513   :  { %v18643_v60 = vmul.f32 %v28237_v56, %v28608_v33 }
0x2515   :  { %v28239_v29 = vpop.eup %28238  ;;  %v18647_v46 = vadd.f32 %v18644_v58, %v18643_v60 }
0x2516   :  { %v28241_v62 = vpop.eup %28240  ;;  %v18646_v34 = vmul.f32 %v28239_v29, %v28617_v50 }
0x2517   :  { %v18645_v9 = vmul.f32 %v28241_v62, %v28614_v48 }
0x2519   :  { %v18648_v57 = vadd.f32 %v18647_v46, %v18645_v9 }
0x251b   :  { %v18649_v0 = vadd.f32 %v18648_v57, %v18646_v34 }
0x251d   :  { %v18650_v1 = vrot.slane %v18649_v0, 4 }
0x251f   :  { %v18651_v4 = vadd.f32 %v18650_v1, %v18649_v0 }
0x2521   :  { %v18652_v53 = vrot.slane %v18651_v4, 2 }
0x2523   :  { %v18653_v18 = vadd.f32 %v18652_v53, %v18651_v4 }
0x2525   :  { %v18654_v32 = vrot.slane %v18653_v18, 1 }
0x2527   :  { %v18655_v26 = vadd.f32 %v18654_v32, %v18653_v18 }
0x2529   :  { %28242 = vtanh.f32 %v18655_v26 }
0x2533   :  { %v28243_v61 = vpop.eup %28242 }
0x2534   :  { %v18657_v31 = vmul.f32 %v28243_v61, %v28629_v7 }
0x2536   :  { %v18658_v45 = vadd.f32 %v18657_v31, %v18010_v41 }
0x2538   :  { %v18662_v21 = vadd.f32 %v18661_v43, %v18658_v45 }
0x253a   :  { %v18663_v59 = vmul.f32 %v18662_v21, %v16028_v11 }
0x253c   :  { %v30016_v56 = vadd.f32 %v18663_v59, %v29811_v40 }
0x253e   :  { %18675 = vrot.lane.b32.xlu1 %v30016_v56, %s28400_s5  ;;  %18665 = vst [vmem:[%s30228_s6 + $0x6] sm:$0x1] %v30016_v56  ;;  %18673 = vrot.lane.b32.xlu0 %v30016_v56, %s28401_s12  ;;  %v18685_v51 = vrot.slane %v30016_v56, %v28503_v20 }
0x2540   :  { %v18687_v55 = vmul.f32 %v18685_v51, %v28509_v23  ;;  %v18688_v25 = vmul.f32 %v18685_v51, %v28515_v28  ;;  %v18689_v40 = vmul.f32 %v18685_v51, %v28507_v22  ;;  %v18690_v8 = vmul.f32 %v18685_v51, %v28513_v27 }
0x2542   :  { %28244 = vtanh.f32 %v18687_v55 }
0x2543   :  { %28246 = vtanh.f32 %v18688_v25 }
0x2544   :  { %28248 = vtanh.f32 %v18689_v40 }
0x2545   :  { %28250 = vtanh.f32 %v18690_v8 }
0x254c   :  { %v28245_v58 = vpop.eup %28244 }
0x254d   :  { %v28247_v60 = vpop.eup %28246  ;;  %v18696_v29 = vand.u32 4294901760, %v28245_v58 }
0x254e   :  { %v28249_v46 = vpop.eup %28248  ;;  %v18699_v62 = vand.u32 4294901760, %v28247_v60 }
0x254f   :  { %v28251_v9 = vpop.eup %28250  ;;  %v18702_v34 = vand.u32 4294901760, %v28249_v46  ;;  %v18806_v57 = vsub.f32 %v28245_v58, %v18696_v29 }
0x2550   :  { %v26897_v0 = vpack.c.bf16 %v18699_v62, %v18696_v29  ;;  %v18705_v1 = vand.u32 4294901760, %v28251_v9  ;;  %v18813_v4 = vsub.f32 %v28247_v60, %v18699_v62 }
0x2551   :  { %v18807_v53 = vand.u32 4294901760, %v18806_v57  ;;  %v18820_v18 = vsub.f32 %v28249_v46, %v18702_v34 }
0x2552   :  { %26898 = vmatprep.subr.bf16.mxu0 %v26897_v0  ;;  %v26901_v32 = vpack.c.bf16 %v18705_v1, %v18702_v34  ;;  %v18814_v26 = vand.u32 4294901760, %v18813_v4  ;;  %v18827_v30 = vsub.f32 %v28251_v9, %v18705_v1  ;;  %v26913_v21 = vpack.c.bf16 %v18813_v4, %v18806_v57 }
0x2553   :  { %26900 = vmatpush3.bf16.msra.mxu0 %v26897_v0  ;;  %v18808_v24 = vsub.f32 %v18806_v57, %v18807_v53  ;;  %v18821_v38 = vand.u32 4294901760, %v18820_v18 }
0x2554   :  { %26902 = vmatprep.subr.bf16.mxu0 %v26901_v32  ;;  %v18815_v6 = vsub.f32 %v18813_v4, %v18814_v26  ;;  %v18828_v15 = vand.u32 4294901760, %v18827_v30  ;;  %v26917_v59 = vpack.c.bf16 %v18827_v30, %v18820_v18  ;;  %v26929_v51 = vpack.c.bf16 %v18814_v26, %v18807_v53 }
0x2555   :  { %v18809_v17 = vand.u32 4294901760, %v18808_v24  ;;  %v18822_v49 = vsub.f32 %v18820_v18, %v18821_v38 }
0x2556   :  { %v18816_v61 = vand.u32 4294901760, %v18815_v6  ;;  %v18829_v41 = vsub.f32 %v18827_v30, %v18828_v15  ;;  %v26933_v55 = vpack.c.bf16 %v18828_v15, %v18821_v38 }
0x2557   :  { %26904 = vmatpush3.bf16.msra.mxu0 %v26901_v32  ;;  %v18823_v31 = vand.u32 4294901760, %v18822_v49 }
0x2558   :  { %v26905_v43 = vpack.c.bf16 %v18816_v61, %v18809_v17  ;;  %v18830_v45 = vand.u32 4294901760, %v18829_v41  ;;  %v18678_v61 = vmul.f32 %v30016_v56, %v28622_v2 }
0x255a   :  { %25226 = vmatmul.mubr.f32.vlgmr.msra.gmra.mrb[56].mxu0 %v28565_v5  ;;  %26906 = vmatprep.subr.bf16.mxu0 %v26905_v43  ;;  %v26909_v11 = vpack.c.bf16 %v18830_v45, %v18823_v31  ;;  %v30067_v45 = vstv %s18669_s28 }
0x255b   :  { %26908 = vmatpush3.bf16.msra.mxu0 %v26905_v43  ;;  %25228 = vmatprep.mubr.f32.mxu0 %v28570_v10 }
0x255c   :  { %26910 = vmatprep.subr.bf16.mxu0 %v26909_v11 }
0x255e   :  { %25229 = vmatmul.mubr.f32.gmra.mrb[58].mxu0 %v28573_v19 }
0x255f   :  { %26912 = vmatpush3.bf16.msra.mxu0 %v26909_v11  ;;  %25239 = vmatprep.mubr.f32.mxu0 %v28483_v12 }
0x2560   :  { %26914 = vmatprep.subr.bf16.mxu0 %v26913_v21 }
0x2562   :  { %25240 = vmatmul.mubr.f32.vlgmr.msra.gmra.mrb[56].mxu0 %v28521_v35 }
0x2563   :  { %26916 = vmatpush3.bf16.msra.mxu0 %v26913_v21  ;;  %25242 = vmatprep.mubr.f32.mxu0 %v28523_v36 }
0x2564   :  { %26918 = vmatprep.subr.bf16.mxu0 %v26917_v59 }
0x2566   :  { %25243 = vmatmul.mubr.f32.gmra.mrb[58].mxu0 %v28529_v42 }
0x2567   :  { %26920 = vmatpush3.bf16.msra.mxu0 %v26917_v59  ;;  %25253 = vmatprep.mubr.f32.mxu0 %v28486_v13 }
0x2568   :  { %26922 = vmatprep.subr.bf16.mxu0 %v26897_v0 }
0x256a   :  { %25254 = vmatmul.mubr.f32.vlgmr.msra.gmra.mrb[56].mxu0 %v28527_v39 }
0x256b   :  { %26924 = vmatpush3.bf16.msra.mxu0 %v26897_v0  ;;  %25256 = vmatprep.mubr.f32.mxu0 %v28532_v44 }
0x256c   :  { %26926 = vmatprep.subr.bf16.mxu0 %v26901_v32 }
0x256e   :  { %25257 = vmatmul.mubr.f32.gmra.mrb[58].mxu0 %v28543_v52 }
0x256f   :  { %26928 = vmatpush3.bf16.msra.mxu0 %v26901_v32  ;;  %25267 = vmatprep.mubr.f32.mxu0 %v28489_v14 }
0x2570   :  { %26930 = vmatprep.subr.bf16.mxu0 %v26929_v51 }
0x2572   :  { %25268 = vmatmul.mubr.f32.vlgmr.msra.gmra.mrb[56].mxu0 %v28537_v47 }
0x2573   :  { %26932 = vmatpush3.bf16.msra.mxu0 %v26929_v51  ;;  %25270 = vmatprep.mubr.f32.mxu0 %v28546_v54 }
0x2574   :  { %26934 = vmatprep.subr.bf16.mxu0 %v26933_v55 }
0x2576   :  { %25271 = vmatmul.mubr.f32.gmra.mrb[58].mxu0 %v28558_v63 }
0x2577   :  { %26936 = vmatpush3.bf16.msra.mxu0 %v26933_v55  ;;  %25281 = vmatprep.mubr.f32.mxu0 %v28483_v12 }
0x2578   :  { %26938 = vmatprep.subr.bf16.mxu0 %v26897_v0 }
0x257a   :  { %25282 = vmatmul.mubr.f32.vlgmr.msra.gmra.mrb[56].mxu0 %v28521_v35 }
0x257b   :  { %26940 = vmatpush3.bf16.msra.mxu0 %v26897_v0  ;;  %25284 = vmatprep.mubr.f32.mxu0 %v28523_v36 }
0x257c   :  { %26942 = vmatprep.subr.bf16.mxu0 %v26901_v32 }
0x257e   :  { %25285 = vmatmul.mubr.f32.gmra.mrb[58].mxu0 %v28529_v42 }
0x257f   :  { %26944 = vmatpush3.bf16.msra.mxu0 %v26901_v32  ;;  %25295 = vmatprep.mubr.f32.mxu0 %v28483_v12 }
0x2582   :  { %25296 = vmatmul.mubr.f32.vlgmr.msra.gmra.mrb[56].mxu0 %v28521_v35 }
0x2583   :  { %25298 = vmatprep.mubr.f32.mxu0 %v28523_v36 }
0x2586   :  { %25299 = vmatmul.mubr.f32.gmra.mrb[58].mxu0 %v28529_v42 }
0x2587   :  { %25393 = vmatprep.mubr.f32.mxu0 %v28493_v16 }
0x25b0   :  { %v18676_v6 = vpop.permute.xlu1 %18675  ;;  %v18674_v15 = vpop.permute.xlu0 %18673 }
0x25b1   :  { %v18677_v17 = vadd.f32 %v18676_v6, %v18674_v15 }
0x25b3   :  { %v18679_v49 = vmul.f32 %v18677_v17, %v28624_v3 }
0x25b5   :  { %v18680_v31 = vadd.f32 %v18679_v49, %v18678_v61 }
0x2655   :  { %v25297_v25 = vpop.f32.mrb[56].mxu0 }
0x2656   :  { %28252 = vtanh.f32 %v25297_v25  ;;  %v19287_v40 = vpop.f32.mrb[57].mxu0 }
0x2657   :  { %28254 = vtanh.f32 %v19287_v40 }
0x2659   :  { %v25300_v8 = vpop.f32.mrb[58].mxu0 }
0x265a   :  { %28256 = vtanh.f32 %v25300_v8  ;;  %v19299_v58 = vpop.f32.mrb[59].mxu0 }
0x265b   :  { %28258 = vtanh.f32 %v19299_v58 }
0x2660   :  { %v28253_v60 = vpop.eup %28252 }
0x2661   :  { %v28255_v29 = vpop.eup %28254  ;;  %v19314_v46 = vmul.f32 %v28253_v60, %v28610_v37 }
0x2662   :  { %v19313_v62 = vmul.f32 %v28255_v29, %v28608_v33 }
0x2664   :  { %v28257_v9 = vpop.eup %28256  ;;  %v19317_v34 = vadd.f32 %v19314_v46, %v19313_v62 }
0x2665   :  { %v28259_v57 = vpop.eup %28258  ;;  %v19316_v1 = vmul.f32 %v28257_v9, %v28617_v50 }
0x2666   :  { %v19315_v0 = vmul.f32 %v28259_v57, %v28614_v48 }
0x2668   :  { %v19318_v4 = vadd.f32 %v19317_v34, %v19315_v0 }
0x266a   :  { %v19319_v53 = vadd.f32 %v19318_v4, %v19316_v1 }
0x266c   :  { %v19320_v18 = vrot.slane %v19319_v53, 4 }
0x266e   :  { %v19321_v32 = vadd.f32 %v19320_v18, %v19319_v53 }
0x2670   :  { %v19322_v26 = vrot.slane %v19321_v32, 2 }
0x2672   :  { %v19323_v30 = vadd.f32 %v19322_v26, %v19321_v32 }
0x2674   :  { %v19324_v24 = vrot.slane %v19323_v30, 1 }
0x2676   :  { %v19325_v38 = vadd.f32 %v19324_v24, %v19323_v30 }
0x2678   :  { %28260 = vtanh.f32 %v19325_v38 }
0x2682   :  { %v28261_v41 = vpop.eup %28260 }
0x2683   :  { %v19327_v43 = vmul.f32 %v28261_v41, %v28629_v7 }
0x2685   :  { %v30069_v11 = vadd.f32 %v19327_v43, %v18680_v31 }
0x2687   :  { %v19329_v21 = vmul.f32 %v30069_v11, %v30067_v45 }
0x2689   :  { %v30074_v59 = vadd.f32 %v19329_v21, %v30016_v56 }
0x268b   :  { %19333 = vrot.lane.b32.xlu1 %v30074_v59, %s28400_s5  ;;  %v19343_v51 = vrot.slane %v30074_v59, %v28503_v20  ;;  %19331 = vrot.lane.b32.xlu0 %v30074_v59, %s28401_s12 }
0x268d   :  { %v19345_v55 = vmul.f32 %v19343_v51, %v28509_v23  ;;  %v19346_v25 = vmul.f32 %v19343_v51, %v28515_v28  ;;  %v19347_v40 = vmul.f32 %v19343_v51, %v28507_v22  ;;  %v19348_v8 = vmul.f32 %v19343_v51, %v28513_v27 }
0x268f   :  { %28262 = vtanh.f32 %v19345_v55 }
0x2690   :  { %28264 = vtanh.f32 %v19346_v25 }
0x2691   :  { %28266 = vtanh.f32 %v19347_v40 }
0x2692   :  { %28268 = vtanh.f32 %v19348_v8 }
0x2699   :  { %v28263_v58 = vpop.eup %28262 }
0x269a   :  { %v28265_v60 = vpop.eup %28264  ;;  %v19354_v29 = vand.u32 4294901760, %v28263_v58 }
0x269b   :  { %v28267_v46 = vpop.eup %28266  ;;  %v19357_v62 = vand.u32 4294901760, %v28265_v60 }
0x269c   :  { %v28269_v9 = vpop.eup %28268  ;;  %v19360_v34 = vand.u32 4294901760, %v28267_v46  ;;  %v19464_v57 = vsub.f32 %v28263_v58, %v19354_v29 }
0x269d   :  { %v26945_v0 = vpack.c.bf16 %v19357_v62, %v19354_v29  ;;  %v19363_v1 = vand.u32 4294901760, %v28269_v9  ;;  %v19471_v4 = vsub.f32 %v28265_v60, %v19357_v62 }
0x269e   :  { %v19465_v53 = vand.u32 4294901760, %v19464_v57  ;;  %v19478_v18 = vsub.f32 %v28267_v46, %v19360_v34 }
0x269f   :  { %26946 = vmatprep.subr.bf16.mxu1 %v26945_v0  ;;  %v26949_v32 = vpack.c.bf16 %v19363_v1, %v19360_v34  ;;  %v19472_v26 = vand.u32 4294901760, %v19471_v4  ;;  %v19485_v30 = vsub.f32 %v28269_v9, %v19363_v1  ;;  %v26961_v55 = vpack.c.bf16 %v19471_v4, %v19464_v57 }
0x26a0   :  { %26948 = vmatpush3.bf16.msra.mxu1 %v26945_v0  ;;  %v19466_v24 = vsub.f32 %v19464_v57, %v19465_v53  ;;  %v19479_v38 = vand.u32 4294901760, %v19478_v18 }
0x26a1   :  { %26950 = vmatprep.subr.bf16.mxu1 %v26949_v32  ;;  %v19473_v6 = vsub.f32 %v19471_v4, %v19472_v26  ;;  %v19486_v15 = vand.u32 4294901760, %v19485_v30  ;;  %v26965_v25 = vpack.c.bf16 %v19485_v30, %v19478_v18  ;;  %v26977_v40 = vpack.c.bf16 %v19472_v26, %v19465_v53 }
0x26a2   :  { %v19467_v17 = vand.u32 4294901760, %v19466_v24  ;;  %v19480_v49 = vsub.f32 %v19478_v18, %v19479_v38 }
0x26a3   :  { %v19474_v61 = vand.u32 4294901760, %v19473_v6  ;;  %v19487_v41 = vsub.f32 %v19485_v30, %v19486_v15  ;;  %v26981_v8 = vpack.c.bf16 %v19486_v15, %v19479_v38 }
0x26a4   :  { %26952 = vmatpush3.bf16.msra.mxu1 %v26949_v32  ;;  %v19481_v31 = vand.u32 4294901760, %v19480_v49 }
0x26a5   :  { %v26953_v43 = vpack.c.bf16 %v19474_v61, %v19467_v17  ;;  %v19488_v21 = vand.u32 4294901760, %v19487_v41 }
0x26a7   :  { %25310 = vmatmul.mubr.f32.vlgmr.msra.gmra.mrb[56].mxu1 %v28565_v5  ;;  %26954 = vmatprep.subr.bf16.mxu1 %v26953_v43  ;;  %v26957_v51 = vpack.c.bf16 %v19488_v21, %v19481_v31  ;;  %v19336_v31 = vmul.f32 %v30074_v59, %v28622_v2 }
0x26a8   :  { %26956 = vmatpush3.bf16.msra.mxu1 %v26953_v43  ;;  %25312 = vmatprep.mubr.f32.mxu1 %v28570_v10 }
0x26a9   :  { %26958 = vmatprep.subr.bf16.mxu1 %v26957_v51 }
0x26ab   :  { %25313 = vmatmul.mubr.f32.gmra.mrb[58].mxu1 %v28573_v19 }
0x26ac   :  { %26960 = vmatpush3.bf16.msra.mxu1 %v26957_v51  ;;  %25323 = vmatprep.mubr.f32.mxu1 %v28483_v12 }
0x26ad   :  { %26962 = vmatprep.subr.bf16.mxu1 %v26961_v55 }
0x26af   :  { %25324 = vmatmul.mubr.f32.vlgmr.msra.gmra.mrb[56].mxu1 %v28521_v35 }
0x26b0   :  { %26964 = vmatpush3.bf16.msra.mxu1 %v26961_v55  ;;  %25326 = vmatprep.mubr.f32.mxu1 %v28523_v36 }
0x26b1   :  { %26966 = vmatprep.subr.bf16.mxu1 %v26965_v25 }
0x26b3   :  { %25327 = vmatmul.mubr.f32.gmra.mrb[58].mxu1 %v28529_v42 }
0x26b4   :  { %26968 = vmatpush3.bf16.msra.mxu1 %v26965_v25  ;;  %25337 = vmatprep.mubr.f32.mxu1 %v28486_v13 }
0x26b5   :  { %26970 = vmatprep.subr.bf16.mxu1 %v26945_v0 }
0x26b7   :  { %25338 = vmatmul.mubr.f32.vlgmr.msra.gmra.mrb[56].mxu1 %v28527_v39 }
0x26b8   :  { %26972 = vmatpush3.bf16.msra.mxu1 %v26945_v0  ;;  %25340 = vmatprep.mubr.f32.mxu1 %v28532_v44 }
0x26b9   :  { %26974 = vmatprep.subr.bf16.mxu1 %v26949_v32 }
0x26bb   :  { %25341 = vmatmul.mubr.f32.gmra.mrb[58].mxu1 %v28543_v52 }
0x26bc   :  { %26976 = vmatpush3.bf16.msra.mxu1 %v26949_v32  ;;  %25351 = vmatprep.mubr.f32.mxu1 %v28489_v14 }
0x26bd   :  { %26978 = vmatprep.subr.bf16.mxu1 %v26977_v40 }
0x26bf   :  { %25352 = vmatmul.mubr.f32.vlgmr.msra.gmra.mrb[56].mxu1 %v28537_v47 }
0x26c0   :  { %26980 = vmatpush3.bf16.msra.mxu1 %v26977_v40  ;;  %25354 = vmatprep.mubr.f32.mxu1 %v28546_v54 }
0x26c1   :  { %26982 = vmatprep.subr.bf16.mxu1 %v26981_v8 }
0x26c3   :  { %25355 = vmatmul.mubr.f32.gmra.mrb[58].mxu1 %v28558_v63 }
0x26c4   :  { %26984 = vmatpush3.bf16.msra.mxu1 %v26981_v8  ;;  %25365 = vmatprep.mubr.f32.mxu1 %v28483_v12 }
0x26c5   :  { %26986 = vmatprep.subr.bf16.mxu1 %v26945_v0 }
0x26c7   :  { %25366 = vmatmul.mubr.f32.vlgmr.msra.gmra.mrb[56].mxu1 %v28521_v35 }
0x26c8   :  { %26988 = vmatpush3.bf16.msra.mxu1 %v26945_v0  ;;  %25368 = vmatprep.mubr.f32.mxu1 %v28523_v36 }
0x26c9   :  { %26990 = vmatprep.subr.bf16.mxu1 %v26949_v32 }
0x26cb   :  { %25369 = vmatmul.mubr.f32.gmra.mrb[58].mxu1 %v28529_v42 }
0x26cc   :  { %26992 = vmatpush3.bf16.msra.mxu1 %v26949_v32  ;;  %25379 = vmatprep.mubr.f32.mxu1 %v28483_v12 }
0x26cf   :  { %25380 = vmatmul.mubr.f32.vlgmr.msra.gmra.mrb[56].mxu1 %v28521_v35 }
0x26d0   :  { %25382 = vmatprep.mubr.f32.mxu1 %v28523_v36 }
0x26d3   :  { %25383 = vmatmul.mubr.f32.gmra.mrb[58].mxu1 %v28529_v42 }
0x26d4   :  { %25477 = vmatprep.mubr.f32.mxu1 %v28493_v16 }
0x26fd   :  { %v19334_v17 = vpop.permute.xlu1 %19333  ;;  %v19332_v49 = vpop.permute.xlu0 %19331 }
0x26fe   :  { %v19335_v61 = vadd.f32 %v19334_v17, %v19332_v49 }
0x2700   :  { %v19337_v41 = vmul.f32 %v19335_v61, %v28624_v3 }
0x2702   :  { %v19338_v21 = vadd.f32 %v19337_v41, %v19336_v31 }
0x27a2   :  { %v25381_v58 = vpop.f32.mrb[56].mxu1 }
0x27a3   :  { %28270 = vtanh.f32 %v25381_v58  ;;  %v19945_v60 = vpop.f32.mrb[57].mxu1 }
0x27a4   :  { %28272 = vtanh.f32 %v19945_v60 }
0x27a6   :  { %v25384_v29 = vpop.f32.mrb[58].mxu1 }
0x27a7   :  { %28274 = vtanh.f32 %v25384_v29  ;;  %v19957_v46 = vpop.f32.mrb[59].mxu1 }
0x27a8   :  { %28276 = vtanh.f32 %v19957_v46 }
0x27ad   :  { %v28271_v62 = vpop.eup %28270 }
0x27ae   :  { %v28273_v9 = vpop.eup %28272  ;;  %v19972_v34 = vmul.f32 %v28271_v62, %v28610_v37 }
0x27af   :  { %v19971_v57 = vmul.f32 %v28273_v9, %v28608_v33 }
0x27b1   :  { %v28275_v0 = vpop.eup %28274  ;;  %v19975_v1 = vadd.f32 %v19972_v34, %v19971_v57 }
0x27b2   :  { %v28277_v4 = vpop.eup %28276  ;;  %v19974_v16 = vmul.f32 %v28275_v0, %v28617_v50 }
0x27b3   :  { %v19973_v53 = vmul.f32 %v28277_v4, %v28614_v48 }
0x27b5   :  { %v19976_v18 = vadd.f32 %v19975_v1, %v19973_v53 }
0x27b7   :  { %v19977_v32 = vadd.f32 %v19976_v18, %v19974_v16 }
0x27b9   :  { %v19978_v26 = vrot.slane %v19977_v32, 4 }
0x27bb   :  { %v19979_v30 = vadd.f32 %v19978_v26, %v19977_v32 }
0x27bd   :  { %v19980_v24 = vrot.slane %v19979_v30, 2 }
0x27bf   :  { %v19981_v38 = vadd.f32 %v19980_v24, %v19979_v30 }
0x27c1   :  { %v19982_v6 = vrot.slane %v19981_v38, 1 }
0x27c3   :  { %v19983_v15 = vadd.f32 %v19982_v6, %v19981_v38 }
0x27c5   :  { %28278 = vtanh.f32 %v19983_v15 }
0x27cf   :  { %v28279_v43 = vpop.eup %28278 }
0x27d0   :  { %v19985_v51 = vmul.f32 %v28279_v43, %v28629_v7 }
0x27d2   :  { %v30118_v55 = vadd.f32 %v19985_v51, %v19338_v21 }
0x27d4   :  { %v19987_v25 = vmul.f32 %v30118_v55, %v30067_v45 }
0x27d6   :  { %v30123_v40 = vadd.f32 %v19987_v25, %v30016_v56 }
0x27d8   :  { %19991 = vrot.lane.b32.xlu1 %v30123_v40, %s28400_s5  ;;  %v20001_v8 = vrot.slane %v30123_v40, %v28503_v20  ;;  %19989 = vrot.lane.b32.xlu0 %v30123_v40, %s28401_s12 }
0x27da   :  { %v20003_v59 = vmul.f32 %v20001_v8, %v28509_v23  ;;  %v20004_v58 = vmul.f32 %v20001_v8, %v28515_v28  ;;  %v20005_v60 = vmul.f32 %v20001_v8, %v28507_v22  ;;  %v20006_v45 = vmul.f32 %v20001_v8, %v28513_v27 }
0x27dc   :  { %28280 = vtanh.f32 %v20003_v59 }
0x27dd   :  { %28282 = vtanh.f32 %v20004_v58 }
0x27de   :  { %28284 = vtanh.f32 %v20005_v60 }
0x27df   :  { %28286 = vtanh.f32 %v20006_v45 }
0x27e6   :  { %v28281_v29 = vpop.eup %28280 }
0x27e7   :  { %v28283_v46 = vpop.eup %28282  ;;  %v20012_v62 = vand.u32 4294901760, %v28281_v29 }
0x27e8   :  { %v28285_v9 = vpop.eup %28284  ;;  %v20015_v34 = vand.u32 4294901760, %v28283_v46 }
0x27e9   :  { %v28287_v57 = vpop.eup %28286  ;;  %v20018_v0 = vand.u32 4294901760, %v28285_v9  ;;  %v20122_v1 = vsub.f32 %v28281_v29, %v20012_v62 }
0x27ea   :  { %v26993_v4 = vpack.c.bf16 %v20015_v34, %v20012_v62  ;;  %v20021_v53 = vand.u32 4294901760, %v28287_v57  ;;  %v20129_v16 = vsub.f32 %v28283_v46, %v20015_v34 }
0x27eb   :  { %v20123_v18 = vand.u32 4294901760, %v20122_v1  ;;  %v20136_v32 = vsub.f32 %v28285_v9, %v20018_v0 }
0x27ec   :  { %26994 = vmatprep.subr.bf16.mxu0 %v26993_v4  ;;  %v26997_v26 = vpack.c.bf16 %v20021_v53, %v20018_v0  ;;  %v20130_v30 = vand.u32 4294901760, %v20129_v16  ;;  %v20143_v24 = vsub.f32 %v28287_v57, %v20021_v53  ;;  %v27009_v8 = vpack.c.bf16 %v20129_v16, %v20122_v1 }
0x27ed   :  { %26996 = vmatpush3.bf16.msra.mxu0 %v26993_v4  ;;  %v20124_v38 = vsub.f32 %v20122_v1, %v20123_v18  ;;  %v20137_v6 = vand.u32 4294901760, %v20136_v32 }
0x27ee   :  { %26998 = vmatprep.subr.bf16.mxu0 %v26997_v26  ;;  %v20131_v15 = vsub.f32 %v20129_v16, %v20130_v30  ;;  %v20144_v17 = vand.u32 4294901760, %v20143_v24  ;;  %v27013_v59 = vpack.c.bf16 %v20143_v24, %v20136_v32  ;;  %v27025_v58 = vpack.c.bf16 %v20130_v30, %v20123_v18 }
0x27ef   :  { %v20125_v49 = vand.u32 4294901760, %v20124_v38  ;;  %v20138_v61 = vsub.f32 %v20136_v32, %v20137_v6 }
0x27f0   :  { %v20132_v41 = vand.u32 4294901760, %v20131_v15  ;;  %v20145_v31 = vsub.f32 %v20143_v24, %v20144_v17  ;;  %v27029_v60 = vpack.c.bf16 %v20144_v17, %v20137_v6 }
0x27f1   :  { %27000 = vmatpush3.bf16.msra.mxu0 %v26997_v26  ;;  %v20139_v43 = vand.u32 4294901760, %v20138_v61 }
0x27f2   :  { %v27001_v21 = vpack.c.bf16 %v20132_v41, %v20125_v49  ;;  %v20146_v51 = vand.u32 4294901760, %v20145_v31 }
0x27f4   :  { %25394 = vmatmul.mubr.f32.vlgmr.msra.gmra.mrb[60].mxu0 %v28565_v5  ;;  %27002 = vmatprep.subr.bf16.mxu0 %v27001_v21  ;;  %v27005_v25 = vpack.c.bf16 %v20146_v51, %v20139_v43  ;;  %v19994_v43 = vmul.f32 %v30123_v40, %v28622_v2 }
0x27f5   :  { %27004 = vmatpush3.bf16.msra.mxu0 %v27001_v21  ;;  %25396 = vmatprep.mubr.f32.mxu0 %v28570_v10 }
0x27f6   :  { %27006 = vmatprep.subr.bf16.mxu0 %v27005_v25 }
0x27f8   :  { %25397 = vmatmul.mubr.f32.gmra.mrb[62].mxu0 %v28573_v19 }
0x27f9   :  { %27008 = vmatpush3.bf16.msra.mxu0 %v27005_v25  ;;  %25407 = vmatprep.mubr.f32.mxu0 %v28483_v12 }
0x27fa   :  { %27010 = vmatprep.subr.bf16.mxu0 %v27009_v8 }
0x27fc   :  { %25408 = vmatmul.mubr.f32.vlgmr.msra.gmra.mrb[60].mxu0 %v28521_v35 }
0x27fd   :  { %27012 = vmatpush3.bf16.msra.mxu0 %v27009_v8  ;;  %25410 = vmatprep.mubr.f32.mxu0 %v28523_v36  ;;  %v18668_v8 = vstv %s30060_s27 }
0x27fe   :  { %27014 = vmatprep.subr.bf16.mxu0 %v27013_v59 }
0x2800   :  { %25411 = vmatmul.mubr.f32.gmra.mrb[62].mxu0 %v28529_v42 }
0x2801   :  { %27016 = vmatpush3.bf16.msra.mxu0 %v27013_v59  ;;  %25421 = vmatprep.mubr.f32.mxu0 %v28486_v13 }
0x2802   :  { %27018 = vmatprep.subr.bf16.mxu0 %v26993_v4 }
0x2804   :  { %25422 = vmatmul.mubr.f32.vlgmr.msra.gmra.mrb[60].mxu0 %v28527_v39 }
0x2805   :  { %27020 = vmatpush3.bf16.msra.mxu0 %v26993_v4  ;;  %25424 = vmatprep.mubr.f32.mxu0 %v28532_v44 }
0x2806   :  { %27022 = vmatprep.subr.bf16.mxu0 %v26997_v26 }
0x2808   :  { %25425 = vmatmul.mubr.f32.gmra.mrb[62].mxu0 %v28543_v52 }
0x2809   :  { %27024 = vmatpush3.bf16.msra.mxu0 %v26997_v26  ;;  %25435 = vmatprep.mubr.f32.mxu0 %v28489_v14 }
0x280a   :  { %27026 = vmatprep.subr.bf16.mxu0 %v27025_v58 }
0x280c   :  { %25436 = vmatmul.mubr.f32.vlgmr.msra.gmra.mrb[60].mxu0 %v28537_v47 }
0x280d   :  { %27028 = vmatpush3.bf16.msra.mxu0 %v27025_v58  ;;  %25438 = vmatprep.mubr.f32.mxu0 %v28546_v54 }
0x280e   :  { %27030 = vmatprep.subr.bf16.mxu0 %v27029_v60 }
0x2810   :  { %25439 = vmatmul.mubr.f32.gmra.mrb[62].mxu0 %v28558_v63 }
0x2811   :  { %27032 = vmatpush3.bf16.msra.mxu0 %v27029_v60  ;;  %25449 = vmatprep.mubr.f32.mxu0 %v28483_v12 }
0x2812   :  { %27034 = vmatprep.subr.bf16.mxu0 %v26993_v4 }
0x2814   :  { %25450 = vmatmul.mubr.f32.vlgmr.msra.gmra.mrb[60].mxu0 %v28521_v35 }
0x2815   :  { %27036 = vmatpush3.bf16.msra.mxu0 %v26993_v4  ;;  %25452 = vmatprep.mubr.f32.mxu0 %v28523_v36 }
0x2816   :  { %27038 = vmatprep.subr.bf16.mxu0 %v26997_v26 }
0x2818   :  { %25453 = vmatmul.mubr.f32.gmra.mrb[62].mxu0 %v28529_v42 }
0x2819   :  { %27040 = vmatpush3.bf16.msra.mxu0 %v26997_v26  ;;  %25463 = vmatprep.mubr.f32.mxu0 %v28483_v12 }
0x281c   :  { %25464 = vmatmul.mubr.f32.vlgmr.msra.gmra.mrb[60].mxu0 %v28521_v35 }
0x281d   :  { %25466 = vmatprep.mubr.f32.mxu0 %v28523_v36 }
0x2820   :  { %25467 = vmatmul.mubr.f32.gmra.mrb[62].mxu0 %v28529_v42 }
0x284a   :  { %v19992_v49 = vpop.permute.xlu1 %19991  ;;  %v19990_v61 = vpop.permute.xlu0 %19989 }
0x284b   :  { %v19993_v41 = vadd.f32 %v19992_v49, %v19990_v61 }
0x284d   :  { %v19995_v31 = vmul.f32 %v19993_v41, %v28624_v3 }
0x284f   :  { %v19996_v51 = vadd.f32 %v19995_v31, %v19994_v43 }
0x28ef   :  { %v25465_v45 = vpop.f32.mrb[60].mxu0 }
0x28f0   :  { %28288 = vtanh.f32 %v25465_v45  ;;  %v20603_v29 = vpop.f32.mrb[61].mxu0 }
0x28f1   :  { %28290 = vtanh.f32 %v20603_v29 }
0x28f3   :  { %v25468_v46 = vpop.f32.mrb[62].mxu0 }
0x28f4   :  { %28292 = vtanh.f32 %v25468_v46  ;;  %v20615_v62 = vpop.f32.mrb[63].mxu0 }
0x28f5   :  { %28294 = vtanh.f32 %v20615_v62 }
0x28fa   :  { %v28289_v9 = vpop.eup %28288 }
0x28fb   :  { %v28291_v34 = vpop.eup %28290  ;;  %v20630_v57 = vmul.f32 %v28289_v9, %v28610_v37 }
0x28fc   :  { %v20629_v0 = vmul.f32 %v28291_v34, %v28608_v33 }
0x28fe   :  { %v28293_v1 = vpop.eup %28292  ;;  %v20633_v4 = vadd.f32 %v20630_v57, %v20629_v0 }
0x28ff   :  { %v28295_v53 = vpop.eup %28294  ;;  %v20632_v18 = vmul.f32 %v28293_v1, %v28617_v50 }
0x2900   :  { %v20631_v16 = vmul.f32 %v28295_v53, %v28614_v48 }
0x2902   :  { %v20634_v32 = vadd.f32 %v20633_v4, %v20631_v16 }
0x2904   :  { %v20635_v26 = vadd.f32 %v20634_v32, %v20632_v18 }
0x2906   :  { %v20636_v30 = vrot.slane %v20635_v26, 4 }
0x2908   :  { %v20637_v24 = vadd.f32 %v20636_v30, %v20635_v26 }
0x290a   :  { %v20638_v38 = vrot.slane %v20637_v24, 2 }
0x290c   :  { %v20639_v6 = vadd.f32 %v20638_v38, %v20637_v24 }
0x290e   :  { %v20640_v15 = vrot.slane %v20639_v6, 1 }
0x2910   :  { %v20641_v17 = vadd.f32 %v20640_v15, %v20639_v6 }
0x2912   :  { %28296 = vtanh.f32 %v20641_v17 }
0x291c   :  { %v28297_v21 = vpop.eup %28296 }
0x291d   :  { %v20643_v25 = vmul.f32 %v28297_v21, %v28629_v7 }
0x291f   :  { %v30167_v59 = vadd.f32 %v20643_v25, %v19996_v51 }
0x2921   :  { %v20645_v58 = vmul.f32 %v30167_v59, %v18668_v8 }
0x2923   :  { %v30171_v60 = vadd.f32 %v20645_v58, %v30016_v56 }
0x2925   :  { %20649 = vrot.lane.b32.xlu1 %v30171_v60, %s28400_s5  ;;  %v20659_v45 = vrot.slane %v30171_v60, %v28503_v20  ;;  %20647 = vrot.lane.b32.xlu0 %v30171_v60, %s28401_s12  ;;  %s18671_s5 = smul.f32 0.16666667, %s30060_s27 }
0x2927   :  { %v20661_v40 = vmul.f32 %v20659_v45, %v28509_v23  ;;  %v20662_v29 = vmul.f32 %v20659_v45, %v28515_v28  ;;  %v20663_v46 = vmul.f32 %v20659_v45, %v28507_v22  ;;  %v20664_v62 = vmul.f32 %v20659_v45, %v28513_v27 }
0x2929   :  { %28298 = vtanh.f32 %v20661_v40 }
0x292a   :  { %28300 = vtanh.f32 %v20662_v29 }
0x292b   :  { %28302 = vtanh.f32 %v20663_v46 }
0x292c   :  { %28304 = vtanh.f32 %v20664_v62 }
0x2933   :  { %v28299_v9 = vpop.eup %28298 }
0x2934   :  { %v28301_v34 = vpop.eup %28300  ;;  %v20670_v57 = vand.u32 4294901760, %v28299_v9 }
0x2935   :  { %v28303_v0 = vpop.eup %28302  ;;  %v20673_v20 = vand.u32 4294901760, %v28301_v34 }
0x2936   :  { %v28305_v1 = vpop.eup %28304  ;;  %v20676_v4 = vand.u32 4294901760, %v28303_v0  ;;  %v20780_v53 = vsub.f32 %v28299_v9, %v20670_v57 }
0x2937   :  { %v27041_v16 = vpack.c.bf16 %v20673_v20, %v20670_v57  ;;  %v20679_v23 = vand.u32 4294901760, %v28305_v1  ;;  %v20787_v18 = vsub.f32 %v28301_v34, %v20673_v20  ;;  %v21303_v57 = vadd.f32 %v30167_v59, %v30118_v55 }
0x2938   :  { %v20781_v28 = vand.u32 4294901760, %v20780_v53  ;;  %v20794_v32 = vsub.f32 %v28303_v0, %v20676_v4 }
0x2939   :  { %27042 = vmatprep.subr.bf16.mxu1 %v27041_v16  ;;  %v27045_v22 = vpack.c.bf16 %v20679_v23, %v20676_v4  ;;  %v20788_v27 = vand.u32 4294901760, %v20787_v18  ;;  %v20801_v26 = vsub.f32 %v28305_v1, %v20679_v23  ;;  %v27057_v51 = vpack.c.bf16 %v20787_v18, %v20780_v53 }
0x293a   :  { %27044 = vmatpush3.bf16.msra.mxu1 %v27041_v16  ;;  %v20782_v30 = vsub.f32 %v20780_v53, %v20781_v28  ;;  %v20795_v24 = vand.u32 4294901760, %v20794_v32  ;;  %v21304_v0 = vmul.f32 2.0, %v21303_v57  ;;  %v18672_v23 = vstv %s18671_s5 }
0x293b   :  { %27046 = vmatprep.subr.bf16.mxu1 %v27045_v22  ;;  %v20789_v38 = vsub.f32 %v20787_v18, %v20788_v27  ;;  %v20802_v6 = vand.u32 4294901760, %v20801_v26  ;;  %v27061_v25 = vpack.c.bf16 %v20801_v26, %v20794_v32 }
0x293c   :  { %v20783_v15 = vand.u32 4294901760, %v20782_v30  ;;  %v20796_v17 = vsub.f32 %v20794_v32, %v20795_v24  ;;  %v21305_v53 = vadd.f32 %v21304_v0, %v30069_v11 }
0x293d   :  { %v20790_v49 = vand.u32 4294901760, %v20789_v38  ;;  %v20803_v61 = vsub.f32 %v20801_v26, %v20802_v6 }
0x293e   :  { %27048 = vmatpush3.bf16.msra.mxu1 %v27045_v22  ;;  %v20797_v41 = vand.u32 4294901760, %v20796_v17 }
0x293f   :  { %v27049_v31 = vpack.c.bf16 %v20790_v49, %v20783_v15  ;;  %v20804_v43 = vand.u32 4294901760, %v20803_v61 }
0x2941   :  { %25478 = vmatmul.mubr.f32.vlgmr.msra.gmra.mrb[60].mxu1 %v28565_v5  ;;  %27050 = vmatprep.subr.bf16.mxu1 %v27049_v31  ;;  %v27053_v21 = vpack.c.bf16 %v20804_v43, %v20797_v41  ;;  %v27073_v5 = vpack.c.bf16 %v20788_v27, %v20781_v28 }
0x2942   :  { %27052 = vmatpush3.bf16.msra.mxu1 %v27049_v31  ;;  %25480 = vmatprep.mubr.f32.mxu1 %v28570_v10  ;;  %v27077_v10 = vpack.c.bf16 %v20802_v6, %v20795_v24 }
0x2943   :  { %27054 = vmatprep.subr.bf16.mxu1 %v27053_v21 }
0x2945   :  { %25481 = vmatmul.mubr.f32.gmra.mrb[62].mxu1 %v28573_v19 }
0x2946   :  { %27056 = vmatpush3.bf16.msra.mxu1 %v27053_v21  ;;  %25491 = vmatprep.mubr.f32.mxu1 %v28483_v12 }
0x2947   :  { %27058 = vmatprep.subr.bf16.mxu1 %v27057_v51 }
0x2949   :  { %25492 = vmatmul.mubr.f32.vlgmr.msra.gmra.mrb[60].mxu1 %v28521_v35 }
0x294a   :  { %27060 = vmatpush3.bf16.msra.mxu1 %v27057_v51  ;;  %25494 = vmatprep.mubr.f32.mxu1 %v28523_v36 }
0x294b   :  { %27062 = vmatprep.subr.bf16.mxu1 %v27061_v25 }
0x294d   :  { %25495 = vmatmul.mubr.f32.gmra.mrb[62].mxu1 %v28529_v42 }
0x294e   :  { %27064 = vmatpush3.bf16.msra.mxu1 %v27061_v25  ;;  %25505 = vmatprep.mubr.f32.mxu1 %v28486_v13 }
0x294f   :  { %27066 = vmatprep.subr.bf16.mxu1 %v27041_v16 }
0x2951   :  { %25506 = vmatmul.mubr.f32.vlgmr.msra.gmra.mrb[60].mxu1 %v28527_v39 }
0x2952   :  { %27068 = vmatpush3.bf16.msra.mxu1 %v27041_v16  ;;  %25508 = vmatprep.mubr.f32.mxu1 %v28532_v44 }
0x2953   :  { %27070 = vmatprep.subr.bf16.mxu1 %v27045_v22 }
0x2955   :  { %25509 = vmatmul.mubr.f32.gmra.mrb[62].mxu1 %v28543_v52 }
0x2956   :  { %27072 = vmatpush3.bf16.msra.mxu1 %v27045_v22  ;;  %25519 = vmatprep.mubr.f32.mxu1 %v28489_v14 }
0x2957   :  { %27074 = vmatprep.subr.bf16.mxu1 %v27073_v5 }
0x2959   :  { %25520 = vmatmul.mubr.f32.vlgmr.msra.gmra.mrb[60].mxu1 %v28537_v47 }
0x295a   :  { %27076 = vmatpush3.bf16.msra.mxu1 %v27073_v5  ;;  %25522 = vmatprep.mubr.f32.mxu1 %v28546_v54 }
0x295b   :  { %27078 = vmatprep.subr.bf16.mxu1 %v27077_v10 }
0x295d   :  { %25523 = vmatmul.mubr.f32.gmra.mrb[62].mxu1 %v28558_v63 }
0x295e   :  { %27080 = vmatpush3.bf16.msra.mxu1 %v27077_v10  ;;  %25533 = vmatprep.mubr.f32.mxu1 %v28483_v12 }
0x295f   :  { %27082 = vmatprep.subr.bf16.mxu1 %v27041_v16 }
0x2961   :  { %25534 = vmatmul.mubr.f32.vlgmr.msra.gmra.mrb[60].mxu1 %v28521_v35 }
0x2962   :  { %27084 = vmatpush3.bf16.msra.mxu1 %v27041_v16  ;;  %25536 = vmatprep.mubr.f32.mxu1 %v28523_v36 }
0x2963   :  { %27086 = vmatprep.subr.bf16.mxu1 %v27045_v22 }
0x2965   :  { %25537 = vmatmul.mubr.f32.gmra.mrb[62].mxu1 %v28529_v42 }
0x2966   :  { %27088 = vmatpush3.bf16.msra.mxu1 %v27045_v22  ;;  %25547 = vmatprep.mubr.f32.mxu1 %v28483_v12 }
0x2969   :  { %25548 = vmatmul.mubr.f32.vlgmr.msra.gmra.mrb[60].mxu1 %v28521_v35 }
0x296a   :  { %25550 = vmatprep.mubr.f32.mxu1 %v28523_v36 }
0x296d   :  { %25551 = vmatmul.mubr.f32.gmra.mrb[62].mxu1 %v28529_v42 }
0x2997   :  { %v20650_v34 = vpop.permute.xlu1 %20649 }
0x2a3c   :  { %v25549_v13 = vpop.f32.mrb[60].mxu1 }
0x2a3d   :  { %28306 = vtanh.f32 %v25549_v13  ;;  %v21261_v14 = vpop.f32.mrb[61].mxu1 }
0x2a3e   :  { %28308 = vtanh.f32 %v21261_v14 }
0x2a40   :  { %v25552_v39 = vpop.f32.mrb[62].mxu1 }
0x2a41   :  { %28310 = vtanh.f32 %v25552_v39  ;;  %v21273_v44 = vpop.f32.mrb[63].mxu1 }
0x2a42   :  { %28312 = vtanh.f32 %v21273_v44 }
0x2a47   :  { %v28307_v47 = vpop.eup %28306 }
0x2a48   :  { %v28309_v52 = vpop.eup %28308  ;;  %v21288_v54 = vmul.f32 %v28307_v47, %v28610_v37  ;;  %v20648_v37 = vpop.permute.xlu0 %20647 }
0x2a49   :  { %v21287_v12 = vmul.f32 %v28309_v52, %v28608_v33  ;;  %v20651_v33 = vadd.f32 %v20650_v34, %v20648_v37 }
0x2a4b   :  { %v28311_v63 = vpop.eup %28310  ;;  %v21291_v35 = vadd.f32 %v21288_v54, %v21287_v12 }
0x2a4c   :  { %v28313_v19 = vpop.eup %28312  ;;  %v21290_v42 = vmul.f32 %v28311_v63, %v28617_v50  ;;  %v20652_v50 = vmul.f32 %v30171_v60, %v28622_v2 }
0x2a4d   :  { %v21289_v36 = vmul.f32 %v28313_v19, %v28614_v48  ;;  %v20653_v48 = vmul.f32 %v20651_v33, %v28624_v3 }
0x2a4f   :  { %v21292_v8 = vadd.f32 %v21291_v35, %v21289_v36  ;;  %v20654_v1 = vadd.f32 %v20653_v48, %v20652_v50 }
0x2a51   :  { %v21293_v58 = vadd.f32 %v21292_v8, %v21290_v42 }
0x2a53   :  { %v21294_v45 = vrot.slane %v21293_v58, 4 }
0x2a55   :  { %v21295_v40 = vadd.f32 %v21294_v45, %v21293_v58 }
0x2a57   :  { %v21296_v29 = vrot.slane %v21295_v40, 2 }
0x2a59   :  { %v21297_v46 = vadd.f32 %v21296_v29, %v21295_v40 }
0x2a5b   :  { %v21298_v62 = vrot.slane %v21297_v46, 1 }
0x2a5d   :  { %v21299_v9 = vadd.f32 %v21298_v62, %v21297_v46 }
0x2a5f   :  { %28314 = vtanh.f32 %v21299_v9 }
0x2a69   :  { %v28315_v20 = vpop.eup %28314 }
0x2a6a   :  { %v21301_v4 = vmul.f32 %v28315_v20, %v28629_v7 }
0x2a6c   :  { %v21302_v16 = vadd.f32 %v21301_v4, %v20654_v1 }
0x2a6e   :  { %v21306_v18 = vadd.f32 %v21305_v53, %v21302_v16 }
0x2a70   :  { %v21307_v28 = vmul.f32 %v21306_v18, %v18672_v23 }
0x2a72   :  { %v21308_v32 = vadd.f32 %v21307_v28, %v30016_v56 }
0x2a74   :  { %21309 = vst [vmem:[%s30228_s6 + $0x7] sm:$0x1] %v21308_v32  ;;  %21310 = vst [vmem:[#allocation2] sm:$0x1] %v21308_v32 }
0x2a75   :  { %21315 = vsyncpa [#allocation4], 1 }
0x2a76   :  { %21316 = vsyncpa [#allocation10], 1 }
0x2a77   :  { %21317 = vsyncpa [#allocation5], 1 }
0x2a78   :  { %21318 = vsyncpa [#allocation7], 1 }

</bundles_post_ra>
